<compile_context>
chip_gen: v5e
topology: v5e:2x2
jax: 0.10.0
libtpu: 0.0.40
codegen_flags: <defaults>
</compile_context>

<pallas_src>
import math
import functools

import jax
import jax.numpy as jnp
from jax import lax
from jax.experimental import pallas as pl
from jax.experimental.pallas import tpu as pltpu


def _pick_row_tile(H, W, target_m=128):
    """Largest divisor of H with roughly TH*W <= target_m (matmul M tile)."""
    th = max(1, min(H, target_m // max(W, 1)))
    while H % th:
        th -= 1
    return th


def _effective_weights(w_conv):
    """(Cout, Cin, 3, 3) conv weight -> (4, 4*Cin, Cout) polyphase, K-stacked.

    For output parity (di, dj) of conv3x3(up2(x)), tap (a, b) reads
    x[i + di + a - 1, j + dj + b - 1] with effective weight = sum of the 3x3
    taps that land on that source pixel.  The 4 taps per parity are stacked
    along K in (a, b) order (0,0),(0,1),(1,0),(1,1) so the kernel issues a
    single (TH*W, 4C) @ (4C, C) matmul per parity.
    """
    wm = jnp.transpose(w_conv, (2, 3, 1, 0))          # (kh, kw, Cin, Cout)
    taps = (((0,), (1, 2)), ((0, 1), (2,)))           # [parity][tap] -> k rows
    blocks = []
    for di in range(2):
        for dj in range(2):
            rows = []
            for a in range(2):
                for b in range(2):
                    w = jnp.zeros(wm.shape[2:], wm.dtype)
                    for ki in taps[di][a]:
                        for kj in taps[dj][b]:
                            w = w + wm[ki, kj]
                    rows.append(w)
            blocks.append(jnp.concatenate(rows, axis=0))     # (4*Cin, Cout)
    return jnp.stack(blocks).astype(jnp.bfloat16)            # (4, 4*Cin, Cout)


def _upsample_conv_kernel(x_ref, top_ref, bot_ref, w_ref, b_ref, o_ref,
                          xpad_ref, *, TH, W, C):
    """One (batch, row-tile) step: fused nearest-x2 upsample + 3x3 conv.

    x_ref:    (1, TH, W, C)        f32 body rows of this tile
    top_ref:  (1, 1, W, C)         f32 row above the tile (index clamped)
    bot_ref:  (1, 1, W, C)         f32 row below the tile (index clamped)
    w_ref:    (4, 4C, C)           bf16 K-stacked polyphase weights
    b_ref:    (1, C)               f32 bias
    o_ref:    (1, TH, 2, W, 2, C)  f32 output, parities interleaved in place
    xpad_ref: (TH+2, W+2, C)       bf16 scratch: tile + 1-px halo
    """
    h = pl.program_id(1)
    nh = pl.num_programs(1)

    # 1-px column halo: always zero.  Only two thin strips -- the interior
    # and row halos below are fully rewritten every step, so no full-scratch
    # zero fill is needed.
    zero_col = jnp.zeros((TH + 2, C), jnp.bfloat16)
    xpad_ref[:, 0, :] = zero_col
    xpad_ref[:, W + 1, :] = zero_col

    # Body rows: single f32 -> bf16 cast here (hoisted out of the tap loop).
    xpad_ref[1:TH + 1, 1:W + 1, :] = x_ref[0].astype(jnp.bfloat16)
    # Row halos: neighbouring rows, masked to zero at the image border.
    xpad_ref[0, 1:W + 1, :] = jnp.where(
        h > 0, top_ref[0, 0, :, :], 0.0).astype(jnp.bfloat16)
    xpad_ref[TH + 1, 1:W + 1, :] = jnp.where(
        h < nh - 1, bot_ref[0, 0, :, :], 0.0).astype(jnp.bfloat16)

    bias = b_ref[...]                                   # (1, C) f32

    for di in range(2):                                 # output row parity
        for dj in range(2):                             # output col parity
            # Concatenate the 4 shifted taps along K -> one K=4C matmul that
            # fills the 256-deep MXU on v6e/v7x (4 issues instead of 16).
            parts = [
                xpad_ref[di + a:di + a + TH, dj + b:dj + b + W, :]
                .reshape(TH * W, C)
                for a in range(2) for b in range(2)
            ]
            lhs = jnp.concatenate(parts, axis=1)        # (TH*W, 4C) bf16
            y = jnp.dot(lhs, w_ref[di * 2 + dj],
                        preferred_element_type=jnp.float32) + bias
            # Store straight into the interleaved output layout so the
            # wrapper reshape to (B, 2H, 2W, C) is free (no HBM relayout).
            o_ref[0, :, di, :, dj, :] = y.reshape(TH, W, C).astype(o_ref.dtype)


def _upsample_nearest_kernel(x_ref, o_ref):
    """use_conv=False: nearest x2 upsample, written interleaved in place."""
    x = x_ref[0]                                        # (TH, W, C)
    for di in range(2):
        for dj in range(2):
            o_ref[0, :, di, :, dj, :] = x.astype(o_ref.dtype)


def upsample(x_nchw, w_conv=None, b_conv=None, *, use_conv=True):
    """Pallas TPU implementation of Upsample.forward (NCHW in / NCHW out)."""
    B, C, H, W = x_nchw.shape
    # Lane-dense channels; other C would need explicit padding handling.
    assert C % 128 == 0, "upsample kernel requires C to be a multiple of 128"

    # Channels-last so C is the (dense) lane dimension and the conv is MXU
    # matmuls.  TODO(synk): if the surrounding model stays channels-last the
    # two wrapper transposes (full HBM relayouts) disappear entirely.
    x = jnp.transpose(x_nchw, (0, 2, 3, 1)).astype(jnp.float32)   # (B,H,W,C)

    TH = _pick_row_tile(H, W)
    NH = H // TH

    out_shape = jax.ShapeDtypeStruct((B, H, 2, W, 2, C), jnp.float32)
    o_spec = pl.BlockSpec((1, TH, 2, W, 2, C),
                          lambda b, h: (b, h, 0, 0, 0, 0))
    x_body_spec = pl.BlockSpec((1, TH, W, C), lambda b, h: (b, h, 0, 0))
    compiler_params = pltpu.CompilerParams(
        dimension_semantics=("parallel", "parallel"))

    if use_conv:
        w_pack = _effective_weights(w_conv)             # (4, 4C, C) bf16
        bias = b_conv.reshape(1, C).astype(jnp.float32)
        # Halo rows: pass x twice more with 1-row blocks whose index_map is
        # clamped at the image border (the kernel masks those rows to zero).
        top_spec = pl.BlockSpec(
            (1, 1, W, C), lambda b, h: (b, jnp.maximum(h * TH - 1, 0), 0, 0))
        bot_spec = pl.BlockSpec(
            (1, 1, W, C),
            lambda b, h: (b, jnp.minimum((h + 1) * TH, H - 1), 0, 0))
        out = pl.pallas_call(
            functools.partial(_upsample_conv_kernel, TH=TH, W=W, C=C),
            out_shape=out_shape,
            grid_spec=pltpu.PrefetchScalarGridSpec(
                num_scalar_prefetch=0,
                grid=(B, NH),
                in_specs=[
                    x_body_spec,
                    top_spec,
                    bot_spec,
                    pl.BlockSpec((4, 4 * C, C), lambda b, h: (0, 0, 0)),
                    pl.BlockSpec((1, C), lambda b, h: (0, 0)),
                ],
                out_specs=o_spec,
                scratch_shapes=[pltpu.VMEM((TH + 2, W + 2, C), jnp.bfloat16)],
            ),
            compiler_params=compiler_params,
        )(x, x, x, w_pack, bias)
    else:
        out = pl.pallas_call(
            _upsample_nearest_kernel,
            out_shape=out_shape,
            grid_spec=pltpu.PrefetchScalarGridSpec(
                num_scalar_prefetch=0,
                grid=(B, NH),
                in_specs=[x_body_spec],
                out_specs=o_spec,
            ),
            compiler_params=compiler_params,
        )(x)

    # (B, H, 2, W, 2, C) -> (B, 2H, 2W, C): pure row-major merge, free.
    out = out.reshape(B, 2 * H, 2 * W, C)
    return jnp.transpose(out, (0, 3, 1, 2))             # back to NCHW


def reference_upsample(x_nchw, w_conv, b_conv, use_conv):
    """Pure-JAX mirror of the PyTorch forward (NCHW)."""
    up = jnp.repeat(jnp.repeat(x_nchw, 2, axis=2), 2, axis=3)
    if not use_conv:
        return up
    out = lax.conv_general_dilated(
        up, w_conv, window_strides=(1, 1), padding=((1, 1), (1, 1)),
        dimension_numbers=("NCHW", "OIHW", "NCHW"),
        precision=lax.Precision.HIGHEST)
    return out + b_conv[None, :, None, None]


if __name__ == "__main__":
    # C=128 so the channel (lane) dimension is fully dense on TPU.
    B, C, H, W = 2, 128, 16, 16

    key = jax.random.PRNGKey(0)
    kx, kw, kb = jax.random.split(key, 3)
    x = jax.random.normal(kx, (B, C, H, W), dtype=jnp.float32)
    w_conv = (jax.random.normal(kw, (C, C, 3, 3)) /
              math.sqrt(9 * C)).astype(jnp.float32)
    b_conv = (0.1 * jax.random.normal(kb, (C,))).astype(jnp.float32)

    # use_conv=True path (upsample + 3x3 conv); bf16 MXU vs f32 reference.
    out = upsample(x, w_conv, b_conv, use_conv=True)
    out = jax.block_until_ready(out)
    ref = reference_upsample(x, w_conv, b_conv, True)
    assert out.shape == (B, C, 2 * H, 2 * W)
    max_err = float(jnp.max(jnp.abs(out - ref)))
    assert jnp.allclose(out, ref, rtol=4e-2, atol=4e-2), max_err

    # use_conv=False path (pure nearest upsample) must be exact.
    out_nc = upsample(x, use_conv=False)
    out_nc = jax.block_until_ready(out_nc)
    ref_nc = reference_upsample(x, w_conv, b_conv, False)
    assert out_nc.shape == (B, C, 2 * H, 2 * W)
    assert jnp.array_equal(out_nc, ref_nc)

    print("KERNEL_OK")
</pallas_src>

<mosaic_0001>
module attributes {stable_mosaic.version = 11 : i64} {
  func.func @_upsample_conv_kernel(%arg0: i32, %arg1: i32, %arg2: memref<1x8x16x128xf32, #tpu.memory_space<vmem>>, %arg3: memref<1x1x16x128xf32, #tpu.memory_space<vmem>>, %arg4: memref<1x1x16x128xf32, #tpu.memory_space<vmem>>, %arg5: memref<4x512x128xbf16, #tpu.memory_space<vmem>>, %arg6: memref<1x128xf32, #tpu.memory_space<vmem>>, %arg7: memref<1x8x2x16x2x128xf32, #tpu.memory_space<vmem>>, %arg8: memref<10x18x128xbf16, #tpu.memory_space<vmem>>) attributes {dimension_semantics = [#tpu.dimension_semantics<parallel>, #tpu.dimension_semantics<parallel>], iteration_bounds = array<i64: 2, 2>, scalar_prefetch = 0 : i64, scratch_operands = 1 : i64, tpu.core_type = #tpu.core_type<tc>, window_params = [{transform_indices = @transform_0, window_bounds = array<i64: 1, 8, 16, 128>}, {transform_indices = @transform_1, window_bounds = array<i64: 1, 1, 16, 128>}, {transform_indices = @transform_2, window_bounds = array<i64: 1, 1, 16, 128>}, {pipeline_mode = #tpu.pipeline_mode<synchronous>, transform_indices = @transform_3, window_bounds = array<i64: 4, 512, 128>}, {pipeline_mode = #tpu.pipeline_mode<synchronous>, transform_indices = @transform_4, window_bounds = array<i64: 1, 128>}, {transform_indices = @transform_5, window_bounds = array<i64: 1, 8, 2, 16, 2, 128>}]} {
    %cst = arith.constant 0.000000e+00 : bf16
    %0 = vector.broadcast %cst : bf16 to vector<10x128xbf16>
    %c0 = arith.constant 0 : index
    %c0_0 = arith.constant 0 : index
    %c0_1 = arith.constant 0 : index
    %1 = vector.load %arg8[%c0, %c0_0, %c0_1] : memref<10x18x128xbf16, #tpu.memory_space<vmem>>, vector<10x1x128xbf16>
    %2 = vector.shape_cast %1 : vector<10x1x128xbf16> to vector<10x128xbf16>
    %3 = vector.shape_cast %0 : vector<10x128xbf16> to vector<10x1x128xbf16>
    tpu.vector_store %arg8[%c0, %c0_0, %c0_1], %3 {strides = array<i32>} : memref<10x18x128xbf16, #tpu.memory_space<vmem>>, vector<10x1x128xbf16>,
    %c0_2 = arith.constant 0 : index
    %c17 = arith.constant 17 : index
    %c0_3 = arith.constant 0 : index
    %4 = vector.load %arg8[%c0_2, %c17, %c0_3] : memref<10x18x128xbf16, #tpu.memory_space<vmem>>, vector<10x1x128xbf16>
    %5 = vector.shape_cast %4 : vector<10x1x128xbf16> to vector<10x128xbf16>
    %6 = vector.shape_cast %0 : vector<10x128xbf16> to vector<10x1x128xbf16>
    tpu.vector_store %arg8[%c0_2, %c17, %c0_3], %6 {strides = array<i32>} : memref<10x18x128xbf16, #tpu.memory_space<vmem>>, vector<10x1x128xbf16>,
    %c0_4 = arith.constant 0 : index
    %c0_5 = arith.constant 0 : index
    %c0_6 = arith.constant 0 : index
    %c0_7 = arith.constant 0 : index
    %7 = vector.load %arg2[%c0_4, %c0_5, %c0_6, %c0_7] : memref<1x8x16x128xf32, #tpu.memory_space<vmem>>, vector<1x8x16x128xf32>
    %8 = vector.shape_cast %7 : vector<1x8x16x128xf32> to vector<8x16x128xf32>
    %9 = arith.truncf %8 : vector<8x16x128xf32> to vector<8x16x128xbf16>
    %c1 = arith.constant 1 : index
    %c1_8 = arith.constant 1 : index
    %c0_9 = arith.constant 0 : index
    %10 = vector.load %arg8[%c1, %c1_8, %c0_9] : memref<10x18x128xbf16, #tpu.memory_space<vmem>>, vector<8x16x128xbf16>
    tpu.vector_store %arg8[%c1, %c1_8, %c0_9], %9 {strides = array<i32>} : memref<10x18x128xbf16, #tpu.memory_space<vmem>>, vector<8x16x128xbf16>,
    %c0_i32 = arith.constant 0 : i32
    %11 = arith.cmpi sgt, %arg1, %c0_i32 : i32
    %c0_10 = arith.constant 0 : index
    %c0_11 = arith.constant 0 : index
    %c0_12 = arith.constant 0 : index
    %c0_13 = arith.constant 0 : index
    %12 = vector.load %arg3[%c0_10, %c0_11, %c0_12, %c0_13] : memref<1x1x16x128xf32, #tpu.memory_space<vmem>>, vector<1x1x16x128xf32>
    %13 = vector.shape_cast %12 : vector<1x1x16x128xf32> to vector<16x128xf32>
    %cst_14 = arith.constant 0.000000e+00 : f32
    %14 = vector.broadcast %cst_14 : f32 to vector<16x128xf32>
    %15 = arith.select %11, %13, %14 : vector<16x128xf32>
    %16 = arith.truncf %15 : vector<16x128xf32> to vector<16x128xbf16>
    %c0_15 = arith.constant 0 : index
    %c1_16 = arith.constant 1 : index
    %c0_17 = arith.constant 0 : index
    %17 = vector.load %arg8[%c0_15, %c1_16, %c0_17] : memref<10x18x128xbf16, #tpu.memory_space<vmem>>, vector<1x16x128xbf16>
    %18 = vector.shape_cast %17 : vector<1x16x128xbf16> to vector<16x128xbf16>
    %19 = vector.shape_cast %16 : vector<16x128xbf16> to vector<1x16x128xbf16>
    tpu.vector_store %arg8[%c0_15, %c1_16, %c0_17], %19 {strides = array<i32>} : memref<10x18x128xbf16, #tpu.memory_space<vmem>>, vector<1x16x128xbf16>,
    %c1_i32 = arith.constant 1 : i32
    %20 = arith.cmpi slt, %arg1, %c1_i32 : i32
    %c0_18 = arith.constant 0 : index
    %c0_19 = arith.constant 0 : index
    %c0_20 = arith.constant 0 : index
    %c0_21 = arith.constant 0 : index
    %21 = vector.load %arg4[%c0_18, %c0_19, %c0_20, %c0_21] : memref<1x1x16x128xf32, #tpu.memory_space<vmem>>, vector<1x1x16x128xf32>
    %22 = vector.shape_cast %21 : vector<1x1x16x128xf32> to vector<16x128xf32>
    %cst_22 = arith.constant 0.000000e+00 : f32
    %23 = vector.broadcast %cst_22 : f32 to vector<16x128xf32>
    %24 = arith.select %20, %22, %23 : vector<16x128xf32>
    %25 = arith.truncf %24 : vector<16x128xf32> to vector<16x128xbf16>
    %c9 = arith.constant 9 : index
    %c1_23 = arith.constant 1 : index
    %c0_24 = arith.constant 0 : index
    %26 = vector.load %arg8[%c9, %c1_23, %c0_24] : memref<10x18x128xbf16, #tpu.memory_space<vmem>>, vector<1x16x128xbf16>
    %27 = vector.shape_cast %26 : vector<1x16x128xbf16> to vector<16x128xbf16>
    %28 = vector.shape_cast %25 : vector<16x128xbf16> to vector<1x16x128xbf16>
    tpu.vector_store %arg8[%c9, %c1_23, %c0_24], %28 {strides = array<i32>} : memref<10x18x128xbf16, #tpu.memory_space<vmem>>, vector<1x16x128xbf16>,
    %c0_25 = arith.constant 0 : index
    %c0_26 = arith.constant 0 : index
    %29 = vector.load %arg6[%c0_25, %c0_26] : memref<1x128xf32, #tpu.memory_space<vmem>>, vector<1x128xf32>
    %c0_27 = arith.constant 0 : index
    %c0_28 = arith.constant 0 : index
    %c0_29 = arith.constant 0 : index
    %30 = vector.load %arg8[%c0_27, %c0_28, %c0_29] : memref<10x18x128xbf16, #tpu.memory_space<vmem>>, vector<8x16x128xbf16>
    %31 = vector.shape_cast %30 : vector<8x16x128xbf16> to vector<128x128xbf16>
    %c0_30 = arith.constant 0 : index
    %c1_31 = arith.constant 1 : index
    %c0_32 = arith.constant 0 : index
    %32 = vector.load %arg8[%c0_30, %c1_31, %c0_32] : memref<10x18x128xbf16, #tpu.memory_space<vmem>>, vector<8x16x128xbf16>
    %33 = vector.shape_cast %32 : vector<8x16x128xbf16> to vector<128x128xbf16>
    %c1_33 = arith.constant 1 : index
    %c0_34 = arith.constant 0 : index
    %c0_35 = arith.constant 0 : index
    %34 = vector.load %arg8[%c1_33, %c0_34, %c0_35] : memref<10x18x128xbf16, #tpu.memory_space<vmem>>, vector<8x16x128xbf16>
    %35 = vector.shape_cast %34 : vector<8x16x128xbf16> to vector<128x128xbf16>
    %c1_36 = arith.constant 1 : index
    %c1_37 = arith.constant 1 : index
    %c0_38 = arith.constant 0 : index
    %36 = vector.load %arg8[%c1_36, %c1_37, %c0_38] : memref<10x18x128xbf16, #tpu.memory_space<vmem>>, vector<8x16x128xbf16>
    %37 = vector.shape_cast %36 : vector<8x16x128xbf16> to vector<128x128xbf16>
    %38 = tpu.concatenate %31, %33, %35, %37 in 1 : vector<128x128xbf16>, vector<128x128xbf16>, vector<128x128xbf16>, vector<128x128xbf16> -> vector<128x512xbf16>
    %c0_39 = arith.constant 0 : index
    %c0_40 = arith.constant 0 : index
    %c0_41 = arith.constant 0 : index
    %39 = vector.load %arg5[%c0_39, %c0_40, %c0_41] : memref<4x512x128xbf16, #tpu.memory_space<vmem>>, vector<1x512x128xbf16>
    %40 = vector.shape_cast %39 : vector<1x512x128xbf16> to vector<512x128xbf16>
    %cst_42 = arith.constant dense<0.000000e+00> : vector<128x128xf32>
    %41 = tpu.matmul %38, %40, %cst_42 {dimension_numbers = #tpu.dot_dimension_numbers<[1], [0], [0], [1], [0, 0, 1, 1], [], []>} : vector<128x512xbf16>, vector<512x128xbf16>, vector<128x128xf32> -> vector<128x128xf32>
    %42 = vector.broadcast %29 : vector<1x128xf32> to vector<128x128xf32>
    %43 = arith.addf %41, %42 : vector<128x128xf32>
    %44 = vector.shape_cast %43 : vector<128x128xf32> to vector<8x16x128xf32>
    %c0_43 = arith.constant 0 : index
    %c0_44 = arith.constant 0 : index
    %c0_45 = arith.constant 0 : index
    %c0_46 = arith.constant 0 : index
    %c0_47 = arith.constant 0 : index
    %c0_48 = arith.constant 0 : index
    %45 = vector.load %arg7[%c0_43, %c0_44, %c0_45, %c0_46, %c0_47, %c0_48] : memref<1x8x2x16x2x128xf32, #tpu.memory_space<vmem>>, vector<1x8x1x16x1x128xf32>
    %46 = vector.shape_cast %45 : vector<1x8x1x16x1x128xf32> to vector<8x16x128xf32>
    %47 = vector.shape_cast %44 : vector<8x16x128xf32> to vector<1x8x1x16x1x128xf32>
    tpu.vector_store %arg7[%c0_43, %c0_44, %c0_45, %c0_46, %c0_47, %c0_48], %47 {strides = array<i32>} : memref<1x8x2x16x2x128xf32, #tpu.memory_space<vmem>>, vector<1x8x1x16x1x128xf32>,
    %c0_49 = arith.constant 0 : index
    %c1_50 = arith.constant 1 : index
    %c0_51 = arith.constant 0 : index
    %48 = vector.load %arg8[%c0_49, %c1_50, %c0_51] : memref<10x18x128xbf16, #tpu.memory_space<vmem>>, vector<8x16x128xbf16>
    %49 = vector.shape_cast %48 : vector<8x16x128xbf16> to vector<128x128xbf16>
    %c0_52 = arith.constant 0 : index
    %c2 = arith.constant 2 : index
    %c0_53 = arith.constant 0 : index
    %50 = vector.load %arg8[%c0_52, %c2, %c0_53] : memref<10x18x128xbf16, #tpu.memory_space<vmem>>, vector<8x16x128xbf16>
    %51 = vector.shape_cast %50 : vector<8x16x128xbf16> to vector<128x128xbf16>
    %c1_54 = arith.constant 1 : index
    %c1_55 = arith.constant 1 : index
    %c0_56 = arith.constant 0 : index
    %52 = vector.load %arg8[%c1_54, %c1_55, %c0_56] : memref<10x18x128xbf16, #tpu.memory_space<vmem>>, vector<8x16x128xbf16>
    %53 = vector.shape_cast %52 : vector<8x16x128xbf16> to vector<128x128xbf16>
    %c1_57 = arith.constant 1 : index
    %c2_58 = arith.constant 2 : index
    %c0_59 = arith.constant 0 : index
    %54 = vector.load %arg8[%c1_57, %c2_58, %c0_59] : memref<10x18x128xbf16, #tpu.memory_space<vmem>>, vector<8x16x128xbf16>
    %55 = vector.shape_cast %54 : vector<8x16x128xbf16> to vector<128x128xbf16>
    %56 = tpu.concatenate %49, %51, %53, %55 in 1 : vector<128x128xbf16>, vector<128x128xbf16>, vector<128x128xbf16>, vector<128x128xbf16> -> vector<128x512xbf16>
    %c1_60 = arith.constant 1 : index
    %c0_61 = arith.constant 0 : index
    %c0_62 = arith.constant 0 : index
    %57 = vector.load %arg5[%c1_60, %c0_61, %c0_62] : memref<4x512x128xbf16, #tpu.memory_space<vmem>>, vector<1x512x128xbf16>
    %58 = vector.shape_cast %57 : vector<1x512x128xbf16> to vector<512x128xbf16>
    %cst_63 = arith.constant dense<0.000000e+00> : vector<128x128xf32>
    %59 = tpu.matmul %56, %58, %cst_63 {dimension_numbers = #tpu.dot_dimension_numbers<[1], [0], [0], [1], [0, 0, 1, 1], [], []>} : vector<128x512xbf16>, vector<512x128xbf16>, vector<128x128xf32> -> vector<128x128xf32>
    %60 = vector.broadcast %29 : vector<1x128xf32> to vector<128x128xf32>
    %61 = arith.addf %59, %60 : vector<128x128xf32>
    %62 = vector.shape_cast %61 : vector<128x128xf32> to vector<8x16x128xf32>
    %c0_64 = arith.constant 0 : index
    %c0_65 = arith.constant 0 : index
    %c0_66 = arith.constant 0 : index
    %c0_67 = arith.constant 0 : index
    %c1_68 = arith.constant 1 : index
    %c0_69 = arith.constant 0 : index
    %63 = vector.load %arg7[%c0_64, %c0_65, %c0_66, %c0_67, %c1_68, %c0_69] : memref<1x8x2x16x2x128xf32, #tpu.memory_space<vmem>>, vector<1x8x1x16x1x128xf32>
    %64 = vector.shape_cast %63 : vector<1x8x1x16x1x128xf32> to vector<8x16x128xf32>
    %65 = vector.shape_cast %62 : vector<8x16x128xf32> to vector<1x8x1x16x1x128xf32>
    tpu.vector_store %arg7[%c0_64, %c0_65, %c0_66, %c0_67, %c1_68, %c0_69], %65 {strides = array<i32>} : memref<1x8x2x16x2x128xf32, #tpu.memory_space<vmem>>, vector<1x8x1x16x1x128xf32>,
    %c1_70 = arith.constant 1 : index
    %c0_71 = arith.constant 0 : index
    %c0_72 = arith.constant 0 : index
    %66 = vector.load %arg8[%c1_70, %c0_71, %c0_72] : memref<10x18x128xbf16, #tpu.memory_space<vmem>>, vector<8x16x128xbf16>
    %67 = vector.shape_cast %66 : vector<8x16x128xbf16> to vector<128x128xbf16>
    %c1_73 = arith.constant 1 : index
    %c1_74 = arith.constant 1 : index
    %c0_75 = arith.constant 0 : index
    %68 = vector.load %arg8[%c1_73, %c1_74, %c0_75] : memref<10x18x128xbf16, #tpu.memory_space<vmem>>, vector<8x16x128xbf16>
    %69 = vector.shape_cast %68 : vector<8x16x128xbf16> to vector<128x128xbf16>
    %c2_76 = arith.constant 2 : index
    %c0_77 = arith.constant 0 : index
    %c0_78 = arith.constant 0 : index
    %70 = vector.load %arg8[%c2_76, %c0_77, %c0_78] : memref<10x18x128xbf16, #tpu.memory_space<vmem>>, vector<8x16x128xbf16>
    %71 = vector.shape_cast %70 : vector<8x16x128xbf16> to vector<128x128xbf16>
    %c2_79 = arith.constant 2 : index
    %c1_80 = arith.constant 1 : index
    %c0_81 = arith.constant 0 : index
    %72 = vector.load %arg8[%c2_79, %c1_80, %c0_81] : memref<10x18x128xbf16, #tpu.memory_space<vmem>>, vector<8x16x128xbf16>
    %73 = vector.shape_cast %72 : vector<8x16x128xbf16> to vector<128x128xbf16>
    %74 = tpu.concatenate %67, %69, %71, %73 in 1 : vector<128x128xbf16>, vector<128x128xbf16>, vector<128x128xbf16>, vector<128x128xbf16> -> vector<128x512xbf16>
    %c2_82 = arith.constant 2 : index
    %c0_83 = arith.constant 0 : index
    %c0_84 = arith.constant 0 : index
    %75 = vector.load %arg5[%c2_82, %c0_83, %c0_84] : memref<4x512x128xbf16, #tpu.memory_space<vmem>>, vector<1x512x128xbf16>
    %76 = vector.shape_cast %75 : vector<1x512x128xbf16> to vector<512x128xbf16>
    %cst_85 = arith.constant dense<0.000000e+00> : vector<128x128xf32>
    %77 = tpu.matmul %74, %76, %cst_85 {dimension_numbers = #tpu.dot_dimension_numbers<[1], [0], [0], [1], [0, 0, 1, 1], [], []>} : vector<128x512xbf16>, vector<512x128xbf16>, vector<128x128xf32> -> vector<128x128xf32>
    %78 = vector.broadcast %29 : vector<1x128xf32> to vector<128x128xf32>
    %79 = arith.addf %77, %78 : vector<128x128xf32>
    %80 = vector.shape_cast %79 : vector<128x128xf32> to vector<8x16x128xf32>
    %c0_86 = arith.constant 0 : index
    %c0_87 = arith.constant 0 : index
    %c1_88 = arith.constant 1 : index
    %c0_89 = arith.constant 0 : index
    %c0_90 = arith.constant 0 : index
    %c0_91 = arith.constant 0 : index
    %81 = vector.load %arg7[%c0_86, %c0_87, %c1_88, %c0_89, %c0_90, %c0_91] : memref<1x8x2x16x2x128xf32, #tpu.memory_space<vmem>>, vector<1x8x1x16x1x128xf32>
    %82 = vector.shape_cast %81 : vector<1x8x1x16x1x128xf32> to vector<8x16x128xf32>
    %83 = vector.shape_cast %80 : vector<8x16x128xf32> to vector<1x8x1x16x1x128xf32>
    tpu.vector_store %arg7[%c0_86, %c0_87, %c1_88, %c0_89, %c0_90, %c0_91], %83 {strides = array<i32>} : memref<1x8x2x16x2x128xf32, #tpu.memory_space<vmem>>, vector<1x8x1x16x1x128xf32>,
    %c1_92 = arith.constant 1 : index
    %c1_93 = arith.constant 1 : index
    %c0_94 = arith.constant 0 : index
    %84 = vector.load %arg8[%c1_92, %c1_93, %c0_94] : memref<10x18x128xbf16, #tpu.memory_space<vmem>>, vector<8x16x128xbf16>
    %85 = vector.shape_cast %84 : vector<8x16x128xbf16> to vector<128x128xbf16>
    %c1_95 = arith.constant 1 : index
    %c2_96 = arith.constant 2 : index
    %c0_97 = arith.constant 0 : index
    %86 = vector.load %arg8[%c1_95, %c2_96, %c0_97] : memref<10x18x128xbf16, #tpu.memory_space<vmem>>, vector<8x16x128xbf16>
    %87 = vector.shape_cast %86 : vector<8x16x128xbf16> to vector<128x128xbf16>
    %c2_98 = arith.constant 2 : index
    %c1_99 = arith.constant 1 : index
    %c0_100 = arith.constant 0 : index
    %88 = vector.load %arg8[%c2_98, %c1_99, %c0_100] : memref<10x18x128xbf16, #tpu.memory_space<vmem>>, vector<8x16x128xbf16>
    %89 = vector.shape_cast %88 : vector<8x16x128xbf16> to vector<128x128xbf16>
    %c2_101 = arith.constant 2 : index
    %c2_102 = arith.constant 2 : index
    %c0_103 = arith.constant 0 : index
    %90 = vector.load %arg8[%c2_101, %c2_102, %c0_103] : memref<10x18x128xbf16, #tpu.memory_space<vmem>>, vector<8x16x128xbf16>
    %91 = vector.shape_cast %90 : vector<8x16x128xbf16> to vector<128x128xbf16>
    %92 = tpu.concatenate %85, %87, %89, %91 in 1 : vector<128x128xbf16>, vector<128x128xbf16>, vector<128x128xbf16>, vector<128x128xbf16> -> vector<128x512xbf16>
    %c3 = arith.constant 3 : index
    %c0_104 = arith.constant 0 : index
    %c0_105 = arith.constant 0 : index
    %93 = vector.load %arg5[%c3, %c0_104, %c0_105] : memref<4x512x128xbf16, #tpu.memory_space<vmem>>, vector<1x512x128xbf16>
    %94 = vector.shape_cast %93 : vector<1x512x128xbf16> to vector<512x128xbf16>
    %cst_106 = arith.constant dense<0.000000e+00> : vector<128x128xf32>
    %95 = tpu.matmul %92, %94, %cst_106 {dimension_numbers = #tpu.dot_dimension_numbers<[1], [0], [0], [1], [0, 0, 1, 1], [], []>} : vector<128x512xbf16>, vector<512x128xbf16>, vector<128x128xf32> -> vector<128x128xf32>
    %96 = vector.broadcast %29 : vector<1x128xf32> to vector<128x128xf32>
    %97 = arith.addf %95, %96 : vector<128x128xf32>
    %98 = vector.shape_cast %97 : vector<128x128xf32> to vector<8x16x128xf32>
    %c0_107 = arith.constant 0 : index
    %c0_108 = arith.constant 0 : index
    %c1_109 = arith.constant 1 : index
    %c0_110 = arith.constant 0 : index
    %c1_111 = arith.constant 1 : index
    %c0_112 = arith.constant 0 : index
    %99 = vector.load %arg7[%c0_107, %c0_108, %c1_109, %c0_110, %c1_111, %c0_112] : memref<1x8x2x16x2x128xf32, #tpu.memory_space<vmem>>, vector<1x8x1x16x1x128xf32>
    %100 = vector.shape_cast %99 : vector<1x8x1x16x1x128xf32> to vector<8x16x128xf32>
    %101 = vector.shape_cast %98 : vector<8x16x128xf32> to vector<1x8x1x16x1x128xf32>
    tpu.vector_store %arg7[%c0_107, %c0_108, %c1_109, %c0_110, %c1_111, %c0_112], %101 {strides = array<i32>} : memref<1x8x2x16x2x128xf32, #tpu.memory_space<vmem>>, vector<1x8x1x16x1x128xf32>,
    return
  }
  func.func @transform_0(%arg0: i32, %arg1: i32) -> (i32, i32, i32, i32) {
    %c0_i32 = arith.constant 0 : i32
    %c0_i32_0 = arith.constant 0 : i32
    %c0_i32_1 = arith.constant 0 : i32
    return %arg0, %arg1, %c0_i32, %c0_i32_0 : i32, i32, i32, i32
  }
  func.func @transform_1(%arg0: i32, %arg1: i32) -> (i32, i32, i32, i32) {
    %c8_i32 = arith.constant 8 : i32
    %0 = arith.muli %arg1, %c8_i32 : i32
    %c1_i32 = arith.constant 1 : i32
    %1 = arith.subi %0, %c1_i32 : i32
    %c0_i32 = arith.constant 0 : i32
    %2 = arith.maxsi %1, %c0_i32 : i32
    %c0_i32_0 = arith.constant 0 : i32
    %c0_i32_1 = arith.constant 0 : i32
    %c0_i32_2 = arith.constant 0 : i32
    return %arg0, %2, %c0_i32_0, %c0_i32_1 : i32, i32, i32, i32
  }
  func.func @transform_2(%arg0: i32, %arg1: i32) -> (i32, i32, i32, i32) {
    %c1_i32 = arith.constant 1 : i32
    %0 = arith.addi %arg1, %c1_i32 : i32
    %c8_i32 = arith.constant 8 : i32
    %1 = arith.muli %0, %c8_i32 : i32
    %c15_i32 = arith.constant 15 : i32
    %2 = arith.minsi %1, %c15_i32 : i32
    %c0_i32 = arith.constant 0 : i32
    %c0_i32_0 = arith.constant 0 : i32
    %c0_i32_1 = arith.constant 0 : i32
    return %arg0, %2, %c0_i32, %c0_i32_0 : i32, i32, i32, i32
  }
  func.func @transform_3(%arg0: i32, %arg1: i32) -> (i32, i32, i32) {
    %c0_i32 = arith.constant 0 : i32
    %c0_i32_0 = arith.constant 0 : i32
    %c0_i32_1 = arith.constant 0 : i32
    %c0_i32_2 = arith.constant 0 : i32
    return %c0_i32, %c0_i32_0, %c0_i32_1 : i32, i32, i32
  }
  func.func @transform_4(%arg0: i32, %arg1: i32) -> (i32, i32) {
    %c0_i32 = arith.constant 0 : i32
    %c0_i32_0 = arith.constant 0 : i32
    %c0_i32_1 = arith.constant 0 : i32
    return %c0_i32, %c0_i32_0 : i32, i32
  }
  func.func @transform_5(%arg0: i32, %arg1: i32) -> (i32, i32, i32, i32, i32, i32) {
    %c0_i32 = arith.constant 0 : i32
    %c0_i32_0 = arith.constant 0 : i32
    %c0_i32_1 = arith.constant 0 : i32
    %c0_i32_2 = arith.constant 0 : i32
    %c0_i32_3 = arith.constant 0 : i32
    return %arg0, %arg1, %c0_i32, %c0_i32_0, %c0_i32_1, %c0_i32_2 : i32, i32, i32, i32, i32, i32
  }
}

</mosaic_0001>

<bundles_post_ra>
// kernel: tpu_custom_call.1
= control target key start
LH: loop header
LB: loop body
LE: loop exit
PB: predicated region body
PF: predicated region fallthrough
CT: control target
= control target key end

     0   :  { %s10966_s0 = inlined_call_operand.hbm [shape: f32[2,16,16,128], index: 0, kind: input, shape index: {}]   ;;  %s10967_s1 = inlined_call_operand.hbm [shape: f32[2,16,16,128], index: 1, kind: input, shape index: {}]   ;;  %s10968_s2 = inlined_call_operand.hbm [shape: f32[2,16,16,128], index: 2, kind: input, shape index: {}]   ;;  %s10969_s3 = inlined_call_operand.hbm [shape: bf16[4,512,128], index: 3, kind: input, shape index: {}]   ;;  %s10970_s4 = inlined_call_operand.vmem [shape: f32[1,128], index: 4, kind: input, shape index: {}]   ;;  %s10971_s5 = inlined_call_operand.hbm [shape: f32[2,16,2,16,2,128], index: 5, kind: output, shape index: {}]  }
   0x1   :  { %10991 = sst [smem:[#allocation32_spill]] %s10966_s0 }
   0x2   :  { %10992 = sst [smem:[#allocation33_spill]] %s10967_s1 }
   0x3   :  { %10993 = sst [smem:[#allocation34_spill]] %s10968_s2 }
   0x4   :  { %10994 = sst [smem:[#allocation35_spill]] %s10969_s3 }
   0x5   :  { %10995 = sst [smem:[#allocation36_spill]] %s10970_s4 }
   0x6   :  { %10996 = sst [smem:[#allocation37_spill]] %s10971_s5 }
   0x7   :  { %10 = vsyncpa [#allocation4], 0 }
   0x8   :  { %12 = vsyncpa [#allocation4 + $0x1], 0 }
   0x9   :  { %13 = vsyncpa [#allocation7], 0 }
   0xa   :  { %15 = vsyncpa [#allocation7 + $0x1], 0 }
   0xb   :  { %16 = vsyncpa [#allocation10], 0 }
   0xc   :  { %17 = vsyncpa [#allocation5], 0 }
   0xd   :  { %19 = vsyncpa [#allocation5 + $0x1], 0  ;;  %s8541_s18 = smov 0   ;;  %s8543_s19 = smov 0  }
   0xe   :  { %s8545_s20 = smov 0   ;;  %s8547_s21 = smov 0  }
   0xf   :  { %s8549_s22 = smov 0   ;;  %s8551_s23 = smov 0  }
  0x10   :  { %s8553_s24 = smov 0   ;;  %s8555_s25 = smov 0  }
  0x11   :  { %s8557_s26 = smov 0   ;;  %s8559_s27 = smov 0  }
  0x12   :  { %s8561_s28 = smov 0   ;;  %s8563_s29 = smov 0  }
  0x13   :  { %s8565_s30 = smov 0   ;;  %s8567_s6 = smov 0  }
  0x14 LB: > { %10997 = sst [smem:[#allocation17_spill]] %s8450_s18  ;;  %s34_s7 = sadd.s32 1, %s8494_s29  ;;  %s8502_s6 = sphi %s8567_s6, %s25_s6   ;;  %s8498_s30 = sphi %s8565_s30, %s11070_s30   ;;  %s8494_s29 = sphi %s8563_s29, %s11069_s29   ;;  %s8490_s28 = sphi %s8561_s28, %s11068_s28   ;;  %s8486_s27 = sphi %s8559_s27, %s11056_s27   ;;  %s8482_s26 = sphi %s8557_s26, %s11067_s26   ;;  %s8478_s25 = sphi %s8555_s25, %s11066_s25   ;;  %s8474_s24 = sphi %s8553_s24, %s11065_s24   ;;  %s8470_s23 = sphi %s8551_s23, %s11053_s23   ;;  %s8466_s22 = sphi %s8549_s22, %s11064_s22   ;;  %s8462_s21 = sphi %s8547_s21, %s11063_s21   ;;  %s8458_s20 = sphi %s8545_s20, %s11062_s20   ;;  %s8454_s19 = sphi %s8543_s19, %s11061_s19   ;;  %s8450_s18 = sphi %s8541_s18, %s11060_s18  }
  0x15   : > { %10998 = sst [smem:[#allocation18_spill]] %s8470_s23  ;;  %s37_s8 = sadd.s32 1, %s8498_s30 }
  0x16   : > { %10999 = sst [smem:[#allocation19_spill]] %s8474_s24  ;;  %p35_p0 = scmp.ge.s32.totalorder %s34_s7, 2 }
  0x17   : > { %11000 = sst [smem:[#allocation20_spill]] %s8482_s26  ;;  %p54_p1 = scmp.eq.s32.totalorder %s8502_s6, 0 }
  0x18   : > { %11001 = sst [smem:[#allocation21_spill]] %s8486_s27  ;;  %s6919_s9 = sshll.u32 %s8494_s29, 3 }
  0x19   : > { %11002 = sst [smem:[#allocation22_spill]] %s8490_s28  ;;  %s82_s10 = sadd.s32 1, %s8470_s23 }
  0x1a   : > { %11003 = sst [smem:[#allocation23_spill]] %s8494_s29  ;;  %s11072_s7 = smov (%p35_p0, %s34_s7), 0 }
  0x1b   : > { %11004 = sst [smem:[#allocation24_spill]] %s8498_s30  ;;  %s11074_s8 = smov (!%p35_p0, %s37_s8), %s8498_s30 }
  0x1c   : > { %11005 = sst [smem:[#allocation25_spill]] %s11072_s7  ;;  %s42_s11 = ssub.s32 %s8494_s29, %s11072_s7 }
  0x1d   : > { %s6920_s12 = sadd.s32 4294967295, %s6919_s9  ;;  %p39_p2 = scmp.ge.s32.totalorder %s11074_s8, 2 }
  0x1e   : > { %p71_p3 = scmp.gt.s32.totalorder %s6920_s12, 0  ;;  %s6921_s13 = sshll.u32 %s11072_s7, 3 }
  0x1f   : > { %p89_p4 = scmp.ne.s32.totalorder %s8470_s23, %s8466_s22  ;;  %s11076_s8 = smov (%p39_p2, %s11074_s8), 0 }
  0x20   : > { %11006 = sst [smem:[#allocation26_spill]] %s11076_s8  ;;  %s11078_s12 = smov (!%p71_p3, %s6920_s12), 0 }
  0x21   : > { %s8628_s14 = ssub.s32 %s8498_s30, %s11076_s8  ;;  %s6922_s15 = sadd.s32 4294967295, %s6921_s13 }
  0x22   : > { %11007 = sst [smem:[#allocation27_spill]] %s8628_s14  ;;  %s8631_s16 = sor.u32 %s42_s11, %s8628_s14 }
  0x23   : > { %p75_p5 = scmp.gt.s32.totalorder %s6922_s15, 0  ;;  %p44_p6 = scmp.eq.s32.totalorder %s8631_s16, 0 }
  0x24   : > { %p8636_p7 = por %p89_p4, %p54_p1  ;;  %p95_p8 = scmp.ne.s32.totalorder %s8466_s22, %s8462_s21 }
  0x25   : > { %s11080_s15 = smov (!%p75_p5, %s6922_s15), 0  ;;  %s8642_s8 = sadd.s32 8, %s6919_s9 }
  0x26   : > { %s78_s7 = ssub.s32 %s11078_s12, %s11080_s15  ;;  %p107_p9 = scmp.lt.s32.totalorder %s8642_s8, 15 }
  0x27   : > { %s79_s5 = sor.u32 %s78_s7, %s8628_s14  ;;  %s8646_s11 = sadd.s32 8, %s6921_s13 }
  0x28   : > { %p80_p10 = scmp.eq.s32.totalorder %s79_s5, 0  ;;  %p10987_p12 = scmp.lt.s32.totalorder %s8502_s6, 4 }
  0x29   : > { %s8654_s4 = sshll.u32 %s8498_s30, 5  ;;  %s267_s27 = sand.u32 1, %s8502_s6  }
  0x2a   : > { %s8651_s28 = scalar_select %p80_p10, %s8470_s23, %s82_s10  }
  0x2b   : > { %s269_s9 = sand.u32 1, %s8470_s23   ;;  %s6936_s15 = sshll.u32 %s11078_s12, 1 }
  0x2c   : > { %11009 = sst [smem:[#allocation28_spill]] %s8651_s28  ;;  %s6933_s2 = sshll.u32 %s269_s9, 4 }
  0x2d   : > { %s280_s7 = sadd.s32 %s6936_s15, %s8654_s4  ;;  %s271_s0 = scalar_lea.vmem [#allocation6], %s6933_s2 }
  0x2e   : > { %s6938_s13 = sshll.u32 %s280_s7, 3  ;;  %s285_s5 = sshll.u32 %s271_s0, 4  ;;  %s286_s5 = int_to_ptr.vmem [resolvable:$true] %s285_s5 }
  0x2f   : > { %s11010_s1 = sld [smem:[#allocation33_spill]]  ;;  %p8073_p13 = pnand %p10987_p12, %p8636_p7 }
  0x30   : > { %s8666_s9 = scalar_lea.sflag [#allocation7], %s267_s27  ;;  %s10979_s12 = smov 128  }
  0x31   : > { %s10981_s15 = smov 8   ;;  %s8673_s0 = sadd.s32 4294967295, %s8502_s6  }
  0x32   : > { %p6925_p0 = scmp.ge.s32.totalorder %s8502_s6, 1  ;;  %p60_p2 = scmp.eq.s32.totalorder %s8673_s0, 0 }
  0x33   : > { %p212_p3 = scmp.lt.s32.totalorder %s8502_s6, 5  ;;  %s11011_s3 = sld [smem:[#allocation35_spill]] }
  0x34   : > { %p8686_p4 = por %p95_p8, %p60_p2  ;;  %s8506_s17 = smov [#allocation9]  }
  0x35   : > { %s282_s10 = scalar_lea.hbm %s11010_s1, %s6938_s13  ;;  %p8690_p5 = pnand %p6925_p0, %p212_p3 }
  0x36   : > { %s283_s30 = sshll.u32 %s282_s10, 4  ;;  %s225_s21 = sshll.u32 %s8506_s17, 4  ;;  %s284_s30 = int_to_ptr.hbm [resolvable:$true] %s283_s30  ;;  %s226_s21 = int_to_ptr.vmem [resolvable:$true] %s225_s21 }
  0x37   : > { %8075 = dma.hbm_to_vmem [thread:$0]  (!%p8073_p13), %s284_s30, 256, %s286_s5, %s8666_s9, %s10979_s12, %s10979_s12, %s10981_s15  }
  0x38   : > { %p8065_p7 = pneg %p8690_p5  ;;  %s8507_s7 = smov 64  }
  0x39   : > { %s223_s27 = sshll.u32 %s11011_s3, 4  ;;  %s8508_s13 = smov 4   ;;  %s224_s27 = int_to_ptr.hbm [resolvable:$true] %s223_s27 }
  0x3a   : > { %p8066_p8 = pnand %p8065_p7, %p60_p2  ;;  %s6918_s5 = sadd.s32 4294967294, %s8502_s6  }
  0x3b   : > { %s46_s10 = sadd.s32 1, %s8482_s26  ;;  %p53_p10 = scmp.ne.s32.totalorder %s8482_s26, %s8478_s25 }
  0x3c   : > { %8068 = dma.hbm_to_vmem [thread:$0]  (!%p8066_p8), %s224_s27, 16384, %s226_s21, [#allocation10], %s8507_s7, %s8507_s7, %s8508_s13  }
  0x3d   : > { %s8705_s2 = scalar_select %p44_p6, %s8482_s26, %s46_s10  }
  0x3e   : > { %p8709_p13 = por %p54_p1, %p53_p10  ;;  %p59_p0 = scmp.ne.s32.totalorder %s8478_s25, %s8474_s24 }
  0x3f   : > { %11014 = sst [smem:[#allocation29_spill]] %s8705_s2  ;;  %p199_p3 = scmp.eq.s32.totalorder %s8673_s0, 3 }
  0x40   : > { %p205_p7 = scmp.eq.s32.totalorder %s6918_s5, 3  ;;  %p8718_p11 = por %p60_p2, %p59_p0 }
  0x41   : > { %s242_s27 = sand.u32 1, %s8482_s26   ;;  %p8723_p8 = por %p199_p3, %p53_p10 }
  0x42   : > { %p8727_p6 = por %p205_p7, %p59_p0  ;;  %s6928_s7 = sshll.u32 %s242_s27, 7 }
  0x43   : > { %s11017_s16 = scalar_select %p8723_p8, 1, 0 }
  0x44   : > { %s11019_s21 = scalar_select %p8727_p6, 1, 0 }
  0x45   : > { %11018 = sst [smem:[#allocation30_spill]] %s11017_s16  ;;  %s7889_s13 = sshll.u32 %s8494_s29, 4 }
  0x46   : > { %11020 = sst [smem:[#allocation31_spill]] %s11019_s21  ;;  %s252_s10 = sadd.s32 %s7889_s13, %s8654_s4 }
  0x47   : > { %s11021_s5 = sld [smem:[#allocation17_spill]]  ;;  %s246_s12 = scalar_lea.vmem [#allocation3], %s6928_s7 }
  0x48   : > { %s257_s15 = sshll.u32 %s246_s12, 4  ;;  %s11022_s1 = sld [smem:[#allocation27_spill]]  ;;  %s258_s15 = int_to_ptr.vmem [resolvable:$true] %s257_s15 }
  0x49   : > { %s6932_s3 = sshll.u32 %s252_s10, 3  ;;  %s11023_s28 = sld [smem:[#allocation32_spill]] }
  0x4a   : > { %p8070_p10 = pnand %p10987_p12, %p8709_p13  ;;  %s243_s29 = scalar_lea.sflag [#allocation4], %s242_s27 }
  0x4b   : > { %s11024_s13 = smov 8   ;;  %s11025_s7 = smov 128  }
  0x4c   : > { %s118_s12 = sadd.s32 1, %s8458_s20  ;;  %s11082_s8 = smov (!%p107_p9, %s8642_s8), 15 }
  0x4d   : > { %p11026_p0 = scmp.lt.s32.totalorder %s8646_s11, 15  ;;  %p125_p3 = scmp.ne.s32.totalorder %s8458_s20, %s8454_s19 }
  0x4e   : > { %p131_p7 = scmp.ne.s32.totalorder %s8454_s19, %s11021_s5  ;;  %s297_s26 = sand.u32 1, %s8458_s20  }
  0x4f   : > { %s254_s23 = scalar_lea.hbm %s11023_s28, %s6932_s3  ;;  %s11084_s11 = smov (!%p11026_p0, %s8646_s11), 15 }
  0x50   : > { %s255_s21 = sshll.u32 %s254_s23, 4  ;;  %s114_s3 = ssub.s32 %s11082_s8, %s11084_s11  ;;  %s256_s21 = int_to_ptr.hbm [resolvable:$true] %s255_s21 }
  0x51   : > { %8072 = dma.hbm_to_vmem [thread:$0]  (!%p8070_p10), %s256_s21, 2048, %s258_s15, %s243_s29, %s11025_s7, %s11025_s7, %s11024_s13  }
  0x52   : > { %s115_s28 = sor.u32 %s114_s3, %s11022_s1  ;;  %p8758_p13 = por %p125_p3, %p54_p1 }
  0x53   : > { %p116_p12 = scmp.eq.s32.totalorder %s115_s28, 0  ;;  %p8764_p10 = por %p131_p7, %p60_p2 }
  0x54   : > { %s6939_s15 = sshll.u32 %s297_s26, 4  ;;  %s6941_s2 = sshll.u32 %s11082_s8, 1 }
  0x55   : > { %s8769_s18 = scalar_select %p116_p12, %s8458_s20, %s118_s12  }
  0x56   : > { %s308_s11 = sadd.s32 %s6941_s2, %s8654_s4  ;;  %s299_s1 = scalar_lea.vmem [#allocation8], %s6939_s15 }
  0x57   : > { %s6943_s27 = sshll.u32 %s308_s11, 3  ;;  %s313_s21 = sshll.u32 %s299_s1, 4  ;;  %s314_s21 = int_to_ptr.vmem [resolvable:$true] %s313_s21 }
  0x58   : > { %s11029_s3 = sld [smem:[#allocation34_spill]]  ;;  %p11030_p1 = scmp.lt.s32.totalorder %s8502_s6, 4 }
  0x59   : > { %s8786_s4 = sand.u32 (!%p8690_p5), 1, %s8478_s25  }
  0x5a   : > { %p8076_p9 = pnand %p11030_p1, %p8758_p13  ;;  %s6945_s8 = sshll.u32 (!%p8690_p5), %s8786_s4, 7 }
  0x5b   : > { %s328_s12 = scalar_lea.sflag (!%p8690_p5), [#allocation4], %s8786_s4 }
  0x5c   : > { %325 = sbr.rel (%p8690_p5) target bundleno = 850 (0x352), region = 40 }
  0x5e   : > { %s310_s24 = scalar_lea.hbm %s11029_s3, %s6943_s27 }
  0x5f   : > { %s311_s16 = sshll.u32 %s310_s24, 4  ;;  %s8790_s24 = scalar_lea.vmem (!%p8690_p5), [#allocation3], %s6945_s8  ;;  %s312_s16 = int_to_ptr.hbm [resolvable:$true] %s311_s16 }
  0x60   : > { %8078 = dma.hbm_to_vmem [thread:$0]  (!%p8076_p9), %s312_s16, 256, %s314_s21, %s8666_s9, %s11025_s7, %s11025_s7, %s11024_s13  }
  0x61   : > { %8429 = dma.done.wait (%p8718_p11), %s328_s12, 2048  }
  0x62   : > { %8431 = vsyncadd (%p8718_p11), %s328_s12, 4294965248  ;;  %s337_s9 = sand.u32 1, %s8673_s0   ;;  %s339_s14 = sand.u32 1, %s8466_s22  }
  0x63   : > { %s8798_s16 = sshll.u32 %s339_s14, 4  ;;  %s338_s13 = scalar_lea.sflag [#allocation7], %s337_s9 }
  0x64   : > { %s341_s7 = scalar_lea.vmem [#allocation6], %s8798_s16 }
  0x65   : > { %8433 = dma.done.wait (%p8686_p4), %s338_s13, 256  }
  0x66   : > { %8435 = vsyncadd (%p8686_p4), %s338_s13, 4294967040  ;;  %s349_s26 = sand.u32 1, %s8454_s19  }
  0x67   : > { %s8806_s17 = sshll.u32 %s349_s26, 4 }
  0x68   : > { %s351_s28 = scalar_lea.vmem [#allocation8], %s8806_s17 }
  0x69   : > { %8437 = dma.done.wait (%p8764_p10), %s338_s13, 256  }
  0x6a   : > { %8439 = vsyncadd (%p8764_p10), %s338_s13, 4294967040 }
  0x6b   : > { %8441 = dma.done.wait (%p60_p2), [#allocation10], 16384  }
  0x6c   : > { %8443 = vsyncadd (%p60_p2), [#allocation10], 4294950912  ;;  %s11031_s30 = sld [smem:[#allocation21_spill]]  ;;  %v7915_v0 = vld [vmem:[#allocation9 + $0x38] sm:$0xff]  ;;  %v7914_v4 = vld [vmem:[#allocation9 + $0x30] sm:$0xff]  ;;  %vm405_vm0 = vcmask 1040384  }
  0x6d   : > { %v7923_v1 = vld [vmem:[#allocation9 + $0x78] sm:$0xff]  ;;  %1653 = vmatpush.bf16.msra.mxu0 %v7915_v0  ;;  %v7922_v5 = vld [vmem:[#allocation9 + $0x70] sm:$0xff]  ;;  %vm406_vm1 = vsmask.f32 256  ;;  %v7913_v8 = vld [vmem:[#allocation9 + $0x28] sm:$0xff]  ;;  %vm665_vm6 = vcmask 1043456  }
  0x6e   : > { %v7931_v2 = vld [vmem:[#allocation9 + $0xb8] sm:$0xff]  ;;  %1702 = vmatpush.bf16.msra.mxu1 %v7923_v1  ;;  %v7930_v6 = vld [vmem:[#allocation9 + $0xb0] sm:$0xff]  ;;  %v7921_v9 = vld [vmem:[#allocation9 + $0x68] sm:$0xff]  ;;  %vm438_vm2 = vsmask.f32 7938  ;;  %vm2465_vm12 = vcmask 1042432  }
  0x6f   : > { %v7939_v3 = vld [vmem:[#allocation9 + $0xf8] sm:$0xff]  ;;  %1751 = vmatpush.bf16.msra.mxu2 %v7931_v2  ;;  %v7938_v7 = vld [vmem:[#allocation9 + $0xf0] sm:$0xff]  ;;  %v7929_v10 = vld [vmem:[#allocation9 + $0xa8] sm:$0xff]  ;;  %vm502_vm5 = vsmask.f32 4368  ;;  %vm2466_vm13 = vcmask 1046532  }
  0x70   : > { %1800 = vmatpush.bf16.msra.mxu3 %v7939_v3  ;;  %v7937_v11 = vld [vmem:[#allocation9 + $0xe8] sm:$0xff]  ;;  %vm8822_vm3 = vmand %vm405_vm0, %vm406_vm1  ;;  %v7912_v13 = vld [vmem:[#allocation9 + $0x20] sm:$0xff]  ;;  %vm823_vm9 = vsmask.f32 3328  ;;  %vm824_vm10 = vsmask.f32 7440 }
  0x71   : > { %1654 = vmatpush.bf16.msra.mxu0 %v7914_v4  ;;  %v7920_v14 = vld [vmem:[#allocation9 + $0x60] sm:$0xff]  ;;  %vm8828_vm4 = vmand %vm405_vm0, %vm438_vm2  ;;  %v408_v18 = vld [vmem:[#allocation2] sm:$0x1]  ;;  %s11044_s15 = sld [smem:[#allocation36_spill]]  ;;  %s6949_s2 = sshll.u32 %s8786_s4, 9 }
  0x72   : > { %p723_p11 = scmp.gt.s32.totalorder %s11031_s30, 0  ;;  %1703 = vmatpush.bf16.msra.mxu1 %v7922_v5  ;;  %v7928_v16 = vld [vmem:[#allocation9 + $0xa0] sm:$0xff]  ;;  %v409_v19 = vsel %vm8822_vm3, 0, %v408_v18  ;;  %v440_v22 = vld [vmem:[#allocation2 + $0x8] sm:$0x1]  ;;  %v7911_v23 = vld [vmem:[#allocation9 + $0x18] sm:$0xff] }
  0x73   : > { %1752 = vmatpush.bf16.msra.mxu2 %v7930_v6  ;;  %v7936_v17 = vld [vmem:[#allocation9 + $0xe0] sm:$0xff]  ;;  %v7919_v24 = vld [vmem:[#allocation9 + $0x58] sm:$0xff]  ;;  %410 = vst [vmem:[#allocation2] sm:$0x1] %v409_v19  ;;  %v441_v27 = vsel %vm8828_vm4, 0, %v440_v22  ;;  %v471_v31 = vld [vmem:[%s8790_s24 + $0x8] sm:$0xff] }
  0x74   : > { %s8207_s0 = scalar_select %p723_p11, 255, 0  ;;  %1801 = vmatpush.bf16.msra.mxu3 %v7938_v7  ;;  %v411_v28 = vld [vmem:[#allocation2 + $0xc] sm:$0x1]  ;;  %v470_v29 = vld [vmem:[%s8790_s24] sm:$0xff]  ;;  %v7927_v38 = vld [vmem:[#allocation9 + $0x98] sm:$0xff]  ;;  %v487_v40 = vpack.c.bf16 %v471_v31, %v471_v31 }
  0x75   : > { %1655 = vmatpush.bf16.msra.mxu0 %v7913_v8  ;;  %442 = vst [vmem:[#allocation2 + $0x8] sm:$0x1] %v441_v27  ;;  %v412_v30 = vsel %vm8822_vm3, 0, %v411_v28  ;;  %v486_v32 = vpack.c.bf16 %v470_v29, %v470_v29  ;;  %v443_v33 = vld [vmem:[#allocation2 + $0x14] sm:$0x1]  ;;  %vm8848_vm7 = vmor %vm406_vm1, %vm502_vm5  ;;  %v472_v47 = vld [vmem:[%s8790_s24 + $0x10] sm:$0xff] }
  0x76   : > { %1704 = vmatpush.bf16.msra.mxu1 %v7921_v9  ;;  %v8208_v20 = vld [vmem:[%s341_s7] sm:%s8207_s0]  ;;  %v8211_v21 = vld [vmem:[%s341_s7 + $0x8] sm:%s8207_s0]  ;;  %413 = vst [vmem:[#allocation2 + $0xc] sm:$0x1] %v412_v30  ;;  %v444_v43 = vsel %vm8828_vm4, 0, %v443_v33  ;;  %vm8855_vm8 = vmand %vm665_vm6, %vm438_vm2  ;;  %v513_v50 = vshrl.u32 %v487_v40, 16  ;;  %v488_v54 = vpack.c.bf16 %v472_v47, %v472_v47 }
  0x77   : > { %1753 = vmatpush.bf16.msra.mxu2 %v7929_v10  ;;  %v731_v25 = vpack.c.bf16 %v8208_v20, %v8208_v20  ;;  %v732_v26 = vpack.c.bf16 %v8211_v21, %v8211_v21  ;;  %v7935_v39 = vld [vmem:[#allocation9 + $0xd8] sm:$0xff]  ;;  %v505_v41 = vshrl.u32 %v486_v32, 16  ;;  %v508_v42 = vshll.u32 %v486_v32, 16  ;;  %445 = vst [vmem:[#allocation2 + $0x14] sm:$0x1] %v444_v43  ;;  %v7910_v55 = vld [vmem:[#allocation9 + $0x10] sm:$0xff]  ;;  %vm8912_vm11 = vmor %vm823_vm9, %vm824_vm10 }
  0x78   : > { %1802 = vmatpush.bf16.msra.mxu3 %v7937_v11  ;;  %v516_v51 = vshll.u32 %v487_v40, 16  ;;  %v414_v52 = vld [vmem:[#allocation2 + $0x18] sm:$0x1]  ;;  %v473_v53 = vld [vmem:[%s8790_s24 + $0x18] sm:$0xff]  ;;  %v7918_v56 = vld [vmem:[#allocation9 + $0x50] sm:$0xff]  ;;  %v515_v2 = vrot.slane %v513_v50, 7 }
  0x79   : > { %1656 = vmatpush.bf16.msra.mxu0 %v7912_v13  ;;  %v734_v34 = vshrl.u32 %v731_v25, 16  ;;  %v737_v35 = vshll.u32 %v731_v25, 16  ;;  %v742_v36 = vshrl.u32 %v732_v26, 16  ;;  %v745_v37 = vshll.u32 %v732_v26, 16  ;;  %v7926_v57 = vld [vmem:[#allocation9 + $0x90] sm:$0xff]  ;;  %v7909_v5 = vld [vmem:[#allocation9 + $0x8] sm:$0xff]  ;;  %vm9183_vm14 = vmor %vm2465_vm12, %vm2466_vm13 }
  0x7a   : > { %1705 = vmatpush.bf16.msra.mxu1 %v7920_v14  ;;  %v507_v49 = vrot.slane %v505_v41, 7  ;;  %v7934_v62 = vld [vmem:[#allocation9 + $0xd0] sm:$0xff]  ;;  %v753_v63 = vld [vmem:[#allocation2] sm:$0xf]  ;;  %v415_v3 = vsel %vm8822_vm3, 0, %v414_v52  ;;  %v489_v10 = vpack.c.bf16 %v473_v53, %v473_v53  ;;  %v522_v11 = vshrl.u32 %v488_v54, 16 }
  0x7b   : > { %1754 = vmatpush.bf16.msra.mxu2 %v7928_v16  ;;  %v736_v45 = vrot.slane %v734_v34, 7  ;;  %v744_v46 = vrot.slane %v742_v36, 7  ;;  %v446_v4 = vld [vmem:[#allocation2 + $0x20] sm:$0x1]  ;;  %416 = vst [vmem:[#allocation2 + $0x18] sm:$0x1] %v415_v3 }
  0x7c   : > { %1803 = vmatpush.bf16.msra.mxu3 %v7936_v17  ;;  %v510_v0 = vor.u32 %v508_v42, %v507_v49  ;;  %v511_v1 = vrot.slane %v507_v49, 4  ;;  %v7917_v6 = vld [vmem:[#allocation9 + $0x48] sm:$0xff]  ;;  %v757_v9 = vld [vmem:[#allocation2 + $0x8] sm:$0x1]  ;;  %v474_v14 = vld [vmem:[%s8790_s24 + $0x20] sm:$0xff]  ;;  %v518_v17 = vor.u32 %v516_v51, %v515_v2  ;;  %v520_v18 = vrot.slane %v515_v2, 4 }
  0x7d   : > { %1657 = vmatpush.bf16.msra.mxu0 %v7911_v23  ;;  %v739_v58 = vor.u32 %v737_v35, %v736_v45  ;;  %v740_v59 = vrot.slane %v736_v45, 4  ;;  %v747_v60 = vor.u32 %v745_v37, %v744_v46  ;;  %v749_v61 = vrot.slane %v744_v46, 4  ;;  %v417_v13 = vld [vmem:[#allocation2 + $0x24] sm:$0x1]  ;;  %v667_v19 = vld [vmem:[#allocation2 + $0xc] sm:$0xf] }
  0x7e   : > { %1706 = vmatpush.bf16.msra.mxu1 %v7919_v24  ;;  %v525_v20 = vshll.u32 %v488_v54, 16  ;;  %v7925_v21 = vld [vmem:[#allocation9 + $0x88] sm:$0xff]  ;;  %v668_v22 = vsel %vm8855_vm8, %v510_v0, %v667_v19  ;;  %v8871_v23 = vrot.slane %v522_v11, 7  ;;  %v530_v24 = vshrl.u32 %v489_v10, 16  ;;  %v671_v28 = vld [vmem:[#allocation2 + $0x14] sm:$0x1] }
  0x7f   : > { %1755 = vmatpush.bf16.msra.mxu2 %v7927_v38  ;;  %v748_v7 = vsel %vm8848_vm7, %v740_v59, %v747_v60  ;;  %v754_v8 = vsel %vm8855_vm8, %v739_v58, %v753_v63  ;;  %v758_v16 = vsel %vm8822_vm3, %v749_v61, %v757_v9  ;;  %v475_v25 = vld [vmem:[%s8790_s24 + $0x28] sm:$0xff]  ;;  %v519_v27 = vsel %vm8848_vm7, %v511_v1, %v518_v17  ;;  %v7908_v31 = vld [vmem:[#allocation9] sm:$0xff]  ;;  %v8885_v37 = vld [vmem:[#allocation2 + $0x2c] sm:$0x1]  ;;  %s9308_s11 = scalar_lea.vmem [#allocation11], %s6949_s2  ;;  %p760_p12 = scmp.lt.s32.totalorder %s11031_s30, 1 }
  0x80   : > { %1804 = vmatpush.bf16.msra.mxu3 %v7935_v39  ;;  %755 = vst [vmem:[#allocation2] sm:$0xf] %v754_v8  ;;  %v7933_v26 = vld [vmem:[#allocation9 + $0xc8] sm:$0xff]  ;;  %v533_v29 = vshll.u32 %v489_v10, 16  ;;  %v8876_v30 = vpack.c.bf16 %v474_v14, %v474_v14  ;;  %v7916_v32 = vld [vmem:[#allocation9 + $0x40] sm:$0xff]  ;;  %v672_v33 = vsel %vm8822_vm3, %v520_v18, %v671_v28  ;;  %v527_v34 = vor.u32 %v525_v20, %v8871_v23  ;;  %v7963_v43 = vld [vmem:[#allocation9 + $0x1b8] sm:$0xff] }
  0x81   : > { %1658 = vmatpush.bf16.msra.mxu0 %v7910_v55  ;;  %756 = vst [vmem:[#allocation2 + $0x4] sm:$0xf] %v748_v7  ;;  %v8881_v35 = vrot.slane %v530_v24, 7  ;;  %v447_v36 = vsel %vm8828_vm4, 0, %v446_v4  ;;  %v7924_v38 = vld [vmem:[#allocation9 + $0x80] sm:$0xff]  ;;  %v418_v40 = vsel %vm8822_vm3, 0, %v417_v13  ;;  %v8889_v41 = vpack.c.bf16 %v475_v25, %v475_v25 }
  0x82   : > { %1707 = vmatpush.bf16.msra.mxu1 %v7918_v56  ;;  %759 = vst [vmem:[#allocation2 + $0x8] sm:$0x1] %v758_v16  ;;  %v7932_v39 = vld [vmem:[#allocation9 + $0xc0] sm:$0xff]  ;;  %v539_v42 = vshrl.u32 %v8876_v30, 16  ;;  %v7947_v45 = vld [vmem:[#allocation9 + $0x138] sm:$0xff]  ;;  %v528_v46 = vrot.slane %v8871_v23, 4 }
  0x83   : > { %1756 = vmatpush.bf16.msra.mxu2 %v7926_v57  ;;  %669 = vst [vmem:[#allocation2 + $0xc] sm:$0xf] %v668_v22  ;;  %v542_v47 = vshll.u32 %v8876_v30, 16  ;;  %v7971_v49 = vld [vmem:[#allocation9 + $0x1f8] sm:$0xff]  ;;  %v535_v50 = vor.u32 %v533_v29, %v8881_v35  ;;  %v537_v51 = vrot.slane %v8881_v35, 4  ;;  %v450_v53 = vsel %vm8828_vm4, 0, %v8885_v37 }
  0x84   : > { %1805 = vmatpush.bf16.msra.mxu3 %v7934_v62  ;;  %670 = vst [vmem:[#allocation2 + $0x10] sm:$0xf] %v519_v27  ;;  %v674_v52 = vld [vmem:[#allocation2 + $0x18] sm:$0xf]  ;;  %v7955_v55 = vld [vmem:[#allocation9 + $0x178] sm:$0xff]  ;;  %v8901_v57 = vrot.slane %v539_v42, 7 }
  0x85   : > { %1659 = vmatpush.bf16.msra.mxu0 %v7909_v5  ;;  %673 = vst [vmem:[#allocation2 + $0x14] sm:$0x1] %v672_v33  ;;  %v675_v56 = vsel %vm8855_vm8, %v527_v34, %v674_v52  ;;  %v547_v58 = vshrl.u32 %v8889_v41, 16  ;;  %v550_v63 = vshll.u32 %v8889_v41, 16  ;;  %v536_v7 = vsel %vm8848_vm7, %v528_v46, %v535_v50  ;;  %v7962_v8 = vld [vmem:[#allocation9 + $0x1b0] sm:$0xff]  ;;  %s11045_s16 = sld [smem:[#allocation22_spill]] }
  0x86   : > { %1708 = vmatpush.bf16.msra.mxu1 %v7917_v6  ;;  %448 = vst [vmem:[#allocation2 + $0x20] sm:$0x1] %v447_v36  ;;  %v8908_v16 = vor.u32 %v542_v47, %v8901_v57  ;;  %v7946_v28 = vld [vmem:[#allocation9 + $0x130] sm:$0xff]  ;;  %s10133_s10 = scalar_select %p760_p12, 255, 0 }
  0x87   : > { %1757 = vmatpush.bf16.msra.mxu2 %v7925_v21  ;;  %v799_v54 = vld [vmem:[#allocation2] sm:$0xf]  ;;  %419 = vst [vmem:[#allocation2 + $0x24] sm:$0x1] %v418_v40  ;;  %s8052_s13 = sshll.u32 %s11031_s30, 8  ;;  %s11046_s0 = sld [smem:[#allocation37_spill]] }
  0x88   : > { %1806 = vmatpush.bf16.msra.mxu3 %v7933_v26  ;;  %v7892_v59 = vld [vmem:[#allocation2] sm:$0xff]  ;;  %v827_v61 = vshrl.u32 %v799_v54, 16  ;;  %v830_v62 = vshll.u32 %v799_v54, 16  ;;  %676 = vst [vmem:[#allocation2 + $0x18] sm:$0xf] %v675_v56  ;;  %v7970_v56 = vld [vmem:[#allocation9 + $0x1f0] sm:$0xff] }
  0x89   : > { %v800_v60 = vld [vmem:[#allocation2 + $0x4] sm:$0xf]  ;;  %1660 = vmatpush.bf16.msra.mxu0 %v7908_v31  ;;  %v815_v0 = vld [vmem:[#allocation2 + $0x8] sm:$0x1]  ;;  %677 = vst [vmem:[#allocation2 + $0x1c] sm:$0xf] %v536_v7 }
  0x8a   : > { %1709 = vmatpush.bf16.msra.mxu1 %v7916_v32  ;;  %v836_v1 = vshll.u32 %v800_v60, 16  ;;  %v840_v2 = vshrl.u32 %v800_v60, 16  ;;  %v829_v3 = vrot.slane %v827_v61, 4  ;;  %v832_v4 = vrot.slane %v830_v62, 5  ;;  %v1018_v6 = vld [vmem:[#allocation2 + $0xc] sm:$0xf] }
  0x8b   : > { %1758 = vmatpush.bf16.msra.mxu2 %v7924_v38  ;;  %v846_v5 = vshll.u32 %v815_v0, 16  ;;  %v7900_v11 = vld [vmem:[#allocation2 + $0xc] sm:$0xff]  ;;  %v1043_v14 = vshrl.u32 %v1018_v6, 16  ;;  %v1046_v20 = vshll.u32 %v1018_v6, 16  ;;  %451 = vst [vmem:[#allocation2 + $0x2c] sm:$0x1] %v450_v53 }
  0x8c   : > { %1807 = vmatpush.bf16.msra.mxu3 %v7932_v39  ;;  %v838_v9 = vrot.slane %v836_v1, 5  ;;  %v842_v10 = vrot.slane %v840_v2, 4  ;;  %v1019_v13 = vld [vmem:[#allocation2 + $0x10] sm:$0xf]  ;;  %1661 = vmatmul.bf16.vlgmr.msra.gmra.mxu0 %v7892_v59  ;;  %v833_v17 = vor.u32 %v832_v4, %v829_v3  ;;  %v1034_v19 = vld [vmem:[#allocation2 + $0x14] sm:$0x1] }
  0x8d   : > { %3213 = vmatpush.bf16.msrb.mxu0 %v7947_v45  ;;  %v848_v18 = vrot.slane %v846_v5, 5  ;;  %v1052_v21 = vshll.u32 %v1019_v13, 16  ;;  %v1045_v24 = vrot.slane %v1043_v14, 4  ;;  %v1056_v25 = vshrl.u32 %v1019_v13, 16  ;;  %v801_v27 = vld [vmem:[#allocation2 + $0xc] sm:$0xf] }
  0x8e   : > { %v843_v23 = vor.u32 %v842_v10, %v838_v9  ;;  %1759 = vmatmul.bf16.vlgmr.msra.gmra.mxu2 %v7900_v11  ;;  %v1062_v26 = vshll.u32 %v1034_v19, 16  ;;  %3262 = vmatpush.bf16.msrb.mxu1 %v7955_v55  ;;  %v834_v29 = vrot.slane %v833_v17, 4  ;;  %v1048_v30 = vrot.slane %v1046_v20, 5  ;;  %v802_v32 = vld [vmem:[#allocation2 + $0x10] sm:$0xf]  ;;  %v7954_v59 = vld [vmem:[#allocation9 + $0x170] sm:$0xff] }
  0x8f   : > { %3311 = vmatpush.bf16.msrb.mxu2 %v7963_v43  ;;  %v1054_v31 = vrot.slane %v1052_v21, 5  ;;  %v851_v33 = vshrl.u32 %v801_v27, 16  ;;  %v1058_v36 = vrot.slane %v1056_v25, 4  ;;  %v816_v39 = vld [vmem:[#allocation2 + $0x14] sm:$0x1]  ;;  %v854_v40 = vshll.u32 %v801_v27, 16 }
  0x90   : > { %3360 = vmatpush.bf16.msrb.mxu3 %v7971_v49  ;;  %v844_v34 = vrot.slane %v843_v23, 4  ;;  %v1064_v38 = vrot.slane %v1062_v26, 5  ;;  %v839_v42 = vsel %vm8912_vm11, %v834_v29, %v838_v9  ;;  %v1049_v43 = vor.u32 %v1048_v30, %v1045_v24  ;;  %v678_v47 = vld [vmem:[#allocation2 + $0x20] sm:$0x1]  ;;  %v1020_v55 = vld [vmem:[#allocation2 + $0x18] sm:$0xf] }
  0x91   : > { %3214 = vmatpush.bf16.msrb.mxu0 %v7946_v28  ;;  %v853_v45 = vrot.slane %v851_v33, 4  ;;  %v860_v46 = vshll.u32 %v802_v32, 16  ;;  %v1282_v50 = vunpack.c.l.b16 %v839_v42  ;;  %v1059_v52 = vor.u32 %v1058_v36, %v1054_v31  ;;  %v803_v5 = vld [vmem:[#allocation2 + $0x18] sm:$0xf]  ;;  %v681_v10 = vld [vmem:[#allocation2 + $0x24] sm:$0xf] }
  0x92   : > { %v849_v49 = vsel %vm8912_vm11, %v844_v34, %v848_v18  ;;  %v856_v54 = vrot.slane %v854_v40, 5  ;;  %v1050_v61 = vrot.slane %v1049_v43, 4  ;;  %v864_v0 = vshrl.u32 %v802_v32, 16  ;;  %3263 = vmatpush.bf16.msrb.mxu1 %v7954_v59  ;;  %v7893_v53 = vld [vmem:[#allocation2 + $0xc] sm:$0xff]  ;;  %v1021_v19 = vld [vmem:[#allocation2 + $0x1c] sm:$0xf] }
  0x93   : > { %3312 = vmatpush.bf16.msrb.mxu2 %v7962_v8  ;;  %v1283_v60 = vunpack.c.l.b16 %v849_v49  ;;  %v862_v62 = vrot.slane %v860_v46, 5  ;;  %v1060_v1 = vrot.slane %v1059_v52, 4  ;;  %v870_v3 = vshll.u32 %v816_v39, 16  ;;  %v804_v29 = vld [vmem:[#allocation2 + $0x1c] sm:$0xf]  ;;  %v7961_v40 = vld [vmem:[#allocation9 + $0x1a8] sm:$0xff] }
  0x94   : > { %v857_v2 = vor.u32 %v856_v54, %v853_v45  ;;  %v679_v4 = vsel %vm8822_vm3, %v537_v51, %v678_v47  ;;  %3361 = vmatpush.bf16.msrb.mxu3 %v7970_v56  ;;  %v1055_v7 = vsel %vm8912_vm11, %v1050_v61, %v1054_v31  ;;  %v866_v8 = vrot.slane %v864_v0, 4  ;;  %v7901_v30 = vld [vmem:[#allocation2 + $0x18] sm:$0xff]  ;;  %v7945_v42 = vld [vmem:[#allocation9 + $0x128] sm:$0xff]  ;;  %s7881_s7 = sshll.u32 %s11045_s16, 9  ;;  %s6765_s29 = sshll.u32 %s9308_s11, 4  ;;  %s6766_s29 = int_to_ptr.vmem [resolvable:$true] %s6765_s29 }
  0x95   : > { %v1298_v6 = vpack.c.b16 %v1283_v60, %v1282_v50  ;;  %680 = vst [vmem:[#allocation2 + $0x20] sm:$0x1] %v679_v4  ;;  %v1067_v9 = vshrl.u32 %v1020_v55, 16  ;;  %v1065_v35 = vsel %vm8912_vm11, %v1060_v1, %v1064_v38  ;;  %v1362_v51 = vunpack.c.l.b16 %v1055_v7  ;;  %v7969_v59 = vld [vmem:[#allocation9 + $0x1e8] sm:$0xff]  ;;  %3215 = vmatpush.bf16.msrb.mxu0 %v7945_v42  ;;  %s6762_s26 = sadd.s32 %s8052_s13, %s7881_s7  ;;  %s6750_s1 = scalar_lea.sflag [#allocation5], %s8786_s4 }
  0x96   : > { %v858_v11 = vrot.slane %v857_v2, 4  ;;  %v872_v13 = vrot.slane %v870_v3, 5  ;;  %v1363_v14 = vunpack.c.l.b16 %v1065_v35  ;;  %v867_v17 = vor.u32 %v866_v8, %v862_v62  ;;  %v7953_v60 = vld [vmem:[#allocation9 + $0x168] sm:$0xff]  ;;  %s7882_s17 = sshll.u32 %s6762_s26, 1  ;;  %s8364_s8 = scalar_lea.hbm %s11046_s0, 2048 }
  0x97   : > { %1710 = vmatmul.bf16.vlgmr.msra.gmra.mxu1 %v1298_v6  ;;  %v1069_v18 = vrot.slane %v1067_v9, 4  ;;  %v1070_v37 = vshll.u32 %v1020_v55, 16  ;;  %v875_v20 = vshrl.u32 %v803_v5, 16  ;;  %v878_v21 = vshll.u32 %v803_v5, 16  ;;  %3313 = vmatpush.bf16.msrb.mxu2 %v7961_v40  ;;  %v685_v6 = vld [vmem:[#allocation2 + $0x2c] sm:$0x1]  ;;  %s6764_s23 = scalar_lea.hbm %s11046_s0, %s7882_s17 }
  0x98   : > { %v545_v23 = vrot.slane %v8901_v57, 4  ;;  %v682_v24 = vsel %vm8855_vm8, %v8908_v16, %v681_v10  ;;  %v1378_v25 = vpack.c.b16 %v1363_v14, %v1362_v51  ;;  %v863_v26 = vsel %vm8912_vm11, %v858_v11, %v862_v62  ;;  %3362 = vmatpush.bf16.msrb.mxu3 %v7969_v59  ;;  %3264 = vmatpush.bf16.msrb.mxu1 %v7953_v60  ;;  %v423_v57 = vld [vmem:[#allocation2 + $0x3c] sm:$0x1]  ;;  %s6767_s27 = sshll.u32 %s6764_s23, 4  ;;  %s6768_s27 = int_to_ptr.hbm [resolvable:$true] %s6767_s27 }
  0x99   : > { %v868_v27 = vrot.slane %v867_v17, 4  ;;  %v1072_v28 = vrot.slane %v1070_v37, 5  ;;  %683 = vst [vmem:[#allocation2 + $0x24] sm:$0xf] %v682_v24  ;;  %v1076_v31 = vshll.u32 %v1021_v19, 16  ;;  %v1080_v32 = vshrl.u32 %v1021_v19, 16 }
  0x9a   : > { %v877_v33 = vrot.slane %v875_v20, 4  ;;  %v880_v34 = vrot.slane %v878_v21, 5  ;;  %1808 = vmatmul.bf16.vlgmr.msra.gmra.mxu3 %v1378_v25  ;;  %v884_v39 = vshll.u32 %v804_v29, 16  ;;  %v888_v16 = vshrl.u32 %v804_v29, 16  ;;  %v420_v37 = vld [vmem:[#allocation2 + $0x30] sm:$0x1] }
  0x9b   : > { %v873_v36 = vsel %vm8912_vm11, %v868_v27, %v872_v13  ;;  %v1073_v38 = vor.u32 %v1072_v28, %v1069_v18  ;;  %v8940_v43 = vunpack.c.l.b16 %v863_v26  ;;  %v1078_v46 = vrot.slane %v1076_v31, 5  ;;  %v452_v24 = vld [vmem:[#allocation2 + $0x38] sm:$0x1]  ;;  %s8358_s21 = sshra.s32 %s6768_s27, 4  ;;  %s8359_s21 = int_to_ptr.hbm [resolvable:$true] %s8358_s21 }
  0x9c   : > { %v1035_v45 = vld [vmem:[#allocation2 + $0x20] sm:$0x1]  ;;  %v1082_v47 = vrot.slane %v1080_v32, 4  ;;  %v881_v50 = vor.u32 %v880_v34, %v877_v33  ;;  %1666 = vmatmul.bf16.gmra.mxu0 %v7893_v53  ;;  %v8942_v55 = vrot.slane %v884_v39, 5  ;;  %v890_v56 = vrot.slane %v888_v16, 4  ;;  %v476_v53 = vld [vmem:[%s8790_s24 + $0x30] sm:$0xff]  ;;  %p8365_p0 = scmp.lt.s32.totalorder %s8359_s21, %s11046_s0 }
  0x9d   : > { %v817_v49 = vld [vmem:[#allocation2 + $0x20] sm:$0x1]  ;;  %v1074_v52 = vrot.slane %v1073_v38, 4  ;;  %v1086_v54 = vshll.u32 %v1035_v45, 16  ;;  %v1285_v61 = vunpack.c.l.b16 %v873_v36  ;;  %v549_v5 = vrot.slane %v547_v58, 7  ;;  %v478_v32 = vld [vmem:[%s8790_s24 + $0x40] sm:$0xff] }
  0x9e   : > { %1764 = vmatmul.bf16.gmra.mxu2 %v7901_v30  ;;  %v1083_v62 = vor.u32 %v1082_v47, %v1078_v46  ;;  %v882_v0 = vrot.slane %v881_v50, 4  ;;  %v894_v1 = vshll.u32 %v817_v49, 16  ;;  %v891_v4 = vor.u32 %v890_v56, %v8942_v55  ;;  %v455_v39 = vld [vmem:[#allocation2 + $0x44] sm:$0x1]  ;;  %v7894_v49 = vld [vmem:[#allocation2 + $0x18] sm:$0xff]  ;;  %s8360_s5 = scalar_lea.hbm %s8359_s21, 512 }
  0x9f   : > { %v1079_v2 = vsel %vm8912_vm11, %v1074_v52, %v1078_v46  ;;  %v1088_v3 = vrot.slane %v1086_v54, 5  ;;  %v552_v11 = vor.u32 %v550_v63, %v549_v5  ;;  %v554_v13 = vrot.slane %v549_v5, 4  ;;  %v477_v63 = vld [vmem:[%s8790_s24 + $0x38] sm:$0xff]  ;;  %v479_v52 = vld [vmem:[%s8790_s24 + $0x48] sm:$0xff]  ;;  %p8361_p2 = scmp.ne.s32.totalorder %s8359_s21, %s8360_s5  ;;  %p8366_p3 = scmp.lt.s32.totalorder %s8364_s8, %s8360_s5 }
  0xa0   : > { %v1084_v7 = vrot.slane %v1083_v62, 4  ;;  %v896_v8 = vrot.slane %v894_v1, 5  ;;  %v1022_v9 = vld [vmem:[#allocation2 + $0x24] sm:$0xf]  ;;  %v1364_v35 = vunpack.c.l.b16 %v1079_v2  ;;  %v892_v51 = vrot.slane %v891_v4, 4 }
  0xa1   : > { %v805_v10 = vld [vmem:[#allocation2 + $0x24] sm:$0xf]  ;;  %v1091_v17 = vshrl.u32 %v1022_v9, 16  ;;  %v1094_v58 = vshll.u32 %v1022_v9, 16  ;;  %v1299_v19 = vpack.c.b16 %v1285_v61, %v8940_v43  ;;  %v553_v21 = vsel %vm8848_vm7, %v545_v23, %v552_v11  ;;  %p8362_p4 = pnand %p8361_p2, %p8723_p8  ;;  %p8367_p7 = por %p8366_p3, %p8365_p0 }
  0xa2   : > { %v1089_v14 = vsel %vm8912_vm11, %v1084_v7, %v1088_v3  ;;  %v899_v18 = vshrl.u32 %v805_v10, 16  ;;  %v686_v41 = vsel %vm8822_vm3, %v554_v13, %v685_v6  ;;  %v887_v25 = vsel %vm8912_vm11, %v882_v0, %v8942_v55  ;;  %684 = vst [vmem:[#allocation2 + $0x28] sm:$0xf] %v553_v21 }
  0xa3   : > { %v1365_v20 = vunpack.c.l.b16 %v1089_v14  ;;  %v897_v26 = vsel %vm8912_vm11, %v892_v51, %v896_v8  ;;  %v1093_v27 = vrot.slane %v1091_v17, 4  ;;  %v1096_v28 = vrot.slane %v1094_v58, 5  ;;  %687 = vst [vmem:[#allocation2 + $0x2c] sm:$0x1] %v686_v41  ;;  %v7944_v41 = vld [vmem:[#allocation9 + $0x120] sm:$0xff]  ;;  %p8363_p5 = pneg %p8362_p4 }
  0xa4   : > { %v8967_v29 = vrot.slane %v899_v18, 4  ;;  %v902_v23 = vshll.u32 %v805_v10, 16  ;;  %v421_v30 = vsel %vm8822_vm3, 0, %v420_v37  ;;  %v492_v31 = vpack.c.bf16 %v476_v53, %v476_v53  ;;  %v7960_v53 = vld [vmem:[#allocation9 + $0x1a0] sm:$0xff]  ;;  %3216 = vmatpush.bf16.msrb.mxu0 %v7944_v41 }
  0xa5   : > { %v1379_v33 = vpack.c.b16 %v1365_v20, %v1364_v35  ;;  %v1097_v34 = vor.u32 %v1096_v28, %v1093_v27  ;;  %422 = vst [vmem:[#allocation2 + $0x30] sm:$0x1] %v421_v30  ;;  %v493_v36 = vpack.c.bf16 %v477_v63, %v477_v63  ;;  %v453_v38 = vsel %vm8828_vm4, 0, %v452_v24  ;;  %3314 = vmatpush.bf16.msrb.mxu2 %v7960_v53  ;;  %v7968_v28 = vld [vmem:[#allocation9 + $0x1e0] sm:$0xff]  ;;  %p8368_p13 = pnand %p8367_p7, %p8363_p5 }
  0xa6   : > { %v904_v16 = vrot.slane %v902_v23, 5  ;;  %v556_v40 = vshrl.u32 %v492_v31, 16  ;;  %v559_v42 = vshll.u32 %v492_v31, 16  ;;  %454 = vst [vmem:[#allocation2 + $0x38] sm:$0x1] %v453_v38  ;;  %v424_v43 = vsel %vm8822_vm3, 0, %v423_v57  ;;  %3363 = vmatpush.bf16.msrb.mxu3 %v7968_v28 }
  0xa7   : > { %1715 = vmatmul.bf16.gmra.mxu1 %v1299_v19  ;;  %v564_v45 = vshrl.u32 %v493_v36, 16  ;;  %v567_v46 = vshll.u32 %v493_v36, 16  ;;  %425 = vst [vmem:[#allocation2 + $0x3c] sm:$0x1] %v424_v43  ;;  %v8976_v47 = vpack.c.bf16 %v478_v32, %v478_v32  ;;  %v456_v54 = vsel %vm8828_vm4, 0, %v455_v39  ;;  %v7952_v31 = vld [vmem:[#allocation9 + $0x160] sm:$0xff] }
  0xa8   : > { %v558_v50 = vrot.slane %v556_v40, 7  ;;  %v8981_v55 = vunpack.c.l.b16 %v887_v25  ;;  %v8983_v56 = vunpack.c.l.b16 %v897_v26  ;;  %v1098_v59 = vrot.slane %v1097_v34, 4  ;;  %457 = vst [vmem:[#allocation2 + $0x44] sm:$0x1] %v456_v54  ;;  %v480_v36 = vld [vmem:[%s8790_s24 + $0x50] sm:$0xff]  ;;  %3265 = vmatpush.bf16.msrb.mxu1 %v7952_v31 }
  0xa9   : > { %v566_v60 = vrot.slane %v564_v45, 7  ;;  %v7902_v61 = vld [vmem:[#allocation2 + $0x24] sm:$0xff]  ;;  %v905_v0 = vor.u32 %v904_v16, %v8967_v29  ;;  %v573_v3 = vshrl.u32 %v8976_v47, 16  ;;  %v495_v9 = vpack.c.bf16 %v479_v52, %v479_v52 }
  0xaa   : > { %1813 = vmatmul.bf16.gmra.mxu3 %v1379_v33  ;;  %v1023_v62 = vld [vmem:[#allocation2 + $0x28] sm:$0xf]  ;;  %v561_v1 = vor.u32 %v559_v42, %v558_v50  ;;  %v562_v2 = vrot.slane %v558_v50, 4  ;;  %v1036_v4 = vld [vmem:[#allocation2 + $0x2c] sm:$0x1]  ;;  %v576_v63 = vshll.u32 %v8976_v47, 16  ;;  %v1300_v38 = vpack.c.b16 %v8983_v56, %v8981_v55 }
  0xab   : > { %v1100_v5 = vshll.u32 %v1023_v62, 16  ;;  %v1104_v6 = vshrl.u32 %v1023_v62, 16  ;;  %v806_v7 = vld [vmem:[#allocation2 + $0x28] sm:$0xf]  ;;  %v569_v8 = vor.u32 %v567_v46, %v566_v60  ;;  %v1110_v10 = vshll.u32 %v1036_v4, 16  ;;  %v481_v55 = vld [vmem:[%s8790_s24 + $0x58] sm:$0xff] }
  0xac   : > { %1671 = vmatmul.bf16.gmra.mxu0 %v7894_v49  ;;  %v818_v35 = vld [vmem:[#allocation2 + $0x2c] sm:$0x1]  ;;  %v908_v51 = vshll.u32 %v806_v7, 16  ;;  %v912_v11 = vshrl.u32 %v806_v7, 16  ;;  %v571_v13 = vrot.slane %v566_v60, 4  ;;  %v8996_v57 = vrot.slane %v905_v0, 4 }
  0xad   : > { %v1102_v14 = vrot.slane %v1100_v5, 5  ;;  %v1106_v17 = vrot.slane %v1104_v6, 4  ;;  %v918_v58 = vshll.u32 %v818_v35, 16  ;;  %v570_v18 = vsel %vm8848_vm7, %v562_v2, %v569_v8  ;;  %v688_v37 = vld [vmem:[#allocation2 + $0x30] sm:$0xf] }
  0xae   : > { %1769 = vmatmul.bf16.gmra.mxu2 %v7902_v61  ;;  %v8989_v19 = vrot.slane %v908_v51, 5  ;;  %v914_v20 = vrot.slane %v912_v11, 4  ;;  %v689_v21 = vsel %vm8855_vm8, %v561_v1, %v688_v37  ;;  %691 = vst [vmem:[#allocation2 + $0x34] sm:$0xf] %v570_v18  ;;  %v1112_v26 = vrot.slane %v1110_v10, 5 }
  0xaf   : > { %v1103_v24 = vsel %vm8912_vm11, %v1098_v59, %v1102_v14  ;;  %v1107_v25 = vor.u32 %v1106_v17, %v1102_v14  ;;  %690 = vst [vmem:[#allocation2 + $0x30] sm:$0xf] %v689_v21  ;;  %v692_v27 = vld [vmem:[#allocation2 + $0x38] sm:$0x1]  ;;  %v8999_v23 = vrot.slane %v918_v58, 5  ;;  %v575_v33 = vrot.slane %v573_v3, 7 }
  0xb0   : > { %v915_v29 = vor.u32 %v914_v20, %v8989_v19  ;;  %v693_v30 = vsel %vm8822_vm3, %v571_v13, %v692_v27  ;;  %v581_v34 = vshrl.u32 %v495_v9, 16  ;;  %v1366_v39 = vunpack.c.l.b16 %v1103_v24  ;;  %v9008_v42 = vld [vmem:[#allocation2 + $0x48] sm:$0x1]  ;;  %v695_v47 = vld [vmem:[#allocation2 + $0x3c] sm:$0xf] }
  0xb1   : > { %v1108_v32 = vrot.slane %v1107_v25, 4  ;;  %694 = vst [vmem:[#allocation2 + $0x38] sm:$0x1] %v693_v30  ;;  %v584_v40 = vshll.u32 %v495_v9, 16  ;;  %v578_v45 = vor.u32 %v576_v63, %v575_v33  ;;  %v911_v50 = vsel %vm8912_vm11, %v8996_v57, %v8989_v19  ;;  %v699_v54 = vld [vmem:[#allocation2 + $0x44] sm:$0x1] }
  0xb2   : > { %v9006_v16 = vrot.slane %v915_v29, 4  ;;  %v583_v46 = vrot.slane %v581_v34, 7  ;;  %v579_v52 = vrot.slane %v575_v33, 4  ;;  %v9017_v56 = vpack.c.bf16 %v480_v36, %v480_v36  ;;  %v7895_v3 = vld [vmem:[#allocation2 + $0x24] sm:$0xff]  ;;  %v7967_v33 = vld [vmem:[#allocation9 + $0x1d8] sm:$0xff] }
  0xb3   : > { %v1113_v43 = vsel %vm8912_vm11, %v1108_v32, %v1112_v26  ;;  %v427_v1 = vsel %vm8822_vm3, 0, %v9008_v42  ;;  %v696_v7 = vsel %vm8855_vm8, %v578_v45, %v695_v47  ;;  %v9028_v11 = vpack.c.bf16 %v481_v55, %v481_v55  ;;  %v7959_v26 = vld [vmem:[#allocation9 + $0x198] sm:$0xff]  ;;  %3364 = vmatpush.bf16.msrb.mxu3 %v7967_v33 }
  0xb4   : > { %v1367_v49 = vunpack.c.l.b16 %v1113_v43  ;;  %v921_v59 = vsel %vm8912_vm11, %v9006_v16, %v8999_v23  ;;  %v586_v62 = vor.u32 %v584_v40, %v583_v46  ;;  %v588_v0 = vrot.slane %v583_v46, 4  ;;  %697 = vst [vmem:[#allocation2 + $0x3c] sm:$0xf] %v696_v7  ;;  %v7943_v23 = vld [vmem:[#allocation9 + $0x118] sm:$0xff]  ;;  %3315 = vmatpush.bf16.msrb.mxu2 %v7959_v26 }
  0xb5   : > { %v1025_v60 = vld [vmem:[#allocation2 + $0x34] sm:$0xf]  ;;  %v590_v36 = vshrl.u32 %v9017_v56, 16  ;;  %3217 = vmatpush.bf16.msrb.mxu0 %v7943_v23  ;;  %428 = vst [vmem:[#allocation2 + $0x48] sm:$0x1] %v427_v1  ;;  %v598_v40 = vshrl.u32 %v9028_v11, 16 }
  0xb6   : > { %v808_v61 = vld [vmem:[#allocation2 + $0x34] sm:$0xf]  ;;  %v1380_v2 = vpack.c.b16 %v1367_v49, %v1366_v39  ;;  %v1024_v4 = vld [vmem:[#allocation2 + $0x30] sm:$0xf]  ;;  %v1124_v5 = vshll.u32 %v1025_v60, 16  ;;  %v1128_v6 = vshrl.u32 %v1025_v60, 16  ;;  %v587_v18 = vsel %vm8848_vm7, %v579_v52, %v586_v62 }
  0xb7   : > { %1720 = vmatmul.bf16.gmra.mxu1 %v1300_v38  ;;  %v7903_v8 = vld [vmem:[#allocation2 + $0x30] sm:$0xff]  ;;  %v1115_v9 = vshrl.u32 %v1024_v4, 16  ;;  %v1118_v10 = vshll.u32 %v1024_v4, 16  ;;  %v932_v51 = vshll.u32 %v808_v61, 16  ;;  %v700_v37 = vsel %vm8822_vm3, %v588_v0, %v699_v54  ;;  %698 = vst [vmem:[#allocation2 + $0x40] sm:$0xf] %v587_v18 }
  0xb8   : > { %v807_v35 = vld [vmem:[#allocation2 + $0x30] sm:$0xf]  ;;  %v1037_v13 = vld [vmem:[#allocation2 + $0x38] sm:$0x1]  ;;  %v1126_v14 = vrot.slane %v1124_v5, 5  ;;  %v1130_v17 = vrot.slane %v1128_v6, 4  ;;  %v1288_v38 = vunpack.c.l.b16 %v911_v50  ;;  %v1289_v39 = vunpack.c.l.b16 %v921_v59 }
  0xb9   : > { %v819_v58 = vld [vmem:[#allocation2 + $0x38] sm:$0x1]  ;;  %v1117_v53 = vrot.slane %v1115_v9, 4  ;;  %v1120_v19 = vrot.slane %v1118_v10, 5  ;;  %v1134_v20 = vshll.u32 %v1037_v13, 16  ;;  %v923_v21 = vshrl.u32 %v807_v35, 16 }
  0xba   : > { %1818 = vmatmul.bf16.gmra.mxu3 %v1380_v2  ;;  %v1131_v41 = vor.u32 %v1130_v17, %v1126_v14  ;;  %v926_v63 = vshll.u32 %v807_v35, 16  ;;  %v9034_v24 = vrot.slane %v932_v51, 5  ;;  %v936_v25 = vshrl.u32 %v808_v61, 16  ;;  %701 = vst [vmem:[#allocation2 + $0x44] sm:$0x1] %v700_v37  ;;  %v7951_v34 = vld [vmem:[#allocation9 + $0x158] sm:$0xff] }
  0xbb   : > { %v1121_v27 = vor.u32 %v1120_v19, %v1117_v53  ;;  %v1136_v28 = vrot.slane %v1134_v20, 5  ;;  %v925_v57 = vrot.slane %v923_v21, 4  ;;  %v942_v29 = vshll.u32 %v819_v58, 16  ;;  %3266 = vmatpush.bf16.msrb.mxu1 %v7951_v34  ;;  %v1026_v49 = vld [vmem:[#allocation2 + $0x3c] sm:$0xf]  ;;  %v7896_v21 = vld [vmem:[#allocation2 + $0x30] sm:$0xff] }
  0xbc   : > { %1676 = vmatmul.bf16.gmra.mxu0 %v7895_v3  ;;  %v1132_v30 = vrot.slane %v1131_v41, 4  ;;  %v928_v31 = vrot.slane %v926_v63, 5  ;;  %v938_v32 = vrot.slane %v936_v25, 4  ;;  %v592_v50 = vrot.slane %v590_v36, 7  ;;  %v809_v62 = vld [vmem:[#allocation2 + $0x3c] sm:$0xf] }
  0xbd   : > { %v1122_v16 = vrot.slane %v1121_v27, 4  ;;  %v9043_v47 = vrot.slane %v942_v29, 5  ;;  %v593_v52 = vshll.u32 %v9017_v56, 16  ;;  %v9046_v54 = vrot.slane %v598_v40, 7  ;;  %v482_v13 = vld [vmem:[%s8790_s24 + $0x60] sm:$0xff] }
  0xbe   : > { %1774 = vmatmul.bf16.gmra.mxu2 %v7903_v8  ;;  %v1137_v43 = vsel %vm8912_vm11, %v1132_v30, %v1136_v28  ;;  %v929_v45 = vor.u32 %v928_v31, %v925_v57  ;;  %v939_v46 = vor.u32 %v938_v32, %v9034_v24  ;;  %v1301_v55 = vpack.c.b16 %v1289_v39, %v1288_v38  ;;  %v1027_v59 = vld [vmem:[#allocation2 + $0x40] sm:$0xf]  ;;  %v702_v20 = vld [vmem:[#allocation2 + $0x48] sm:$0xf]  ;;  %v458_v26 = vld [vmem:[#allocation2 + $0x50] sm:$0x1] }
  0xbf   : > { %v1127_v42 = vsel %vm8912_vm11, %v1122_v16, %v1126_v14  ;;  %v1139_v60 = vshrl.u32 %v1026_v49, 16  ;;  %v1142_v61 = vshll.u32 %v1026_v49, 16  ;;  %v1369_v1 = vunpack.c.l.b16 %v1137_v43  ;;  %v810_v4 = vld [vmem:[#allocation2 + $0x40] sm:$0xf]  ;;  %v429_v30 = vld [vmem:[#allocation2 + $0x54] sm:$0x1] }
  0xc0   : > { %v1368_v0 = vunpack.c.l.b16 %v1127_v42  ;;  %v1148_v3 = vshll.u32 %v1027_v59, 16  ;;  %v601_v5 = vshll.u32 %v9028_v11, 16  ;;  %v930_v6 = vrot.slane %v929_v45, 4  ;;  %v483_v31 = vld [vmem:[%s8790_s24 + $0x68] sm:$0xff]  ;;  %v461_v39 = vld [vmem:[#allocation2 + $0x5c] sm:$0x1] }
  0xc1   : > { %v1038_v2 = vld [vmem:[#allocation2 + $0x44] sm:$0x1]  ;;  %v940_v7 = vrot.slane %v939_v46, 4  ;;  %v1141_v8 = vrot.slane %v1139_v60, 4  ;;  %v1144_v9 = vrot.slane %v1142_v61, 5  ;;  %v1152_v10 = vshrl.u32 %v1027_v59, 16 }
  0xc2   : > { %v9049_v56 = vrot.slane %v1148_v3, 5  ;;  %v1158_v35 = vshll.u32 %v1038_v2, 16  ;;  %v947_v51 = vshrl.u32 %v809_v62, 16  ;;  %v950_v17 = vshll.u32 %v809_v62, 16  ;;  %v7904_v32 = vld [vmem:[#allocation2 + $0x3c] sm:$0xff]  ;;  %v7958_v42 = vld [vmem:[#allocation9 + $0x190] sm:$0xff] }
  0xc3   : > { %v1145_v14 = vor.u32 %v1144_v9, %v1141_v8  ;;  %v956_v58 = vshll.u32 %v810_v4, 16  ;;  %v595_v18 = vor.u32 %v593_v52, %v592_v50  ;;  %v1381_v37 = vpack.c.b16 %v1369_v1, %v1368_v0  ;;  %v820_v34 = vld [vmem:[#allocation2 + $0x44] sm:$0x1]  ;;  %v7942_v43 = vld [vmem:[#allocation9 + $0x110] sm:$0xff]  ;;  %3316 = vmatpush.bf16.msrb.mxu2 %v7958_v42  ;;  %v432_v3 = vld [vmem:[#allocation2 + $0x60] sm:$0x1] }
  0xc4   : > { %v1154_v53 = vrot.slane %v1152_v10, 4  ;;  %v960_v19 = vshrl.u32 %v810_v4, 16  ;;  %v603_v11 = vor.u32 %v601_v5, %v9046_v54  ;;  %v935_v41 = vsel %vm8912_vm11, %v930_v6, %v9034_v24  ;;  %v7966_v45 = vld [vmem:[#allocation9 + $0x1d0] sm:$0xff]  ;;  %3218 = vmatpush.bf16.msrb.mxu0 %v7942_v43 }
  0xc5   : > { %v945_v63 = vsel %vm8912_vm11, %v940_v7, %v9043_v47  ;;  %v1160_v25 = vrot.slane %v1158_v35, 5  ;;  %v9059_v27 = vpack.c.bf16 %v482_v13, %v482_v13  ;;  %v949_v57 = vrot.slane %v947_v51, 4  ;;  %v7950_v49 = vld [vmem:[#allocation9 + $0x150] sm:$0xff]  ;;  %3365 = vmatpush.bf16.msrb.mxu3 %v7966_v45 }
  0xc6   : > { %v1155_v28 = vor.u32 %v1154_v53, %v9049_v56  ;;  %v952_v29 = vrot.slane %v950_v17, 5  ;;  %v596_v23 = vrot.slane %v592_v50, 4  ;;  %v1146_v33 = vrot.slane %v1145_v14, 4  ;;  %3267 = vmatpush.bf16.msrb.mxu1 %v7950_v49  ;;  %v464_v53 = vld [vmem:[#allocation2 + $0x68] sm:$0x1] }
  0xc7   : > { %1725 = vmatmul.bf16.gmra.mxu1 %v1301_v55  ;;  %v9063_v36 = vrot.slane %v956_v58, 5  ;;  %v962_v24 = vrot.slane %v960_v19, 4  ;;  %v703_v38 = vsel %vm8855_vm8, %v595_v18, %v702_v20  ;;  %v9069_v46 = vunpack.c.l.b16 %v935_v41 }
  0xc8   : > { %v1156_v16 = vrot.slane %v1155_v28, 4  ;;  %v604_v40 = vsel %vm8848_vm7, %v596_v23, %v603_v11  ;;  %704 = vst [vmem:[#allocation2 + $0x48] sm:$0xf] %v703_v38  ;;  %v459_v47 = vsel %vm8828_vm4, 0, %v458_v26  ;;  %v430_v50 = vsel %vm8822_vm3, 0, %v429_v30 }
  0xc9   : > { %705 = vst [vmem:[#allocation2 + $0x4c] sm:$0xf] %v604_v40  ;;  %v499_v52 = vpack.c.bf16 %v483_v31, %v483_v31  ;;  %v1291_v55 = vunpack.c.l.b16 %v945_v63  ;;  %v953_v59 = vor.u32 %v952_v29, %v949_v57  ;;  %v966_v60 = vshll.u32 %v820_v34, 16  ;;  %v485_v57 = vld [vmem:[%s8790_s24 + $0x78] sm:$0xff] }
  0xca   : > { %1823 = vmatmul.bf16.gmra.mxu3 %v1381_v37  ;;  %460 = vst [vmem:[#allocation2 + $0x50] sm:$0x1] %v459_v47  ;;  %v607_v61 = vshrl.u32 %v9059_v27, 16  ;;  %v1151_v62 = vsel %vm8912_vm11, %v1146_v33, %v9049_v56  ;;  %v963_v0 = vor.u32 %v962_v24, %v9063_v36  ;;  %v1161_v4 = vsel %vm8912_vm11, %v1156_v16, %v1160_v25  ;;  %v484_v37 = vld [vmem:[%s8790_s24 + $0x70] sm:$0xff] }
  0xcb   : > { %431 = vst [vmem:[#allocation2 + $0x54] sm:$0x1] %v430_v50  ;;  %v615_v1 = vshrl.u32 %v499_v52, 16  ;;  %v618_v2 = vshll.u32 %v499_v52, 16  ;;  %v610_v6 = vshll.u32 %v9059_v27, 16  ;;  %v462_v7 = vsel %vm8828_vm4, 0, %v461_v39 }
  0xcc   : > { %1681 = vmatmul.bf16.gmra.mxu0 %v7896_v21  ;;  %v609_v5 = vrot.slane %v607_v61, 7  ;;  %463 = vst [vmem:[#allocation2 + $0x5c] sm:$0x1] %v462_v7  ;;  %v433_v9 = vsel %vm8822_vm3, 0, %v432_v3  ;;  %v9087_v56 = vrot.slane %v953_v59, 4  ;;  %v9089_v10 = vrot.slane %v966_v60, 5 }
  0xcd   : > { %v617_v8 = vrot.slane %v615_v1, 7  ;;  %v605_v35 = vrot.slane %v9046_v54, 4  ;;  %434 = vst [vmem:[#allocation2 + $0x60] sm:$0x1] %v433_v9  ;;  %v1370_v13 = vunpack.c.l.b16 %v1151_v62  ;;  %v1371_v14 = vunpack.c.l.b16 %v1161_v4  ;;  %v7897_v50 = vld [vmem:[#allocation2 + $0x3c] sm:$0xff] }
  0xce   : > { %1779 = vmatmul.bf16.gmra.mxu2 %v7904_v32  ;;  %v613_v51 = vrot.slane %v609_v5, 4  ;;  %v9092_v17 = vrot.slane %v963_v0, 4  ;;  %v1302_v19 = vpack.c.b16 %v1291_v55, %v9069_v46  ;;  %v612_v63 = vor.u32 %v610_v6, %v609_v5  ;;  %v7957_v1 = vld [vmem:[#allocation9 + $0x188] sm:$0xff] }
  0xcf   : > { %v1028_v58 = vld [vmem:[#allocation2 + $0x48] sm:$0xf]  ;;  %v620_v18 = vor.u32 %v618_v2, %v617_v8  ;;  %v622_v28 = vrot.slane %v617_v8, 4  ;;  %v500_v33 = vpack.c.bf16 %v484_v37, %v484_v37  ;;  %v1382_v34 = vpack.c.b16 %v1371_v14, %v1370_v13  ;;  %v7941_v2 = vld [vmem:[#allocation9 + $0x108] sm:$0xff]  ;;  %3317 = vmatpush.bf16.msrb.mxu2 %v7957_v1 }
  0xd0   : > { %v1029_v11 = vld [vmem:[#allocation2 + $0x4c] sm:$0xf]  ;;  %v1163_v20 = vshrl.u32 %v1028_v58, 16  ;;  %v1166_v21 = vshll.u32 %v1028_v58, 16  ;;  %v811_v41 = vld [vmem:[#allocation2 + $0x48] sm:$0xf]  ;;  %v959_v24 = vsel %vm8912_vm11, %v9087_v56, %v9063_v36  ;;  %v9107_v43 = vpack.c.bf16 %v485_v57, %v485_v57  ;;  %3219 = vmatpush.bf16.msrb.mxu0 %v7941_v2 }
  0xd1   : > { %v706_v25 = vld [vmem:[#allocation2 + $0x50] sm:$0x1]  ;;  %v1172_v54 = vshll.u32 %v1029_v11, 16  ;;  %v1176_v26 = vshrl.u32 %v1029_v11, 16  ;;  %v621_v27 = vsel %vm8848_vm7, %v613_v51, %v620_v18  ;;  %v812_v31 = vld [vmem:[#allocation2 + $0x4c] sm:$0xf]  ;;  %v969_v0 = vsel %vm8912_vm11, %v9092_v17, %v9089_v10 }
  0xd2   : > { %v707_v29 = vsel %vm8822_vm3, %v605_v35, %v706_v25  ;;  %v1165_v23 = vrot.slane %v1163_v20, 4  ;;  %v1168_v30 = vrot.slane %v1166_v21, 5  ;;  %v709_v32 = vld [vmem:[#allocation2 + $0x54] sm:$0xf]  ;;  %712 = vst [vmem:[#allocation2 + $0x58] sm:$0xf] %v621_v27  ;;  %v1292_v6 = vunpack.c.l.b16 %v959_v24 }
  0xd3   : > { %708 = vst [vmem:[#allocation2 + $0x50] sm:$0x1] %v707_v29  ;;  %v1174_v38 = vrot.slane %v1172_v54, 5  ;;  %v1178_v39 = vrot.slane %v1176_v26, 4  ;;  %v710_v40 = vsel %vm8855_vm8, %v612_v63, %v709_v32  ;;  %v713_v42 = vld [vmem:[#allocation2 + $0x5c] sm:$0x1]  ;;  %v1293_v17 = vunpack.c.l.b16 %v969_v0 }
  0xd4   : > { %v1169_v16 = vor.u32 %v1168_v30, %v1165_v23  ;;  %v465_v45 = vsel %vm8828_vm4, 0, %v464_v53  ;;  %v971_v46 = vshrl.u32 %v811_v41, 16  ;;  %v974_v47 = vshll.u32 %v811_v41, 16  ;;  %711 = vst [vmem:[#allocation2 + $0x54] sm:$0xf] %v710_v40  ;;  %v7905_v61 = vld [vmem:[#allocation2 + $0x48] sm:$0xff] }
  0xd5   : > { %v980_v49 = vshll.u32 %v812_v31, 16  ;;  %v714_v36 = vsel %vm8822_vm3, %v622_v28, %v713_v42  ;;  %v1179_v52 = vor.u32 %v1178_v39, %v1174_v38  ;;  %v984_v55 = vshrl.u32 %v812_v31, 16  ;;  %466 = vst [vmem:[#allocation2 + $0x68] sm:$0x1] %v465_v45  ;;  %v7965_v3 = vld [vmem:[#allocation9 + $0x1c8] sm:$0xff] }
  0xd6   : > { %715 = vst [vmem:[#allocation2 + $0x5c] sm:$0x1] %v714_v36  ;;  %v624_v59 = vshrl.u32 %v500_v33, 16  ;;  %v627_v60 = vshll.u32 %v500_v33, 16  ;;  %v1170_v62 = vrot.slane %v1169_v16, 4  ;;  %v632_v5 = vshrl.u32 %v9107_v43, 16  ;;  %3366 = vmatpush.bf16.msrb.mxu3 %v7965_v3 }
  0xd7   : > { %1730 = vmatmul.bf16.gmra.mxu1 %v1302_v19  ;;  %v973_v7 = vrot.slane %v971_v46, 4  ;;  %v976_v8 = vrot.slane %v974_v47, 5  ;;  %v7949_v9 = vld [vmem:[#allocation9 + $0x148] sm:$0xff]  ;;  %v1180_v51 = vrot.slane %v1179_v52, 4  ;;  %v9120_v13 = vrot.slane %v980_v49, 5 }
  0xd8   : > { %v9117_v4 = vrot.slane %v624_v59, 7  ;;  %v716_v56 = vld [vmem:[#allocation2 + $0x60] sm:$0xf]  ;;  %v986_v14 = vrot.slane %v984_v55, 4  ;;  %v1175_v58 = vsel %vm8912_vm11, %v1170_v62, %v1174_v38  ;;  %v635_v19 = vshll.u32 %v9107_v43, 16  ;;  %3268 = vmatpush.bf16.msrb.mxu1 %v7949_v9 }
  0xd9   : > { %v1031_v53 = vld [vmem:[#allocation2 + $0x58] sm:$0xf]  ;;  %v634_v41 = vrot.slane %v632_v5, 7  ;;  %v977_v54 = vor.u32 %v976_v8, %v973_v7  ;;  %v1372_v57 = vunpack.c.l.b16 %v1175_v58  ;;  %v1303_v39 = vpack.c.b16 %v1293_v17, %v1292_v6  ;;  %v7898_v6 = vld [vmem:[#allocation2 + $0x48] sm:$0xff] }
  0xda   : > { %1828 = vmatmul.bf16.gmra.mxu3 %v1382_v34  ;;  %v1039_v35 = vld [vmem:[#allocation2 + $0x50] sm:$0x1]  ;;  %v629_v10 = vor.u32 %v627_v60, %v9117_v4  ;;  %v1196_v20 = vshll.u32 %v1031_v53, 16  ;;  %v1200_v21 = vshrl.u32 %v1031_v53, 16  ;;  %v814_v28 = vld [vmem:[#allocation2 + $0x58] sm:$0xf]  ;;  %v987_v29 = vor.u32 %v986_v14, %v9120_v13 }
  0xdb   : > { %v1182_v18 = vshll.u32 %v1039_v35, 16  ;;  %v821_v37 = vld [vmem:[#allocation2 + $0x50] sm:$0x1]  ;;  %v1030_v11 = vld [vmem:[#allocation2 + $0x54] sm:$0xf]  ;;  %v630_v40 = vrot.slane %v9117_v4, 4  ;;  %v637_v42 = vor.u32 %v635_v19, %v634_v41 }
  0xdc   : > { %1686 = vmatmul.bf16.gmra.mxu0 %v7897_v50  ;;  %v717_v63 = vsel %vm8855_vm8, %v629_v10, %v716_v56  ;;  %v1187_v26 = vshrl.u32 %v1030_v11, 16  ;;  %v1190_v27 = vshll.u32 %v1030_v11, 16  ;;  %v990_v23 = vshll.u32 %v821_v37, 16  ;;  %v813_v32 = vld [vmem:[#allocation2 + $0x54] sm:$0xf]  ;;  %v7956_v53 = vld [vmem:[#allocation9 + $0x180] sm:$0xff] }
  0xdd   : > { %v1184_v25 = vrot.slane %v1182_v18, 5  ;;  %v1040_v30 = vld [vmem:[#allocation2 + $0x5c] sm:$0x1]  ;;  %v9129_v31 = vrot.slane %v1196_v20, 5  ;;  %v1202_v38 = vrot.slane %v1200_v21, 4  ;;  %v978_v43 = vrot.slane %v977_v54, 4  ;;  %3318 = vmatpush.bf16.msrb.mxu2 %v7956_v53 }
  0xde   : > { %1784 = vmatmul.bf16.gmra.mxu2 %v7905_v61  ;;  %v1189_v34 = vrot.slane %v1187_v26, 4  ;;  %v1192_v24 = vrot.slane %v1190_v27, 5  ;;  %718 = vst [vmem:[#allocation2 + $0x60] sm:$0xf] %v717_v63  ;;  %v995_v45 = vshrl.u32 %v813_v32, 16  ;;  %v998_v46 = vshll.u32 %v813_v32, 16 }
  0xdf   : > { %v1185_v33 = vsel %vm8912_vm11, %v1180_v51, %v1184_v25  ;;  %v1004_v47 = vshll.u32 %v814_v28, 16  ;;  %v988_v49 = vrot.slane %v987_v29, 4  ;;  %v992_v36 = vrot.slane %v990_v23, 5  ;;  %v720_v61 = vld [vmem:[#allocation2 + $0x68] sm:$0x1]  ;;  %v7906_v9 = vld [vmem:[#allocation2 + $0x54] sm:$0xff] }
  0xe0   : > { %v1373_v16 = vunpack.c.l.b16 %v1185_v33  ;;  %v1206_v50 = vshll.u32 %v1040_v30, 16  ;;  %v1008_v52 = vshrl.u32 %v814_v28, 16  ;;  %v1193_v59 = vor.u32 %v1192_v24, %v1189_v34  ;;  %v822_v3 = vld [vmem:[#allocation2 + $0x5c] sm:$0x1]  ;;  %v2217_v54 = vld [vmem:[#allocation2] sm:$0xf] }
  0xe1   : > { %v1203_v60 = vor.u32 %v1202_v38, %v9129_v31  ;;  %v997_v62 = vrot.slane %v995_v45, 4  ;;  %v1000_v0 = vrot.slane %v998_v46, 5  ;;  %v638_v1 = vsel %vm8848_vm7, %v630_v40, %v637_v42  ;;  %v7940_v19 = vld [vmem:[#allocation9 + $0x100] sm:$0xff]  ;;  %v9147_v26 = vld [vmem:[#allocation2 + $0x4] sm:$0xf] }
  0xe2   : > { %v1383_v55 = vpack.c.b16 %v1373_v16, %v1372_v57  ;;  %v639_v2 = vrot.slane %v634_v41, 4  ;;  %v9137_v4 = vrot.slane %v1004_v47, 5  ;;  %v1010_v5 = vrot.slane %v1008_v52, 4  ;;  %719 = vst [vmem:[#allocation2 + $0x64] sm:$0xf] %v638_v1  ;;  %v7948_v41 = vld [vmem:[#allocation9 + $0x140] sm:$0xff]  ;;  %3220 = vmatpush.bf16.msrb.mxu0 %v7940_v19 }
  0xe3   : > { %v983_v7 = vsel %vm8912_vm11, %v978_v43, %v9120_v13  ;;  %v993_v8 = vsel %vm8912_vm11, %v988_v49, %v992_v36  ;;  %v1208_v56 = vrot.slane %v1206_v50, 5  ;;  %v1194_v14 = vrot.slane %v1193_v59, 4  ;;  %v7964_v13 = vld [vmem:[#allocation9 + $0x1c0] sm:$0xff]  ;;  %3269 = vmatpush.bf16.msrb.mxu1 %v7948_v41  ;;  %v9156_v45 = vld [vmem:[#allocation2 + $0x8] sm:$0x1] }
  0xe4   : > { %v721_v35 = vsel %vm8822_vm3, %v639_v2, %v720_v61  ;;  %v1204_v10 = vrot.slane %v1203_v60, 4  ;;  %v1001_v18 = vor.u32 %v1000_v0, %v997_v62  ;;  %v1014_v37 = vshll.u32 %v822_v3, 16  ;;  %3367 = vmatpush.bf16.msrb.mxu3 %v7964_v13 }
  0xe5   : > { %v1032_v51 = vld [vmem:[#allocation2 + $0x60] sm:$0xf]  ;;  %722 = vst [vmem:[#allocation2 + $0x68] sm:$0x1] %v721_v35  ;;  %v1011_v11 = vor.u32 %v1010_v5, %v9137_v4  ;;  %v1294_v63 = vunpack.c.l.b16 %v983_v7  ;;  %v1295_v25 = vunpack.c.l.b16 %v993_v8  ;;  %v1199_v27 = vsel %vm8912_vm11, %v1194_v14, %v9129_v31  ;;  %v2524_v31 = vld [vmem:[#allocation2 + $0xc] sm:$0xf] }
  0xe6   : > { %v1211_v17 = vshrl.u32 %v1032_v51, 16  ;;  %v1214_v58 = vshll.u32 %v1032_v51, 16  ;;  %v1209_v28 = vsel %vm8912_vm11, %v1204_v10, %v1208_v56  ;;  %v2242_v57 = vshrl.u32 %v2217_v54, 16  ;;  %v2433_v35 = vld [vmem:[#allocation2] sm:$0xe] }
  0xe7   : > { %1735 = vmatmul.bf16.gmra.mxu1 %v1303_v39  ;;  %v2245_v29 = vshll.u32 %v2217_v54, 16  ;;  %v1002_v23 = vrot.slane %v1001_v18, 4  ;;  %v1016_v30 = vrot.slane %v1014_v37, 5  ;;  %v2251_v33 = vshll.u32 %v9147_v26, 16  ;;  %v9165_v10 = vld [vmem:[#allocation2 + $0x10] sm:$0xf] }
  0xe8   : > { %v1213_v20 = vrot.slane %v1211_v17, 4  ;;  %v1216_v21 = vrot.slane %v1214_v58, 5  ;;  %v2255_v34 = vshrl.u32 %v9147_v26, 16  ;;  %v1012_v24 = vrot.slane %v1011_v11, 4  ;;  %v9169_v17 = vld [vmem:[#allocation2 + $0x14] sm:$0x1] }
  0xe9   : > { %v1033_v32 = vld [vmem:[#allocation2 + $0x64] sm:$0xf]  ;;  %v1374_v40 = vunpack.c.l.b16 %v1199_v27  ;;  %v1375_v42 = vunpack.c.l.b16 %v1209_v28  ;;  %v2244_v46 = vrot.slane %v2242_v57, 4  ;;  %v2247_v47 = vrot.slane %v2245_v29, 5  ;;  %v7899_v37 = vld [vmem:[#allocation2 + $0x54] sm:$0xff] }
  0xea   : > { %1833 = vmatmul.bf16.gmra.mxu3 %v1383_v55  ;;  %v1217_v38 = vor.u32 %v1216_v21, %v1213_v20  ;;  %v1220_v39 = vshll.u32 %v1033_v32, 16  ;;  %v1224_v16 = vshrl.u32 %v1033_v32, 16  ;;  %v2253_v52 = vrot.slane %v2251_v33, 5  ;;  %v7907_v20 = vld [vmem:[#allocation2 + $0x60] sm:$0xff]  ;;  %v8011_v29 = vld [vmem:[#allocation9 + $0x2b8] sm:$0xff] }
  0xeb   : > { %v1304_v55 = vpack.c.b16 %v1295_v25, %v1294_v63  ;;  %v2248_v59 = vor.u32 %v2247_v47, %v2244_v46  ;;  %v2257_v60 = vrot.slane %v2255_v34, 4  ;;  %v2261_v61 = vshll.u32 %v9156_v45, 16  ;;  %4725 = vmatpush.bf16.msra.mxu2 %v8011_v29 }
  0xec   : > { %1691 = vmatmul.bf16.gmra.mxu0 %v7898_v6  ;;  %v1041_v43 = vld [vmem:[#allocation2 + $0x68] sm:$0x1]  ;;  %v1222_v49 = vrot.slane %v1220_v39, 5  ;;  %v1226_v36 = vrot.slane %v1224_v16, 4  ;;  %v1218_v62 = vrot.slane %v1217_v38, 4  ;;  %v2549_v1 = vshrl.u32 %v2524_v31, 16 }
  0xed   : > { %v1230_v50 = vshll.u32 %v1041_v43, 16  ;;  %v1384_v2 = vpack.c.b16 %v1375_v42, %v1374_v40  ;;  %v1007_v3 = vsel %vm8912_vm11, %v1002_v23, %v9137_v4  ;;  %v2249_v5 = vrot.slane %v2248_v59, 4  ;;  %v7995_v23 = vld [vmem:[#allocation9 + $0x238] sm:$0xff]  ;;  %v2740_v40 = vld [vmem:[#allocation2 + $0xc] sm:$0xe] }
  0xee   : > { %1789 = vmatmul.bf16.gmra.mxu2 %v7906_v9  ;;  %v1227_v0 = vor.u32 %v1226_v36, %v1222_v49  ;;  %v2258_v6 = vor.u32 %v2257_v60, %v2253_v52  ;;  %v1017_v7 = vsel %vm8912_vm11, %v1012_v24, %v1016_v30  ;;  %v2263_v56 = vrot.slane %v2261_v61, 5  ;;  %v8019_v30 = vld [vmem:[#allocation9 + $0x2f8] sm:$0xff]  ;;  %4627 = vmatpush.bf16.msra.mxu0 %v7995_v23  ;;  %v2220_v60 = vld [vmem:[#allocation2 + $0xc] sm:$0xf] }
  0xef   : > { %v1232_v9 = vrot.slane %v1230_v50, 5  ;;  %v2470_v14 = vrot.slane %v9147_v26, 5  ;;  %v1223_v4 = vsel %vm8912_vm11, %v1218_v62, %v1222_v49  ;;  %v2551_v58 = vrot.slane %v2549_v1, 4  ;;  %4774 = vmatpush.bf16.msra.mxu3 %v8019_v30  ;;  %v2221_v61 = vld [vmem:[#allocation2 + $0x10] sm:$0xf] }
  0xf0   : > { %v1228_v8 = vrot.slane %v1227_v0, 4  ;;  %v2259_v51 = vrot.slane %v2258_v6, 4  ;;  %v2552_v18 = vshll.u32 %v2524_v31, 16  ;;  %v9171_v53 = vunpack.c.l.b16 %v1007_v3  ;;  %v2527_v3 = vld [vmem:[#allocation2 + $0x18] sm:$0xf]  ;;  %v8003_v23 = vld [vmem:[#allocation9 + $0x278] sm:$0xff] }
  0xf1   : > { %v9173_v19 = vunpack.c.l.b16 %v1017_v7  ;;  %v2254_v13 = vsel %vm8912_vm11, %v2249_v5, %v2253_v52  ;;  %v7142_v11 = vrot.slane %v2433_v35, 9  ;;  %v2558_v54 = vshll.u32 %v9165_v10, 16  ;;  %4676 = vmatpush.bf16.msra.mxu1 %v8003_v23  ;;  %v2225_v23 = vld [vmem:[#allocation2 + $0x20] sm:$0x1] }
  0xf2   : > { %v1233_v21 = vsel %vm8912_vm11, %v1228_v8, %v1232_v9  ;;  %v2264_v41 = vsel %vm8912_vm11, %v2259_v51, %v2263_v56  ;;  %v2554_v25 = vrot.slane %v2552_v18, 5  ;;  %v9188_v26 = vunpack.c.l.b16 %v1223_v4 }
  0xf3   : > { %v2472_v27 = vrot.slane %v2470_v14, 4  ;;  %v2562_v28 = vshrl.u32 %v9165_v10, 16  ;;  %v2568_v57 = vshll.u32 %v9169_v17, 16  ;;  %v9192_v32 = vunpack.c.l.b16 %v2254_v13 }
  0xf4   : > { %v2473_v33 = vrot.slane %v9156_v45, 5  ;;  %v2555_v34 = vor.u32 %v2554_v25, %v2551_v58  ;;  %v2560_v24 = vrot.slane %v2558_v54, 5  ;;  %v9195_v38 = vunpack.c.l.b16 %v1233_v21  ;;  %v2222_v58 = vld [vmem:[#allocation2 + $0x14] sm:$0x1]  ;;  %v2434_v21 = vld [vmem:[#allocation2 + $0xc] sm:$0xe] }
  0xf5   : > { %v9197_v39 = vunpack.c.l.b16 %v2264_v41  ;;  %v9201_v16 = vsel %vm9183_vm14, %v7142_v11, %v2470_v14  ;;  %v2564_v31 = vrot.slane %v2562_v28, 4  ;;  %v2570_v46 = vrot.slane %v2568_v57, 5  ;;  %v9224_v14 = vld [vmem:[#allocation2 + $0x1c] sm:$0xf]  ;;  %v2529_v57 = vld [vmem:[#allocation2 + $0x20] sm:$0x1] }
  0xf6   : > { %v2556_v42 = vrot.slane %v2555_v34, 4  ;;  %v1305_v45 = vpack.c.b16 %v9173_v19, %v9171_v53  ;;  %v9207_v47 = vsel %vm9183_vm14, %v2472_v27, %v2473_v33  ;;  %v2860_v49 = vunpack.c.l.b16 %v9201_v16 }
  0xf7   : > { %1740 = vmatmul.bf16.gmra.mxu1 %v1304_v55  ;;  %v2565_v43 = vor.u32 %v2564_v31, %v2560_v24  ;;  %v7150_v36 = vrot.slane %v2740_v40, 9  ;;  %v1385_v50 = vpack.c.b16 %v9195_v38, %v9188_v26  ;;  %v2844_v52 = vpack.c.b16 %v9197_v39, %v9192_v32  ;;  %v2741_v40 = vld [vmem:[#allocation2 + $0x18] sm:$0xe] }
  0xf8   : > { %v2774_v59 = vrot.slane %v9165_v10, 5  ;;  %v2561_v62 = vsel %vm8912_vm11, %v2556_v42, %v2560_v24  ;;  %v2266_v0 = vshrl.u32 %v2220_v60, 16  ;;  %v2269_v1 = vshll.u32 %v2220_v60, 16 }
  0xf9   : > { %v2566_v55 = vrot.slane %v2565_v43, 4  ;;  %v2279_v6 = vshrl.u32 %v2221_v61, 16  ;;  %v2573_v7 = vshrl.u32 %v2527_v3, 16  ;;  %v2576_v8 = vshll.u32 %v2527_v3, 16 }
  0xfa   : > { %1838 = vmatmul.bf16.gmra.mxu3 %v1384_v2  ;;  %v2275_v2 = vshll.u32 %v2221_v61, 16  ;;  %v9221_v9 = vsel %vm9183_vm14, %v7150_v36, %v2774_v59  ;;  %v2777_v56 = vrot.slane %v9169_v17, 5  ;;  %v2268_v35 = vrot.slane %v2266_v0, 4 }
  0xfb   : > { %v2571_v5 = vsel %vm8912_vm11, %v2566_v55, %v2570_v46  ;;  %v2271_v51 = vrot.slane %v2269_v1, 5  ;;  %v2892_v10 = vunpack.c.l.b16 %v2561_v62  ;;  %v2776_v4 = vrot.slane %v2774_v59, 4  ;;  %v9246_v1 = vld [vmem:[%s11044_s15] ss:$0 sm:$0xff] }
  0xfc   : > { %1696 = vmatmul.bf16.gmra.mxu0 %v7899_v37  ;;  %v2277_v18 = vrot.slane %v2275_v2, 5  ;;  %v2281_v37 = vrot.slane %v2279_v6, 4  ;;  %v2893_v53 = vunpack.c.l.b16 %v2571_v5  ;;  %v2285_v13 = vshll.u32 %v2222_v58, 16 }
  0xfd   : > { %v2272_v19 = vor.u32 %v2271_v51, %v2268_v35  ;;  %v2477_v11 = vrot.slane %v2221_v61, 5  ;;  %v2575_v41 = vrot.slane %v2573_v7, 4  ;;  %v2578_v25 = vrot.slane %v2576_v8, 5 }
  0xfe   : > { %1794 = vmatmul.bf16.gmra.mxu2 %v7907_v20  ;;  %v2282_v20 = vor.u32 %v2281_v37, %v2277_v18  ;;  %v2582_v17 = vshll.u32 %v9224_v14, 16  ;;  %v2287_v26 = vrot.slane %v2285_v13, 5  ;;  %v7143_v27 = vrot.slane %v2434_v21, 9  ;;  %v2224_v13 = vld [vmem:[#allocation2 + $0x1c] sm:$0xf] }
  0xff   : > { %v2273_v54 = vrot.slane %v2272_v19, 4  ;;  %v2479_v28 = vrot.slane %v2477_v11, 4  ;;  %v2778_v29 = vsel %vm9183_vm14, %v2776_v4, %v2777_v56  ;;  %v2480_v32 = vrot.slane %v2222_v58, 5  ;;  %v7994_v4 = vld [vmem:[#allocation9 + $0x230] sm:$0xff] }
 0x100   : > { %v2283_v30 = vrot.slane %v2282_v20, 4  ;;  %v2579_v33 = vor.u32 %v2578_v25, %v2575_v41  ;;  %v2908_v24 = vpack.c.b16 %v2893_v53, %v2892_v10  ;;  %v2584_v39 = vrot.slane %v2582_v17, 5  ;;  %v8010_v10 = vld [vmem:[#allocation9 + $0x2b0] sm:$0xff]  ;;  %4628 = vmatpush.bf16.msra.mxu0 %v7994_v4 }
 0x101   : > { %v2278_v38 = vsel %vm8912_vm11, %v2273_v54, %v2277_v18  ;;  %v2586_v31 = vshrl.u32 %v9224_v14, 16  ;;  %v2478_v43 = vsel %vm9183_vm14, %v7143_v27, %v2477_v11  ;;  %v2481_v46 = vsel %vm9183_vm14, %v2479_v28, %v2480_v32  ;;  %v8018_v58 = vld [vmem:[#allocation9 + $0x2f0] sm:$0xff]  ;;  %4726 = vmatpush.bf16.msra.mxu2 %v8010_v10  ;;  %v2530_v28 = vld [vmem:[#allocation2 + $0x24] sm:$0xf] }
 0x102   : > { %v2288_v42 = vsel %vm8912_vm11, %v2283_v30, %v2287_v26  ;;  %v2861_v36 = vunpack.c.l.b16 %v9207_v47  ;;  %v2924_v55 = vunpack.c.l.b16 %v9221_v9  ;;  %v2925_v59 = vunpack.c.l.b16 %v2778_v29  ;;  %4775 = vmatpush.bf16.msra.mxu3 %v8018_v58  ;;  %v9283_v4 = vld [vmem:[#allocation2 + $0x2c] sm:$0x1] }
 0x103   : > { %v2580_v60 = vrot.slane %v2579_v33, 4  ;;  %v9240_v61 = vunpack.c.l.b16 %v2278_v38  ;;  %v7151_v62 = vrot.slane %v2741_v40, 9  ;;  %v2781_v0 = vrot.slane %v9224_v14, 5  ;;  %v2435_v40 = vld [vmem:[#allocation2 + $0x18] sm:$0xe] }
 0x104   : > { %v9248_v2 = vunpack.c.l.b16 %v2288_v42  ;;  %v2862_v47 = vunpack.c.l.b16 %v2478_v43  ;;  %v2863_v3 = vunpack.c.l.b16 %v2481_v46  ;;  %v2784_v5 = vrot.slane %v2529_v57, 5  ;;  %v9272_v43 = vld [vmem:[#allocation2 + $0x28] sm:$0xf] }
 0x105   : > { %v2585_v8 = vsel %vm8912_vm11, %v2580_v60, %v2584_v39  ;;  %v2876_v9 = vpack.c.b16 %v2861_v36, %v2860_v49  ;;  %v2940_v56 = vpack.c.b16 %v2925_v59, %v2924_v55  ;;  %v9256_v14 = vsel %vm9183_vm14, %v7151_v62, %v2781_v0  ;;  %v2223_v49 = vld [vmem:[#allocation2 + $0x18] sm:$0xf] }
 0x106   : > { %v2845_v53 = vpack.c.b16 %v9248_v2, %v9240_v61  ;;  %v9261_v19 = vpack.c.b16 %v2863_v3, %v2862_v47  ;;  %v9267_v20 = vunpack.c.l.b16 %v2585_v8  ;;  %v2290_v21 = vshrl.u32 %v2223_v49, 16 }
 0x107   : > { %1745 = vmatmul.bf16.gmra.mxu1 %v1305_v45  ;;  %v2592_v45 = vshll.u32 %v2529_v57, 16  ;;  %v2293_v41 = vshll.u32 %v2223_v49, 16  ;;  %v2926_v54 = vunpack.c.l.b16 %v9256_v14  ;;  %v2299_v26 = vshll.u32 %v2224_v13, 16 }
 0x108   : > { %v2303_v27 = vshrl.u32 %v2224_v13, 16  ;;  %v2292_v30 = vrot.slane %v2290_v21, 4  ;;  %v2309_v38 = vshll.u32 %v2225_v23, 16  ;;  %v2484_v42 = vrot.slane %v2224_v13, 5 }
 0x109   : > { %v1662_v34 = vpop.f32.mrf.mxu0  ;;  %v2594_v7 = vrot.slane %v2592_v45, 5  ;;  %v2295_v32 = vrot.slane %v2293_v41, 5  ;;  %v2597_v46 = vshrl.u32 %v2530_v28, 16  ;;  %v7144_v55 = vrot.slane %v2435_v40, 9 }
 0x10a   : > { %1843 = vmatmul.bf16.gmra.mxu3 %v1385_v50  ;;  %v2588_v50 = vrot.slane %v2586_v31, 4  ;;  %v1663_v18 = vadd.f32 %v9246_v1, %v1662_v34  ;;  %v2301_v34 = vrot.slane %v2299_v26, 5  ;;  %v2311_v36 = vrot.slane %v2309_v38, 5 }
 0x10b   : > { %v2296_v31 = vor.u32 %v2295_v32, %v2292_v30  ;;  %v2487_v59 = vrot.slane %v2225_v23, 5  ;;  %v2599_v47 = vrot.slane %v2597_v46, 4  ;;  %v2600_v3 = vshll.u32 %v2530_v28, 16  ;;  %v8017_v46 = vld [vmem:[#allocation9 + $0x2e8] sm:$0xff] }
 0x10c   : > { %3221 = vmatmul.bf16.vlgmr.msrb.gmra.mxu0 %v2844_v52  ;;  %v2589_v6 = vor.u32 %v2588_v50, %v2584_v39  ;;  %v2783_v52 = vrot.slane %v2781_v0, 4  ;;  %v8002_v50 = vld [vmem:[#allocation9 + $0x270] sm:$0xff]  ;;  %v2486_v0 = vrot.slane %v2484_v42, 4  ;;  %v2610_v8 = vshrl.u32 %v9272_v43, 16  ;;  %4776 = vmatpush.bf16.msra.mxu3 %v8017_v46 }
 0x10d   : > { %v2297_v62 = vrot.slane %v2296_v31, 4  ;;  %4677 = vmatpush.bf16.msra.mxu1 %v8002_v50  ;;  %v2788_v23 = vrot.slane %v9272_v43, 5 }
 0x10e   : > { %3319 = vmatmul.bf16.vlgmr.msrb.gmra.mxu2 %v2908_v24  ;;  %v2590_v51 = vrot.slane %v2589_v6, 4  ;;  %v2785_v16 = vsel %vm9183_vm14, %v2783_v52, %v2784_v5  ;;  %v2305_v24 = vrot.slane %v2303_v27, 4  ;;  %v2606_v52 = vshll.u32 %v9272_v43, 16  ;;  %v7993_v43 = vld [vmem:[#allocation9 + $0x228] sm:$0xff] }
 0x10f   : > { %v2927_v29 = vunpack.c.l.b16 %v2785_v16  ;;  %v2488_v14 = vsel %vm9183_vm14, %v2486_v0, %v2487_v59  ;;  %4629 = vmatpush.bf16.msra.mxu0 %v7993_v43 }
 0x110   : > { %v2595_v11 = vsel %vm8912_vm11, %v2590_v51, %v2594_v7  ;;  %v2306_v45 = vor.u32 %v2305_v24, %v2301_v34  ;;  %v2485_v7 = vsel %vm9183_vm14, %v7144_v55, %v2484_v42  ;;  %v2302_v51 = vsel %vm8912_vm11, %v2297_v62, %v2301_v34  ;;  %v8009_v24 = vld [vmem:[#allocation9 + $0x2a8] sm:$0xff] }
 0x111   : > { %v1760_v35 = vpop.f32.mrf.mxu2  ;;  %v1664_v37 = vpop.f32.mrf.mxu0  ;;  %v2895_v17 = vunpack.c.l.b16 %v2595_v11  ;;  %v2864_v10 = vunpack.c.l.b16 %v2485_v7  ;;  %v2865_v16 = vunpack.c.l.b16 %v2488_v14  ;;  %v9293_v13 = vunpack.c.l.b16 %v2302_v51  ;;  %4727 = vmatpush.bf16.msra.mxu2 %v8009_v24 }
 0x112   : > { %v1665_v57 = vadd.f32 %v9246_v1, %v1664_v37  ;;  %v2307_v6 = vrot.slane %v2306_v45, 4  ;;  %v2608_v11 = vrot.slane %v2606_v52, 5  ;;  %v2791_v34 = vrot.slane %v9283_v4, 5  ;;  %v9333_v52 = vld [vmem:[#allocation2 + $0x2c] sm:$0x1] }
 0x113   : > { %v2909_v39 = vpack.c.b16 %v2895_v17, %v9267_v20  ;;  %v2612_v20 = vrot.slane %v2610_v8, 4  ;;  %v9300_v27 = vpack.c.b16 %v2865_v16, %v2864_v10 }
 0x114   : > { %v1711_v25 = vpop.f32.mrf.mxu1  ;;  %v2312_v37 = vsel %vm8912_vm11, %v2307_v6, %v2311_v36 }
 0x115   : > { %v1712_v33 = vadd.f32 %v1711_v25, %v1663_v18  ;;  %v9285_v18 = vpack.c.b16 %v2927_v29, %v2926_v54  ;;  %v9295_v25 = vunpack.c.l.b16 %v2312_v37  ;;  %v2616_v54 = vshll.u32 %v9283_v4, 16 }
 0x116   : > { %v2613_v28 = vor.u32 %v2612_v20, %v2608_v11 }
 0x117   : > { %3270 = vmatmul.bf16.vlgmr.msrb.gmra.mxu1 %v2876_v9  ;;  %v1761_v9 = vadd.f32 %v1760_v35, %v1712_v33  ;;  %v2742_v35 = vld [vmem:[#allocation2 + $0x24] sm:$0xe]  ;;  %v2618_v29 = vrot.slane %v2616_v54, 5  ;;  %v2846_v36 = vpack.c.b16 %v9295_v25, %v9293_v13 }
 0x118   : > { %v7152_v61 = vrot.slane %v2742_v35, 9  ;;  %v2614_v55 = vrot.slane %v2613_v28, 4 }
 0x119   : > { %v1762_v60 = vpop.f32.mrf.mxu2  ;;  %v1667_v5 = vpop.f32.mrf.mxu0 }
 0x11a   : > { %3368 = vmatmul.bf16.vlgmr.msrb.gmra.mxu3 %v2940_v56  ;;  %v2602_v56 = vrot.slane %v2600_v3, 5  ;;  %v1668_v49 = vadd.f32 %v9246_v1, %v1667_v5  ;;  %v2789_v59 = vsel %vm9183_vm14, %v7152_v61, %v2788_v23  ;;  %v9328_v3 = vld [vmem:[#allocation2 + $0x28] sm:$0xf]  ;;  %v2619_v7 = vsel %vm8912_vm11, %v2614_v55, %v2618_v29 }
 0x11b   : > { %v2897_v14 = vunpack.c.l.b16 %v2619_v7  ;;  %v2928_v4 = vunpack.c.l.b16 %v2789_v59 }
 0x11c   : > { %v1713_v58 = vpop.f32.mrf.mxu1  ;;  %3226 = vmatmul.bf16.gmra.mxu0 %v2845_v53  ;;  %v2603_v17 = vor.u32 %v2602_v56, %v2599_v47  ;;  %v2790_v47 = vrot.slane %v2788_v23, 4 }
 0x11d   : > { %v1809_v21 = vpop.f32.mrf.mxu3  ;;  %v1714_v41 = vadd.f32 %v1713_v58, %v1665_v57  ;;  %v2327_v58 = vshrl.u32 %v9328_v3, 16 }
 0x11e   : > { %3324 = vmatmul.bf16.gmra.mxu2 %v2909_v39  ;;  %v9298_v26 = vadd.f32 %v1809_v21, %v1761_v9  ;;  %v2604_v53 = vrot.slane %v2603_v17, 4  ;;  %v2323_v9 = vshll.u32 %v9328_v3, 16  ;;  %v2792_v10 = vsel %vm9183_vm14, %v2790_v47, %v2791_v34 }
 0x11f   : > { %v1763_v2 = vadd.f32 %v1762_v60, %v1714_v41  ;;  %v2226_v60 = vld [vmem:[#allocation2 + $0x24] sm:$0xf]  ;;  %v2929_v16 = vunpack.c.l.b16 %v2792_v10  ;;  %v2329_v41 = vrot.slane %v2327_v58, 4  ;;  %v2333_v17 = vshll.u32 %v9333_v52, 16 }
 0x120   : > { %v1865_v57 = vrot.slane %v9298_v26, 1  ;;  %v1866_v30 = vrot.slane %v9298_v26, 2  ;;  %v1867_v32 = vrot.slane %v9298_v26, 3  ;;  %2089 = vst [vmem:[%s9308_s11] sm:$0x1] %v9298_v26  ;;  %v1868_v38 = vrot.slane %v9298_v26, 4 }
 0x121   : > { %v1765_v33 = vpop.f32.mrf.mxu2  ;;  %v1869_v39 = vrot.slane %v9298_v26, 5  ;;  %v1870_v31 = vrot.slane %v9298_v26, 6  ;;  %v1669_v40 = vpop.f32.mrf.mxu0  ;;  %v2609_v42 = vsel %vm8912_vm11, %v2604_v53, %v2608_v11  ;;  %v1871_v45 = vrot.slane %v9298_v26, 7  ;;  %v9344_v11 = vld [vmem:[#allocation2 + $0x30] sm:$0xf] }
 0x122   : > { %2090 = vst [vmem:[%s9308_s11 + $0x2] sm:$0x1] %v1865_v57  ;;  %v1670_v62 = vadd.f32 %v9246_v1, %v1669_v40  ;;  %v9326_v0 = vunpack.c.l.b16 %v2609_v42  ;;  %v2314_v5 = vshrl.u32 %v2226_v60, 16  ;;  %v2317_v8 = vshll.u32 %v2226_v60, 16 }
 0x123   : > { %2091 = vst [vmem:[%s9308_s11 + $0x4] sm:$0x1] %v1866_v30  ;;  %v2325_v21 = vrot.slane %v2323_v9, 5  ;;  %v8001_v30 = vld [vmem:[#allocation9 + $0x268] sm:$0xff]  ;;  %v2335_v24 = vrot.slane %v2333_v17, 5  ;;  %v2494_v40 = vrot.slane %v9333_v52, 5 }
 0x124   : > { %v1716_v50 = vpop.f32.mrf.mxu1  ;;  %2092 = vst [vmem:[%s9308_s11 + $0x6] sm:$0x1] %v1867_v32  ;;  %v2316_v56 = vrot.slane %v2314_v5, 4  ;;  %v2319_v35 = vrot.slane %v2317_v8, 5  ;;  %v2910_v57 = vpack.c.b16 %v2897_v14, %v9326_v0  ;;  %v9361_v32 = vpack.c.b16 %v2929_v16, %v2928_v4  ;;  %4678 = vmatpush.bf16.msra.mxu1 %v8001_v30  ;;  %v9390_v52 = vld [vmem:[#allocation2 + $0x38] sm:$0x1] }
 0x125   : > { %v1717_v6 = vadd.f32 %v1716_v50, %v1668_v49  ;;  %2093 = vst [vmem:[%s9308_s11 + $0x8] sm:$0x1] %v1868_v38  ;;  %v1811_v51 = vpop.f32.mrf.mxu3  ;;  %v2436_v49 = vld [vmem:[#allocation2 + $0x24] sm:$0xe]  ;;  %v2330_v34 = vor.u32 %v2329_v41, %v2325_v21  ;;  %v2621_v42 = vshrl.u32 %v9344_v11, 16  ;;  %v7992_v17 = vld [vmem:[#allocation9 + $0x220] sm:$0xff] }
 0x126   : > { %2094 = vst [vmem:[%s9308_s11 + $0xa] sm:$0x1] %v1869_v39  ;;  %v9341_v37 = vadd.f32 %v1811_v51, %v1763_v2  ;;  %v7145_v39 = vrot.slane %v2436_v49, 9  ;;  %v2743_v8 = vld [vmem:[#allocation2 + $0x30] sm:$0xe]  ;;  %v8008_v49 = vld [vmem:[#allocation9 + $0x2a0] sm:$0xff]  ;;  %4630 = vmatpush.bf16.msra.mxu0 %v7992_v17 }
 0x127   : > { %3275 = vmatmul.bf16.gmra.mxu1 %v9261_v19  ;;  %2095 = vst [vmem:[%s9308_s11 + $0xc] sm:$0x1] %v1870_v31  ;;  %v1766_v20 = vadd.f32 %v1765_v33, %v1717_v6  ;;  %v2320_v33 = vor.u32 %v2319_v35, %v2316_v56  ;;  %v2491_v31 = vrot.slane %v9328_v3, 5  ;;  %v2623_v50 = vrot.slane %v2621_v42, 4  ;;  %4728 = vmatpush.bf16.msra.mxu2 %v8008_v49  ;;  %v2229_v30 = vld [vmem:[#allocation2 + $0x30] sm:$0xf] }
 0x128   : > { %2096 = vst [vmem:[%s9308_s11 + $0xe] sm:$0x1] %v1871_v45  ;;  %v1872_v54 = vrot.slane %v9341_v37, 1  ;;  %v1873_v26 = vrot.slane %v9341_v37, 2  ;;  %v1874_v19 = vrot.slane %v9341_v37, 3  ;;  %v1875_v28 = vrot.slane %v9341_v37, 4 }
 0x129   : > { %v1767_v61 = vpop.f32.mrf.mxu2  ;;  %v1876_v2 = vrot.slane %v9341_v37, 5  ;;  %v1877_v53 = vrot.slane %v9341_v37, 6  ;;  %v1878_v29 = vrot.slane %v9341_v37, 7  ;;  %2097 = vst [vmem:[%s9308_s11 + $0x10] sm:$0x1] %v9341_v37  ;;  %v1672_v23 = vpop.f32.mrf.mxu0  ;;  %v2321_v46 = vrot.slane %v2320_v33, 4 }
 0x12a   : > { %2098 = vst [vmem:[%s9308_s11 + $0x12] sm:$0x1] %v1872_v54  ;;  %3373 = vmatmul.bf16.gmra.mxu3 %v9285_v18  ;;  %v1673_v18 = vadd.f32 %v9246_v1, %v1672_v23  ;;  %v2331_v45 = vrot.slane %v2330_v34, 4  ;;  %v2492_v59 = vsel %vm9183_vm14, %v7145_v39, %v2491_v31  ;;  %v2493_v60 = vrot.slane %v2491_v31, 4  ;;  %v8016_v54 = vld [vmem:[#allocation9 + $0x2e0] sm:$0xff] }
 0x12b   : > { %2099 = vst [vmem:[%s9308_s11 + $0x14] sm:$0x1] %v1873_v26  ;;  %v2326_v13 = vsel %vm8912_vm11, %v2321_v46, %v2325_v21  ;;  %v2866_v7 = vunpack.c.l.b16 %v2492_v59  ;;  %4777 = vmatpush.bf16.msra.mxu3 %v8016_v54  ;;  %v2338_v59 = vshrl.u32 %v2229_v30, 16 }
 0x12c   : > { %v1718_v38 = vpop.f32.mrf.mxu1  ;;  %2100 = vst [vmem:[%s9308_s11 + $0x16] sm:$0x1] %v1874_v19  ;;  %3231 = vmatmul.bf16.gmra.mxu0 %v2846_v36  ;;  %v2336_v25 = vsel %vm8912_vm11, %v2331_v45, %v2335_v24  ;;  %v2534_v36 = vld [vmem:[#allocation2 + $0x34] sm:$0xf]  ;;  %v9384_v3 = vunpack.c.l.b16 %v2326_v13  ;;  %v2495_v6 = vsel %vm9183_vm14, %v2493_v60, %v2494_v40  ;;  %v2341_v60 = vshll.u32 %v2229_v30, 16 }
 0x12d   : > { %v1719_v43 = vadd.f32 %v1718_v38, %v1670_v62  ;;  %2101 = vst [vmem:[%s9308_s11 + $0x18] sm:$0x1] %v1875_v28  ;;  %v1814_v55 = vpop.f32.mrf.mxu3  ;;  %v2624_v62 = vshll.u32 %v9344_v11, 16  ;;  %v9386_v5 = vunpack.c.l.b16 %v2336_v25  ;;  %v2630_v41 = vshll.u32 %v2534_v36, 16 }
 0x12e   : > { %3329 = vmatmul.bf16.gmra.mxu2 %v2910_v57  ;;  %2102 = vst [vmem:[%s9308_s11 + $0x1a] sm:$0x1] %v1876_v2  ;;  %v9377_v0 = vadd.f32 %v1814_v55, %v1766_v20  ;;  %v2867_v20 = vunpack.c.l.b16 %v2495_v6  ;;  %v2634_v19 = vshrl.u32 %v2534_v36, 16  ;;  %v2640_v28 = vshll.u32 %v9390_v52, 16  ;;  %v9424_v55 = vld [vmem:[#allocation2 + $0x38] sm:$0x1] }
 0x12f   : > { %v1768_v47 = vadd.f32 %v1767_v61, %v1719_v43  ;;  %2103 = vst [vmem:[%s9308_s11 + $0x1c] sm:$0x1] %v1877_v53  ;;  %v2847_v35 = vpack.c.b16 %v9386_v5, %v9384_v3  ;;  %v2626_v21 = vrot.slane %v2624_v62, 5  ;;  %v7153_v61 = vrot.slane %v2743_v8, 9 }
 0x130   : > { %2104 = vst [vmem:[%s9308_s11 + $0x1e] sm:$0x1] %v1878_v29  ;;  %v1879_v9 = vrot.slane %v9377_v0, 1  ;;  %v1880_v51 = vrot.slane %v9377_v0, 2  ;;  %v1881_v14 = vrot.slane %v9377_v0, 3  ;;  %v1882_v10 = vrot.slane %v9377_v0, 4 }
 0x131   : > { %v1770_v4 = vpop.f32.mrf.mxu2  ;;  %v1883_v58 = vrot.slane %v9377_v0, 5  ;;  %v1884_v37 = vrot.slane %v9377_v0, 6  ;;  %v1885_v16 = vrot.slane %v9377_v0, 7  ;;  %2105 = vst [vmem:[%s9308_s11 + $0x40] sm:$0x1] %v9377_v0  ;;  %v1674_v56 = vpop.f32.mrf.mxu0  ;;  %v2795_v2 = vrot.slane %v2534_v36, 5 }
 0x132   : > { %2106 = vst [vmem:[%s9308_s11 + $0x42] sm:$0x1] %v1879_v9  ;;  %v9406_v11 = vadd.f32 %v9246_v1, %v1674_v56  ;;  %v9411_v29 = vpack.c.b16 %v2867_v20, %v2866_v7  ;;  %v2627_v23 = vor.u32 %v2626_v21, %v2623_v50  ;;  %v2632_v57 = vrot.slane %v2630_v41, 5  ;;  %v2437_v21 = vld [vmem:[#allocation2 + $0x30] sm:$0xe] }
 0x133   : > { %2107 = vst [vmem:[%s9308_s11 + $0x44] sm:$0x1] %v1880_v51  ;;  %v2636_v34 = vrot.slane %v2634_v19, 4  ;;  %v2642_v24 = vrot.slane %v2640_v28, 5  ;;  %v2796_v38 = vsel %vm9183_vm14, %v7153_v61, %v2795_v2  ;;  %v2797_v39 = vrot.slane %v2795_v2, 4 }
 0x134   : > { %v1721_v26 = vpop.f32.mrf.mxu1  ;;  %2108 = vst [vmem:[%s9308_s11 + $0x46] sm:$0x1] %v1881_v14  ;;  %v2628_v42 = vrot.slane %v2627_v23, 4  ;;  %v2798_v43 = vrot.slane %v9390_v52, 5  ;;  %v2930_v45 = vunpack.c.l.b16 %v2796_v38  ;;  %v8000_v52 = vld [vmem:[#allocation9 + $0x260] sm:$0xff]  ;;  %v2357_v20 = vshll.u32 %v9424_v55, 16 }
 0x135   : > { %v1722_v53 = vadd.f32 %v1721_v26, %v1673_v18  ;;  %2109 = vst [vmem:[%s9308_s11 + $0x48] sm:$0x1] %v1882_v10  ;;  %v1816_v33 = vpop.f32.mrf.mxu3  ;;  %v9421_v18 = vld [vmem:[#allocation2 + $0x34] sm:$0xf]  ;;  %v2637_v46 = vor.u32 %v2636_v34, %v2632_v57  ;;  %4679 = vmatpush.bf16.msra.mxu1 %v8000_v52  ;;  %v2536_v28 = vld [vmem:[#allocation2 + $0x3c] sm:$0xf] }
 0x136   : > { %2110 = vst [vmem:[%s9308_s11 + $0x4a] sm:$0x1] %v1883_v58  ;;  %v9417_v31 = vadd.f32 %v1816_v33, %v1768_v47  ;;  %v2633_v7 = vsel %vm8912_vm11, %v2628_v42, %v2632_v57  ;;  %v2799_v14 = vsel %vm9183_vm14, %v2797_v39, %v2798_v43  ;;  %v2340_v58 = vrot.slane %v2338_v59, 4  ;;  %v9464_v57 = vld [vmem:[#allocation2 + $0x40] sm:$0xf] }
 0x137   : > { %3280 = vmatmul.bf16.gmra.mxu1 %v9300_v27  ;;  %v1771_v40 = vadd.f32 %v1770_v4, %v1722_v53  ;;  %2111 = vst [vmem:[%s9308_s11 + $0x4c] sm:$0x1] %v1884_v37  ;;  %v2638_v9 = vrot.slane %v2637_v46, 4  ;;  %v2898_v51 = vunpack.c.l.b16 %v2633_v7  ;;  %v2931_v4 = vunpack.c.l.b16 %v2799_v14 }
 0x138   : > { %2112 = vst [vmem:[%s9308_s11 + $0x4e] sm:$0x1] %v1885_v16  ;;  %v1886_v50 = vrot.slane %v9417_v31, 1  ;;  %v1887_v27 = vrot.slane %v9417_v31, 2  ;;  %v1888_v62 = vrot.slane %v9417_v31, 3  ;;  %v1889_v0 = vrot.slane %v9417_v31, 4 }
 0x139   : > { %v1772_v47 = vpop.f32.mrf.mxu2  ;;  %v1890_v13 = vrot.slane %v9417_v31, 5  ;;  %v1891_v25 = vrot.slane %v9417_v31, 6  ;;  %v1892_v36 = vrot.slane %v9417_v31, 7  ;;  %2113 = vst [vmem:[%s9308_s11 + $0x50] sm:$0x1] %v9417_v31  ;;  %v1677_v6 = vpop.f32.mrf.mxu0  ;;  %v2343_v37 = vrot.slane %v2341_v60, 5 }
 0x13a   : > { %2114 = vst [vmem:[%s9308_s11 + $0x52] sm:$0x1] %v1886_v50  ;;  %3378 = vmatmul.bf16.gmra.mxu3 %v9361_v32  ;;  %v9441_v8 = vadd.f32 %v9246_v1, %v1677_v6  ;;  %v2347_v16 = vshll.u32 %v9421_v18, 16  ;;  %v2643_v56 = vsel %vm8912_vm11, %v2638_v9, %v2642_v24  ;;  %v2351_v49 = vshrl.u32 %v9421_v18, 16  ;;  %v9486_v50 = vld [vmem:[#allocation2 + $0x44] sm:$0x1] }
 0x13b   : > { %2115 = vst [vmem:[%s9308_s11 + $0x54] sm:$0x1] %v1887_v27  ;;  %v2899_v17 = vunpack.c.l.b16 %v2643_v56  ;;  %v9457_v54 = vpack.c.b16 %v2931_v4, %v2930_v45  ;;  %v2359_v19 = vrot.slane %v2357_v20, 5  ;;  %v7146_v53 = vrot.slane %v2437_v21, 9  ;;  %v7991_v27 = vld [vmem:[#allocation9 + $0x218] sm:$0xff] }
 0x13c   : > { %v1723_v10 = vpop.f32.mrf.mxu1  ;;  %2116 = vst [vmem:[%s9308_s11 + $0x56] sm:$0x1] %v1888_v62  ;;  %3236 = vmatmul.bf16.gmra.mxu0 %v2847_v35  ;;  %v2349_v26 = vrot.slane %v2347_v16, 5  ;;  %v2353_v35 = vrot.slane %v2351_v49, 4  ;;  %v2498_v23 = vrot.slane %v9421_v18, 5  ;;  %v8007_v18 = vld [vmem:[#allocation9 + $0x298] sm:$0xff] }
 0x13d   : > { %v1724_v32 = vadd.f32 %v1723_v10, %v9406_v11  ;;  %2117 = vst [vmem:[%s9308_s11 + $0x58] sm:$0x1] %v1889_v0  ;;  %v1819_v41 = vpop.f32.mrf.mxu3  ;;  %v2344_v11 = vor.u32 %v2343_v37, %v2340_v58  ;;  %v2911_v61 = vpack.c.b16 %v2899_v17, %v2898_v51  ;;  %v8015_v62 = vld [vmem:[#allocation9 + $0x2d8] sm:$0xff]  ;;  %4729 = vmatpush.bf16.msra.mxu2 %v8007_v18  ;;  %v2648_v52 = vshll.u32 %v2536_v28, 16 }
 0x13e   : > { %2118 = vst [vmem:[%s9308_s11 + $0x5a] sm:$0x1] %v1890_v13  ;;  %v9460_v3 = vadd.f32 %v1819_v41, %v1771_v40  ;;  %v2354_v45 = vor.u32 %v2353_v35, %v2349_v26  ;;  %v2499_v60 = vsel %vm9183_vm14, %v7146_v53, %v2498_v23  ;;  %v2501_v13 = vrot.slane %v9424_v55, 5  ;;  %4631 = vmatpush.bf16.msra.mxu0 %v7991_v27  ;;  %v9505_v41 = vld [vmem:[#allocation2 + $0x3c] sm:$0xf] }
 0x13f   : > { %v1773_v5 = vadd.f32 %v1772_v47, %v1724_v32  ;;  %2119 = vst [vmem:[%s9308_s11 + $0x5c] sm:$0x1] %v1891_v25  ;;  %v2345_v2 = vrot.slane %v2344_v11, 4  ;;  %3334 = vmatmul.bf16.gmra.mxu2 %v2911_v61  ;;  %v2500_v47 = vrot.slane %v2498_v23, 4  ;;  %v2868_v25 = vunpack.c.l.b16 %v2499_v60  ;;  %4778 = vmatpush.bf16.msra.mxu3 %v8015_v62  ;;  %v2744_v32 = vld [vmem:[#allocation2 + $0x3c] sm:$0xe] }
 0x140   : > { %2120 = vst [vmem:[%s9308_s11 + $0x5e] sm:$0x1] %v1892_v36  ;;  %v1893_v30 = vrot.slane %v9460_v3, 1  ;;  %v1894_v33 = vrot.slane %v9460_v3, 2  ;;  %v1895_v34 = vrot.slane %v9460_v3, 3  ;;  %v1896_v24 = vrot.slane %v9460_v3, 4 }
 0x141   : > { %v1775_v38 = vpop.f32.mrf.mxu2  ;;  %v1897_v39 = vrot.slane %v9460_v3, 5  ;;  %v1898_v31 = vrot.slane %v9460_v3, 6  ;;  %v1899_v40 = vrot.slane %v9460_v3, 7  ;;  %2121 = vst [vmem:[%s9308_s11 + $0x80] sm:$0x1] %v9460_v3  ;;  %v1679_v42 = vpop.f32.mrf.mxu0  ;;  %v2350_v43 = vsel %vm8912_vm11, %v2345_v2, %v2349_v26  ;;  %v7999_v2 = vld [vmem:[#allocation9 + $0x258] sm:$0xff] }
 0x142   : > { %2122 = vst [vmem:[%s9308_s11 + $0x82] sm:$0x1] %v1893_v30  ;;  %v9480_v46 = vadd.f32 %v9246_v1, %v1679_v42  ;;  %v9482_v59 = vunpack.c.l.b16 %v2350_v43  ;;  %v2645_v36 = vshrl.u32 %v2536_v28, 16  ;;  %v2355_v7 = vrot.slane %v2354_v45, 4  ;;  %4680 = vmatpush.bf16.msra.mxu1 %v7999_v2 }
 0x143   : > { %2123 = vst [vmem:[%s9308_s11 + $0x84] sm:$0x1] %v1894_v33  ;;  %v2654_v9 = vshll.u32 %v9464_v57, 16  ;;  %v2502_v14 = vsel %vm9183_vm14, %v2500_v47, %v2501_v13  ;;  %v2658_v10 = vshrl.u32 %v9464_v57, 16  ;;  %v2664_v4 = vshll.u32 %v9486_v50, 16 }
 0x144   : > { %v1726_v0 = vpop.f32.mrf.mxu1  ;;  %2124 = vst [vmem:[%s9308_s11 + $0x86] sm:$0x1] %v1895_v34  ;;  %v2647_v55 = vrot.slane %v2645_v36, 4  ;;  %v2360_v37 = vsel %vm8912_vm11, %v2355_v7, %v2359_v19  ;;  %v2869_v16 = vunpack.c.l.b16 %v2502_v14  ;;  %v2650_v49 = vrot.slane %v2648_v52, 5  ;;  %v9525_v34 = vld [vmem:[#allocation2 + $0x40] sm:$0xf] }
 0x145   : > { %v1727_v6 = vadd.f32 %v1726_v0, %v9441_v8  ;;  %2125 = vst [vmem:[%s9308_s11 + $0x88] sm:$0x1] %v1896_v24  ;;  %v1821_v51 = vpop.f32.mrf.mxu3  ;;  %v2837_v56 = vunpack.c.l.b16 %v2360_v37  ;;  %v2656_v20 = vrot.slane %v2654_v9, 5  ;;  %v2660_v21 = vrot.slane %v2658_v10, 4  ;;  %v9543_v47 = vld [vmem:[#allocation2 + $0x44] sm:$0x1] }
 0x146   : > { %2126 = vst [vmem:[%s9308_s11 + $0x8a] sm:$0x1] %v1897_v39  ;;  %v9499_v8 = vadd.f32 %v1821_v51, %v1773_v5  ;;  %v9523_v23 = vpack.c.b16 %v2869_v16, %v2868_v25  ;;  %v2651_v30 = vor.u32 %v2650_v49, %v2647_v55  ;;  %v2666_v33 = vrot.slane %v2664_v4, 5  ;;  %v2438_v7 = vld [vmem:[#allocation2 + $0x3c] sm:$0xe]  ;;  %v8006_v16 = vld [vmem:[#allocation9 + $0x290] sm:$0xff] }
 0x147   : > { %3285 = vmatmul.bf16.gmra.mxu1 %v9411_v29  ;;  %v1776_v58 = vadd.f32 %v1775_v38, %v1727_v6  ;;  %2127 = vst [vmem:[%s9308_s11 + $0x8c] sm:$0x1] %v1898_v31  ;;  %v2848_v61 = vpack.c.b16 %v2837_v56, %v9482_v59  ;;  %v2661_v38 = vor.u32 %v2660_v21, %v2656_v20  ;;  %v7154_v39 = vrot.slane %v2744_v32, 9  ;;  %v9564_v21 = vld [vmem:[#allocation2 + $0x48] sm:$0xf] }
 0x148   : > { %2128 = vst [vmem:[%s9308_s11 + $0x8e] sm:$0x1] %v1899_v40  ;;  %v1900_v17 = vrot.slane %v9499_v8, 1  ;;  %v1901_v29 = vrot.slane %v9499_v8, 2  ;;  %v1902_v11 = vrot.slane %v9499_v8, 3  ;;  %v1903_v26 = vrot.slane %v9499_v8, 4  ;;  %4730 = vmatpush.bf16.msra.mxu2 %v8006_v16 }
 0x149   : > { %v1777_v3 = vpop.f32.mrf.mxu2  ;;  %v1904_v5 = vrot.slane %v9499_v8, 5  ;;  %v1905_v35 = vrot.slane %v9499_v8, 6  ;;  %v1906_v19 = vrot.slane %v9499_v8, 7  ;;  %2129 = vst [vmem:[%s9308_s11 + $0x90] sm:$0x1] %v9499_v8  ;;  %v1682_v28 = vpop.f32.mrf.mxu0  ;;  %v2802_v31 = vrot.slane %v9464_v57, 5 }
 0x14a   : > { %2130 = vst [vmem:[%s9308_s11 + $0x92] sm:$0x1] %v1900_v17  ;;  %3383 = vmatmul.bf16.gmra.mxu3 %v9457_v54  ;;  %v9521_v53 = vadd.f32 %v9246_v1, %v1682_v28  ;;  %v2805_v40 = vrot.slane %v9486_v50, 5  ;;  %v2652_v42 = vrot.slane %v2651_v30, 4  ;;  %v2362_v43 = vshrl.u32 %v9505_v41, 16 }
 0x14b   : > { %2131 = vst [vmem:[%s9308_s11 + $0x94] sm:$0x1] %v1901_v29  ;;  %v2365_v18 = vshll.u32 %v9505_v41, 16  ;;  %v2662_v59 = vrot.slane %v2661_v38, 4  ;;  %v2803_v57 = vsel %vm9183_vm14, %v7154_v39, %v2802_v31  ;;  %v2804_v60 = vrot.slane %v2802_v31, 4 }
 0x14c   : > { %v1728_v24 = vpop.f32.mrf.mxu1  ;;  %2132 = vst [vmem:[%s9308_s11 + $0x96] sm:$0x1] %v1902_v11  ;;  %3241 = vmatmul.bf16.gmra.mxu0 %v2848_v61  ;;  %v2371_v50 = vshll.u32 %v9525_v34, 16  ;;  %v2657_v62 = vsel %vm8912_vm11, %v2652_v42, %v2656_v20  ;;  %v2932_v0 = vunpack.c.l.b16 %v2803_v57  ;;  %v2364_v6 = vrot.slane %v2362_v43, 4  ;;  %v8014_v61 = vld [vmem:[#allocation9 + $0x2d0] sm:$0xff] }
 0x14d   : > { %v1729_v54 = vadd.f32 %v1728_v24, %v9480_v46  ;;  %2133 = vst [vmem:[%s9308_s11 + $0x98] sm:$0x1] %v1903_v26  ;;  %v1824_v45 = vpop.f32.mrf.mxu3  ;;  %v2667_v13 = vsel %vm8912_vm11, %v2662_v59, %v2666_v33  ;;  %v2900_v25 = vunpack.c.l.b16 %v2657_v62  ;;  %v2806_v36 = vsel %vm9183_vm14, %v2804_v60, %v2805_v40  ;;  %v9579_v40 = vld [vmem:[#allocation2 + $0x4c] sm:$0xf]  ;;  %v9584_v59 = vld [vmem:[#allocation2 + $0x48] sm:$0xe]  ;;  %4779 = vmatpush.bf16.msra.mxu3 %v8014_v61 }
 0x14e   : > { %2134 = vst [vmem:[%s9308_s11 + $0x9a] sm:$0x1] %v1904_v5  ;;  %v9539_v27 = vadd.f32 %v1824_v45, %v1776_v58  ;;  %v2901_v58 = vunpack.c.l.b16 %v2667_v13  ;;  %v2933_v32 = vunpack.c.l.b16 %v2806_v36  ;;  %v2367_v49 = vrot.slane %v2365_v18, 5  ;;  %v9582_v18 = vld [vmem:[#allocation2 + $0x50] sm:$0x1] }
 0x14f   : > { %v1778_v46 = vadd.f32 %v1777_v3, %v1729_v54  ;;  %2135 = vst [vmem:[%s9308_s11 + $0x9c] sm:$0x1] %v1905_v35  ;;  %v2373_v20 = vrot.slane %v2371_v50, 5  ;;  %v2375_v29 = vshrl.u32 %v9525_v34, 16  ;;  %v2381_v11 = vshll.u32 %v9543_v47, 16  ;;  %v7990_v3 = vld [vmem:[#allocation9 + $0x210] sm:$0xff] }
 0x150   : > { %2136 = vst [vmem:[%s9308_s11 + $0x9e] sm:$0x1] %v1906_v19  ;;  %v1907_v52 = vrot.slane %v9539_v27, 1  ;;  %v1908_v9 = vrot.slane %v9539_v27, 2  ;;  %v1909_v51 = vrot.slane %v9539_v27, 3  ;;  %v1910_v14 = vrot.slane %v9539_v27, 4  ;;  %4632 = vmatpush.bf16.msra.mxu0 %v7990_v3 }
 0x151   : > { %v1780_v55 = vpop.f32.mrf.mxu2  ;;  %v1911_v10 = vrot.slane %v9539_v27, 5  ;;  %v1912_v4 = vrot.slane %v9539_v27, 6  ;;  %v1913_v8 = vrot.slane %v9539_v27, 7  ;;  %2137 = vst [vmem:[%s9308_s11 + $0xc0] sm:$0x1] %v9539_v27  ;;  %v1684_v37 = vpop.f32.mrf.mxu0  ;;  %v2912_v17 = vpack.c.b16 %v2901_v58, %v2900_v25  ;;  %v7998_v25 = vld [vmem:[#allocation9 + $0x250] sm:$0xff] }
 0x152   : > { %2138 = vst [vmem:[%s9308_s11 + $0xc2] sm:$0x1] %v1907_v52  ;;  %v9562_v56 = vadd.f32 %v9246_v1, %v1684_v37  ;;  %v7147_v26 = vrot.slane %v2438_v7, 9  ;;  %v2944_v35 = vpack.c.b16 %v2933_v32, %v2932_v0  ;;  %v2368_v19 = vor.u32 %v2367_v49, %v2364_v6  ;;  %4681 = vmatpush.bf16.msra.mxu1 %v7998_v25  ;;  %v9644_v25 = vld [vmem:[#allocation2 + $0x50] sm:$0x1] }
 0x153   : > { %2139 = vst [vmem:[%s9308_s11 + $0xc4] sm:$0x1] %v1908_v9  ;;  %v2505_v28 = vrot.slane %v9525_v34, 5  ;;  %3339 = vmatmul.bf16.gmra.mxu2 %v2912_v17  ;;  %v2377_v30 = vrot.slane %v2375_v29, 4  ;;  %v2383_v33 = vrot.slane %v2381_v11, 5  ;;  %v2508_v24 = vrot.slane %v9543_v47, 5 }
 0x154   : > { %v1731_v41 = vpop.f32.mrf.mxu1  ;;  %2140 = vst [vmem:[%s9308_s11 + $0xc6] sm:$0x1] %v1909_v51  ;;  %v2669_v38 = vshrl.u32 %v9564_v21, 16  ;;  %v2369_v31 = vrot.slane %v2368_v19, 4  ;;  %v7155_v58 = vrot.slane %v9584_v59, 9  ;;  %v2812_v3 = vrot.slane %v9582_v18, 5 }
 0x155   : > { %v1732_v5 = vadd.f32 %v1731_v41, %v9521_v53  ;;  %2141 = vst [vmem:[%s9308_s11 + $0xc8] sm:$0x1] %v1910_v14  ;;  %v1826_v2 = vpop.f32.mrf.mxu3  ;;  %v2506_v34 = vsel %vm9183_vm14, %v7147_v26, %v2505_v28  ;;  %v2378_v54 = vor.u32 %v2377_v30, %v2373_v20  ;;  %v2507_v42 = vrot.slane %v2505_v28, 4 }
 0x156   : > { %2142 = vst [vmem:[%s9308_s11 + $0xca] sm:$0x1] %v1911_v10  ;;  %v1827_v39 = vadd.f32 %v1826_v2, %v1778_v46  ;;  %v2870_v43 = vunpack.c.l.b16 %v2506_v34  ;;  %v2671_v45 = vrot.slane %v2669_v38, 4  ;;  %v2374_v13 = vsel %vm8912_vm11, %v2369_v31, %v2373_v20 }
 0x157   : > { %3290 = vmatmul.bf16.gmra.mxu1 %v9523_v23  ;;  %v1781_v53 = vadd.f32 %v1780_v55, %v1732_v5  ;;  %2143 = vst [vmem:[%s9308_s11 + $0xcc] sm:$0x1] %v1912_v4  ;;  %v2379_v6 = vrot.slane %v2378_v54, 4  ;;  %v2838_v7 = vunpack.c.l.b16 %v2374_v13  ;;  %v2509_v52 = vsel %vm9183_vm14, %v2507_v42, %v2508_v24  ;;  %v2235_v5 = vld [vmem:[#allocation2 + $0x48] sm:$0xf] }
 0x158   : > { %2144 = vst [vmem:[%s9308_s11 + $0xce] sm:$0x1] %v1913_v8  ;;  %v1914_v23 = vrot.slane %v1827_v39, 1  ;;  %v1915_v57 = vrot.slane %v1827_v39, 2  ;;  %v1916_v60 = vrot.slane %v1827_v39, 3  ;;  %v1917_v50 = vrot.slane %v1827_v39, 4 }
 0x159   : > { %v1782_v27 = vpop.f32.mrf.mxu2  ;;  %v1918_v46 = vrot.slane %v1827_v39, 5  ;;  %v1919_v62 = vrot.slane %v1827_v39, 6  ;;  %v1920_v0 = vrot.slane %v1827_v39, 7  ;;  %2145 = vst [vmem:[%s9308_s11 + $0xd0] sm:$0x1] %v1827_v39  ;;  %v1687_v47 = vpop.f32.mrf.mxu0  ;;  %v2871_v51 = vunpack.c.l.b16 %v2509_v52 }
 0x15a   : > { %2146 = vst [vmem:[%s9308_s11 + $0xd2] sm:$0x1] %v1914_v23  ;;  %3388 = vmatmul.bf16.gmra.mxu3 %v2944_v35  ;;  %v9592_v36 = vadd.f32 %v9246_v1, %v1687_v47  ;;  %v2672_v14 = vshll.u32 %v9564_v21, 16  ;;  %v2678_v55 = vshll.u32 %v9579_v40, 16  ;;  %v2682_v10 = vshrl.u32 %v9579_v40, 16 }
 0x15b   : > { %2147 = vst [vmem:[%s9308_s11 + $0xd4] sm:$0x1] %v1915_v57  ;;  %v2384_v4 = vsel %vm8912_vm11, %v2379_v6, %v2383_v33  ;;  %v2688_v8 = vshll.u32 %v9582_v18, 16  ;;  %v2881_v32 = vpack.c.b16 %v2871_v51, %v2870_v43  ;;  %v2809_v26 = vrot.slane %v9579_v40, 5  ;;  %v9629_v40 = vld [vmem:[%s11044_s15] ss:$0 sm:$0xff] }
 0x15c   : > { %v1733_v9 = vpop.f32.mrf.mxu1  ;;  %2148 = vst [vmem:[%s9308_s11 + $0xd6] sm:$0x1] %v1916_v60  ;;  %v2839_v16 = vunpack.c.l.b16 %v2384_v4  ;;  %v2674_v49 = vrot.slane %v2672_v14, 5  ;;  %v2680_v20 = vrot.slane %v2678_v55, 5  ;;  %v2684_v17 = vrot.slane %v2682_v10, 4  ;;  %v8005_v43 = vld [vmem:[#allocation9 + $0x288] sm:$0xff] }
 0x15d   : > { %v1734_v1 = vadd.f32 %v1733_v9, %v9562_v56  ;;  %2149 = vst [vmem:[%s9308_s11 + $0xd8] sm:$0x1] %v1917_v50  ;;  %v1829_v37 = vpop.f32.mrf.mxu3  ;;  %v2690_v56 = vrot.slane %v2688_v8, 5  ;;  %v2810_v31 = vsel %vm9183_vm14, %v7155_v58, %v2809_v26  ;;  %v2811_v34 = vrot.slane %v2809_v26, 4  ;;  %v9634_v42 = vld [vmem:[#allocation2 + $0x4c] sm:$0xf]  ;;  %4731 = vmatpush.bf16.msra.mxu2 %v8005_v43 }
 0x15e   : > { %2150 = vst [vmem:[%s9308_s11 + $0xda] sm:$0x1] %v1918_v46  ;;  %v9608_v21 = vadd.f32 %v1829_v37, %v1781_v53  ;;  %v2849_v29 = vpack.c.b16 %v2839_v16, %v2838_v7  ;;  %v2675_v11 = vor.u32 %v2674_v49, %v2671_v45  ;;  %v2685_v53 = vor.u32 %v2684_v17, %v2680_v20  ;;  %v7989_v60 = vld [vmem:[#allocation9 + $0x208] sm:$0xff]  ;;  %v2439_v55 = vld [vmem:[#allocation2 + $0x48] sm:$0xe] }
 0x15f   : > { %v1783_v41 = vadd.f32 %v1782_v27, %v1734_v1  ;;  %2151 = vst [vmem:[%s9308_s11 + $0xdc] sm:$0x1] %v1919_v62  ;;  %v2934_v59 = vunpack.c.l.b16 %v2810_v31  ;;  %v2386_v23 = vshrl.u32 %v2235_v5, 16  ;;  %v2389_v57 = vshll.u32 %v2235_v5, 16  ;;  %v8013_v50 = vld [vmem:[#allocation9 + $0x2c8] sm:$0xff]  ;;  %4633 = vmatpush.bf16.msra.mxu0 %v7989_v60 }
 0x160   : > { %2152 = vst [vmem:[%s9308_s11 + $0xde] sm:$0x1] %v1920_v0  ;;  %v1921_v35 = vrot.slane %v9608_v21, 1  ;;  %v1922_v19 = vrot.slane %v9608_v21, 2  ;;  %v1923_v28 = vrot.slane %v9608_v21, 3  ;;  %v1924_v61 = vrot.slane %v9608_v21, 4  ;;  %3246 = vmatmul.bf16.gmra.mxu0 %v2849_v29  ;;  %4780 = vmatpush.bf16.msra.mxu3 %v8013_v50 }
 0x161   : > { %v1785_v2 = vpop.f32.mrf.mxu2  ;;  %v1925_v30 = vrot.slane %v9608_v21, 5  ;;  %v1926_v33 = vrot.slane %v9608_v21, 6  ;;  %v1927_v24 = vrot.slane %v9608_v21, 7  ;;  %2153 = vst [vmem:[%s9308_s11 + $0x100] sm:$0x1] %v9608_v21  ;;  %v2676_v38 = vrot.slane %v2675_v11, 4  ;;  %v1689_v39 = vpop.f32.mrf.mxu0 }
 0x162   : > { %2154 = vst [vmem:[%s9308_s11 + $0x102] sm:$0x1] %v1921_v35  ;;  %v9632_v54 = vadd.f32 %v9629_v40, %v1689_v39  ;;  %v2686_v46 = vrot.slane %v2685_v53, 4  ;;  %v2813_v0 = vsel %vm9183_vm14, %v2811_v34, %v2812_v3  ;;  %v2388_v6 = vrot.slane %v2386_v23, 4  ;;  %v9654_v58 = vld [vmem:[#allocation2 + $0x54] sm:$0xf] }
 0x163   : > { %2155 = vst [vmem:[%s9308_s11 + $0x104] sm:$0x1] %v1922_v19  ;;  %v2681_v45 = vsel %vm8912_vm11, %v2676_v38, %v2680_v20  ;;  %v2935_v13 = vunpack.c.l.b16 %v2813_v0  ;;  %v2391_v7 = vrot.slane %v2389_v57, 5  ;;  %v2395_v52 = vshll.u32 %v9634_v42, 16  ;;  %v7997_v11 = vld [vmem:[#allocation9 + $0x248] sm:$0xff] }
 0x164   : > { %v1736_v18 = vpop.f32.mrf.mxu1  ;;  %2156 = vst [vmem:[%s9308_s11 + $0x106] sm:$0x1] %v1923_v28  ;;  %v2902_v62 = vunpack.c.l.b16 %v2681_v45  ;;  %v2691_v9 = vsel %vm8912_vm11, %v2686_v46, %v2690_v56  ;;  %v2399_v14 = vshrl.u32 %v9634_v42, 16  ;;  %v2405_v35 = vshll.u32 %v9644_v25, 16  ;;  %4682 = vmatpush.bf16.msra.mxu1 %v7997_v11  ;;  %v2543_v53 = vld [vmem:[#allocation2 + $0x58] sm:$0xf] }
 0x165   : > { %v1737_v27 = vadd.f32 %v1736_v18, %v9592_v36  ;;  %2157 = vst [vmem:[%s9308_s11 + $0x108] sm:$0x1] %v1924_v61  ;;  %v1831_v47 = vpop.f32.mrf.mxu3  ;;  %v2903_v10 = vunpack.c.l.b16 %v2691_v9  ;;  %v2945_v1 = vpack.c.b16 %v2935_v13, %v2934_v59  ;;  %v2392_v4 = vor.u32 %v2391_v7, %v2388_v6  ;;  %v9683_v57 = vld [vmem:[#allocation2 + $0x5c] sm:$0x1]  ;;  %v2746_v60 = vld [vmem:[#allocation2 + $0x54] sm:$0xe] }
 0x166   : > { %2158 = vst [vmem:[%s9308_s11 + $0x10a] sm:$0x1] %v1925_v30  ;;  %v9648_v36 = vadd.f32 %v1831_v47, %v1783_v41  ;;  %v2397_v8 = vrot.slane %v2395_v52, 5  ;;  %v2401_v5 = vrot.slane %v2399_v14, 4  ;;  %v7148_v28 = vrot.slane %v2439_v55, 9 }
 0x167   : > { %3295 = vmatmul.bf16.gmra.mxu1 %v2881_v32  ;;  %v1786_v51 = vadd.f32 %v1785_v2, %v1737_v27  ;;  %2159 = vst [vmem:[%s9308_s11 + $0x10c] sm:$0x1] %v1926_v33  ;;  %v2913_v56 = vpack.c.b16 %v2903_v10, %v2902_v62  ;;  %v2393_v3 = vrot.slane %v2392_v4, 4  ;;  %v2512_v61 = vrot.slane %v9634_v42, 5 }
 0x168   : > { %2160 = vst [vmem:[%s9308_s11 + $0x10e] sm:$0x1] %v1927_v24  ;;  %v1928_v37 = vrot.slane %v9648_v36, 1  ;;  %v1929_v16 = vrot.slane %v9648_v36, 2  ;;  %v1930_v32 = vrot.slane %v9648_v36, 3  ;;  %v1931_v49 = vrot.slane %v9648_v36, 4 }
 0x169   : > { %v1787_v20 = vpop.f32.mrf.mxu2  ;;  %v1932_v21 = vrot.slane %v9648_v36, 5  ;;  %v1933_v41 = vrot.slane %v9648_v36, 6  ;;  %v1934_v17 = vrot.slane %v9648_v36, 7  ;;  %2161 = vst [vmem:[%s9308_s11 + $0x110] sm:$0x1] %v9648_v36  ;;  %v1692_v29 = vpop.f32.mrf.mxu0  ;;  %3344 = vmatmul.bf16.gmra.mxu2 %v2913_v56  ;;  %v2515_v2 = vrot.slane %v9644_v25, 5 }
 0x16a   : > { %2162 = vst [vmem:[%s9308_s11 + $0x112] sm:$0x1] %v1928_v37  ;;  %3393 = vmatmul.bf16.gmra.mxu3 %v2945_v1  ;;  %v1693_v26 = vadd.f32 %v9629_v40, %v1692_v29  ;;  %v2693_v30 = vshrl.u32 %v9654_v58, 16  ;;  %v2398_v24 = vsel %vm8912_vm11, %v2393_v3, %v2397_v8  ;;  %v2402_v38 = vor.u32 %v2401_v5, %v2397_v8  ;;  %v8004_v5 = vld [vmem:[#allocation9 + $0x280] sm:$0xff] }
 0x16b   : > { %2163 = vst [vmem:[%s9308_s11 + $0x114] sm:$0x1] %v1929_v16  ;;  %v2407_v39 = vrot.slane %v2405_v35, 5  ;;  %v2840_v34 = vunpack.c.l.b16 %v2398_v24  ;;  %v2513_v42 = vsel %vm9183_vm14, %v7148_v28, %v2512_v61  ;;  %v2514_v43 = vrot.slane %v2512_v61, 4  ;;  %v7988_v35 = vld [vmem:[#allocation9 + $0x200] sm:$0xff]  ;;  %4732 = vmatpush.bf16.msra.mxu2 %v8004_v5 }
 0x16c   : > { %v1738_v19 = vpop.f32.mrf.mxu1  ;;  %2164 = vst [vmem:[%s9308_s11 + $0x116] sm:$0x1] %v1930_v32  ;;  %v2695_v18 = vrot.slane %v2693_v30, 4  ;;  %v2403_v59 = vrot.slane %v2402_v38, 4  ;;  %v2872_v23 = vunpack.c.l.b16 %v2513_v42  ;;  %v2696_v27 = vshll.u32 %v9654_v58, 16  ;;  %4634 = vmatpush.bf16.msra.mxu0 %v7988_v35 }
 0x16d   : > { %v1739_v33 = vadd.f32 %v1738_v19, %v9632_v54  ;;  %2165 = vst [vmem:[%s9308_s11 + $0x118] sm:$0x1] %v1931_v49  ;;  %v1834_v31 = vpop.f32.mrf.mxu3  ;;  %v2516_v50 = vsel %vm9183_vm14, %v2514_v43, %v2515_v2  ;;  %v2702_v46 = vshll.u32 %v2543_v53, 16  ;;  %v2706_v62 = vshrl.u32 %v2543_v53, 16  ;;  %v8012_v2 = vld [vmem:[#allocation9 + $0x2c0] sm:$0xff] }
 0x16e   : > { %2166 = vst [vmem:[%s9308_s11 + $0x11a] sm:$0x1] %v1932_v21  ;;  %v9681_v45 = vadd.f32 %v1834_v31, %v1786_v51  ;;  %v2408_v9 = vsel %vm8912_vm11, %v2403_v59, %v2407_v39  ;;  %v2873_v55 = vunpack.c.l.b16 %v2516_v50  ;;  %v2698_v10 = vrot.slane %v2696_v27, 5  ;;  %v9714_v38 = vld [vmem:[#allocation2 + $0x58] sm:$0xf]  ;;  %4781 = vmatpush.bf16.msra.mxu3 %v8012_v2 }
 0x16f   : > { %v1788_v54 = vadd.f32 %v1787_v20, %v1739_v33  ;;  %2167 = vst [vmem:[%s9308_s11 + $0x11c] sm:$0x1] %v1933_v41  ;;  %v2841_v14 = vunpack.c.l.b16 %v2408_v9  ;;  %v2704_v1 = vrot.slane %v2702_v46, 5  ;;  %v2708_v8 = vrot.slane %v2706_v62, 4  ;;  %v2238_v41 = vld [vmem:[#allocation2 + $0x54] sm:$0xf] }
 0x170   : > { %2168 = vst [vmem:[%s9308_s11 + $0x11e] sm:$0x1] %v1934_v17  ;;  %v1935_v0 = vrot.slane %v9681_v45, 1  ;;  %v1936_v47 = vrot.slane %v9681_v45, 2  ;;  %v1937_v13 = vrot.slane %v9681_v45, 3  ;;  %v1938_v25 = vrot.slane %v9681_v45, 4 }
 0x171   : > { %v1790_v6 = vpop.f32.mrf.mxu2  ;;  %v1939_v7 = vrot.slane %v9681_v45, 5  ;;  %v1940_v52 = vrot.slane %v9681_v45, 6  ;;  %v1941_v36 = vrot.slane %v9681_v45, 7  ;;  %2169 = vst [vmem:[%s9308_s11 + $0x140] sm:$0x1] %v9681_v45  ;;  %v1694_v51 = vpop.f32.mrf.mxu0  ;;  %v2712_v58 = vshll.u32 %v9683_v57, 16 }
 0x172   : > { %2170 = vst [vmem:[%s9308_s11 + $0x142] sm:$0x1] %v1935_v0  ;;  %v7156_v37 = vrot.slane %v2746_v60, 9  ;;  %v2816_v16 = vrot.slane %v2543_v53, 5  ;;  %v2850_v49 = vpack.c.b16 %v2841_v14, %v2840_v34  ;;  %v2882_v20 = vpack.c.b16 %v2873_v55, %v2872_v23  ;;  %v9716_v39 = vld [vmem:[#allocation2 + $0x5c] sm:$0x1] }
 0x173   : > { %2171 = vst [vmem:[%s9308_s11 + $0x144] sm:$0x1] %v1936_v47  ;;  %v2699_v21 = vor.u32 %v2698_v10, %v2695_v18  ;;  %v2709_v56 = vor.u32 %v2708_v8, %v2704_v1  ;;  %v2714_v29 = vrot.slane %v2712_v58, 5  ;;  %v2819_v28 = vrot.slane %v9683_v57, 5  ;;  %v7996_v60 = vld [vmem:[#allocation9 + $0x240] sm:$0xff] }
 0x174   : > { %v1741_v4 = vpop.f32.mrf.mxu1  ;;  %2172 = vst [vmem:[%s9308_s11 + $0x146] sm:$0x1] %v1937_v13  ;;  %v2817_v11 = vsel %vm9183_vm14, %v7156_v37, %v2816_v16  ;;  %v2818_v3 = vrot.slane %v2816_v16, 4  ;;  %3251 = vmatmul.bf16.gmra.mxu0 %v2850_v49  ;;  %v1695_v24 = vadd.f32 %v9629_v40, %v1694_v51  ;;  %v2410_v53 = vshrl.u32 %v2238_v41, 16  ;;  %v2440_v0 = vld [vmem:[#allocation2 + $0x54] sm:$0xe]  ;;  %4683 = vmatpush.bf16.msra.mxu1 %v7996_v60 }
 0x175   : > { %v1742_v32 = vadd.f32 %v1741_v4, %v1693_v26  ;;  %2173 = vst [vmem:[%s9308_s11 + $0x148] sm:$0x1] %v1938_v25  ;;  %v1836_v17 = vpop.f32.mrf.mxu3  ;;  %v2700_v26 = vrot.slane %v2699_v21, 4  ;;  %v2936_v61 = vunpack.c.l.b16 %v2817_v11  ;;  %v2710_v30 = vrot.slane %v2709_v56, 4  ;;  %v2545_v8 = vld [vmem:[#allocation2 + $0x60] sm:$0xf] }
 0x176   : > { %2174 = vst [vmem:[%s9308_s11 + $0x14a] sm:$0x1] %v1939_v7  ;;  %v9709_v19 = vadd.f32 %v1836_v17, %v1788_v54  ;;  %v2820_v46 = vsel %vm9183_vm14, %v2818_v3, %v2819_v28  ;;  %v2413_v7 = vshll.u32 %v2238_v41, 16  ;;  %v2423_v9 = vshrl.u32 %v9714_v38, 16  ;;  %v9743_v49 = vld [vmem:[#allocation2 + $0x64] sm:$0xf] }
 0x177   : > { %3300 = vmatmul.bf16.gmra.mxu1 %v2882_v20  ;;  %2175 = vst [vmem:[%s9308_s11 + $0x14c] sm:$0x1] %v1940_v52  ;;  %v1791_v33 = vadd.f32 %v1790_v6, %v1742_v32  ;;  %v2705_v23 = vsel %vm8912_vm11, %v2700_v26, %v2704_v1  ;;  %v2715_v50 = vsel %vm8912_vm11, %v2710_v30, %v2714_v29  ;;  %v2937_v13 = vunpack.c.l.b16 %v2820_v46  ;;  %v8043_v46 = vld [vmem:[#allocation9 + $0x3b8] sm:$0xff] }
 0x178   : > { %2176 = vst [vmem:[%s9308_s11 + $0x14e] sm:$0x1] %v1941_v36  ;;  %v1942_v31 = vrot.slane %v9709_v19, 1  ;;  %v1943_v34 = vrot.slane %v9709_v19, 2  ;;  %v1944_v42 = vrot.slane %v9709_v19, 3  ;;  %v1945_v43 = vrot.slane %v9709_v19, 4  ;;  %6283 = vmatpush.bf16.msrb.mxu2 %v8043_v46 }
 0x179   : > { %v1792_v18 = vpop.f32.mrf.mxu2  ;;  %v1946_v45 = vrot.slane %v9709_v19, 5  ;;  %v1947_v54 = vrot.slane %v9709_v19, 6  ;;  %v1948_v59 = vrot.slane %v9709_v19, 7  ;;  %2177 = vst [vmem:[%s9308_s11 + $0x150] sm:$0x1] %v9709_v19  ;;  %v1697_v57 = vpop.f32.mrf.mxu0  ;;  %v2904_v27 = vunpack.c.l.b16 %v2705_v23 }
 0x17a   : > { %2178 = vst [vmem:[%s9308_s11 + $0x152] sm:$0x1] %v1942_v31  ;;  %v1698_v62 = vadd.f32 %v9629_v40, %v1697_v57  ;;  %v2905_v47 = vunpack.c.l.b16 %v2715_v50  ;;  %v2412_v6 = vrot.slane %v2410_v53, 4  ;;  %v2419_v36 = vshll.u32 %v9714_v38, 16  ;;  %v9760_v31 = vld [vmem:[#allocation2 + $0x68] sm:$0x1] }
 0x17b   : > { %2179 = vst [vmem:[%s9308_s11 + $0x154] sm:$0x1] %v1943_v34  ;;  %v2429_v51 = vshll.u32 %v9716_v39, 16  ;;  %v2946_v55 = vpack.c.b16 %v2937_v13, %v2936_v61  ;;  %v2415_v1 = vrot.slane %v2413_v7, 5  ;;  %v7149_v4 = vrot.slane %v2440_v0, 9 }
 0x17c   : > { %v1743_v25 = vpop.f32.mrf.mxu1  ;;  %2180 = vst [vmem:[%s9308_s11 + $0x156] sm:$0x1] %v1944_v42  ;;  %v2914_v14 = vpack.c.b16 %v2905_v47, %v2904_v27  ;;  %v2421_v16 = vrot.slane %v2419_v36, 5  ;;  %v2425_v32 = vrot.slane %v2423_v9, 4  ;;  %v2519_v41 = vrot.slane %v9714_v38, 5 }
 0x17d   : > { %v1744_v52 = vadd.f32 %v1743_v25, %v1695_v24  ;;  %2181 = vst [vmem:[%s9308_s11 + $0x158] sm:$0x1] %v1945_v43  ;;  %v1839_v10 = vpop.f32.mrf.mxu3  ;;  %3398 = vmatmul.bf16.gmra.mxu3 %v2946_v55  ;;  %v2416_v20 = vor.u32 %v2415_v1, %v2412_v6  ;;  %v2431_v21 = vrot.slane %v2429_v51, 5  ;;  %v2522_v17 = vrot.slane %v9716_v39, 5  ;;  %v8027_v25 = vld [vmem:[#allocation9 + $0x338] sm:$0xff] }
 0x17e   : > { %2182 = vst [vmem:[%s9308_s11 + $0x15a] sm:$0x1] %v1946_v45  ;;  %v1840_v58 = vadd.f32 %v1839_v10, %v1791_v33  ;;  %3349 = vmatmul.bf16.gmra.mxu2 %v2914_v14  ;;  %v2426_v2 = vor.u32 %v2425_v32, %v2421_v16  ;;  %v2520_v30 = vsel %vm9183_vm14, %v7149_v4, %v2519_v41  ;;  %v2521_v33 = vrot.slane %v2519_v41, 4  ;;  %v8051_v6 = vld [vmem:[#allocation9 + $0x3f8] sm:$0xff]  ;;  %v9780_v4 = vld [vmem:[#allocation2 + $0xc] sm:$0xf] }
 0x17f   : > { %v1793_v37 = vadd.f32 %v1792_v18, %v1744_v52  ;;  %2183 = vst [vmem:[%s9308_s11 + $0x15c] sm:$0x1] %v1947_v54  ;;  %v2417_v28 = vrot.slane %v2416_v20, 4  ;;  %v2717_v24 = vshrl.u32 %v2545_v8, 16  ;;  %v2874_v53 = vunpack.c.l.b16 %v2520_v30  ;;  %6185 = vmatpush.bf16.msrb.mxu0 %v8027_v25  ;;  %6332 = vmatpush.bf16.msrb.mxu3 %v8051_v6  ;;  %v8035_v20 = vld [vmem:[#allocation9 + $0x378] sm:$0xff] }
 0x180   : > { %2184 = vst [vmem:[%s9308_s11 + $0x15e] sm:$0x1] %v1948_v59  ;;  %v1949_v56 = vrot.slane %v1840_v58, 1  ;;  %v1950_v29 = vrot.slane %v1840_v58, 2  ;;  %v1951_v11 = vrot.slane %v1840_v58, 3  ;;  %v1952_v3 = vrot.slane %v1840_v58, 4  ;;  %6234 = vmatpush.bf16.msrb.mxu1 %v8035_v20 }
 0x181   : > { %v9749_v5 = vpop.f32.mrf.mxu2  ;;  %v1953_v35 = vrot.slane %v1840_v58, 5  ;;  %v1954_v19 = vrot.slane %v1840_v58, 6  ;;  %v1955_v26 = vrot.slane %v1840_v58, 7  ;;  %2185 = vst [vmem:[%s9308_s11 + $0x180] sm:$0x1] %v1840_v58  ;;  %v9752_v61 = vpop.f32.mrf.mxu0  ;;  %v2422_v39 = vsel %vm8912_vm11, %v2417_v28, %v2421_v16 }
 0x182   : > { %2186 = vst [vmem:[%s9308_s11 + $0x182] sm:$0x1] %v1949_v56  ;;  %v2720_v34 = vshll.u32 %v2545_v8, 16  ;;  %v2726_v42 = vshll.u32 %v9743_v49, 16  ;;  %v2427_v18 = vrot.slane %v2426_v2, 4  ;;  %v2842_v45 = vunpack.c.l.b16 %v2422_v39 }
 0x183   : > { %2187 = vst [vmem:[%s9308_s11 + $0x184] sm:$0x1] %v1950_v29  ;;  %v2523_v54 = vsel %vm9183_vm14, %v2521_v33, %v2522_v17  ;;  %v2747_v59 = vld [vmem:[#allocation2 + $0x60] sm:$0xe]  ;;  %v2719_v60 = vrot.slane %v2717_v24, 4  ;;  %v2730_v47 = vshrl.u32 %v9743_v49, 16 }
 0x184   : > { %v1746_v38 = vpop.f32.mrf.mxu1  ;;  %2188 = vst [vmem:[%s9308_s11 + $0x186] sm:$0x1] %v1951_v11  ;;  %v2875_v57 = vunpack.c.l.b16 %v2523_v54  ;;  %v2722_v50 = vrot.slane %v2720_v34, 5  ;;  %v2728_v27 = vrot.slane %v2726_v42, 5  ;;  %v2736_v13 = vshll.u32 %v9760_v31, 16 }
 0x185   : > { %v1747_v43 = vadd.f32 %v1746_v38, %v1698_v62  ;;  %2189 = vst [vmem:[%s9308_s11 + $0x188] sm:$0x1] %v1952_v3  ;;  %v1841_v23 = vpop.f32.mrf.mxu3  ;;  %v2432_v62 = vsel %vm8912_vm11, %v2427_v18, %v2431_v21  ;;  %v7157_v9 = vrot.slane %v2747_v59, 9  ;;  %v2732_v41 = vrot.slane %v2730_v47, 4  ;;  %v3778_v30 = vld [vmem:[#allocation2 + $0x10] sm:$0xf] }
 0x186   : > { %2190 = vst [vmem:[%s9308_s11 + $0x18a] sm:$0x1] %v1953_v35  ;;  %v9768_v0 = vadd.f32 %v1841_v23, %v1793_v37  ;;  %v2843_v7 = vunpack.c.l.b16 %v2432_v62  ;;  %v2883_v52 = vpack.c.b16 %v2875_v57, %v2874_v53  ;;  %v2723_v36 = vor.u32 %v2722_v50, %v2719_v60  ;;  %v3994_v42 = vld [vmem:[#allocation2 + $0x18] sm:$0xf] }
 0x187   : > { %2191 = vst [vmem:[%s9308_s11 + $0x18c] sm:$0x1] %v1954_v19  ;;  %v2738_v17 = vrot.slane %v2736_v13, 5  ;;  %v2823_v56 = vrot.slane %v9743_v49, 5  ;;  %v2826_v29 = vrot.slane %v9760_v31, 5  ;;  %v1796_v11 = vadd.f32 %v9749_v5, %v1747_v43 }
 0x188   : > { %2192 = vst [vmem:[%s9308_s11 + $0x18e] sm:$0x1] %v1955_v26  ;;  %v1956_v51 = vrot.slane %v9768_v0, 1  ;;  %v1957_v14 = vrot.slane %v9768_v0, 2  ;;  %v1958_v55 = vrot.slane %v9768_v0, 3  ;;  %v1959_v10 = vrot.slane %v9768_v0, 4  ;;  %3305 = vmatmul.bf16.gmra.mxu1 %v2883_v52 }
 0x189   : > { %v1797_v1 = vpop.f32.mrf.mxu2  ;;  %v1960_v8 = vrot.slane %v9768_v0, 5  ;;  %v1961_v58 = vrot.slane %v9768_v0, 6  ;;  %v1962_v37 = vrot.slane %v9768_v0, 7  ;;  %2193 = vst [vmem:[%s9308_s11 + $0x190] sm:$0x1] %v9768_v0  ;;  %v2851_v16 = vpack.c.b16 %v2843_v7, %v2842_v45  ;;  %v3222_v32 = vpop.f32.mrf.mxu0 }
 0x18a   : > { %2194 = vst [vmem:[%s9308_s11 + $0x192] sm:$0x1] %v1956_v51  ;;  %v2724_v21 = vrot.slane %v2723_v36, 4  ;;  %v1700_v3 = vadd.f32 %v9629_v40, %v9752_v61  ;;  %v3223_v19 = vadd.f32 %v9629_v40, %v3222_v32  ;;  %v2733_v28 = vor.u32 %v2732_v41, %v2728_v27  ;;  %v3793_v45 = vld [vmem:[#allocation2 + $0x14] sm:$0x1]  ;;  %v7972_v32 = vld [vmem:[#allocation2 + $0xc] sm:$0xff] }
 0x18b   : > { %2195 = vst [vmem:[%s9308_s11 + $0x194] sm:$0x1] %v1957_v14  ;;  %3256 = vmatmul.bf16.gmra.mxu0 %v2851_v16  ;;  %v2824_v49 = vsel %vm9183_vm14, %v7157_v9, %v2823_v56  ;;  %v2825_v2 = vrot.slane %v2823_v56, 4  ;;  %v3802_v38 = vshrl.u32 %v9780_v4, 16  ;;  %v3805_v34 = vshll.u32 %v9780_v4, 16 }
 0x18c   : > { %v1748_v35 = vpop.f32.mrf.mxu1  ;;  %2196 = vst [vmem:[%s9308_s11 + $0x196] sm:$0x1] %v1958_v55  ;;  %v2729_v26 = vsel %vm8912_vm11, %v2724_v21, %v2728_v27  ;;  %v2938_v33 = vunpack.c.l.b16 %v2824_v49  ;;  %v2734_v39 = vrot.slane %v2733_v28, 4  ;;  %v3811_v59 = vshll.u32 %v3778_v30, 16  ;;  %v3995_v13 = vld [vmem:[#allocation2 + $0x1c] sm:$0xf] }
 0x18d   : > { %2197 = vst [vmem:[%s9308_s11 + $0x198] sm:$0x1] %v1959_v10  ;;  %v2906_v5 = vunpack.c.l.b16 %v2729_v26  ;;  %v1844_v61 = vpop.f32.mrf.mxu3  ;;  %v1749_v24 = vadd.f32 %v1748_v35, %v1700_v3  ;;  %v2827_v53 = vsel %vm9183_vm14, %v2825_v2, %v2826_v29  ;;  %v3804_v54 = vrot.slane %v3802_v38, 4  ;;  %v3779_v35 = vld [vmem:[#allocation2 + $0x18] sm:$0xf] }
 0x18e   : > { %2198 = vst [vmem:[%s9308_s11 + $0x19a] sm:$0x1] %v1960_v8  ;;  %v1845_v31 = vadd.f32 %v1844_v61, %v1796_v11  ;;  %v2939_v43 = vunpack.c.l.b16 %v2827_v53  ;;  %v2739_v23 = vsel %vm8912_vm11, %v2734_v39, %v2738_v17  ;;  %v3807_v52 = vrot.slane %v3805_v34, 5  ;;  %v4010_v8 = vld [vmem:[#allocation2 + $0x20] sm:$0x1] }
 0x18f   : > { %2199 = vst [vmem:[%s9308_s11 + $0x19c] sm:$0x1] %v1961_v58  ;;  %v1798_v18 = vadd.f32 %v1797_v1, %v1749_v24  ;;  %v2907_v46 = vunpack.c.l.b16 %v2739_v23  ;;  %v3813_v36 = vrot.slane %v3811_v59, 5  ;;  %v3815_v14 = vshrl.u32 %v3778_v30, 16  ;;  %v8026_v30 = vld [vmem:[#allocation9 + $0x330] sm:$0xff] }
 0x190   : > { %2200 = vst [vmem:[%s9308_s11 + $0x19e] sm:$0x1] %v1962_v37  ;;  %v1963_v57 = vrot.slane %v1845_v31, 1  ;;  %v1964_v60 = vrot.slane %v1845_v31, 2  ;;  %v1965_v50 = vrot.slane %v1845_v31, 3  ;;  %v2947_v0 = vpack.c.b16 %v2939_v43, %v2938_v33  ;;  %6186 = vmatpush.bf16.msrb.mxu0 %v8026_v30 }
 0x191   : > { %v3320_v27 = vpop.f32.mrf.mxu2  ;;  %v1966_v62 = vrot.slane %v1845_v31, 4  ;;  %v1967_v47 = vrot.slane %v1845_v31, 5  ;;  %2201 = vst [vmem:[%s9308_s11 + $0x1c0] sm:$0x1] %v1845_v31  ;;  %v9811_v25 = vpop.f32.mrf.mxu0  ;;  %v1968_v6 = vrot.slane %v1845_v31, 6  ;;  %v1969_v7 = vrot.slane %v1845_v31, 7 }
 0x192   : > { %2202 = vst [vmem:[%s9308_s11 + $0x1c2] sm:$0x1] %v1963_v57  ;;  %v2915_v9 = vpack.c.b16 %v2907_v46, %v2906_v5  ;;  %3403 = vmatmul.bf16.gmra.mxu3 %v2947_v0  ;;  %v3821_v55 = vshll.u32 %v3793_v45, 16  ;;  %v4019_v10 = vshrl.u32 %v3994_v42, 16  ;;  %v3808_v4 = vor.u32 %v3807_v52, %v3804_v54  ;;  %v8050_v5 = vld [vmem:[#allocation9 + $0x3f0] sm:$0xff] }
 0x193   : > { %2203 = vst [vmem:[%s9308_s11 + $0x1c4] sm:$0x1] %v1964_v60  ;;  %v4022_v58 = vshll.u32 %v3994_v42, 16  ;;  %v4028_v37 = vshll.u32 %v3995_v13, 16  ;;  %v3817_v20 = vrot.slane %v3815_v14, 4  ;;  %v4032_v17 = vshrl.u32 %v3995_v13, 16  ;;  %6333 = vmatpush.bf16.msrb.mxu3 %v8050_v5 }
 0x194   : > { %v3271_v51 = vpop.f32.mrf.mxu1  ;;  %2204 = vst [vmem:[%s9308_s11 + $0x1c6] sm:$0x1] %v1965_v50  ;;  %3354 = vmatmul.bf16.gmra.mxu2 %v2915_v9  ;;  %v3823_v21 = vrot.slane %v3821_v55, 5  ;;  %v4021_v41 = vrot.slane %v4019_v10, 4  ;;  %v3809_v29 = vrot.slane %v3808_v4, 4  ;;  %v4038_v49 = vshll.u32 %v4010_v8, 16 }
 0x195   : > { %v3272_v1 = vadd.f32 %v3271_v51, %v3223_v19  ;;  %2205 = vst [vmem:[%s9308_s11 + $0x1c8] sm:$0x1] %v1966_v62  ;;  %v1846_v16 = vpop.f32.mrf.mxu3  ;;  %v4024_v11 = vrot.slane %v4022_v58, 5  ;;  %v4030_v3 = vrot.slane %v4028_v37, 5  ;;  %v8042_v19 = vld [vmem:[#allocation9 + $0x3b0] sm:$0xff]  ;;  %v3818_v26 = vor.u32 %v3817_v20, %v3813_v36 }
 0x196   : > { %2206 = vst [vmem:[%s9308_s11 + $0x1ca] sm:$0x1] %v1967_v47  ;;  %v9818_v56 = vadd.f32 %v1846_v16, %v1798_v18  ;;  %v4034_v28 = vrot.slane %v4032_v17, 4  ;;  %6284 = vmatpush.bf16.msrb.mxu2 %v8042_v19  ;;  %v3814_v42 = vsel %vm8912_vm11, %v3809_v29, %v3813_v36  ;;  %v8034_v18 = vld [vmem:[#allocation9 + $0x370] sm:$0xff]  ;;  %v9834_v57 = vld [vmem:[#allocation2 + $0x1c] sm:$0xf]  ;;  %v3225_v50 = vadd.f32 %v9629_v40, %v9811_v25 }
 0x197   : > { %2207 = vst [vmem:[%s9308_s11 + $0x1cc] sm:$0x1] %v1968_v6  ;;  %v3321_v2 = vadd.f32 %v3320_v27, %v3272_v1  ;;  %v3819_v45 = vrot.slane %v3818_v26, 4  ;;  %v4258_v54 = vunpack.c.l.b16 %v3814_v42  ;;  %v4025_v59 = vor.u32 %v4024_v11, %v4021_v41  ;;  %6235 = vmatpush.bf16.msrb.mxu1 %v8034_v18  ;;  %v3794_v10 = vld [vmem:[#allocation2 + $0x20] sm:$0x1]  ;;  %v7980_v29 = vld [vmem:[#allocation2 + $0x18] sm:$0xff] }
 0x198   : > { %2208 = vst [vmem:[%s9308_s11 + $0x1ce] sm:$0x1] %v1969_v7  ;;  %v1970_v33 = vrot.slane %v9818_v56, 1  ;;  %v1971_v61 = vrot.slane %v9818_v56, 2  ;;  %v1972_v24 = vrot.slane %v9818_v56, 3  ;;  %v1973_v38 = vrot.slane %v9818_v56, 4 }
 0x199   : > { %v3322_v39 = vpop.f32.mrf.mxu2  ;;  %v1974_v53 = vrot.slane %v9818_v56, 5  ;;  %v1975_v31 = vrot.slane %v9818_v56, 6  ;;  %v1976_v34 = vrot.slane %v9818_v56, 7  ;;  %2209 = vst [vmem:[%s9308_s11 + $0x1d0] sm:$0x1] %v9818_v56  ;;  %v3227_v43 = vpop.f32.mrf.mxu0  ;;  %v4035_v23 = vor.u32 %v4034_v28, %v4030_v3 }
 0x19a   : > { %2210 = vst [vmem:[%s9308_s11 + $0x1d2] sm:$0x1] %v1970_v33  ;;  %v4040_v60 = vrot.slane %v4038_v49, 5  ;;  %v3228_v46 = vadd.f32 %v9629_v40, %v3227_v43  ;;  %v3826_v0 = vshrl.u32 %v3779_v35, 16  ;;  %v3824_v62 = vsel %vm8912_vm11, %v3819_v45, %v3823_v21  ;;  %v3996_v16 = vld [vmem:[#allocation2 + $0x24] sm:$0xf] }
 0x19b   : > { %2211 = vst [vmem:[%s9308_s11 + $0x1d4] sm:$0x1] %v1971_v61  ;;  %4635 = vmatmul.bf16.vlgmr.msra.gmra.mxu0 %v7972_v32  ;;  %v4026_v47 = vrot.slane %v4025_v59, 4  ;;  %v4036_v13 = vrot.slane %v4035_v23, 4  ;;  %v3829_v6 = vshll.u32 %v3779_v35, 16  ;;  %v4259_v7 = vunpack.c.l.b16 %v3824_v62  ;;  %v7973_v62 = vld [vmem:[#allocation2 + $0x18] sm:$0xff] }
 0x19c   : > { %v3273_v27 = vpop.f32.mrf.mxu1  ;;  %2212 = vst [vmem:[%s9308_s11 + $0x1d6] sm:$0x1] %v1972_v24  ;;  %v3828_v25 = vrot.slane %v3826_v0, 4  ;;  %v3835_v9 = vshll.u32 %v9834_v57, 16  ;;  %v3997_v32 = vld [vmem:[#allocation2 + $0x28] sm:$0xf] }
 0x19d   : > { %2213 = vst [vmem:[%s9308_s11 + $0x1d8] sm:$0x1] %v1973_v38  ;;  %v3369_v52 = vpop.f32.mrf.mxu3  ;;  %v3274_v36 = vadd.f32 %v3273_v27, %v3225_v50  ;;  %v4031_v51 = vsel %vm8912_vm11, %v4026_v47, %v4030_v3  ;;  %v4041_v14 = vsel %vm8912_vm11, %v4036_v13, %v4040_v60  ;;  %v3831_v1 = vrot.slane %v3829_v6, 5  ;;  %v4011_v26 = vld [vmem:[#allocation2 + $0x2c] sm:$0x1]  ;;  %v8041_v27 = vld [vmem:[#allocation9 + $0x3a8] sm:$0xff] }
 0x19e   : > { %2214 = vst [vmem:[%s9308_s11 + $0x1da] sm:$0x1] %v1974_v53  ;;  %v9850_v55 = vadd.f32 %v3369_v52, %v3321_v2  ;;  %v4274_v4 = vpack.c.b16 %v4259_v7, %v4258_v54  ;;  %v4338_v8 = vunpack.c.l.b16 %v4031_v51  ;;  %v4339_v58 = vunpack.c.l.b16 %v4041_v14  ;;  %v8049_v0 = vld [vmem:[#allocation9 + $0x3e8] sm:$0xff]  ;;  %6285 = vmatpush.bf16.msrb.mxu2 %v8041_v27 }
 0x19f   : > { %2215 = vst [vmem:[%s9308_s11 + $0x1dc] sm:$0x1] %v1975_v31  ;;  %v3323_v37 = vadd.f32 %v3322_v39, %v3274_v36  ;;  %v3832_v49 = vor.u32 %v3831_v1, %v3828_v25  ;;  %v3837_v2 = vrot.slane %v3835_v9, 5  ;;  %v3839_v30 = vshrl.u32 %v9834_v57, 16  ;;  %v3781_v52 = vld [vmem:[#allocation2 + $0x24] sm:$0xf]  ;;  %6334 = vmatpush.bf16.msrb.mxu3 %v8049_v0 }
 0x1a0   : > { %2216 = vst [vmem:[%s9308_s11 + $0x1de] sm:$0x1] %v1976_v34  ;;  %v3425_v20 = vrot.slane %v9850_v55, 1  ;;  %v3426_v21 = vrot.slane %v9850_v55, 2  ;;  %v3427_v41 = vrot.slane %v9850_v55, 3  ;;  %v3428_v17 = vrot.slane %v9850_v55, 4  ;;  %4684 = vmatmul.bf16.vlgmr.msra.gmra.mxu1 %v4274_v4 }
 0x1a1   : > { %v3325_v56 = vpop.f32.mrf.mxu2  ;;  %v4354_v11 = vpack.c.b16 %v4339_v58, %v4338_v8  ;;  %v3429_v3 = vrot.slane %v9850_v55, 5  ;;  %v3430_v35 = vrot.slane %v9850_v55, 6  ;;  %v3431_v19 = vrot.slane %v9850_v55, 7  ;;  %3649 = vst [vmem:[%s9308_s11 + $0x1] sm:$0x1] %v9850_v55  ;;  %v3229_v28 = vpop.f32.mrf.mxu0 }
 0x1a2   : > { %3650 = vst [vmem:[%s9308_s11 + $0x3] sm:$0x1] %v3425_v20  ;;  %v3845_v5 = vshll.u32 %v3794_v10, 16  ;;  %v4043_v61 = vshrl.u32 %v3996_v16, 16  ;;  %v4046_v24 = vshll.u32 %v3996_v16, 16  ;;  %v4052_v38 = vshll.u32 %v3997_v32, 16 }
 0x1a3   : > { %4782 = vmatmul.bf16.vlgmr.msra.gmra.mxu3 %v4354_v11  ;;  %3651 = vst [vmem:[%s9308_s11 + $0x5] sm:$0x1] %v3426_v21  ;;  %v4056_v39 = vshrl.u32 %v3997_v32, 16  ;;  %v3833_v31 = vrot.slane %v3832_v49, 4  ;;  %v3841_v34 = vrot.slane %v3839_v30, 4  ;;  %v4062_v50 = vshll.u32 %v4011_v26, 16 }
 0x1a4   : > { %v3276_v33 = vpop.f32.mrf.mxu1  ;;  %3652 = vst [vmem:[%s9308_s11 + $0x7] sm:$0x1] %v3427_v41  ;;  %v3847_v42 = vrot.slane %v3845_v5, 5  ;;  %4733 = vmatmul.bf16.vlgmr.msra.gmra.mxu2 %v7980_v29  ;;  %v4045_v18 = vrot.slane %v4043_v61, 4  ;;  %v4048_v45 = vrot.slane %v4046_v24, 5  ;;  %v4054_v54 = vrot.slane %v4052_v38, 5 }
 0x1a5   : > { %v3277_v53 = vadd.f32 %v3276_v33, %v3228_v46  ;;  %3653 = vst [vmem:[%s9308_s11 + $0x9] sm:$0x1] %v3428_v17  ;;  %v3371_v43 = vpop.f32.mrf.mxu3  ;;  %v4058_v59 = vrot.slane %v4056_v39, 4  ;;  %v3838_v57 = vsel %vm8912_vm11, %v3833_v31, %v3837_v2  ;;  %v3842_v60 = vor.u32 %v3841_v34, %v3837_v2  ;;  %v8025_v46 = vld [vmem:[#allocation9 + $0x328] sm:$0xff]  ;;  %v3998_v33 = vld [vmem:[#allocation2 + $0x30] sm:$0xf] }
 0x1a6   : > { %3654 = vst [vmem:[%s9308_s11 + $0xb] sm:$0x1] %v3429_v3  ;;  %v9869_v23 = vadd.f32 %v3371_v43, %v3323_v37  ;;  %v9874_v47 = vunpack.c.l.b16 %v3838_v57  ;;  %v4049_v13 = vor.u32 %v4048_v45, %v4045_v18  ;;  %6187 = vmatpush.bf16.msrb.mxu0 %v8025_v46  ;;  %v4064_v16 = vrot.slane %v4062_v50, 5  ;;  %v8033_v20 = vld [vmem:[#allocation9 + $0x368] sm:$0xff]  ;;  %v4012_v45 = vld [vmem:[#allocation2 + $0x38] sm:$0x1] }
 0x1a7   : > { %3655 = vst [vmem:[%s9308_s11 + $0xd] sm:$0x1] %v3430_v35  ;;  %v4059_v6 = vor.u32 %v4058_v59, %v4054_v54  ;;  %v3326_v7 = vadd.f32 %v3325_v56, %v3277_v53  ;;  %v3843_v4 = vrot.slane %v3842_v60, 4  ;;  %v3230_v32 = vadd.f32 %v9629_v40, %v3229_v28  ;;  %v3782_v56 = vld [vmem:[#allocation2 + $0x28] sm:$0xf]  ;;  %6236 = vmatpush.bf16.msrb.mxu1 %v8033_v20 }
 0x1a8   : > { %3656 = vst [vmem:[%s9308_s11 + $0xf] sm:$0x1] %v3431_v19  ;;  %v3432_v36 = vrot.slane %v9869_v23, 1  ;;  %v3433_v25 = vrot.slane %v9869_v23, 2  ;;  %v3434_v9 = vrot.slane %v9869_v23, 3  ;;  %v3435_v51 = vrot.slane %v9869_v23, 4 }
 0x1a9   : > { %v3327_v14 = vpop.f32.mrf.mxu2  ;;  %v3436_v55 = vrot.slane %v9869_v23, 5  ;;  %v3437_v10 = vrot.slane %v9869_v23, 6  ;;  %v3438_v1 = vrot.slane %v9869_v23, 7  ;;  %3657 = vst [vmem:[%s9308_s11 + $0x11] sm:$0x1] %v9869_v23  ;;  %v3232_v8 = vpop.f32.mrf.mxu0  ;;  %v4050_v58 = vrot.slane %v4049_v13, 4 }
 0x1aa   : > { %3658 = vst [vmem:[%s9308_s11 + $0x13] sm:$0x1] %v3432_v36  ;;  %v4060_v37 = vrot.slane %v4059_v6, 4  ;;  %v3848_v21 = vsel %vm8912_vm11, %v3843_v4, %v3847_v42  ;;  %v3233_v17 = vadd.f32 %v9629_v40, %v3232_v8  ;;  %v3850_v29 = vshrl.u32 %v3781_v52, 16  ;;  %v3795_v28 = vld [vmem:[#allocation2 + $0x2c] sm:$0x1] }
 0x1ab   : > { %3659 = vst [vmem:[%s9308_s11 + $0x15] sm:$0x1] %v3433_v25  ;;  %4640 = vmatmul.bf16.gmra.mxu0 %v7973_v62  ;;  %v3853_v11 = vshll.u32 %v3781_v52, 16  ;;  %v4261_v3 = vunpack.c.l.b16 %v3848_v21  ;;  %v4055_v35 = vsel %vm8912_vm11, %v4050_v58, %v4054_v54  ;;  %v3859_v39 = vshll.u32 %v3782_v56, 16  ;;  %v3999_v53 = vld [vmem:[#allocation2 + $0x34] sm:$0xf] }
 0x1ac   : > { %v3278_v41 = vpop.f32.mrf.mxu1  ;;  %3660 = vst [vmem:[%s9308_s11 + $0x17] sm:$0x1] %v3434_v9  ;;  %v4065_v19 = vsel %vm8912_vm11, %v4060_v37, %v4064_v16  ;;  %v4340_v49 = vunpack.c.l.b16 %v4055_v35  ;;  %v3852_v30 = vrot.slane %v3850_v29, 4  ;;  %v7981_v31 = vld [vmem:[#allocation2 + $0x24] sm:$0xff]  ;;  %v3863_v43 = vshrl.u32 %v3782_v56, 16  ;;  %v8024_v56 = vld [vmem:[#allocation9 + $0x320] sm:$0xff] }
 0x1ad   : > { %v3279_v26 = vadd.f32 %v3278_v41, %v3230_v32  ;;  %3661 = vst [vmem:[%s9308_s11 + $0x19] sm:$0x1] %v3435_v51  ;;  %v4341_v2 = vunpack.c.l.b16 %v4065_v19  ;;  %v3374_v40 = vpop.f32.mrf.mxu3  ;;  %v3855_v5 = vrot.slane %v3853_v11, 5  ;;  %v4275_v61 = vpack.c.b16 %v4261_v3, %v9874_v47  ;;  %v9918_v4 = vld [vmem:[#allocation2 + $0x30] sm:$0xf]  ;;  %v8040_v32 = vld [vmem:[#allocation9 + $0x3a0] sm:$0xff]  ;;  %6188 = vmatpush.bf16.msrb.mxu0 %v8024_v56 }
 0x1ae   : > { %3662 = vst [vmem:[%s9308_s11 + $0x1b] sm:$0x1] %v3436_v55  ;;  %v9900_v24 = vadd.f32 %v3374_v40, %v3326_v7  ;;  %v3869_v18 = vshll.u32 %v3795_v28, 16  ;;  %v3861_v47 = vrot.slane %v3859_v39, 5  ;;  %v3865_v13 = vrot.slane %v3863_v43, 4  ;;  %v8048_v29 = vld [vmem:[#allocation9 + $0x3e0] sm:$0xff]  ;;  %6286 = vmatpush.bf16.msrb.mxu2 %v8040_v32 }
 0x1af   : > { %v3328_v38 = vadd.f32 %v3327_v14, %v3279_v26  ;;  %3663 = vst [vmem:[%s9308_s11 + $0x1d] sm:$0x1] %v3437_v10  ;;  %v4355_v34 = vpack.c.b16 %v4341_v2, %v4340_v49  ;;  %v3856_v42 = vor.u32 %v3855_v5, %v3852_v30  ;;  %v4067_v7 = vshrl.u32 %v3998_v33, 16  ;;  %v7974_v11 = vld [vmem:[#allocation2 + $0x24] sm:$0xff]  ;;  %v3784_v26 = vld [vmem:[#allocation2 + $0x34] sm:$0xf]  ;;  %6335 = vmatpush.bf16.msrb.mxu3 %v8048_v29 }
 0x1b0   : > { %3664 = vst [vmem:[%s9308_s11 + $0x1f] sm:$0x1] %v3438_v1  ;;  %v3439_v54 = vrot.slane %v9900_v24, 1  ;;  %v3440_v59 = vrot.slane %v9900_v24, 2  ;;  %v3441_v23 = vrot.slane %v9900_v24, 3  ;;  %v3442_v57 = vrot.slane %v9900_v24, 4  ;;  %4689 = vmatmul.bf16.gmra.mxu1 %v4275_v61 }
 0x1b1   : > { %v3330_v60 = vpop.f32.mrf.mxu2  ;;  %v3443_v50 = vrot.slane %v9900_v24, 5  ;;  %v3444_v27 = vrot.slane %v9900_v24, 6  ;;  %v3445_v46 = vrot.slane %v9900_v24, 7  ;;  %3665 = vst [vmem:[%s9308_s11 + $0x41] sm:$0x1] %v9900_v24  ;;  %v3857_v0 = vrot.slane %v3856_v42, 4  ;;  %v3234_v62 = vpop.f32.mrf.mxu0 }
 0x1b2   : > { %3666 = vst [vmem:[%s9308_s11 + $0x43] sm:$0x1] %v3439_v54  ;;  %v3871_v6 = vrot.slane %v3869_v18, 5  ;;  %v4070_v36 = vshll.u32 %v3998_v33, 16  ;;  %v4076_v25 = vshll.u32 %v3999_v53, 16  ;;  %v4080_v9 = vshrl.u32 %v3999_v53, 16 }
 0x1b3   : > { %4787 = vmatmul.bf16.gmra.mxu3 %v4355_v34  ;;  %3667 = vst [vmem:[%s9308_s11 + $0x45] sm:$0x1] %v3440_v59  ;;  %v4086_v51 = vshll.u32 %v4012_v45, 16  ;;  %v3862_v55 = vsel %vm8912_vm11, %v3857_v0, %v3861_v47  ;;  %v3866_v10 = vor.u32 %v3865_v13, %v3861_v47  ;;  %v4069_v1 = vrot.slane %v4067_v7, 4  ;;  %v9935_v30 = vld [vmem:[%s11044_s15] ss:$0 sm:$0xff] }
 0x1b4   : > { %v3281_v52 = vpop.f32.mrf.mxu1  ;;  %3668 = vst [vmem:[%s9308_s11 + $0x47] sm:$0x1] %v3441_v23  ;;  %4738 = vmatmul.bf16.gmra.mxu2 %v7981_v31  ;;  %v4072_v58 = vrot.slane %v4070_v36, 5  ;;  %v4078_v37 = vrot.slane %v4076_v25, 5  ;;  %v4082_v16 = vrot.slane %v4080_v9, 4  ;;  %v9924_v41 = vunpack.c.l.b16 %v3862_v55  ;;  %v8032_v31 = vld [vmem:[#allocation9 + $0x360] sm:$0xff] }
 0x1b5   : > { %v3282_v14 = vadd.f32 %v3281_v52, %v3233_v17  ;;  %3669 = vst [vmem:[%s9308_s11 + $0x49] sm:$0x1] %v3442_v57  ;;  %v3376_v8 = vpop.f32.mrf.mxu3  ;;  %v3867_v21 = vrot.slane %v3866_v10, 4  ;;  %v4088_v17 = vrot.slane %v4086_v51, 5  ;;  %v3874_v28 = vshrl.u32 %v9918_v4, 16  ;;  %6237 = vmatpush.bf16.msrb.mxu1 %v8032_v31  ;;  %v7975_v31 = vld [vmem:[#allocation2 + $0x30] sm:$0xff] }
 0x1b6   : > { %3670 = vst [vmem:[%s9308_s11 + $0x4b] sm:$0x1] %v3443_v50  ;;  %v9922_v20 = vadd.f32 %v3376_v8, %v3328_v38  ;;  %v4073_v3 = vor.u32 %v4072_v58, %v4069_v1  ;;  %v4083_v35 = vor.u32 %v4082_v16, %v4078_v37  ;;  %v3235_v5 = vadd.f32 %v9935_v30, %v3234_v62  ;;  %v3796_v53 = vld [vmem:[#allocation2 + $0x38] sm:$0x1]  ;;  %v4000_v62 = vld [vmem:[#allocation2 + $0x3c] sm:$0xf] }
 0x1b7   : > { %3671 = vst [vmem:[%s9308_s11 + $0x4d] sm:$0x1] %v3444_v27  ;;  %v3331_v19 = vadd.f32 %v3330_v60, %v3282_v14  ;;  %v3872_v38 = vsel %vm8912_vm11, %v3867_v21, %v3871_v6  ;;  %v3876_v59 = vrot.slane %v3874_v28, 4  ;;  %v3877_v23 = vshll.u32 %v9918_v4, 16  ;;  %v4001_v14 = vld [vmem:[#allocation2 + $0x40] sm:$0xf] }
 0x1b8   : > { %3672 = vst [vmem:[%s9308_s11 + $0x4f] sm:$0x1] %v3445_v46  ;;  %v3446_v49 = vrot.slane %v9922_v20, 1  ;;  %v3447_v2 = vrot.slane %v9922_v20, 2  ;;  %v3448_v40 = vrot.slane %v9922_v20, 3  ;;  %v3449_v33 = vrot.slane %v9922_v20, 4 }
 0x1b9   : > { %v3450_v61 = vrot.slane %v9922_v20, 5  ;;  %v3451_v24 = vrot.slane %v9922_v20, 6  ;;  %3673 = vst [vmem:[%s9308_s11 + $0x51] sm:$0x1] %v9922_v20  ;;  %v3237_v39 = vpop.f32.mrf.mxu0  ;;  %v3452_v34 = vrot.slane %v9922_v20, 7  ;;  %v4263_v42 = vunpack.c.l.b16 %v3872_v38  ;;  %v3332_v45 = vpop.f32.mrf.mxu2  ;;  %v7982_v58 = vld [vmem:[#allocation2 + $0x30] sm:$0xff] }
 0x1ba   : > { %3674 = vst [vmem:[%s9308_s11 + $0x53] sm:$0x1] %v3446_v49  ;;  %v4074_v43 = vrot.slane %v4073_v3, 4  ;;  %v4084_v18 = vrot.slane %v4083_v35, 4  ;;  %v3883_v57 = vshll.u32 %v3784_v26, 16  ;;  %v3887_v60 = vshrl.u32 %v3784_v26, 16 }
 0x1bb   : > { %3675 = vst [vmem:[%s9308_s11 + $0x55] sm:$0x1] %v3447_v2  ;;  %4645 = vmatmul.bf16.gmra.mxu0 %v7974_v11  ;;  %v4276_v50 = vpack.c.b16 %v4263_v42, %v9924_v41  ;;  %v3238_v0 = vadd.f32 %v9935_v30, %v3237_v39  ;;  %v3879_v52 = vrot.slane %v3877_v23, 5  ;;  %v3893_v51 = vshll.u32 %v3796_v53, 16  ;;  %v4013_v1 = vld [vmem:[#allocation2 + $0x44] sm:$0x1] }
 0x1bc   : > { %v3283_v54 = vpop.f32.mrf.mxu1  ;;  %3676 = vst [vmem:[%s9308_s11 + $0x57] sm:$0x1] %v3448_v40  ;;  %v4079_v27 = vsel %vm8912_vm11, %v4074_v43, %v4078_v37  ;;  %v4089_v46 = vsel %vm8912_vm11, %v4084_v18, %v4088_v17  ;;  %v3885_v25 = vrot.slane %v3883_v57, 5  ;;  %v3889_v9 = vrot.slane %v3887_v60, 4  ;;  %v3785_v38 = vld [vmem:[#allocation2 + $0x3c] sm:$0xf] }
 0x1bd   : > { %3677 = vst [vmem:[%s9308_s11 + $0x59] sm:$0x1] %v3449_v33  ;;  %v4342_v47 = vunpack.c.l.b16 %v4079_v27  ;;  %v4343_v13 = vunpack.c.l.b16 %v4089_v46  ;;  %v3379_v6 = vpop.f32.mrf.mxu3  ;;  %v3284_v7 = vadd.f32 %v3283_v54, %v3235_v5  ;;  %v3880_v10 = vor.u32 %v3879_v52, %v3876_v59  ;;  %v8039_v18 = vld [vmem:[#allocation9 + $0x398] sm:$0xff]  ;;  %v3786_v57 = vld [vmem:[#allocation2 + $0x40] sm:$0xf] }
 0x1be   : > { %3678 = vst [vmem:[%s9308_s11 + $0x5b] sm:$0x1] %v3450_v61  ;;  %v9958_v36 = vadd.f32 %v3379_v6, %v3331_v19  ;;  %v4091_v4 = vshrl.u32 %v4000_v62, 16  ;;  %v4094_v8 = vshll.u32 %v4000_v62, 16  ;;  %v3890_v11 = vor.u32 %v3889_v9, %v3885_v25  ;;  %v8023_v60 = vld [vmem:[#allocation9 + $0x318] sm:$0xff]  ;;  %6287 = vmatpush.bf16.msrb.mxu2 %v8039_v18 }
 0x1bf   : > { %3679 = vst [vmem:[%s9308_s11 + $0x5d] sm:$0x1] %v3451_v24  ;;  %v4356_v55 = vpack.c.b16 %v4343_v13, %v4342_v47  ;;  %v3333_v20 = vadd.f32 %v3332_v45, %v3284_v7  ;;  %v3881_v56 = vrot.slane %v3880_v10, 4  ;;  %v3895_v3 = vrot.slane %v3893_v51, 5  ;;  %v9986_v13 = vld [vmem:[#allocation2 + $0x48] sm:$0xf]  ;;  %6189 = vmatpush.bf16.msrb.mxu0 %v8023_v60 }
 0x1c0   : > { %3680 = vst [vmem:[%s9308_s11 + $0x5f] sm:$0x1] %v3452_v34  ;;  %v3453_v37 = vrot.slane %v9958_v36, 1  ;;  %v3454_v16 = vrot.slane %v9958_v36, 2  ;;  %v3455_v32 = vrot.slane %v9958_v36, 3  ;;  %4694 = vmatmul.bf16.gmra.mxu1 %v4276_v50  ;;  %v3456_v21 = vrot.slane %v9958_v36, 4 }
 0x1c1   : > { %v3457_v41 = vrot.slane %v9958_v36, 5  ;;  %v3458_v17 = vrot.slane %v9958_v36, 6  ;;  %3681 = vst [vmem:[%s9308_s11 + $0x81] sm:$0x1] %v9958_v36  ;;  %v3239_v29 = vpop.f32.mrf.mxu0  ;;  %v4093_v35 = vrot.slane %v4091_v4, 4  ;;  %v4096_v19 = vrot.slane %v4094_v8, 5 }
 0x1c2   : > { %3682 = vst [vmem:[%s9308_s11 + $0x83] sm:$0x1] %v3453_v37  ;;  %v3886_v28 = vsel %vm8912_vm11, %v3881_v56, %v3885_v25  ;;  %v4100_v49 = vshll.u32 %v4001_v14, 16  ;;  %v4104_v2 = vshrl.u32 %v4001_v14, 16  ;;  %v4110_v40 = vshll.u32 %v4013_v1, 16  ;;  %v3335_v24 = vpop.f32.mrf.mxu2  ;;  %v8047_v50 = vld [vmem:[#allocation9 + $0x3d8] sm:$0xff] }
 0x1c3   : > { %4792 = vmatmul.bf16.gmra.mxu3 %v4356_v55  ;;  %3683 = vst [vmem:[%s9308_s11 + $0x85] sm:$0x1] %v3454_v16  ;;  %v3459_v5 = vrot.slane %v9958_v36, 7  ;;  %v3891_v33 = vrot.slane %v3890_v11, 4  ;;  %v4097_v61 = vor.u32 %v4096_v19, %v4093_v35  ;;  %v9977_v34 = vunpack.c.l.b16 %v3886_v28  ;;  %v8031_v10 = vld [vmem:[#allocation9 + $0x358] sm:$0xff] }
 0x1c4   : > { %v3286_v26 = vpop.f32.mrf.mxu1  ;;  %3684 = vst [vmem:[%s9308_s11 + $0x87] sm:$0x1] %v3455_v32  ;;  %4743 = vmatmul.bf16.gmra.mxu2 %v7982_v58  ;;  %v4102_v42 = vrot.slane %v4100_v49, 5  ;;  %v4106_v43 = vrot.slane %v4104_v2, 4  ;;  %v4112_v23 = vrot.slane %v4110_v40, 5  ;;  %v3240_v46 = vadd.f32 %v9935_v30, %v3239_v29  ;;  %6336 = vmatpush.bf16.msrb.mxu3 %v8047_v50 }
 0x1c5   : > { %3685 = vst [vmem:[%s9308_s11 + $0x89] sm:$0x1] %v3456_v21  ;;  %v3381_v39 = vpop.f32.mrf.mxu3  ;;  %v3287_v53 = vadd.f32 %v3286_v26, %v3238_v0  ;;  %v3896_v54 = vsel %vm8912_vm11, %v3891_v33, %v3895_v3  ;;  %v4098_v59 = vrot.slane %v4097_v61, 4  ;;  %v3797_v0 = vld [vmem:[#allocation2 + $0x44] sm:$0x1]  ;;  %v3898_v62 = vshrl.u32 %v3785_v38, 16  ;;  %6238 = vmatpush.bf16.msrb.mxu1 %v8031_v10 }
 0x1c6   : > { %3686 = vst [vmem:[%s9308_s11 + $0x8b] sm:$0x1] %v3457_v41  ;;  %v9980_v45 = vadd.f32 %v3381_v39, %v3333_v20  ;;  %v4107_v27 = vor.u32 %v4106_v43, %v4102_v42  ;;  %v3901_v47 = vshll.u32 %v3785_v38, 16  ;;  %v4265_v36 = vunpack.c.l.b16 %v3896_v54  ;;  %v4003_v28 = vld [vmem:[#allocation2 + $0x4c] sm:$0xf]  ;;  %v7976_v10 = vld [vmem:[#allocation2 + $0x3c] sm:$0xff] }
 0x1c7   : > { %3687 = vst [vmem:[%s9308_s11 + $0x8d] sm:$0x1] %v3458_v17  ;;  %v3336_v14 = vadd.f32 %v3335_v24, %v3287_v53  ;;  %v4103_v4 = vsel %vm8912_vm11, %v4098_v59, %v4102_v42  ;;  %v3900_v58 = vrot.slane %v3898_v62, 4  ;;  %v3907_v20 = vshll.u32 %v3786_v57, 16  ;;  %v4014_v61 = vld [vmem:[#allocation2 + $0x50] sm:$0x1] }
 0x1c8   : > { %3688 = vst [vmem:[%s9308_s11 + $0x8f] sm:$0x1] %v3459_v5  ;;  %v3460_v6 = vrot.slane %v9980_v45, 1  ;;  %v3461_v7 = vrot.slane %v9980_v45, 2  ;;  %v3462_v52 = vrot.slane %v9980_v45, 3  ;;  %v3463_v25 = vrot.slane %v9980_v45, 4 }
 0x1c9   : > { %v3464_v9 = vrot.slane %v9980_v45, 5  ;;  %v3465_v51 = vrot.slane %v9980_v45, 6  ;;  %3689 = vst [vmem:[%s9308_s11 + $0x91] sm:$0x1] %v9980_v45  ;;  %v3242_v55 = vpop.f32.mrf.mxu0  ;;  %v3466_v1 = vrot.slane %v9980_v45, 7  ;;  %v4108_v8 = vrot.slane %v4107_v27, 4 }
 0x1ca   : > { %3690 = vst [vmem:[%s9308_s11 + $0x93] sm:$0x1] %v3460_v6  ;;  %v4344_v37 = vunpack.c.l.b16 %v4103_v4  ;;  %v3903_v32 = vrot.slane %v3901_v47, 5  ;;  %v3911_v21 = vshrl.u32 %v3786_v57, 16  ;;  %v4277_v41 = vpack.c.b16 %v4265_v36, %v9977_v34  ;;  %v3337_v40 = vpop.f32.mrf.mxu2  ;;  %v7983_v45 = vld [vmem:[#allocation2 + $0x3c] sm:$0xff] }
 0x1cb   : > { %3691 = vst [vmem:[%s9308_s11 + $0x95] sm:$0x1] %v3461_v7  ;;  %4650 = vmatmul.bf16.gmra.mxu0 %v7975_v31  ;;  %v4113_v17 = vsel %vm8912_vm11, %v4108_v8, %v4112_v23  ;;  %v3917_v56 = vshll.u32 %v3797_v0, 16  ;;  %v4115_v29 = vshrl.u32 %v9986_v13, 16  ;;  %v3909_v19 = vrot.slane %v3907_v20, 5 }
 0x1cc   : > { %v3288_v16 = vpop.f32.mrf.mxu1  ;;  %3692 = vst [vmem:[%s9308_s11 + $0x97] sm:$0x1] %v3462_v52  ;;  %v4345_v11 = vunpack.c.l.b16 %v4113_v17  ;;  %v3904_v35 = vor.u32 %v3903_v32, %v3900_v58  ;;  %v3913_v26 = vrot.slane %v3911_v21, 4  ;;  %v3243_v5 = vadd.f32 %v9935_v30, %v3242_v55  ;;  %v10014_v31 = vld [vmem:[#allocation2 + $0x48] sm:$0xf] }
 0x1cd   : > { %3693 = vst [vmem:[%s9308_s11 + $0x99] sm:$0x1] %v3463_v25  ;;  %v3384_v3 = vpop.f32.mrf.mxu3  ;;  %v3289_v2 = vadd.f32 %v3288_v16, %v3240_v46  ;;  %v3919_v33 = vrot.slane %v3917_v56, 5  ;;  %v4118_v53 = vshll.u32 %v9986_v13, 16  ;;  %v4117_v18 = vrot.slane %v4115_v29, 4  ;;  %v8022_v17 = vld [vmem:[#allocation9 + $0x310] sm:$0xff] }
 0x1ce   : > { %3694 = vst [vmem:[%s9308_s11 + $0x9b] sm:$0x1] %v3464_v9  ;;  %v10009_v49 = vadd.f32 %v3384_v3, %v3336_v14  ;;  %v4357_v24 = vpack.c.b16 %v4345_v11, %v4344_v37  ;;  %v3905_v38 = vrot.slane %v3904_v35, 4  ;;  %v3914_v39 = vor.u32 %v3913_v26, %v3909_v19  ;;  %v10042_v58 = vld [vmem:[#allocation2 + $0x50] sm:$0x1]  ;;  %v8038_v37 = vld [vmem:[#allocation9 + $0x390] sm:$0xff]  ;;  %6190 = vmatpush.bf16.msrb.mxu0 %v8022_v17 }
 0x1cf   : > { %3695 = vst [vmem:[%s9308_s11 + $0x9d] sm:$0x1] %v3465_v51  ;;  %v3338_v23 = vadd.f32 %v3337_v40, %v3289_v2  ;;  %v4120_v27 = vrot.slane %v4118_v53, 5  ;;  %v4124_v46 = vshll.u32 %v4003_v28, 16  ;;  %v4128_v13 = vshrl.u32 %v4003_v28, 16  ;;  %6288 = vmatpush.bf16.msrb.mxu2 %v8038_v37  ;;  %v8046_v35 = vld [vmem:[#allocation9 + $0x3d0] sm:$0xff] }
 0x1d0   : > { %3696 = vst [vmem:[%s9308_s11 + $0x9f] sm:$0x1] %v3466_v1  ;;  %v3467_v34 = vrot.slane %v10009_v49, 1  ;;  %v3468_v42 = vrot.slane %v10009_v49, 2  ;;  %v3469_v43 = vrot.slane %v10009_v49, 3  ;;  %4699 = vmatmul.bf16.gmra.mxu1 %v4277_v41  ;;  %v3470_v54 = vrot.slane %v10009_v49, 4  ;;  %6337 = vmatpush.bf16.msrb.mxu3 %v8046_v35 }
 0x1d1   : > { %v3471_v59 = vrot.slane %v10009_v49, 5  ;;  %3697 = vst [vmem:[%s9308_s11 + $0xc1] sm:$0x1] %v10009_v49  ;;  %v3910_v57 = vsel %vm8912_vm11, %v3905_v38, %v3909_v19  ;;  %v3472_v60 = vrot.slane %v10009_v49, 6  ;;  %v3915_v50 = vrot.slane %v3914_v39, 4  ;;  %v3244_v0 = vpop.f32.mrf.mxu0 }
 0x1d2   : > { %3698 = vst [vmem:[%s9308_s11 + $0xc3] sm:$0x1] %v3467_v34  ;;  %v3473_v62 = vrot.slane %v10009_v49, 7  ;;  %v4134_v6 = vshll.u32 %v4014_v61, 16  ;;  %v3922_v7 = vshrl.u32 %v10014_v31, 16  ;;  %v10034_v36 = vunpack.c.l.b16 %v3910_v57 }
 0x1d3   : > { %4797 = vmatmul.bf16.gmra.mxu3 %v4357_v24  ;;  %3699 = vst [vmem:[%s9308_s11 + $0xc5] sm:$0x1] %v3468_v42  ;;  %v3920_v52 = vsel %vm8912_vm11, %v3915_v50, %v3919_v33  ;;  %v4121_v25 = vor.u32 %v4120_v27, %v4117_v18  ;;  %v4126_v9 = vrot.slane %v4124_v46, 5  ;;  %v3788_v51 = vld [vmem:[#allocation2 + $0x4c] sm:$0xf]  ;;  %v4130_v4 = vrot.slane %v4128_v13, 4 }
 0x1d4   : > { %v3291_v47 = vpop.f32.mrf.mxu1  ;;  %3700 = vst [vmem:[%s9308_s11 + $0xc7] sm:$0x1] %v3469_v43  ;;  %4748 = vmatmul.bf16.gmra.mxu2 %v7983_v45  ;;  %v10037_v1 = vunpack.c.l.b16 %v3920_v52  ;;  %v10040_v8 = vadd.f32 %v9935_v30, %v3244_v0  ;;  %v4136_v20 = vrot.slane %v4134_v6, 5  ;;  %v3925_v21 = vshll.u32 %v10014_v31, 16  ;;  %v4004_v41 = vld [vmem:[#allocation2 + $0x54] sm:$0xf] }
 0x1d5   : > { %3701 = vst [vmem:[%s9308_s11 + $0xc9] sm:$0x1] %v3470_v54  ;;  %v3386_v14 = vpop.f32.mrf.mxu3  ;;  %v3292_v55 = vadd.f32 %v3291_v47, %v3243_v5  ;;  %v4122_v32 = vrot.slane %v4121_v25, 4  ;;  %v4131_v56 = vor.u32 %v4130_v4, %v4126_v9  ;;  %v3924_v29 = vrot.slane %v3922_v7, 4  ;;  %v10055_v40 = vld [vmem:[#allocation2 + $0x58] sm:$0xf] }
 0x1d6   : > { %3702 = vst [vmem:[%s9308_s11 + $0xcb] sm:$0x1] %v3471_v59  ;;  %v10045_v16 = vadd.f32 %v3386_v14, %v3338_v23  ;;  %v3931_v11 = vshll.u32 %v3788_v51, 16  ;;  %v3935_v3 = vshrl.u32 %v3788_v51, 16  ;;  %v4278_v49 = vpack.c.b16 %v10037_v1, %v10034_v36  ;;  %v3340_v2 = vpop.f32.mrf.mxu2  ;;  %v4015_v6 = vld [vmem:[#allocation2 + $0x5c] sm:$0x1] }
 0x1d7   : > { %3703 = vst [vmem:[%s9308_s11 + $0xcd] sm:$0x1] %v3472_v60  ;;  %v4127_v61 = vsel %vm8912_vm11, %v4122_v32, %v4126_v9  ;;  %v3941_v24 = vshll.u32 %v10042_v58, 16  ;;  %v4132_v39 = vrot.slane %v4131_v56, 4  ;;  %v3341_v53 = vadd.f32 %v3340_v2, %v3292_v55  ;;  %v8030_v60 = vld [vmem:[#allocation9 + $0x350] sm:$0xff] }
 0x1d8   : > { %3704 = vst [vmem:[%s9308_s11 + $0xcf] sm:$0x1] %v3473_v62  ;;  %v3474_v19 = vrot.slane %v10045_v16, 1  ;;  %v3475_v26 = vrot.slane %v10045_v16, 2  ;;  %v3476_v28 = vrot.slane %v10045_v16, 3  ;;  %v3477_v5 = vrot.slane %v10045_v16, 4  ;;  %6239 = vmatpush.bf16.msrb.mxu1 %v8030_v60 }
 0x1d9   : > { %v3478_v33 = vrot.slane %v10045_v16, 5  ;;  %3705 = vst [vmem:[%s9308_s11 + $0xd1] sm:$0x1] %v10045_v16  ;;  %v3479_v38 = vrot.slane %v10045_v16, 6  ;;  %v3927_v31 = vrot.slane %v3925_v21, 5  ;;  %v4346_v34 = vunpack.c.l.b16 %v4127_v61 }
 0x1da   : > { %3706 = vst [vmem:[%s9308_s11 + $0xd3] sm:$0x1] %v3474_v19  ;;  %v10067_v43 = vrot.slane %v3931_v11, 5  ;;  %v3937_v18 = vrot.slane %v3935_v3, 4  ;;  %v4139_v45 = vshrl.u32 %v4004_v41, 16  ;;  %v3480_v54 = vrot.slane %v10045_v16, 7 }
 0x1db   : > { %3707 = vst [vmem:[%s9308_s11 + $0xd5] sm:$0x1] %v3475_v26  ;;  %4655 = vmatmul.bf16.gmra.mxu0 %v7976_v10  ;;  %v4137_v59 = vsel %vm8912_vm11, %v4132_v39, %v4136_v20  ;;  %v3928_v23 = vor.u32 %v3927_v31, %v3924_v29  ;;  %v4142_v57 = vshll.u32 %v4004_v41, 16  ;;  %v4148_v62 = vshll.u32 %v10055_v40, 16  ;;  %v3789_v14 = vld [vmem:[#allocation2 + $0x54] sm:$0xf] }
 0x1dc   : > { %v3293_v42 = vpop.f32.mrf.mxu1  ;;  %3708 = vst [vmem:[%s9308_s11 + $0xd7] sm:$0x1] %v3476_v28  ;;  %v4347_v50 = vunpack.c.l.b16 %v4137_v59  ;;  %v3938_v46 = vor.u32 %v3937_v18, %v10067_v43  ;;  %v4141_v0 = vrot.slane %v4139_v45, 4  ;;  %v4152_v52 = vshrl.u32 %v10055_v40, 16  ;;  %v7984_v16 = vld [vmem:[#allocation2 + $0x48] sm:$0xff]  ;;  %v8021_v45 = vld [vmem:[#allocation9 + $0x308] sm:$0xff] }
 0x1dd   : > { %3709 = vst [vmem:[%s9308_s11 + $0xd9] sm:$0x1] %v3477_v5  ;;  %v3389_v27 = vpop.f32.mrf.mxu3  ;;  %v3929_v13 = vrot.slane %v3928_v23, 4  ;;  %v4144_v7 = vrot.slane %v4142_v57, 5  ;;  %v3294_v25 = vadd.f32 %v3293_v42, %v10040_v8  ;;  %v3943_v51 = vrot.slane %v3941_v24, 5  ;;  %v3247_v58 = vpop.f32.mrf.mxu0  ;;  %v7977_v23 = vld [vmem:[#allocation2 + $0x48] sm:$0xff]  ;;  %6191 = vmatpush.bf16.msrb.mxu0 %v8021_v45 }
 0x1de   : > { %3710 = vst [vmem:[%s9308_s11 + $0xdb] sm:$0x1] %v3478_v33  ;;  %v10077_v47 = vadd.f32 %v3389_v27, %v3341_v53  ;;  %v4358_v36 = vpack.c.b16 %v4347_v50, %v4346_v34  ;;  %v3939_v9 = vrot.slane %v3938_v46, 4  ;;  %v3342_v4 = vpop.f32.mrf.mxu2  ;;  %v4150_v37 = vrot.slane %v4148_v62, 5  ;;  %v3790_v29 = vld [vmem:[#allocation2 + $0x58] sm:$0xf] }
 0x1df   : > { %3711 = vst [vmem:[%s9308_s11 + $0xdd] sm:$0x1] %v3479_v38  ;;  %v3248_v20 = vadd.f32 %v9935_v30, %v3247_v58  ;;  %v3343_v21 = vadd.f32 %v3342_v4, %v3294_v25  ;;  %v3934_v41 = vsel %vm8912_vm11, %v3929_v13, %v10067_v43  ;;  %v4145_v17 = vor.u32 %v4144_v7, %v4141_v0  ;;  %v3799_v24 = vld [vmem:[#allocation2 + $0x5c] sm:$0x1]  ;;  %v8037_v53 = vld [vmem:[#allocation9 + $0x388] sm:$0xff] }
 0x1e0   : > { %3712 = vst [vmem:[%s9308_s11 + $0xdf] sm:$0x1] %v3480_v54  ;;  %v3481_v55 = vrot.slane %v10077_v47, 1  ;;  %v3482_v10 = vrot.slane %v10077_v47, 2  ;;  %v3483_v1 = vrot.slane %v10077_v47, 3  ;;  %4704 = vmatmul.bf16.gmra.mxu1 %v4278_v49  ;;  %v3484_v32 = vrot.slane %v10077_v47, 4  ;;  %6289 = vmatpush.bf16.msrb.mxu2 %v8037_v53 }
 0x1e1   : > { %v3485_v8 = vrot.slane %v10077_v47, 5  ;;  %3713 = vst [vmem:[%s9308_s11 + $0x101] sm:$0x1] %v10077_v47  ;;  %v4154_v56 = vrot.slane %v4152_v52, 4  ;;  %v3486_v11 = vrot.slane %v10077_v47, 6  ;;  %v3487_v3 = vrot.slane %v10077_v47, 7 }
 0x1e2   : > { %3714 = vst [vmem:[%s9308_s11 + $0x103] sm:$0x1] %v3481_v55  ;;  %v4158_v19 = vshll.u32 %v4015_v6, 16  ;;  %v3946_v26 = vshrl.u32 %v3789_v14, 16  ;;  %v3944_v28 = vsel %vm8912_vm11, %v3939_v9, %v3943_v51  ;;  %v4146_v49 = vrot.slane %v4145_v17, 4  ;;  %v8045_v54 = vld [vmem:[#allocation9 + $0x3c8] sm:$0xff] }
 0x1e3   : > { %4802 = vmatmul.bf16.gmra.mxu3 %v4358_v36  ;;  %3715 = vst [vmem:[%s9308_s11 + $0x105] sm:$0x1] %v3482_v10  ;;  %v4155_v2 = vor.u32 %v4154_v56, %v4150_v37  ;;  %v3949_v40 = vshll.u32 %v3789_v14, 16  ;;  %v10103_v33 = vunpack.c.l.b16 %v3934_v41  ;;  %v3955_v39 = vshll.u32 %v3790_v29, 16  ;;  %v4006_v18 = vld [vmem:[#allocation2 + $0x60] sm:$0xf] }
 0x1e4   : > { %v3296_v35 = vpop.f32.mrf.mxu1  ;;  %3716 = vst [vmem:[%s9308_s11 + $0x107] sm:$0x1] %v3483_v1  ;;  %4753 = vmatmul.bf16.gmra.mxu2 %v7984_v16  ;;  %v4160_v61 = vrot.slane %v4158_v19, 5  ;;  %v3948_v38 = vrot.slane %v3946_v26, 4  ;;  %v4151_v34 = vsel %vm8912_vm11, %v4146_v49, %v4150_v37  ;;  %v4269_v57 = vunpack.c.l.b16 %v3944_v28  ;;  %v4007_v27 = vld [vmem:[#allocation2 + $0x64] sm:$0xf]  ;;  %6338 = vmatpush.bf16.msrb.mxu3 %v8045_v54 }
 0x1e5   : > { %3717 = vst [vmem:[%s9308_s11 + $0x109] sm:$0x1] %v3484_v32  ;;  %v3391_v5 = vpop.f32.mrf.mxu3  ;;  %v4156_v42 = vrot.slane %v4155_v2, 4  ;;  %v3951_v43 = vrot.slane %v3949_v40, 5  ;;  %v3297_v59 = vadd.f32 %v3296_v35, %v3248_v20  ;;  %v10109_v60 = vunpack.c.l.b16 %v4151_v34  ;;  %v3249_v25 = vpop.f32.mrf.mxu0  ;;  %v4016_v32 = vld [vmem:[#allocation2 + $0x68] sm:$0x1] }
 0x1e6   : > { %3718 = vst [vmem:[%s9308_s11 + $0x10b] sm:$0x1] %v3485_v8  ;;  %v3392_v31 = vadd.f32 %v3391_v5, %v3343_v21  ;;  %v3959_v50 = vshrl.u32 %v3790_v29, 16  ;;  %v10112_v47 = vrot.slane %v3955_v39, 5  ;;  %v3965_v14 = vshll.u32 %v3799_v24, 16  ;;  %v8029_v49 = vld [vmem:[#allocation9 + $0x348] sm:$0xff] }
 0x1e7   : > { %3719 = vst [vmem:[%s9308_s11 + $0x10d] sm:$0x1] %v3486_v11  ;;  %v4161_v52 = vsel %vm8912_vm11, %v4156_v42, %v4160_v61  ;;  %v3952_v9 = vor.u32 %v3951_v43, %v3948_v38  ;;  %v4163_v55 = vshrl.u32 %v4006_v18, 16  ;;  %v4166_v10 = vshll.u32 %v4006_v18, 16  ;;  %v3791_v2 = vld [vmem:[#allocation2 + $0x60] sm:$0xf]  ;;  %6240 = vmatpush.bf16.msrb.mxu1 %v8029_v49 }
 0x1e8   : > { %3720 = vst [vmem:[%s9308_s11 + $0x10f] sm:$0x1] %v3487_v3  ;;  %v3488_v46 = vrot.slane %v3392_v31, 1  ;;  %v3489_v0 = vrot.slane %v3392_v31, 2  ;;  %v3490_v62 = vrot.slane %v3392_v31, 3  ;;  %v3491_v13 = vrot.slane %v3392_v31, 4 }
 0x1e9   : > { %v3492_v6 = vrot.slane %v3392_v31, 5  ;;  %v3493_v7 = vrot.slane %v3392_v31, 6  ;;  %3721 = vst [vmem:[%s9308_s11 + $0x111] sm:$0x1] %v3392_v31  ;;  %v4349_v36 = vunpack.c.l.b16 %v4161_v52  ;;  %v3961_v51 = vrot.slane %v3959_v50, 4 }
 0x1ea   : > { %3722 = vst [vmem:[%s9308_s11 + $0x113] sm:$0x1] %v3488_v46  ;;  %v4172_v1 = vshll.u32 %v4007_v27, 16  ;;  %v4176_v4 = vshrl.u32 %v4007_v27, 16  ;;  %v3494_v58 = vrot.slane %v3392_v31, 7  ;;  %v4279_v8 = vpack.c.b16 %v4269_v57, %v10103_v33  ;;  %v7985_v33 = vld [vmem:[#allocation2 + $0x54] sm:$0xff] }
 0x1eb   : > { %3723 = vst [vmem:[%s9308_s11 + $0x115] sm:$0x1] %v3489_v0  ;;  %4660 = vmatmul.bf16.gmra.mxu0 %v7977_v23  ;;  %v3962_v16 = vor.u32 %v3961_v51, %v10112_v47  ;;  %v4165_v20 = vrot.slane %v4163_v55, 4  ;;  %v4168_v21 = vrot.slane %v4166_v10, 5  ;;  %v3953_v29 = vrot.slane %v3952_v9, 4  ;;  %v8215_v46 = vld [vmem:[%s351_s28] sm:%s10133_s10] }
 0x1ec   : > { %3724 = vst [vmem:[%s9308_s11 + $0x117] sm:$0x1] %v3490_v62  ;;  %v3298_v37 = vpop.f32.mrf.mxu1  ;;  %v10123_v41 = vrot.slane %v4172_v1, 5  ;;  %v3345_v17 = vpop.f32.mrf.mxu2  ;;  %v3967_v3 = vrot.slane %v3965_v14, 5  ;;  %v4178_v35 = vrot.slane %v4176_v4, 4  ;;  %v4359_v19 = vpack.c.b16 %v4349_v36, %v10109_v60  ;;  %v8218_v14 = vld [vmem:[%s351_s28 + $0x8] sm:%s10133_s10] }
 0x1ed   : > { %3725 = vst [vmem:[%s9308_s11 + $0x119] sm:$0x1] %v3491_v13  ;;  %v3394_v56 = vpop.f32.mrf.mxu3  ;;  %v3963_v11 = vrot.slane %v3962_v16, 4  ;;  %v3346_v26 = vadd.f32 %v3345_v17, %v3297_v59  ;;  %v4169_v28 = vor.u32 %v4168_v21, %v4165_v20  ;;  %v4182_v5 = vshll.u32 %v4016_v32, 16  ;;  %v3792_v53 = vld [vmem:[#allocation2 + $0x64] sm:$0xf] }
 0x1ee   : > { %3726 = vst [vmem:[%s9308_s11 + $0x11b] sm:$0x1] %v3492_v6  ;;  %v4179_v40 = vor.u32 %v4178_v35, %v10123_v41  ;;  %v3250_v24 = vadd.f32 %v9935_v30, %v3249_v25  ;;  %v3958_v38 = vsel %vm8912_vm11, %v3953_v29, %v10112_v47  ;;  %v3970_v31 = vshrl.u32 %v3791_v2, 16  ;;  %v7978_v25 = vld [vmem:[#allocation2 + $0x54] sm:$0xff] }
 0x1ef   : > { %3727 = vst [vmem:[%s9308_s11 + $0x11d] sm:$0x1] %v3493_v7  ;;  %v3395_v61 = vadd.f32 %v3394_v56, %v3346_v26  ;;  %v3968_v39 = vsel %vm8912_vm11, %v3963_v11, %v3967_v3  ;;  %v4170_v18 = vrot.slane %v4169_v28, 4  ;;  %v4184_v23 = vrot.slane %v4182_v5, 5  ;;  %v435_v26 = vld [vmem:[#allocation2 + $0x6c] sm:$0x1] }
 0x1f0   : > { %3728 = vst [vmem:[%s9308_s11 + $0x11f] sm:$0x1] %v3494_v58  ;;  %4709 = vmatmul.bf16.gmra.mxu1 %v4279_v8  ;;  %v4180_v59 = vrot.slane %v4179_v40, 4  ;;  %v3299_v60 = vadd.f32 %v3298_v37, %v3250_v24  ;;  %v3973_v50 = vshll.u32 %v3791_v2, 16  ;;  %v3979_v27 = vshll.u32 %v3792_v53, 16 }
 0x1f1   : > { %v3495_v34 = vrot.slane %v3395_v61, 1  ;;  %v3496_v42 = vrot.slane %v3395_v61, 2  ;;  %v3497_v43 = vrot.slane %v3395_v61, 3  ;;  %3729 = vst [vmem:[%s9308_s11 + $0x141] sm:$0x1] %v3395_v61  ;;  %v3498_v45 = vrot.slane %v3395_v61, 4  ;;  %v3252_v54 = vpop.f32.mrf.mxu0 }
 0x1f2   : > { %v3499_v57 = vrot.slane %v3395_v61, 5  ;;  %v3500_v0 = vrot.slane %v3395_v61, 6  ;;  %v4270_v13 = vunpack.c.l.b16 %v3958_v38  ;;  %v4271_v6 = vunpack.c.l.b16 %v3968_v39  ;;  %v3800_v8 = vld [vmem:[#allocation2 + $0x68] sm:$0x1] }
 0x1f3   : > { %4807 = vmatmul.bf16.gmra.mxu3 %v4359_v19  ;;  %3730 = vst [vmem:[%s9308_s11 + $0x143] sm:$0x1] %v3495_v34  ;;  %v3983_v7 = vshrl.u32 %v3792_v53, 16  ;;  %v3501_v52 = vrot.slane %v3395_v61, 7  ;;  %v4175_v9 = vsel %vm8912_vm11, %v4170_v18, %v10123_v41  ;;  %v3972_v51 = vrot.slane %v3970_v31, 4  ;;  %v7986_v18 = vld [vmem:[#allocation2 + $0x60] sm:$0xff] }
 0x1f4   : > { %4758 = vmatmul.bf16.gmra.mxu2 %v7985_v33  ;;  %3731 = vst [vmem:[%s9308_s11 + $0x145] sm:$0x1] %v3496_v42  ;;  %v3347_v62 = vpop.f32.mrf.mxu2  ;;  %v3301_v47 = vpop.f32.mrf.mxu1  ;;  %v3253_v10 = vadd.f32 %v9935_v30, %v3252_v54  ;;  %v4185_v1 = vsel %vm8912_vm11, %v4180_v59, %v4184_v23  ;;  %v10157_v4 = vpack.c.bf16 %v8215_v46, %v8215_v46  ;;  %v3975_v37 = vrot.slane %v3973_v50, 5 }
 0x1f5   : > { %3732 = vst [vmem:[%s9308_s11 + $0x147] sm:$0x1] %v3497_v43  ;;  %v3348_v36 = vadd.f32 %v3347_v62, %v3299_v60  ;;  %v3396_v55 = vpop.f32.mrf.mxu3  ;;  %v10160_v16 = vrot.slane %v3979_v27, 5  ;;  %v4350_v32 = vunpack.c.l.b16 %v4175_v9  ;;  %v3985_v20 = vrot.slane %v3983_v7, 4  ;;  %v467_v43 = vld [vmem:[#allocation2 + $0x74] sm:$0x1] }
 0x1f6   : > { %3733 = vst [vmem:[%s9308_s11 + $0x149] sm:$0x1] %v3498_v45  ;;  %v769_v21 = vpack.c.bf16 %v8218_v14, %v8218_v14  ;;  %v771_v41 = vshrl.u32 %v10157_v4, 16  ;;  %v4351_v11 = vunpack.c.l.b16 %v4185_v1  ;;  %v3302_v35 = vadd.f32 %v3301_v47, %v3253_v10 }
 0x1f7   : > { %3734 = vst [vmem:[%s9308_s11 + $0x14b] sm:$0x1] %v3499_v57  ;;  %v3397_v58 = vadd.f32 %v3396_v55, %v3348_v36  ;;  %v4280_v19 = vpack.c.b16 %v4271_v6, %v4270_v13  ;;  %v3976_v49 = vor.u32 %v3975_v37, %v3972_v51  ;;  %v3986_v61 = vor.u32 %v3985_v20, %v10160_v16 }
 0x1f8   : > { %3735 = vst [vmem:[%s9308_s11 + $0x14d] sm:$0x1] %v3500_v0  ;;  %v10167_v2 = vrot.slane %v771_v41, 7  ;;  %v779_v40 = vshrl.u32 %v769_v21, 16  ;;  %v3989_v24 = vshll.u32 %v3800_v8, 16  ;;  %v782_v38 = vshll.u32 %v769_v21, 16 }
 0x1f9   : > { %3736 = vst [vmem:[%s9308_s11 + $0x14f] sm:$0x1] %v3501_v52  ;;  %v3502_v17 = vrot.slane %v3397_v58, 1  ;;  %v3503_v56 = vrot.slane %v3397_v58, 2  ;;  %v3504_v29 = vrot.slane %v3397_v58, 3  ;;  %v3505_v3 = vrot.slane %v3397_v58, 4  ;;  %v3254_v33 = vpop.f32.mrf.mxu0 }
 0x1fa   : > { %3737 = vst [vmem:[%s9308_s11 + $0x151] sm:$0x1] %v3397_v58  ;;  %v3506_v28 = vrot.slane %v3397_v58, 5  ;;  %v3507_v5 = vrot.slane %v3397_v58, 6  ;;  %v3508_v39 = vrot.slane %v3397_v58, 7  ;;  %v4360_v53 = vpack.c.b16 %v4351_v11, %v4350_v32  ;;  %v7979_v52 = vld [vmem:[#allocation2 + $0x60] sm:$0xff] }
 0x1fb   : > { %4665 = vmatmul.bf16.gmra.mxu0 %v7978_v25  ;;  %3738 = vst [vmem:[%s9308_s11 + $0x153] sm:$0x1] %v3502_v17  ;;  %v777_v31 = vrot.slane %v10167_v2, 4  ;;  %v10173_v34 = vrot.slane %v779_v40, 7  ;;  %v436_v45 = vsel %vm8822_vm3, 0, %v435_v26  ;;  %v3977_v57 = vrot.slane %v3976_v49, 4 }
 0x1fc   : > { %3739 = vst [vmem:[%s9308_s11 + $0x155] sm:$0x1] %v3503_v56  ;;  %v3303_v42 = vpop.f32.mrf.mxu1  ;;  %v3987_v60 = vrot.slane %v3986_v61, 4  ;;  %v3991_v50 = vrot.slane %v3989_v24, 5  ;;  %v468_v0 = vsel %vm8828_vm4, 0, %v467_v43  ;;  %v3255_v47 = vadd.f32 %v9935_v30, %v3254_v33 }
 0x1fd   : > { %3740 = vst [vmem:[%s9308_s11 + $0x157] sm:$0x1] %v3504_v29  ;;  %v784_v54 = vor.u32 %v782_v38, %v10173_v34  ;;  %v3982_v13 = vsel %vm8912_vm11, %v3977_v57, %v10160_v16  ;;  %v774_v32 = vshll.u32 %v10157_v4, 16  ;;  %v10203_v56 = vld [vmem:[%s11044_s15] ss:$0 sm:$0xff]  ;;  %v786_v11 = vrot.slane %v10173_v34, 4 }
 0x1fe   : > { %3741 = vst [vmem:[%s9308_s11 + $0x159] sm:$0x1] %v3505_v3  ;;  %v3992_v6 = vsel %vm8912_vm11, %v3987_v60, %v3991_v50  ;;  %v3304_v9 = vadd.f32 %v3303_v42, %v3255_v47  ;;  %v4272_v51 = vunpack.c.l.b16 %v3982_v13  ;;  %v8036_v3 = vld [vmem:[#allocation9 + $0x380] sm:$0xff]  ;;  %v5192_v42 = vld [vmem:[#allocation2 + $0xc] sm:$0xf] }
 0x1ff   : > { %3742 = vst [vmem:[%s9308_s11 + $0x15b] sm:$0x1] %v3506_v28  ;;  %v785_v46 = vsel %vm8848_vm7, %v777_v31, %v784_v54  ;;  %v4273_v14 = vunpack.c.l.b16 %v3992_v6  ;;  %v8044_v4 = vld [vmem:[#allocation9 + $0x3c0] sm:$0xff]  ;;  %6290 = vmatpush.bf16.msrb.mxu2 %v8036_v3  ;;  %v5193_v43 = vld [vmem:[#allocation2 + $0x10] sm:$0xf] }
 0x200   : > { %4714 = vmatmul.bf16.gmra.mxu1 %v4280_v19  ;;  %3743 = vst [vmem:[%s9308_s11 + $0x15d] sm:$0x1] %v3507_v5  ;;  %v3399_v23 = vpop.f32.mrf.mxu3  ;;  %6339 = vmatpush.bf16.msrb.mxu3 %v8044_v4  ;;  %v8028_v34 = vld [vmem:[#allocation9 + $0x340] sm:$0xff]  ;;  %v5408_v57 = vld [vmem:[#allocation2 + $0xc] sm:$0xe]  ;;  %v5226_v60 = vshll.u32 %v5193_v43, 16 }
 0x201   : > { %v3350_v59 = vpop.f32.mrf.mxu2  ;;  %3744 = vst [vmem:[%s9308_s11 + $0x15f] sm:$0x1] %v3508_v39  ;;  %v4281_v21 = vpack.c.b16 %v4273_v14, %v4272_v51  ;;  %v776_v39 = vor.u32 %v774_v32, %v10167_v2  ;;  %6241 = vmatpush.bf16.msrb.mxu1 %v8028_v34  ;;  %v5230_v50 = vshrl.u32 %v5193_v43, 16  ;;  %v5442_v13 = vrot.slane %v5193_v43, 5  ;;  %v5712_v43 = vld [vmem:[#allocation2 + $0x18] sm:$0xe] }
 0x202   : > { %v3351_v27 = vadd.f32 %v3350_v59, %v3302_v35  ;;  %437 = vst [vmem:[#allocation2 + $0x6c] sm:$0x1] %v436_v45  ;;  %v8020_v35 = vld [vmem:[#allocation9 + $0x300] sm:$0xff]  ;;  %v5217_v59 = vshrl.u32 %v5192_v42, 16 }
 0x203   : > { %4812 = vmatmul.bf16.gmra.mxu3 %v4360_v53  ;;  %794 = vst [vmem:[#allocation2 + $0x70] sm:$0xf] %v785_v46  ;;  %6192 = vmatpush.bf16.msrb.mxu0 %v8020_v35  ;;  %v7606_v46 = vrot.slane %v5408_v57, 9  ;;  %v5444_v48 = vrot.slane %v5442_v13, 4 }
 0x204   : > { %4763 = vmatmul.bf16.gmra.mxu2 %v7986_v18  ;;  %v3400_v62 = vadd.f32 %v3399_v23, %v3351_v27  ;;  %469 = vst [vmem:[#allocation2 + $0x74] sm:$0x1] %v468_v0  ;;  %v5194_v18 = vld [vmem:[#allocation2 + $0x14] sm:$0x1]  ;;  %v5220_v23 = vshll.u32 %v5192_v42, 16 }
 0x205   : > { %v3306_v1 = vpop.f32.mrf.mxu1  ;;  %v5236_v27 = vshll.u32 %v5194_v18, 16 }
 0x206   : > { %v3509_v44 = vrot.slane %v3400_v62, 1  ;;  %v3510_v7 = vrot.slane %v3400_v62, 2  ;;  %v3511_v15 = vrot.slane %v3400_v62, 3  ;;  %3745 = vst [vmem:[%s9308_s11 + $0x181] sm:$0x1] %v3400_v62  ;;  %v3512_v36 = vrot.slane %v3400_v62, 4 }
 0x207   : > { %v3513_v30 = vrot.slane %v3400_v62, 5  ;;  %v3514_v55 = vrot.slane %v3400_v62, 6  ;;  %v3515_v58 = vrot.slane %v3400_v62, 7  ;;  %v5219_v62 = vrot.slane %v5217_v59, 4 }
 0x208   : > { %v3257_v25 = vpop.f32.mrf.mxu0  ;;  %3746 = vst [vmem:[%s9308_s11 + $0x183] sm:$0x1] %v3509_v44  ;;  %v3401_v16 = vpop.f32.mrf.mxu3  ;;  %v5222_v47 = vrot.slane %v5220_v23, 5 }
 0x209   : > { %3747 = vst [vmem:[%s9308_s11 + $0x185] sm:$0x1] %v3510_v7  ;;  %v3352_v10 = vpop.f32.mrf.mxu2  ;;  %v3258_v29 = vadd.f32 %v10203_v56, %v3257_v25  ;;  %v791_v61 = vld [vmem:[#allocation2 + $0x6c] sm:$0xf]  ;;  %v5228_v7 = vrot.slane %v5226_v60, 5 }
 0x20a   : > { %3748 = vst [vmem:[%s9308_s11 + $0x187] sm:$0x1] %v3511_v15  ;;  %v3353_v37 = vadd.f32 %v3352_v10, %v3304_v9  ;;  %v4009_v8 = vld [vmem:[#allocation2 + $0x70] sm:$0xf]  ;;  %v792_v0 = vsel %vm8855_vm8, %v776_v39, %v791_v61  ;;  %v5232_v15 = vrot.slane %v5230_v50, 4  ;;  %v5223_v25 = vor.u32 %v5222_v47, %v5219_v62 }
 0x20b   : > { %4670 = vmatmul.bf16.gmra.mxu0 %v7979_v52  ;;  %3749 = vst [vmem:[%s9308_s11 + $0x189] sm:$0x1] %v3512_v36  ;;  %v4196_v41 = vshll.u32 %v4009_v8, 16  ;;  %v4200_v17 = vshrl.u32 %v4009_v8, 16  ;;  %v795_v53 = vld [vmem:[#allocation2 + $0x74] sm:$0x1]  ;;  %v3307_v45 = vadd.f32 %v3306_v1, %v3258_v29 }
 0x20c   : > { %3750 = vst [vmem:[%s9308_s11 + $0x18b] sm:$0x1] %v3513_v30  ;;  %v3402_v20 = vadd.f32 %v3401_v16, %v3353_v37  ;;  %v796_v6 = vsel %vm8822_vm3, %v786_v11, %v795_v53  ;;  %v5445_v52 = vrot.slane %v5194_v18, 5  ;;  %v5443_v30 = vsel %vm9183_vm14, %v7606_v46, %v5442_v13  ;;  %v5496_v9 = vld [vmem:[#allocation2 + $0x18] sm:$0xf] }
 0x20d   : > { %3751 = vst [vmem:[%s9308_s11 + $0x18d] sm:$0x1] %v3514_v55  ;;  %v10209_v24 = vrot.slane %v4196_v41, 5  ;;  %v4202_v31 = vrot.slane %v4200_v17, 4  ;;  %v10217_v2 = vpop.f32.mrf.mxu1  ;;  %v5233_v12 = vor.u32 %v5232_v15, %v5228_v7  ;;  %v5238_v10 = vrot.slane %v5236_v27, 5 }
 0x20e   : > { %3752 = vst [vmem:[%s9308_s11 + $0x18f] sm:$0x1] %v3515_v58  ;;  %v3516_v19 = vrot.slane %v3402_v20, 1  ;;  %v3517_v26 = vrot.slane %v3402_v20, 2  ;;  %v3518_v28 = vrot.slane %v3402_v20, 3  ;;  %v3519_v49 = vrot.slane %v3402_v20, 4 }
 0x20f   : > { %v3520_v40 = vrot.slane %v3402_v20, 5  ;;  %v3521_v5 = vrot.slane %v3402_v20, 6  ;;  %v3522_v33 = vrot.slane %v3402_v20, 7  ;;  %3753 = vst [vmem:[%s9308_s11 + $0x191] sm:$0x1] %v3402_v20  ;;  %v4203_v54 = vor.u32 %v4202_v31, %v10209_v24 }
 0x210   : > { %v3259_v38 = vpop.f32.mrf.mxu0  ;;  %3754 = vst [vmem:[%s9308_s11 + $0x193] sm:$0x1] %v3516_v19  ;;  %4719 = vmatmul.bf16.gmra.mxu1 %v4281_v21  ;;  %v5832_v1 = vunpack.c.l.b16 %v5443_v30  ;;  %v10231_v58 = vld [vmem:[#allocation2 + $0x1c] sm:$0xf]  ;;  %v5224_v32 = vrot.slane %v5223_v25, 4  ;;  %v5446_v8 = vsel %vm9183_vm14, %v5444_v48, %v5445_v52  ;;  %v5234_v20 = vrot.slane %v5233_v12, 4 }
 0x211   : > { %3755 = vst [vmem:[%s9308_s11 + $0x195] sm:$0x1] %v3517_v26  ;;  %v3260_v36 = vadd.f32 %v10203_v56, %v3259_v38  ;;  %v10229_v51 = vrot.slane %v4203_v54, 4  ;;  %v5833_v21 = vunpack.c.l.b16 %v5446_v8  ;;  %v5521_v41 = vshrl.u32 %v5496_v9, 16  ;;  %v10243_v61 = vld [vmem:[#allocation2 + $0x20] sm:$0x1] }
 0x212   : > { %3756 = vst [vmem:[%s9308_s11 + $0x197] sm:$0x1] %v3518_v28  ;;  %v5524_v17 = vshll.u32 %v5496_v9, 16  ;;  %v5229_v11 = vsel %vm8912_vm11, %v5224_v32, %v5228_v7  ;;  %v5530_v3 = vshll.u32 %v10231_v58, 16  ;;  %v5534_v35 = vshrl.u32 %v10231_v58, 16 }
 0x213   : > { %3757 = vst [vmem:[%s9308_s11 + $0x199] sm:$0x1] %v3519_v49  ;;  %v5239_v4 = vsel %vm8912_vm11, %v5234_v20, %v5238_v10  ;;  %v5800_v19 = vunpack.c.l.b16 %v5229_v11  ;;  %v5848_v26 = vpack.c.b16 %v5833_v21, %v5832_v1  ;;  %v5523_v28 = vrot.slane %v5521_v41, 4 }
 0x214   : > { %3758 = vst [vmem:[%s9308_s11 + $0x19b] sm:$0x1] %v3520_v40  ;;  %v5801_v42 = vunpack.c.l.b16 %v5239_v4  ;;  %v3309_v54 = vadd.f32 %v10217_v2, %v3260_v36  ;;  %v5526_v59 = vrot.slane %v5524_v17, 5  ;;  %v5536_v7 = vrot.slane %v5534_v35, 4 }
 0x215   : > { %3759 = vst [vmem:[%s9308_s11 + $0x19d] sm:$0x1] %v3521_v5  ;;  %v3404_v44 = vpop.f32.mrf.mxu3  ;;  %v5540_v15 = vshll.u32 %v10243_v61, 16  ;;  %v7614_v30 = vrot.slane %v5712_v43, 9 }
 0x216   : > { %3760 = vst [vmem:[%s9308_s11 + $0x19f] sm:$0x1] %v3522_v33  ;;  %v5816_v46 = vpack.c.b16 %v5801_v42, %v5800_v19  ;;  %v5527_v13 = vor.u32 %v5526_v59, %v5523_v28  ;;  %v5195_v28 = vld [vmem:[#allocation2 + $0x18] sm:$0xf] }
 0x217   : > { %793 = vst [vmem:[#allocation2 + $0x6c] sm:$0xf] %v792_v0  ;;  %v3355_v14 = vpop.f32.mrf.mxu2  ;;  %v5241_v43 = vshrl.u32 %v5195_v28, 16 }
 0x218   : > { %v4636_v55 = vpop.f32.mrf.mxu0  ;;  %797 = vst [vmem:[#allocation2 + $0x74] sm:$0x1] %v796_v6  ;;  %v3356_v37 = vadd.f32 %v3355_v14, %v3307_v45  ;;  %v5532_v6 = vrot.slane %v5530_v3, 5  ;;  %v5528_v25 = vrot.slane %v5527_v13, 4  ;;  %v5542_v14 = vrot.slane %v5540_v15, 5 }
 0x219   : > { %v4637_v16 = vadd.f32 %v10203_v56, %v4636_v55  ;;  %v5746_v55 = vrot.slane %v10231_v58, 5 }
 0x21a   : > { %v3405_v29 = vadd.f32 %v3404_v44, %v3356_v37  ;;  %v5537_v9 = vor.u32 %v5536_v7, %v5532_v6 }
 0x21b   : > { %6193 = vmatmul.bf16.vlgmr.msrb.gmra.mxu0 %v5816_v46  ;;  %v5747_v35 = vsel %vm9183_vm14, %v7614_v30, %v5746_v55  ;;  %v5748_v4 = vrot.slane %v5746_v55, 4 }
 0x21c   : > { %v3523_v49 = vrot.slane %v3405_v29, 1  ;;  %v3524_v40 = vrot.slane %v3405_v29, 2  ;;  %v3525_v5 = vrot.slane %v3405_v29, 3  ;;  %v3526_v33 = vrot.slane %v3405_v29, 4  ;;  %3761 = vst [vmem:[%s9308_s11 + $0x1c1] sm:$0x1] %v3405_v29 }
 0x21d   : > { %v3527_v38 = vrot.slane %v3405_v29, 5  ;;  %v3528_v39 = vrot.slane %v3405_v29, 6  ;;  %v3529_v53 = vrot.slane %v3405_v29, 7  ;;  %v3406_v31 = vpop.f32.mrf.mxu3  ;;  %v4685_v34 = vpop.f32.mrf.mxu1  ;;  %v5538_v58 = vrot.slane %v5537_v9, 4 }
 0x21e   : > { %v7987_v18 = vld [vmem:[#allocation2 + $0x6c] sm:$0xff]  ;;  %3762 = vst [vmem:[%s9308_s11 + $0x1c3] sm:$0x1] %v3523_v49  ;;  %v4686_v27 = vadd.f32 %v4685_v34, %v4637_v16 }
 0x21f   : > { %v4008_v45 = vld [vmem:[#allocation2 + $0x6c] sm:$0xf]  ;;  %v4017_v23 = vld [vmem:[#allocation2 + $0x74] sm:$0x1]  ;;  %3763 = vst [vmem:[%s9308_s11 + $0x1c5] sm:$0x1] %v3524_v40  ;;  %v3357_v50 = vpop.f32.mrf.mxu2  ;;  %4768 = vmatmul.bf16.gmra.mxu2 %v7987_v18  ;;  %v5543_v40 = vsel %vm8912_vm11, %v5538_v58, %v5542_v14 }
 0x220   : > { %v4187_v57 = vshrl.u32 %v4008_v45, 16  ;;  %v4190_v60 = vshll.u32 %v4008_v45, 16  ;;  %v4638_v0 = vpop.f32.mrf.mxu0  ;;  %v4206_v62 = vshll.u32 %v4017_v23, 16  ;;  %3764 = vst [vmem:[%s9308_s11 + $0x1c7] sm:$0x1] %v3525_v5  ;;  %v3358_v47 = vadd.f32 %v3357_v50, %v3309_v54  ;;  %6242 = vmatmul.bf16.vlgmr.msrb.gmra.mxu1 %v5848_v26 }
 0x221   : > { %3765 = vst [vmem:[%s9308_s11 + $0x1c9] sm:$0x1] %v3526_v33  ;;  %v5749_v5 = vrot.slane %v10243_v61, 5  ;;  %v5896_v33 = vunpack.c.l.b16 %v5747_v35  ;;  %v5244_v18 = vshll.u32 %v5195_v28, 16  ;;  %v10279_v23 = vld [vmem:[#allocation2 + $0x20] sm:$0x1] }
 0x222   : > { %v4189_v2 = vrot.slane %v4187_v57, 4  ;;  %v4192_v44 = vrot.slane %v4190_v60, 5  ;;  %v4208_v52 = vrot.slane %v4206_v62, 5  ;;  %3766 = vst [vmem:[%s9308_s11 + $0x1cb] sm:$0x1] %v3527_v38  ;;  %v3407_v36 = vadd.f32 %v3406_v31, %v3358_v47 }
 0x223   : > { %3767 = vst [vmem:[%s9308_s11 + $0x1cd] sm:$0x1] %v3528_v39  ;;  %v4639_v39 = vadd.f32 %v10203_v56, %v4638_v0  ;;  %v5196_v31 = vld [vmem:[#allocation2 + $0x1c] sm:$0xf]  ;;  %v5750_v42 = vsel %vm9183_vm14, %v5748_v4, %v5749_v5  ;;  %v5409_v57 = vld [vmem:[#allocation2 + $0x18] sm:$0xe] }
 0x224   : > { %v4193_v48 = vor.u32 %v4192_v44, %v4189_v2  ;;  %v4209_v12 = vsel %vm8912_vm11, %v10229_v51, %v4208_v52  ;;  %3768 = vst [vmem:[%s9308_s11 + $0x1cf] sm:$0x1] %v3529_v53  ;;  %v3530_v10 = vrot.slane %v3407_v36, 1  ;;  %v3531_v1 = vrot.slane %v3407_v36, 2  ;;  %v5501_v58 = vld [vmem:[#allocation2 + $0x2c] sm:$0x1] }
 0x225   : > { %v3532_v37 = vrot.slane %v3407_v36, 3  ;;  %v4353_v32 = vunpack.c.l.b16 %v4209_v12  ;;  %v3533_v8 = vrot.slane %v3407_v36, 4  ;;  %v3534_v20 = vrot.slane %v3407_v36, 5  ;;  %3769 = vst [vmem:[%s9308_s11 + $0x1d1] sm:$0x1] %v3407_v36  ;;  %v4687_v41 = vpop.f32.mrf.mxu1 }
 0x226   : > { %v4194_v16 = vrot.slane %v4193_v48, 4  ;;  %v4783_v21 = vpop.f32.mrf.mxu3  ;;  %v3535_v17 = vrot.slane %v3407_v36, 6  ;;  %v3536_v29 = vrot.slane %v3407_v36, 7  ;;  %3770 = vst [vmem:[%s9308_s11 + $0x1d3] sm:$0x1] %v3530_v10  ;;  %v5533_v51 = vsel %vm8912_vm11, %v5528_v25, %v5532_v6 }
 0x227   : > { %3771 = vst [vmem:[%s9308_s11 + $0x1d5] sm:$0x1] %v3531_v1  ;;  %v5864_v3 = vunpack.c.l.b16 %v5533_v51  ;;  %v4734_v19 = vpop.f32.mrf.mxu2  ;;  %v5897_v61 = vunpack.c.l.b16 %v5750_v42  ;;  %v4688_v59 = vadd.f32 %v4687_v41, %v4639_v39  ;;  %v5243_v60 = vrot.slane %v5241_v43, 4  ;;  %v5499_v36 = vld [vmem:[#allocation2 + $0x24] sm:$0xf] }
 0x228   : > { %v4199_v11 = vsel %vm8912_vm11, %v4194_v16, %v10209_v24  ;;  %v4641_v26 = vpop.f32.mrf.mxu0  ;;  %3772 = vst [vmem:[%s9308_s11 + $0x1d7] sm:$0x1] %v3532_v37  ;;  %v5865_v24 = vunpack.c.l.b16 %v5543_v40  ;;  %v4735_v38 = vadd.f32 %v4734_v19, %v4686_v27  ;;  %v5246_v50 = vrot.slane %v5244_v18, 5  ;;  %v5500_v51 = vld [vmem:[#allocation2 + $0x28] sm:$0xf] }
 0x229   : > { %v4352_v49 = vunpack.c.l.b16 %v4199_v11  ;;  %3773 = vst [vmem:[%s9308_s11 + $0x1d9] sm:$0x1] %v3533_v8  ;;  %v4642_v53 = vadd.f32 %v10203_v56, %v4641_v26  ;;  %v5250_v27 = vshll.u32 %v5196_v31, 16  ;;  %v5254_v46 = vshrl.u32 %v5196_v31, 16  ;;  %v5713_v19 = vld [vmem:[#allocation2 + $0x24] sm:$0xe] }
 0x22a   : > { %3774 = vst [vmem:[%s9308_s11 + $0x1db] sm:$0x1] %v3534_v20  ;;  %v5880_v45 = vpack.c.b16 %v5865_v24, %v5864_v3  ;;  %v4784_v54 = vadd.f32 %v4783_v21, %v4735_v38  ;;  %v10282_v0 = vpack.c.b16 %v5897_v61, %v5896_v33  ;;  %v5247_v48 = vor.u32 %v5246_v50, %v5243_v60 }
 0x22b   : > { %v4361_v34 = vpack.c.b16 %v4353_v32, %v4352_v49  ;;  %3775 = vst [vmem:[%s9308_s11 + $0x1dd] sm:$0x1] %v3535_v17  ;;  %v5252_v9 = vrot.slane %v5250_v27, 5  ;;  %v5256_v14 = vrot.slane %v5254_v46, 4  ;;  %v5260_v10 = vshll.u32 %v10279_v23, 16 }
 0x22c   : > { %3776 = vst [vmem:[%s9308_s11 + $0x1df] sm:$0x1] %v3536_v29  ;;  %v4839_v62 = vrot.slane %v4784_v54, 1  ;;  %v4840_v47 = vrot.slane %v4784_v54, 2  ;;  %v4841_v13 = vrot.slane %v4784_v54, 3  ;;  %v4842_v44 = vrot.slane %v4784_v54, 4 }
 0x22d   : > { %4817 = vmatmul.bf16.gmra.mxu3 %v4361_v34  ;;  %7478 = vst [vmem:[%s9308_s11 + $0x20] sm:$0x1] %v4784_v54  ;;  %v4690_v2 = vpop.f32.mrf.mxu1  ;;  %v4843_v7 = vrot.slane %v4784_v54, 5  ;;  %v4844_v15 = vrot.slane %v4784_v54, 6  ;;  %v4845_v52 = vrot.slane %v4784_v54, 7  ;;  %v7607_v1 = vrot.slane %v5409_v57, 9 }
 0x22e   : > { %v4785_v6 = vpop.f32.mrf.mxu3  ;;  %7479 = vst [vmem:[%s9308_s11 + $0x22] sm:$0x1] %v4839_v62  ;;  %v10286_v30 = vadd.f32 %v4690_v2, %v4642_v53  ;;  %v5449_v37 = vrot.slane %v5196_v31, 5  ;;  %v5248_v16 = vrot.slane %v5247_v48, 4  ;;  %v5257_v32 = vor.u32 %v5256_v14, %v5252_v9  ;;  %v5198_v57 = vld [vmem:[#allocation2 + $0x24] sm:$0xf] }
 0x22f   : > { %v4736_v25 = vpop.f32.mrf.mxu2  ;;  %6291 = vmatmul.bf16.vlgmr.msrb.gmra.mxu2 %v5880_v45  ;;  %7480 = vst [vmem:[%s9308_s11 + $0x24] sm:$0x1] %v4840_v47  ;;  %v5452_v8 = vrot.slane %v10279_v23, 5  ;;  %v5545_v20 = vshrl.u32 %v5499_v36, 16  ;;  %v5262_v41 = vrot.slane %v5260_v10, 5  ;;  %v5548_v43 = vshll.u32 %v5499_v36, 16 }
 0x230   : > { %v10288_v55 = vpop.f32.mrf.mxu0  ;;  %v4737_v12 = vadd.f32 %v4736_v25, %v4688_v59  ;;  %7481 = vst [vmem:[%s9308_s11 + $0x26] sm:$0x1] %v4841_v13  ;;  %v5450_v17 = vsel %vm9183_vm14, %v7607_v1, %v5449_v37  ;;  %v5451_v29 = vrot.slane %v5449_v37, 4  ;;  %v5253_v11 = vsel %vm8912_vm11, %v5248_v16, %v5252_v9 }
 0x231   : > { %7482 = vst [vmem:[%s9308_s11 + $0x28] sm:$0x1] %v4842_v44  ;;  %v5258_v3 = vrot.slane %v5257_v32, 4  ;;  %v5834_v35 = vunpack.c.l.b16 %v5450_v17  ;;  %v5547_v4 = vrot.slane %v5545_v20, 4  ;;  %v5802_v31 = vunpack.c.l.b16 %v5253_v11  ;;  %v5199_v20 = vld [vmem:[#allocation2 + $0x28] sm:$0xf] }
 0x232   : > { %v10295_v21 = vadd.f32 %v4785_v6, %v4737_v12  ;;  %7483 = vst [vmem:[%s9308_s11 + $0x2a] sm:$0x1] %v4843_v7  ;;  %v5453_v42 = vsel %vm9183_vm14, %v5451_v29, %v5452_v8  ;;  %v5554_v45 = vshll.u32 %v5500_v51, 16  ;;  %v5558_v61 = vshrl.u32 %v5500_v51, 16 }
 0x233   : > { %7484 = vst [vmem:[%s9308_s11 + $0x2c] sm:$0x1] %v4844_v15  ;;  %v5263_v38 = vsel %vm8912_vm11, %v5258_v3, %v5262_v41  ;;  %v5835_v18 = vunpack.c.l.b16 %v5453_v42  ;;  %v5564_v54 = vshll.u32 %v5501_v58, 16  ;;  %v5550_v50 = vrot.slane %v5548_v43, 5  ;;  %v5200_v3 = vld [vmem:[#allocation2 + $0x2c] sm:$0x1] }
 0x234   : > { %v4846_v26 = vrot.slane %v10295_v21, 1  ;;  %v4847_v28 = vrot.slane %v10295_v21, 2  ;;  %v4848_v49 = vrot.slane %v10295_v21, 3  ;;  %v4849_v40 = vrot.slane %v10295_v21, 4  ;;  %7485 = vst [vmem:[%s9308_s11 + $0x2e] sm:$0x1] %v4845_v52 }
 0x235   : > { %v4850_v5 = vrot.slane %v10295_v21, 5  ;;  %v4851_v33 = vrot.slane %v10295_v21, 6  ;;  %v4852_v24 = vrot.slane %v10295_v21, 7  ;;  %v4692_v53 = vpop.f32.mrf.mxu1  ;;  %7486 = vst [vmem:[%s9308_s11 + $0x30] sm:$0x1] %v10295_v21  ;;  %v5803_v34 = vunpack.c.l.b16 %v5263_v38 }
 0x236   : > { %v4788_v39 = vpop.f32.mrf.mxu3  ;;  %7487 = vst [vmem:[%s9308_s11 + $0x32] sm:$0x1] %v4846_v26  ;;  %v7615_v27 = vrot.slane %v5713_v19, 9  ;;  %v5753_v46 = vrot.slane %v5500_v51, 5  ;;  %v5849_v62 = vpack.c.b16 %v5835_v18, %v5834_v35  ;;  %v5556_v47 = vrot.slane %v5554_v45, 5 }
 0x237   : > { %v4739_v59 = vpop.f32.mrf.mxu2  ;;  %7488 = vst [vmem:[%s9308_s11 + $0x34] sm:$0x1] %v4847_v28  ;;  %v5817_v60 = vpack.c.b16 %v5803_v34, %v5802_v31  ;;  %v5560_v13 = vrot.slane %v5558_v61, 4  ;;  %v5566_v6 = vrot.slane %v5564_v54, 5  ;;  %v5551_v2 = vor.u32 %v5550_v50, %v5547_v4  ;;  %v5502_v45 = vld [vmem:[#allocation2 + $0x30] sm:$0xf] }
 0x238   : > { %v4646_v23 = vpop.f32.mrf.mxu0  ;;  %7489 = vst [vmem:[%s9308_s11 + $0x36] sm:$0x1] %v4848_v49  ;;  %v5754_v44 = vsel %vm9183_vm14, %v7615_v27, %v5753_v46  ;;  %v5755_v7 = vrot.slane %v5753_v46, 4  ;;  %v5756_v15 = vrot.slane %v5501_v58, 5  ;;  %6247 = vmatmul.bf16.gmra.mxu1 %v5849_v62  ;;  %v4740_v25 = vadd.f32 %v4739_v59, %v10286_v30  ;;  %v5410_v49 = vld [vmem:[#allocation2 + $0x24] sm:$0xe] }
 0x239   : > { %7490 = vst [vmem:[%s9308_s11 + $0x38] sm:$0x1] %v4849_v40  ;;  %6198 = vmatmul.bf16.gmra.mxu0 %v5817_v60  ;;  %v5561_v52 = vor.u32 %v5560_v13, %v5556_v47  ;;  %v5898_v36 = vunpack.c.l.b16 %v5754_v44  ;;  %v4644_v48 = vadd.f32 %v10203_v56, %v10288_v55  ;;  %v5552_v9 = vrot.slane %v5551_v2, 4 }
 0x23a   : > { %7491 = vst [vmem:[%s9308_s11 + $0x3a] sm:$0x1] %v4850_v5  ;;  %v5757_v14 = vsel %vm9183_vm14, %v5755_v7, %v5756_v15  ;;  %v4647_v12 = vadd.f32 %v10203_v56, %v4646_v23  ;;  %v5265_v10 = vshrl.u32 %v5198_v57, 16  ;;  %v4789_v16 = vadd.f32 %v4788_v39, %v4740_v25 }
 0x23b   : > { %7492 = vst [vmem:[%s9308_s11 + $0x3c] sm:$0x1] %v4851_v33  ;;  %v5562_v1 = vrot.slane %v5561_v52, 4  ;;  %v5899_v37 = vunpack.c.l.b16 %v5757_v14  ;;  %v4693_v32 = vadd.f32 %v4692_v53, %v4644_v48  ;;  %v5557_v55 = vsel %vm8912_vm11, %v5552_v9, %v5556_v47 }
 0x23c   : > { %7493 = vst [vmem:[%s9308_s11 + $0x3e] sm:$0x1] %v4852_v24  ;;  %v5267_v21 = vrot.slane %v5265_v10, 4  ;;  %v5268_v41 = vshll.u32 %v5198_v57, 16  ;;  %v5866_v29 = vunpack.c.l.b16 %v5557_v55  ;;  %v4853_v58 = vrot.slane %v4789_v16, 1 }
 0x23d   : > { %6340 = vmatmul.bf16.vlgmr.msrb.gmra.mxu3 %v10282_v0  ;;  %v4695_v30 = vpop.f32.mrf.mxu1  ;;  %v5567_v17 = vsel %vm8912_vm11, %v5562_v1, %v5566_v6  ;;  %v10339_v51 = vpack.c.b16 %v5899_v37, %v5898_v36  ;;  %7494 = vst [vmem:[%s9308_s11 + $0x60] sm:$0x1] %v4789_v16  ;;  %v4854_v19 = vrot.slane %v4789_v16, 2  ;;  %v4855_v26 = vrot.slane %v4789_v16, 3  ;;  %v10350_v57 = vld [vmem:[#allocation2 + $0x34] sm:$0xf] }
 0x23e   : > { %v4790_v8 = vpop.f32.mrf.mxu3  ;;  %v10335_v0 = vadd.f32 %v4695_v30, %v4647_v12  ;;  %v5867_v4 = vunpack.c.l.b16 %v5567_v17  ;;  %v4856_v28 = vrot.slane %v4789_v16, 4  ;;  %v4857_v40 = vrot.slane %v4789_v16, 5  ;;  %7495 = vst [vmem:[%s9308_s11 + $0x62] sm:$0x1] %v4853_v58  ;;  %v5504_v36 = vld [vmem:[#allocation2 + $0x38] sm:$0x1] }
 0x23f   : > { %v4741_v11 = vpop.f32.mrf.mxu2  ;;  %v4858_v5 = vrot.slane %v4789_v16, 6  ;;  %v4859_v33 = vrot.slane %v4789_v16, 7  ;;  %7496 = vst [vmem:[%s9308_s11 + $0x64] sm:$0x1] %v4854_v19  ;;  %v5270_v39 = vrot.slane %v5268_v41, 5  ;;  %v5274_v53 = vshll.u32 %v5199_v20, 16 }
 0x240   : > { %v10342_v35 = vpop.f32.mrf.mxu0  ;;  %v4742_v24 = vadd.f32 %v4741_v11, %v4693_v32  ;;  %v5881_v38 = vpack.c.b16 %v5867_v4, %v5866_v29  ;;  %v5278_v31 = vshrl.u32 %v5199_v20, 16  ;;  %7497 = vst [vmem:[%s9308_s11 + $0x66] sm:$0x1] %v4855_v26  ;;  %v5284_v42 = vshll.u32 %v5200_v3, 16  ;;  %v5714_v1 = vld [vmem:[#allocation2 + $0x30] sm:$0xe] }
 0x241   : > { %v7608_v43 = vrot.slane %v5410_v49, 9  ;;  %v5456_v18 = vrot.slane %v5199_v20, 5  ;;  %7498 = vst [vmem:[%s9308_s11 + $0x68] sm:$0x1] %v4856_v28  ;;  %v5271_v61 = vor.u32 %v5270_v39, %v5267_v21  ;;  %v5276_v54 = vrot.slane %v5274_v53, 5 }
 0x242   : > { %v10347_v34 = vadd.f32 %v4790_v8, %v4742_v24  ;;  %6296 = vmatmul.bf16.gmra.mxu2 %v5881_v38  ;;  %v5280_v59 = vrot.slane %v5278_v31, 4  ;;  %v5459_v23 = vrot.slane %v5200_v3, 5  ;;  %7499 = vst [vmem:[%s9308_s11 + $0x6a] sm:$0x1] %v4857_v40  ;;  %v5286_v7 = vrot.slane %v5284_v42, 5 }
 0x243   : > { %7500 = vst [vmem:[%s9308_s11 + $0x6c] sm:$0x1] %v4858_v5  ;;  %v5272_v2 = vrot.slane %v5271_v61, 4  ;;  %v5457_v15 = vsel %vm9183_vm14, %v7608_v43, %v5456_v18  ;;  %v5458_v52 = vrot.slane %v5456_v18, 4  ;;  %v5569_v12 = vshrl.u32 %v5502_v45, 16 }
 0x244   : > { %v4860_v60 = vrot.slane %v10347_v34, 1  ;;  %v4861_v50 = vrot.slane %v10347_v34, 2  ;;  %v4862_v27 = vrot.slane %v10347_v34, 3  ;;  %v4863_v46 = vrot.slane %v10347_v34, 4  ;;  %7501 = vst [vmem:[%s9308_s11 + $0x6e] sm:$0x1] %v4859_v33 }
 0x245   : > { %v10357_v62 = vpop.f32.mrf.mxu1  ;;  %v4864_v47 = vrot.slane %v10347_v34, 5  ;;  %v4865_v13 = vrot.slane %v10347_v34, 6  ;;  %v4866_v6 = vrot.slane %v10347_v34, 7  ;;  %v5281_v44 = vor.u32 %v5280_v59, %v5276_v54  ;;  %7502 = vst [vmem:[%s9308_s11 + $0x70] sm:$0x1] %v10347_v34 }
 0x246   : > { %v5277_v9 = vsel %vm8912_vm11, %v5272_v2, %v5276_v54  ;;  %v5836_v14 = vunpack.c.l.b16 %v5457_v15  ;;  %v5572_v10 = vshll.u32 %v5502_v45, 16  ;;  %7503 = vst [vmem:[%s9308_s11 + $0x72] sm:$0x1] %v4860_v60  ;;  %v5460_v32 = vsel %vm9183_vm14, %v5458_v52, %v5459_v23  ;;  %v4793_v55 = vpop.f32.mrf.mxu3  ;;  %v5201_v54 = vld [vmem:[#allocation2 + $0x30] sm:$0xf] }
 0x247   : > { %v4744_v25 = vpop.f32.mrf.mxu2  ;;  %v5282_v37 = vrot.slane %v5281_v44, 4  ;;  %v5804_v16 = vunpack.c.l.b16 %v5277_v9  ;;  %v5578_v30 = vshll.u32 %v10350_v57, 16  ;;  %7504 = vst [vmem:[%s9308_s11 + $0x74] sm:$0x1] %v4861_v50  ;;  %v5837_v8 = vunpack.c.l.b16 %v5460_v32  ;;  %v5202_v50 = vld [vmem:[#allocation2 + $0x34] sm:$0xf] }
 0x248   : > { %v4651_v48 = vpop.f32.mrf.mxu0  ;;  %v5571_v20 = vrot.slane %v5569_v12, 4  ;;  %v5574_v21 = vrot.slane %v5572_v10, 5  ;;  %v5582_v41 = vshrl.u32 %v10350_v57, 16  ;;  %7505 = vst [vmem:[%s9308_s11 + $0x76] sm:$0x1] %v4862_v27  ;;  %v5588_v58 = vshll.u32 %v5504_v36, 16 }
 0x249   : > { %v5287_v17 = vsel %vm8912_vm11, %v5282_v37, %v5286_v7  ;;  %v5580_v29 = vrot.slane %v5578_v30, 5  ;;  %v7616_v11 = vrot.slane %v5714_v1, 9  ;;  %7506 = vst [vmem:[%s9308_s11 + $0x78] sm:$0x1] %v4863_v46  ;;  %v5850_v4 = vpack.c.b16 %v5837_v8, %v5836_v14  ;;  %v5505_v8 = vld [vmem:[#allocation2 + $0x3c] sm:$0xf] }
 0x24a   : > { %v5805_v3 = vunpack.c.l.b16 %v5287_v17  ;;  %v5575_v19 = vor.u32 %v5574_v21, %v5571_v20  ;;  %v5584_v26 = vrot.slane %v5582_v41, 4  ;;  %7507 = vst [vmem:[%s9308_s11 + $0x7a] sm:$0x1] %v4864_v47  ;;  %v5590_v28 = vrot.slane %v5588_v58, 5 }
 0x24b   : > { %v5760_v49 = vrot.slane %v10350_v57, 5  ;;  %v5763_v40 = vrot.slane %v5504_v36, 5  ;;  %v4745_v5 = vadd.f32 %v4744_v25, %v10335_v0  ;;  %7508 = vst [vmem:[%s9308_s11 + $0x7c] sm:$0x1] %v4865_v13  ;;  %6252 = vmatmul.bf16.gmra.mxu1 %v5850_v4  ;;  %v4652_v43 = vadd.f32 %v10203_v56, %v4651_v48 }
 0x24c   : > { %v5818_v24 = vpack.c.b16 %v5805_v3, %v5804_v16  ;;  %v5576_v38 = vrot.slane %v5575_v19, 4  ;;  %v5585_v39 = vor.u32 %v5584_v26, %v5580_v29  ;;  %7509 = vst [vmem:[%s9308_s11 + $0x7e] sm:$0x1] %v4866_v6  ;;  %v10401_v6 = vld [vmem:[#allocation2 + $0x38] sm:$0x1]  ;;  %v5289_v9 = vshrl.u32 %v5201_v54, 16 }
 0x24d   : > { %6345 = vmatmul.bf16.gmra.mxu3 %v10339_v51  ;;  %v4700_v33 = vpop.f32.mrf.mxu1  ;;  %v4649_v51 = vadd.f32 %v10203_v56, %v10342_v35  ;;  %v5761_v53 = vsel %vm9183_vm14, %v7616_v11, %v5760_v49  ;;  %v5762_v31 = vrot.slane %v5760_v49, 4  ;;  %v4794_v34 = vadd.f32 %v4793_v55, %v4745_v5 }
 0x24e   : > { %6203 = vmatmul.bf16.gmra.mxu0 %v5818_v24  ;;  %v5581_v18 = vsel %vm8912_vm11, %v5576_v38, %v5580_v29  ;;  %v5586_v45 = vrot.slane %v5585_v39, 4  ;;  %v5900_v61 = vunpack.c.l.b16 %v5761_v53  ;;  %v4795_v52 = vpop.f32.mrf.mxu3  ;;  %v10405_v48 = vadd.f32 %v4700_v33, %v4652_v43  ;;  %v10415_v29 = vld [vmem:[#allocation2 + $0x40] sm:$0xf] }
 0x24f   : > { %v4746_v42 = vpop.f32.mrf.mxu2  ;;  %v4698_v35 = vadd.f32 %v10357_v62, %v4649_v51  ;;  %v5868_v59 = vunpack.c.l.b16 %v5581_v18  ;;  %v5764_v23 = vsel %vm9183_vm14, %v5762_v31, %v5763_v40  ;;  %v4867_v57 = vrot.slane %v4794_v34, 1  ;;  %7510 = vst [vmem:[%s9308_s11 + $0xa0] sm:$0x1] %v4794_v34  ;;  %v5411_v62 = vld [vmem:[#allocation2 + $0x30] sm:$0xe] }
 0x250   : > { %v10391_v0 = vpop.f32.mrf.mxu0  ;;  %v4868_v60 = vrot.slane %v4794_v34, 2  ;;  %v5591_v27 = vsel %vm8912_vm11, %v5586_v45, %v5590_v28  ;;  %v5901_v46 = vunpack.c.l.b16 %v5764_v23  ;;  %v4869_v47 = vrot.slane %v4794_v34, 3  ;;  %v5507_v51 = vld [vmem:[#allocation2 + $0x44] sm:$0x1] }
 0x251   : > { %v4870_v13 = vrot.slane %v4794_v34, 4  ;;  %v5869_v2 = vunpack.c.l.b16 %v5591_v27  ;;  %v4871_v44 = vrot.slane %v4794_v34, 5  ;;  %v4872_v7 = vrot.slane %v4794_v34, 6  ;;  %7511 = vst [vmem:[%s9308_s11 + $0xa2] sm:$0x1] %v4867_v57 }
 0x252   : > { %v4873_v15 = vrot.slane %v4794_v34, 7  ;;  %v5914_v36 = vpack.c.b16 %v5901_v46, %v5900_v61  ;;  %7512 = vst [vmem:[%s9308_s11 + $0xa4] sm:$0x1] %v4868_v60  ;;  %v4747_v25 = vadd.f32 %v4746_v42, %v4698_v35  ;;  %v5292_v12 = vshll.u32 %v5201_v54, 16  ;;  %v5715_v57 = vld [vmem:[#allocation2 + $0x3c] sm:$0xe] }
 0x253   : > { %v5882_v14 = vpack.c.b16 %v5869_v2, %v5868_v59  ;;  %7513 = vst [vmem:[%s9308_s11 + $0xa6] sm:$0x1] %v4869_v47  ;;  %v5298_v10 = vshll.u32 %v5202_v50, 16  ;;  %v5302_v1 = vshrl.u32 %v5202_v50, 16  ;;  %v5291_v32 = vrot.slane %v5289_v9, 4 }
 0x254   : > { %7514 = vst [vmem:[%s9308_s11 + $0xa8] sm:$0x1] %v4870_v13  ;;  %v10411_v16 = vadd.f32 %v4795_v52, %v4747_v25  ;;  %v5308_v30 = vshll.u32 %v10401_v6, 16  ;;  %v7609_v55 = vrot.slane %v5411_v62, 9  ;;  %v5294_v20 = vrot.slane %v5292_v12, 5 }
 0x255   : > { %v10408_v37 = vpop.f32.mrf.mxu1  ;;  %6301 = vmatmul.bf16.gmra.mxu2 %v5882_v14  ;;  %7515 = vst [vmem:[%s9308_s11 + $0xaa] sm:$0x1] %v4871_v44  ;;  %v5300_v21 = vrot.slane %v5298_v10, 5  ;;  %v5304_v41 = vrot.slane %v5302_v1, 4  ;;  %v5463_v17 = vrot.slane %v5202_v50, 5  ;;  %v5466_v31 = vrot.slane %v10401_v6, 5 }
 0x256   : > { %7516 = vst [vmem:[%s9308_s11 + $0xac] sm:$0x1] %v4872_v7  ;;  %v4874_v3 = vrot.slane %v10411_v16, 1  ;;  %v4875_v4 = vrot.slane %v10411_v16, 2  ;;  %v4876_v19 = vrot.slane %v10411_v16, 3  ;;  %v4877_v26 = vrot.slane %v10411_v16, 4  ;;  %v4798_v60 = vpop.f32.mrf.mxu3 }
 0x257   : > { %v4749_v58 = vpop.f32.mrf.mxu2  ;;  %7517 = vst [vmem:[%s9308_s11 + $0xae] sm:$0x1] %v4873_v15  ;;  %v4878_v28 = vrot.slane %v10411_v16, 5  ;;  %v4879_v49 = vrot.slane %v10411_v16, 6  ;;  %v4880_v40 = vrot.slane %v10411_v16, 7  ;;  %v5295_v5 = vor.u32 %v5294_v20, %v5291_v32 }
 0x258   : > { %v10417_v11 = vpop.f32.mrf.mxu0  ;;  %7518 = vst [vmem:[%s9308_s11 + $0xb0] sm:$0x1] %v10411_v16  ;;  %v5305_v33 = vor.u32 %v5304_v41, %v5300_v21  ;;  %v5310_v24 = vrot.slane %v5308_v30, 5  ;;  %v5464_v38 = vsel %vm9183_vm14, %v7609_v55, %v5463_v17  ;;  %v5465_v39 = vrot.slane %v5463_v17, 4  ;;  %v5204_v1 = vld [vmem:[#allocation2 + $0x3c] sm:$0xf] }
 0x259   : > { %7519 = vst [vmem:[%s9308_s11 + $0xb2] sm:$0x1] %v4874_v3  ;;  %v5296_v53 = vrot.slane %v5295_v5, 4  ;;  %v5838_v34 = vunpack.c.l.b16 %v5464_v38  ;;  %v5593_v42 = vshrl.u32 %v5505_v8, 16  ;;  %v5596_v18 = vshll.u32 %v5505_v8, 16 }
 0x25a   : > { %7520 = vst [vmem:[%s9308_s11 + $0xb4] sm:$0x1] %v4875_v4  ;;  %v5306_v43 = vrot.slane %v5305_v33, 4  ;;  %v5602_v45 = vshll.u32 %v10415_v29, 16  ;;  %v5606_v61 = vshrl.u32 %v10415_v29, 16  ;;  %v5467_v54 = vsel %vm9183_vm14, %v5465_v39, %v5466_v31 }
 0x25b   : > { %7521 = vst [vmem:[%s9308_s11 + $0xb6] sm:$0x1] %v4876_v19  ;;  %v5301_v35 = vsel %vm8912_vm11, %v5296_v53, %v5300_v21  ;;  %v5595_v59 = vrot.slane %v5593_v42, 4  ;;  %v5612_v23 = vshll.u32 %v5507_v51, 16  ;;  %v5839_v47 = vunpack.c.l.b16 %v5467_v54 }
 0x25c   : > { %7522 = vst [vmem:[%s9308_s11 + $0xb8] sm:$0x1] %v4877_v26  ;;  %v5311_v27 = vsel %vm8912_vm11, %v5306_v43, %v5310_v24  ;;  %v5806_v46 = vunpack.c.l.b16 %v5301_v35  ;;  %v5598_v13 = vrot.slane %v5596_v18, 5  ;;  %v5604_v62 = vrot.slane %v5602_v45, 5  ;;  %v5412_v24 = vld [vmem:[#allocation2 + $0x3c] sm:$0xe] }
 0x25d   : > { %6350 = vmatmul.bf16.gmra.mxu3 %v5914_v36  ;;  %v4705_v50 = vpop.f32.mrf.mxu1  ;;  %7523 = vst [vmem:[%s9308_s11 + $0xba] sm:$0x1] %v4878_v28  ;;  %v5807_v6 = vunpack.c.l.b16 %v5311_v27  ;;  %v5608_v2 = vrot.slane %v5606_v61, 4  ;;  %v5614_v44 = vrot.slane %v5612_v23, 5  ;;  %v5851_v15 = vpack.c.b16 %v5839_v47, %v5838_v34  ;;  %v5508_v23 = vld [vmem:[#allocation2 + $0x48] sm:$0xf] }
 0x25e   : > { %7524 = vst [vmem:[%s9308_s11 + $0xbc] sm:$0x1] %v4879_v49  ;;  %v5599_v52 = vor.u32 %v5598_v13, %v5595_v59  ;;  %v7617_v36 = vrot.slane %v5715_v57, 9  ;;  %v5767_v25 = vrot.slane %v10415_v29, 5  ;;  %v5770_v12 = vrot.slane %v5507_v51, 5  ;;  %v4800_v31 = vpop.f32.mrf.mxu3 }
 0x25f   : > { %v4751_v7 = vpop.f32.mrf.mxu2  ;;  %7525 = vst [vmem:[%s9308_s11 + $0xbe] sm:$0x1] %v4880_v40  ;;  %v5819_v9 = vpack.c.b16 %v5807_v6, %v5806_v46  ;;  %v5609_v14 = vor.u32 %v5608_v2, %v5604_v62  ;;  %v4750_v10 = vadd.f32 %v4749_v58, %v10405_v48  ;;  %6257 = vmatmul.bf16.gmra.mxu1 %v5851_v15  ;;  %v10459_v48 = vld [vmem:[%s11044_s15] ss:$0 sm:$0xff]  ;;  %v5313_v3 = vshrl.u32 %v5204_v1, 16 }
 0x260   : > { %v10450_v16 = vpop.f32.mrf.mxu0  ;;  %v5600_v32 = vrot.slane %v5599_v52, 4  ;;  %v5768_v30 = vsel %vm9183_vm14, %v7617_v36, %v5767_v25  ;;  %v5769_v55 = vrot.slane %v5767_v25, 4  ;;  %v4654_v8 = vadd.f32 %v10203_v56, %v10391_v0  ;;  %v5205_v0 = vld [vmem:[#allocation2 + $0x40] sm:$0xf]  ;;  %v10487_v46 = vld [vmem:[#allocation2 + $0x4c] sm:$0xf] }
 0x261   : > { %6208 = vmatmul.bf16.gmra.mxu0 %v5819_v9  ;;  %v5610_v20 = vrot.slane %v5609_v14, 4  ;;  %v5902_v21 = vunpack.c.l.b16 %v5768_v30  ;;  %v4799_v41 = vadd.f32 %v4798_v60, %v4750_v10  ;;  %v4657_v17 = vadd.f32 %v10459_v48, %v10417_v11  ;;  %v10471_v11 = vld [vmem:[#allocation2 + $0x44] sm:$0x1] }
 0x262   : > { %v5605_v29 = vsel %vm8912_vm11, %v5600_v32, %v5604_v62  ;;  %v5771_v58 = vsel %vm9183_vm14, %v5769_v55, %v5770_v12  ;;  %v4703_v56 = vadd.f32 %v10408_v37, %v4654_v8  ;;  %v5315_v45 = vrot.slane %v5313_v3, 4  ;;  %v5510_v12 = vld [vmem:[#allocation2 + $0x50] sm:$0x1]  ;;  %v5716_v55 = vld [vmem:[#allocation2 + $0x48] sm:$0xe] }
 0x263   : > { %v5615_v4 = vsel %vm8912_vm11, %v5610_v20, %v5614_v44  ;;  %v5870_v19 = vunpack.c.l.b16 %v5605_v29  ;;  %v5903_v26 = vunpack.c.l.b16 %v5771_v58  ;;  %v4881_v28 = vrot.slane %v4799_v41, 1  ;;  %7526 = vst [vmem:[%s9308_s11 + $0xe0] sm:$0x1] %v4799_v41 }
 0x264   : > { %v5871_v40 = vunpack.c.l.b16 %v5615_v4  ;;  %v4882_v5 = vrot.slane %v4799_v41, 2  ;;  %v4883_v33 = vrot.slane %v4799_v41, 3  ;;  %v4884_v37 = vrot.slane %v4799_v41, 4 }
 0x265   : > { %v10473_v49 = vpop.f32.mrf.mxu1  ;;  %v5915_v38 = vpack.c.b16 %v5903_v26, %v5902_v21  ;;  %v4885_v39 = vrot.slane %v4799_v41, 5  ;;  %v4886_v51 = vrot.slane %v4799_v41, 6  ;;  %v4887_v53 = vrot.slane %v4799_v41, 7  ;;  %7527 = vst [vmem:[%s9308_s11 + $0xe2] sm:$0x1] %v4881_v28 }
 0x266   : > { %v5883_v42 = vpack.c.b16 %v5871_v40, %v5870_v19  ;;  %7528 = vst [vmem:[%s9308_s11 + $0xe4] sm:$0x1] %v4882_v5  ;;  %v4752_v43 = vadd.f32 %v4751_v7, %v4703_v56  ;;  %v10479_v18 = vadd.f32 %v4705_v50, %v4657_v17  ;;  %v5316_v61 = vshll.u32 %v5204_v1, 16  ;;  %v4803_v28 = vpop.f32.mrf.mxu3 }
 0x267   : > { %v10476_v34 = vpop.f32.mrf.mxu2  ;;  %7529 = vst [vmem:[%s9308_s11 + $0xe6] sm:$0x1] %v4883_v33  ;;  %v5322_v35 = vshll.u32 %v5205_v0, 16  ;;  %v5326_v54 = vshrl.u32 %v5205_v0, 16  ;;  %v5332_v59 = vshll.u32 %v10471_v11, 16  ;;  %v7610_v60 = vrot.slane %v5412_v24, 9 }
 0x268   : > { %6306 = vmatmul.bf16.gmra.mxu2 %v5883_v42  ;;  %7530 = vst [vmem:[%s9308_s11 + $0xe8] sm:$0x1] %v4884_v37  ;;  %v10484_v57 = vadd.f32 %v4800_v31, %v4752_v43  ;;  %v5470_v27 = vrot.slane %v5205_v0, 5  ;;  %v5473_v50 = vrot.slane %v10471_v11, 5  ;;  %v10489_v47 = vpop.f32.mrf.mxu0  ;;  %v5318_v13 = vrot.slane %v5316_v61, 5 }
 0x269   : > { %7531 = vst [vmem:[%s9308_s11 + $0xea] sm:$0x1] %v4885_v39  ;;  %v5324_v6 = vrot.slane %v5322_v35, 5  ;;  %v5328_v62 = vrot.slane %v5326_v54, 4  ;;  %v5334_v2 = vrot.slane %v5332_v59, 5  ;;  %v5617_v30 = vshrl.u32 %v5508_v23, 16 }
 0x26a   : > { %7532 = vst [vmem:[%s9308_s11 + $0xec] sm:$0x1] %v4886_v51  ;;  %v4888_v44 = vrot.slane %v10484_v57, 1  ;;  %v4889_v7 = vrot.slane %v10484_v57, 2  ;;  %v4890_v15 = vrot.slane %v10484_v57, 3  ;;  %v4891_v52 = vrot.slane %v10484_v57, 4 }
 0x26b   : > { %7533 = vst [vmem:[%s9308_s11 + $0xee] sm:$0x1] %v4887_v53  ;;  %v4892_v36 = vrot.slane %v10484_v57, 5  ;;  %v4893_v25 = vrot.slane %v10484_v57, 6  ;;  %v4894_v9 = vrot.slane %v10484_v57, 7  ;;  %v5319_v14 = vor.u32 %v5318_v13, %v5315_v45 }
 0x26c   : > { %7534 = vst [vmem:[%s9308_s11 + $0xf0] sm:$0x1] %v10484_v57  ;;  %v5329_v10 = vor.u32 %v5328_v62, %v5324_v6  ;;  %v5471_v1 = vsel %vm9183_vm14, %v7610_v60, %v5470_v27  ;;  %v5472_v32 = vrot.slane %v5470_v27, 4  ;;  %v5620_v21 = vshll.u32 %v5508_v23, 16 }
 0x26d   : > { %6355 = vmatmul.bf16.gmra.mxu3 %v5915_v38  ;;  %7535 = vst [vmem:[%s9308_s11 + $0xf2] sm:$0x1] %v4888_v44  ;;  %v5320_v8 = vrot.slane %v5319_v14, 4  ;;  %v5840_v20 = vunpack.c.l.b16 %v5471_v1  ;;  %v5626_v41 = vshll.u32 %v10487_v46, 16  ;;  %v4710_v17 = vpop.f32.mrf.mxu1  ;;  %v5619_v56 = vrot.slane %v5617_v30, 4 }
 0x26e   : > { %7536 = vst [vmem:[%s9308_s11 + $0xf4] sm:$0x1] %v4889_v7  ;;  %v5330_v29 = vrot.slane %v5329_v10, 4  ;;  %v5474_v58 = vsel %vm9183_vm14, %v5472_v32, %v5473_v50  ;;  %v5630_v0 = vshrl.u32 %v10487_v46, 16  ;;  %v5622_v19 = vrot.slane %v5620_v21, 5 }
 0x26f   : > { %7537 = vst [vmem:[%s9308_s11 + $0xf6] sm:$0x1] %v4890_v15  ;;  %v5325_v3 = vsel %vm8912_vm11, %v5320_v8, %v5324_v6  ;;  %v5841_v4 = vunpack.c.l.b16 %v5474_v58  ;;  %v5628_v26 = vrot.slane %v5626_v41, 5  ;;  %v4756_v11 = vpop.f32.mrf.mxu2  ;;  %v5636_v37 = vshll.u32 %v5510_v12, 16  ;;  %v5413_v10 = vld [vmem:[#allocation2 + $0x48] sm:$0xe]  ;;  %v4805_v8 = vpop.f32.mrf.mxu3 }
 0x270   : > { %7538 = vst [vmem:[%s9308_s11 + $0xf8] sm:$0x1] %v4891_v52  ;;  %v5335_v40 = vsel %vm8912_vm11, %v5330_v29, %v5334_v2  ;;  %v5808_v5 = vunpack.c.l.b16 %v5325_v3  ;;  %v5632_v33 = vrot.slane %v5630_v0, 4  ;;  %v5623_v39 = vor.u32 %v5622_v19, %v5619_v56  ;;  %v10520_v45 = vpop.f32.mrf.mxu0  ;;  %v5207_v2 = vld [vmem:[#allocation2 + $0x48] sm:$0xf] }
 0x271   : > { %7539 = vst [vmem:[%s9308_s11 + $0xfa] sm:$0x1] %v4892_v36  ;;  %v5809_v24 = vunpack.c.l.b16 %v5335_v40  ;;  %v5852_v38 = vpack.c.b16 %v5841_v4, %v5840_v20  ;;  %v7618_v51 = vrot.slane %v5716_v55, 9  ;;  %v5638_v31 = vrot.slane %v5636_v37, 5  ;;  %v10541_v36 = vld [vmem:[#allocation2 + $0x50] sm:$0x1] }
 0x272   : > { %7540 = vst [vmem:[%s9308_s11 + $0xfc] sm:$0x1] %v4893_v25  ;;  %v5633_v53 = vor.u32 %v5632_v33, %v5628_v26  ;;  %v5774_v42 = vrot.slane %v10487_v46, 5  ;;  %v5777_v43 = vrot.slane %v5510_v12, 5  ;;  %v5624_v35 = vrot.slane %v5623_v39, 4 }
 0x273   : > { %7541 = vst [vmem:[%s9308_s11 + $0xfe] sm:$0x1] %v4894_v9  ;;  %v5820_v61 = vpack.c.b16 %v5809_v24, %v5808_v5  ;;  %6262 = vmatmul.bf16.gmra.mxu1 %v5852_v38  ;;  %v4755_v54 = vadd.f32 %v10476_v34, %v10479_v18  ;;  %v4659_v59 = vadd.f32 %v10459_v48, %v10450_v16  ;;  %v5337_v21 = vshrl.u32 %v5207_v2, 16  ;;  %v5511_v4 = vld [vmem:[#allocation2 + $0x54] sm:$0xf] }
 0x274   : > { %v5634_v23 = vrot.slane %v5633_v53, 4  ;;  %v5775_v57 = vsel %vm9183_vm14, %v7618_v51, %v5774_v42  ;;  %v5776_v60 = vrot.slane %v5774_v42, 4  ;;  %v4662_v27 = vadd.f32 %v10459_v48, %v10489_v47  ;;  %v5208_v47 = vld [vmem:[#allocation2 + $0x4c] sm:$0xf]  ;;  %v10554_v40 = vld [vmem:[#allocation2 + $0x58] sm:$0xf] }
 0x275   : > { %6213 = vmatmul.bf16.gmra.mxu0 %v5820_v61  ;;  %v5629_v50 = vsel %vm8912_vm11, %v5624_v35, %v5628_v26  ;;  %v5904_v46 = vunpack.c.l.b16 %v5775_v57  ;;  %v4804_v13 = vadd.f32 %v4803_v28, %v4755_v54  ;;  %v4708_v34 = vadd.f32 %v10473_v49, %v4659_v59  ;;  %v10543_v49 = vpop.f32.mrf.mxu1  ;;  %v5513_v54 = vld [vmem:[#allocation2 + $0x5c] sm:$0x1] }
 0x276   : > { %v5639_v16 = vsel %vm8912_vm11, %v5634_v23, %v5638_v31  ;;  %v5872_v18 = vunpack.c.l.b16 %v5629_v50  ;;  %v5778_v6 = vsel %vm9183_vm14, %v5776_v60, %v5777_v43  ;;  %v10538_v62 = vadd.f32 %v4710_v17, %v4662_v27 }
 0x277   : > { %v5873_v44 = vunpack.c.l.b16 %v5639_v16  ;;  %v5905_v7 = vunpack.c.l.b16 %v5778_v6  ;;  %v4895_v15 = vrot.slane %v4804_v13, 1  ;;  %v4896_v52 = vrot.slane %v4804_v13, 2  ;;  %7542 = vst [vmem:[%s9308_s11 + $0x120] sm:$0x1] %v4804_v13  ;;  %v10546_v20 = vpop.f32.mrf.mxu2 }
 0x278   : > { %v4897_v25 = vrot.slane %v4804_v13, 3  ;;  %v4898_v9 = vrot.slane %v4804_v13, 4  ;;  %v4899_v14 = vrot.slane %v4804_v13, 5  ;;  %v4900_v12 = vrot.slane %v4804_v13, 6  ;;  %v10556_v5 = vpop.f32.mrf.mxu0 }
 0x279   : > { %v5884_v1 = vpack.c.b16 %v5873_v44, %v5872_v18  ;;  %v5916_v32 = vpack.c.b16 %v5905_v7, %v5904_v46  ;;  %v4901_v30 = vrot.slane %v4804_v13, 7  ;;  %7543 = vst [vmem:[%s9308_s11 + $0x122] sm:$0x1] %v4895_v15  ;;  %v4757_v55 = vadd.f32 %v4756_v11, %v4708_v34 }
 0x27a   : > { %7544 = vst [vmem:[%s9308_s11 + $0x124] sm:$0x1] %v4896_v52  ;;  %v5340_v41 = vshll.u32 %v5207_v2, 16  ;;  %v5346_v17 = vshll.u32 %v5208_v47, 16  ;;  %v5350_v29 = vshrl.u32 %v5208_v47, 16  ;;  %v5356_v56 = vshll.u32 %v10541_v36, 16 }
 0x27b   : > { %6311 = vmatmul.bf16.gmra.mxu2 %v5884_v1  ;;  %7545 = vst [vmem:[%s9308_s11 + $0x126] sm:$0x1] %v4897_v25  ;;  %v10550_v58 = vadd.f32 %v4805_v8, %v4757_v55  ;;  %v7611_v0 = vrot.slane %v5413_v10, 9  ;;  %v5477_v3 = vrot.slane %v5208_v47, 5  ;;  %v5339_v19 = vrot.slane %v5337_v21, 4 }
 0x27c   : > { %7546 = vst [vmem:[%s9308_s11 + $0x128] sm:$0x1] %v4898_v9  ;;  %v5342_v26 = vrot.slane %v5340_v41, 5  ;;  %v5348_v28 = vrot.slane %v5346_v17, 5  ;;  %v5352_v11 = vrot.slane %v5350_v29, 4  ;;  %v5358_v43 = vrot.slane %v5356_v56, 5 }
 0x27d   : > { %6360 = vmatmul.bf16.gmra.mxu3 %v5916_v32  ;;  %7547 = vst [vmem:[%s9308_s11 + $0x12a] sm:$0x1] %v4899_v14  ;;  %v4902_v33 = vrot.slane %v10550_v58, 1  ;;  %v4903_v37 = vrot.slane %v10550_v58, 2  ;;  %v4904_v24 = vrot.slane %v10550_v58, 3  ;;  %v4905_v38 = vrot.slane %v10550_v58, 4  ;;  %v10576_v34 = vpop.f32.mrf.mxu1 }
 0x27e   : > { %7548 = vst [vmem:[%s9308_s11 + $0x12c] sm:$0x1] %v4900_v12  ;;  %v4906_v39 = vrot.slane %v10550_v58, 5  ;;  %v4907_v51 = vrot.slane %v10550_v58, 6  ;;  %v4908_v53 = vrot.slane %v10550_v58, 7  ;;  %v5343_v31 = vor.u32 %v5342_v26, %v5339_v19 }
 0x27f   : > { %7549 = vst [vmem:[%s9308_s11 + $0x12e] sm:$0x1] %v4901_v30  ;;  %v5353_v42 = vor.u32 %v5352_v11, %v5348_v28  ;;  %v5478_v61 = vsel %vm9183_vm14, %v7611_v0, %v5477_v3  ;;  %v5479_v35 = vrot.slane %v5477_v3, 4  ;;  %v5480_v23 = vrot.slane %v10541_v36, 5  ;;  %v5717_v47 = vld [vmem:[#allocation2 + $0x54] sm:$0xe]  ;;  %v4808_v36 = vpop.f32.mrf.mxu3  ;;  %v4761_v25 = vpop.f32.mrf.mxu2 }
 0x280   : > { %7550 = vst [vmem:[%s9308_s11 + $0x130] sm:$0x1] %v10550_v58  ;;  %v5344_v59 = vrot.slane %v5343_v31, 4  ;;  %v5842_v57 = vunpack.c.l.b16 %v5478_v61  ;;  %v5641_v60 = vshrl.u32 %v5511_v4, 16  ;;  %v5644_v50 = vshll.u32 %v5511_v4, 16  ;;  %v10592_v58 = vpop.f32.mrf.mxu0 }
 0x281   : > { %7551 = vst [vmem:[%s9308_s11 + $0x132] sm:$0x1] %v4902_v33  ;;  %v5354_v27 = vrot.slane %v5353_v42, 4  ;;  %v5650_v46 = vshll.u32 %v10554_v40, 16  ;;  %v5654_v13 = vshrl.u32 %v10554_v40, 16  ;;  %v5481_v18 = vsel %vm9183_vm14, %v5479_v35, %v5480_v23 }
 0x282   : > { %7552 = vst [vmem:[%s9308_s11 + $0x134] sm:$0x1] %v4903_v37  ;;  %v5349_v16 = vsel %vm8912_vm11, %v5344_v59, %v5348_v28  ;;  %v5643_v6 = vrot.slane %v5641_v60, 4  ;;  %v5660_v2 = vshll.u32 %v5513_v54, 16  ;;  %v5843_v15 = vunpack.c.l.b16 %v5481_v18  ;;  %v5210_v29 = vld [vmem:[#allocation2 + $0x54] sm:$0xf] }
 0x283   : > { %7553 = vst [vmem:[%s9308_s11 + $0x136] sm:$0x1] %v4904_v24  ;;  %v5359_v44 = vsel %vm8912_vm11, %v5354_v27, %v5358_v43  ;;  %v5810_v7 = vunpack.c.l.b16 %v5349_v16  ;;  %v5646_v52 = vrot.slane %v5644_v50, 5  ;;  %v5652_v14 = vrot.slane %v5650_v46, 5  ;;  %v5211_v33 = vld [vmem:[#allocation2 + $0x58] sm:$0xf] }
 0x284   : > { %7554 = vst [vmem:[%s9308_s11 + $0x138] sm:$0x1] %v4905_v38  ;;  %v5811_v9 = vunpack.c.l.b16 %v5359_v44  ;;  %v5656_v12 = vrot.slane %v5654_v13, 4  ;;  %v5662_v10 = vrot.slane %v5660_v2, 5  ;;  %v5853_v1 = vpack.c.b16 %v5843_v15, %v5842_v57  ;;  %v5414_v43 = vld [vmem:[#allocation2 + $0x54] sm:$0xe] }
 0x285   : > { %7555 = vst [vmem:[%s9308_s11 + $0x13a] sm:$0x1] %v4906_v39  ;;  %v5647_v32 = vor.u32 %v5646_v52, %v5643_v6  ;;  %v7619_v30 = vrot.slane %v5717_v47, 9  ;;  %v5781_v55 = vrot.slane %v10554_v40, 5  ;;  %v5784_v41 = vrot.slane %v5513_v54, 5 }
 0x286   : > { %7556 = vst [vmem:[%s9308_s11 + $0x13c] sm:$0x1] %v4907_v51  ;;  %v5821_v8 = vpack.c.b16 %v5811_v9, %v5810_v7  ;;  %v5657_v21 = vor.u32 %v5656_v12, %v5652_v14  ;;  %v4760_v17 = vadd.f32 %v10546_v20, %v10538_v62  ;;  %6267 = vmatmul.bf16.gmra.mxu1 %v5853_v1  ;;  %v5361_v37 = vshrl.u32 %v5210_v29, 16  ;;  %v5514_v2 = vld [vmem:[#allocation2 + $0x60] sm:$0xf] }
 0x287   : > { %7557 = vst [vmem:[%s9308_s11 + $0x13e] sm:$0x1] %v4908_v53  ;;  %v5648_v56 = vrot.slane %v5647_v32, 4  ;;  %v5782_v0 = vsel %vm9183_vm14, %v7619_v30, %v5781_v55  ;;  %v5783_v3 = vrot.slane %v5781_v55, 4  ;;  %v4664_v4 = vadd.f32 %v10459_v48, %v10520_v45  ;;  %v4810_v60 = vpop.f32.mrf.mxu3  ;;  %v10618_v46 = vpop.f32.mrf.mxu2  ;;  %v10624_v15 = vld [vmem:[#allocation2 + $0x64] sm:$0xf] }
 0x288   : > { %6218 = vmatmul.bf16.gmra.mxu0 %v5821_v8  ;;  %v5658_v19 = vrot.slane %v5657_v21, 4  ;;  %v5906_v26 = vunpack.c.l.b16 %v5782_v0  ;;  %v4809_v28 = vadd.f32 %v4808_v36, %v4760_v17  ;;  %v4667_v62 = vadd.f32 %v10459_v48, %v10556_v5  ;;  %v10609_v5 = vld [vmem:[#allocation2 + $0x5c] sm:$0x1]  ;;  %v10626_v52 = vpop.f32.mrf.mxu0 }
 0x289   : > { %v5653_v20 = vsel %vm8912_vm11, %v5648_v56, %v5652_v14  ;;  %v5785_v11 = vsel %vm9183_vm14, %v5783_v3, %v5784_v41  ;;  %v4713_v40 = vadd.f32 %v10543_v49, %v4664_v4  ;;  %v10611_v49 = vpop.f32.mrf.mxu1  ;;  %v5363_v50 = vrot.slane %v5361_v37, 4  ;;  %v5516_v41 = vld [vmem:[#allocation2 + $0x68] sm:$0x1]  ;;  %v5718_v3 = vld [vmem:[#allocation2 + $0x60] sm:$0xe] }
 0x28a   : > { %v5663_v45 = vsel %vm8912_vm11, %v5658_v19, %v5662_v10  ;;  %v5874_v24 = vunpack.c.l.b16 %v5653_v20  ;;  %v5907_v38 = vunpack.c.l.b16 %v5785_v11  ;;  %v4909_v39 = vrot.slane %v4809_v28, 1  ;;  %7558 = vst [vmem:[%s9308_s11 + $0x160] sm:$0x1] %v4809_v28 }
 0x28b   : > { %v5875_v51 = vunpack.c.l.b16 %v5663_v45  ;;  %v4910_v53 = vrot.slane %v4809_v28, 2  ;;  %v4911_v31 = vrot.slane %v4809_v28, 3  ;;  %v4912_v42 = vrot.slane %v4809_v28, 4 }
 0x28c   : > { %v5917_v61 = vpack.c.b16 %v5907_v38, %v5906_v26  ;;  %v4913_v35 = vrot.slane %v4809_v28, 5  ;;  %v4914_v54 = vrot.slane %v4809_v28, 6  ;;  %v4915_v59 = vrot.slane %v4809_v28, 7  ;;  %7559 = vst [vmem:[%s9308_s11 + $0x162] sm:$0x1] %v4909_v39 }
 0x28d   : > { %v5885_v23 = vpack.c.b16 %v5875_v51, %v5874_v24  ;;  %7560 = vst [vmem:[%s9308_s11 + $0x164] sm:$0x1] %v4910_v53  ;;  %v4762_v57 = vadd.f32 %v4761_v25, %v4713_v40  ;;  %v10616_v27 = vadd.f32 %v10576_v34, %v4667_v62  ;;  %v5364_v13 = vshll.u32 %v5210_v29, 16 }
 0x28e   : > { %6365 = vmatmul.bf16.gmra.mxu3 %v5917_v61  ;;  %7561 = vst [vmem:[%s9308_s11 + $0x166] sm:$0x1] %v4911_v31  ;;  %v5370_v16 = vshll.u32 %v5211_v33, 16  ;;  %v5374_v18 = vshrl.u32 %v5211_v33, 16  ;;  %v5380_v6 = vshll.u32 %v10609_v5, 16  ;;  %v7612_v44 = vrot.slane %v5414_v43, 9 }
 0x28f   : > { %6316 = vmatmul.bf16.gmra.mxu2 %v5885_v23  ;;  %7562 = vst [vmem:[%s9308_s11 + $0x168] sm:$0x1] %v4912_v42  ;;  %v4811_v47 = vadd.f32 %v4810_v60, %v4762_v57  ;;  %v5484_v34 = vrot.slane %v5211_v33, 5  ;;  %v5487_v7 = vrot.slane %v10609_v5, 5  ;;  %v5366_v36 = vrot.slane %v5364_v13, 5  ;;  %v4813_v31 = vpop.f32.mrf.mxu3  ;;  %v4766_v42 = vpop.f32.mrf.mxu2 }
 0x290   : > { %7563 = vst [vmem:[%s9308_s11 + $0x16a] sm:$0x1] %v4913_v35  ;;  %v5372_v25 = vrot.slane %v5370_v16, 5  ;;  %v5376_v9 = vrot.slane %v5374_v18, 4  ;;  %v5382_v14 = vrot.slane %v5380_v6, 5  ;;  %v5665_v0 = vshrl.u32 %v5514_v2, 16 }
 0x291   : > { %7564 = vst [vmem:[%s9308_s11 + $0x16c] sm:$0x1] %v4914_v54  ;;  %v4916_v12 = vrot.slane %v4811_v47, 1  ;;  %v4917_v10 = vrot.slane %v4811_v47, 2  ;;  %v4918_v1 = vrot.slane %v4811_v47, 3  ;;  %v4919_v32 = vrot.slane %v4811_v47, 4  ;;  %v4720_v33 = vpop.f32.mrf.mxu1 }
 0x292   : > { %7565 = vst [vmem:[%s9308_s11 + $0x16e] sm:$0x1] %v4915_v59  ;;  %v4920_v30 = vrot.slane %v4811_v47, 5  ;;  %v4921_v55 = vrot.slane %v4811_v47, 6  ;;  %v4922_v8 = vrot.slane %v4811_v47, 7  ;;  %v5367_v21 = vor.u32 %v5366_v36, %v5363_v50  ;;  %v10649_v50 = vpop.f32.mrf.mxu0 }
 0x293   : > { %7566 = vst [vmem:[%s9308_s11 + $0x170] sm:$0x1] %v4811_v47  ;;  %v5377_v17 = vor.u32 %v5376_v9, %v5372_v25  ;;  %v5485_v29 = vsel %vm9183_vm14, %v7612_v44, %v5484_v34  ;;  %v5486_v56 = vrot.slane %v5484_v34, 4  ;;  %v5668_v26 = vshll.u32 %v5514_v2, 16 }
 0x294   : > { %7567 = vst [vmem:[%s9308_s11 + $0x172] sm:$0x1] %v4916_v12  ;;  %v5368_v4 = vrot.slane %v5367_v21, 4  ;;  %v5844_v19 = vunpack.c.l.b16 %v5485_v29  ;;  %v5674_v28 = vshll.u32 %v10624_v15, 16  ;;  %v5667_v11 = vrot.slane %v5665_v0, 4 }
 0x295   : > { %7568 = vst [vmem:[%s9308_s11 + $0x174] sm:$0x1] %v4917_v10  ;;  %v5378_v62 = vrot.slane %v5377_v17, 4  ;;  %v5488_v20 = vsel %vm9183_vm14, %v5486_v56, %v5487_v7  ;;  %v5678_v40 = vshrl.u32 %v10624_v15, 16  ;;  %v5670_v24 = vrot.slane %v5668_v26, 5 }
 0x296   : > { %7569 = vst [vmem:[%s9308_s11 + $0x176] sm:$0x1] %v4918_v1  ;;  %v5373_v37 = vsel %vm8912_vm11, %v5368_v4, %v5372_v25  ;;  %v5845_v45 = vunpack.c.l.b16 %v5488_v20  ;;  %v5676_v38 = vrot.slane %v5674_v28, 5  ;;  %v5684_v53 = vshll.u32 %v5516_v41, 16 }
 0x297   : > { %7570 = vst [vmem:[%s9308_s11 + $0x178] sm:$0x1] %v4919_v32  ;;  %v5383_v39 = vsel %vm8912_vm11, %v5378_v62, %v5382_v14  ;;  %v5812_v5 = vunpack.c.l.b16 %v5373_v37  ;;  %v5680_v51 = vrot.slane %v5678_v40, 4  ;;  %v5671_v35 = vor.u32 %v5670_v24, %v5667_v11  ;;  %v5213_v14 = vld [vmem:[#allocation2 + $0x60] sm:$0xf]  ;;  %v4815_v4 = vpop.f32.mrf.mxu3 }
 0x298   : > { %7571 = vst [vmem:[%s9308_s11 + $0x17a] sm:$0x1] %v4920_v30  ;;  %v5813_v43 = vunpack.c.l.b16 %v5383_v39  ;;  %v5854_v61 = vpack.c.b16 %v5845_v45, %v5844_v19  ;;  %v7620_v54 = vrot.slane %v5718_v3, 9  ;;  %v5686_v23 = vrot.slane %v5684_v53, 5  ;;  %v10670_v30 = vld [vmem:[#allocation2 + $0x68] sm:$0x1] }
 0x299   : > { %7572 = vst [vmem:[%s9308_s11 + $0x17c] sm:$0x1] %v4921_v55  ;;  %v5681_v59 = vor.u32 %v5680_v51, %v5676_v38  ;;  %v5788_v57 = vrot.slane %v10624_v15, 5  ;;  %v5791_v60 = vrot.slane %v5516_v41, 5  ;;  %v5672_v16 = vrot.slane %v5671_v35, 4  ;;  %v10672_v17 = vpop.f32.mrf.mxu1 }
 0x29a   : > { %7573 = vst [vmem:[%s9308_s11 + $0x17e] sm:$0x1] %v4922_v8  ;;  %v5822_v13 = vpack.c.b16 %v5813_v43, %v5812_v5  ;;  %6272 = vmatmul.bf16.gmra.mxu1 %v5854_v61  ;;  %v4765_v18 = vadd.f32 %v10618_v46, %v10616_v27  ;;  %v4669_v6 = vadd.f32 %v10459_v48, %v10592_v58  ;;  %v5415_v41 = vld [vmem:[#allocation2 + $0x60] sm:$0xe]  ;;  %v5385_v19 = vshrl.u32 %v5213_v14, 16  ;;  %v10685_v53 = vpop.f32.mrf.mxu0 }
 0x29b   : > { %v5682_v2 = vrot.slane %v5681_v59, 4  ;;  %v5789_v47 = vsel %vm9183_vm14, %v7620_v54, %v5788_v57  ;;  %v5790_v44 = vrot.slane %v5788_v57, 4  ;;  %v4672_v34 = vadd.f32 %v10459_v48, %v10626_v52  ;;  %v5214_v52 = vld [vmem:[#allocation2 + $0x64] sm:$0xf]  ;;  %v5517_v45 = vld [vmem:[#allocation2 + $0x6c] sm:$0xf] }
 0x29c   : > { %6223 = vmatmul.bf16.gmra.mxu0 %v5822_v13  ;;  %v5677_v7 = vsel %vm8912_vm11, %v5672_v16, %v5676_v38  ;;  %v5908_v15 = vunpack.c.l.b16 %v5789_v47  ;;  %v4814_v36 = vadd.f32 %v4813_v31, %v4765_v18  ;;  %v4718_v27 = vadd.f32 %v10611_v49, %v4669_v6  ;;  %v10683_v51 = vld [vmem:[#allocation2 + $0x70] sm:$0xf]  ;;  %v5519_v18 = vld [vmem:[#allocation2 + $0x74] sm:$0x1] }
 0x29d   : > { %v5687_v58 = vsel %vm8912_vm11, %v5682_v2, %v5686_v23  ;;  %v5876_v46 = vunpack.c.l.b16 %v5677_v7  ;;  %v5792_v25 = vsel %vm9183_vm14, %v5790_v44, %v5791_v60  ;;  %v10667_v9 = vadd.f32 %v4720_v33, %v4672_v34 }
 0x29e   : > { %v5877_v12 = vunpack.c.l.b16 %v5687_v58  ;;  %v5909_v10 = vunpack.c.l.b16 %v5792_v25  ;;  %v4923_v1 = vrot.slane %v4814_v36, 1  ;;  %v4924_v32 = vrot.slane %v4814_v36, 2  ;;  %7574 = vst [vmem:[%s9308_s11 + $0x1a0] sm:$0x1] %v4814_v36 }
 0x29f   : > { %v4925_v49 = vrot.slane %v4814_v36, 3  ;;  %v4926_v55 = vrot.slane %v4814_v36, 4  ;;  %v4927_v8 = vrot.slane %v4814_v36, 5  ;;  %v4928_v21 = vrot.slane %v4814_v36, 6 }
 0x2a0   : > { %v5886_v29 = vpack.c.b16 %v5877_v12, %v5876_v46  ;;  %v5918_v56 = vpack.c.b16 %v5909_v10, %v5908_v15  ;;  %v4929_v0 = vrot.slane %v4814_v36, 7  ;;  %7575 = vst [vmem:[%s9308_s11 + $0x1a2] sm:$0x1] %v4923_v1  ;;  %v4767_v3 = vadd.f32 %v4766_v42, %v4718_v27 }
 0x2a1   : > { %7576 = vst [vmem:[%s9308_s11 + $0x1a4] sm:$0x1] %v4924_v32  ;;  %v5388_v26 = vshll.u32 %v5213_v14, 16  ;;  %v5394_v28 = vshll.u32 %v5214_v52, 16  ;;  %v5398_v62 = vshrl.u32 %v5214_v52, 16  ;;  %v5404_v40 = vshll.u32 %v10670_v30, 16  ;;  %v6243_v12 = vpop.f32.mrf.mxu1 }
 0x2a2   : > { %v10676_v20 = vpop.f32.mrf.mxu2  ;;  %6321 = vmatmul.bf16.gmra.mxu2 %v5886_v29  ;;  %6370 = vmatmul.bf16.gmra.mxu3 %v5918_v56  ;;  %7577 = vst [vmem:[%s9308_s11 + $0x1a6] sm:$0x1] %v4925_v49  ;;  %v10679_v11 = vadd.f32 %v4815_v4, %v4767_v3  ;;  %v7613_v33 = vrot.slane %v5415_v41, 9  ;;  %v5491_v37 = vrot.slane %v5214_v52, 5  ;;  %v5387_v24 = vrot.slane %v5385_v19, 4 }
 0x2a3   : > { %7578 = vst [vmem:[%s9308_s11 + $0x1a8] sm:$0x1] %v4926_v55  ;;  %v5390_v38 = vrot.slane %v5388_v26, 5  ;;  %v5396_v39 = vrot.slane %v5394_v28, 5  ;;  %v5400_v5 = vrot.slane %v5398_v62, 4  ;;  %v5406_v60 = vrot.slane %v5404_v40, 5  ;;  %v6196_v62 = vpop.f32.mrf.mxu0 }
 0x2a4   : > { %7579 = vst [vmem:[%s9308_s11 + $0x1aa] sm:$0x1] %v4927_v8  ;;  %v4930_v31 = vrot.slane %v10679_v11, 1  ;;  %v4931_v42 = vrot.slane %v10679_v11, 2  ;;  %v4932_v43 = vrot.slane %v10679_v11, 3  ;;  %v4933_v61 = vrot.slane %v10679_v11, 4 }
 0x2a5   : > { %7580 = vst [vmem:[%s9308_s11 + $0x1ac] sm:$0x1] %v4928_v21  ;;  %v4934_v35 = vrot.slane %v10679_v11, 5  ;;  %v4935_v54 = vrot.slane %v10679_v11, 6  ;;  %v4936_v59 = vrot.slane %v10679_v11, 7  ;;  %v5391_v23 = vor.u32 %v5390_v38, %v5387_v24 }
 0x2a6   : > { %7581 = vst [vmem:[%s9308_s11 + $0x1ae] sm:$0x1] %v4929_v0  ;;  %v5401_v57 = vor.u32 %v5400_v5, %v5396_v39  ;;  %v5492_v13 = vsel %vm9183_vm14, %v7613_v33, %v5491_v37  ;;  %v5493_v16 = vrot.slane %v5491_v37, 4  ;;  %v5494_v2 = vrot.slane %v10670_v30, 5  ;;  %v5719_v14 = vld [vmem:[#allocation2 + $0x6c] sm:$0xe] }
 0x2a7   : > { %7582 = vst [vmem:[%s9308_s11 + $0x1b0] sm:$0x1] %v10679_v11  ;;  %v5392_v6 = vrot.slane %v5391_v23, 4  ;;  %v5846_v47 = vunpack.c.l.b16 %v5492_v13  ;;  %v5689_v44 = vshrl.u32 %v5517_v45, 16  ;;  %v5692_v7 = vshll.u32 %v5517_v45, 16 }
 0x2a8   : > { %7583 = vst [vmem:[%s9308_s11 + $0x1b2] sm:$0x1] %v4930_v31  ;;  %v5402_v34 = vrot.slane %v5401_v57, 4  ;;  %v5698_v15 = vshll.u32 %v10683_v51, 16  ;;  %v5702_v36 = vshrl.u32 %v10683_v51, 16  ;;  %v5495_v58 = vsel %vm9183_vm14, %v5493_v16, %v5494_v2 }
 0x2a9   : > { %7584 = vst [vmem:[%s9308_s11 + $0x1b4] sm:$0x1] %v4931_v42  ;;  %v5397_v27 = vsel %vm8912_vm11, %v5392_v6, %v5396_v39  ;;  %v5691_v46 = vrot.slane %v5689_v44, 4  ;;  %v5708_v25 = vshll.u32 %v5519_v18, 16  ;;  %v5847_v32 = vunpack.c.l.b16 %v5495_v58 }
 0x2aa   : > { %v4771_v52 = vpop.f32.mrf.mxu2  ;;  %7585 = vst [vmem:[%s9308_s11 + $0x1b6] sm:$0x1] %v4932_v43  ;;  %v5407_v10 = vsel %vm8912_vm11, %v5402_v34, %v5406_v60  ;;  %v5814_v1 = vunpack.c.l.b16 %v5397_v27  ;;  %v5694_v30 = vrot.slane %v5692_v7, 5  ;;  %v5700_v55 = vrot.slane %v5698_v15, 5 }
 0x2ab   : > { %7586 = vst [vmem:[%s9308_s11 + $0x1b8] sm:$0x1] %v4933_v61  ;;  %v5815_v49 = vunpack.c.l.b16 %v5407_v10  ;;  %v5704_v8 = vrot.slane %v5702_v36, 4  ;;  %v5710_v21 = vrot.slane %v5708_v25, 5  ;;  %v5855_v41 = vpack.c.b16 %v5847_v32, %v5846_v47 }
 0x2ac   : > { %7587 = vst [vmem:[%s9308_s11 + $0x1ba] sm:$0x1] %v4934_v35  ;;  %v5695_v29 = vor.u32 %v5694_v30, %v5691_v46  ;;  %v7621_v56 = vrot.slane %v5719_v14, 9  ;;  %v5795_v0 = vrot.slane %v10683_v51, 5  ;;  %v5798_v19 = vrot.slane %v5519_v18, 5 }
 0x2ad   : > { %7588 = vst [vmem:[%s9308_s11 + $0x1bc] sm:$0x1] %v4935_v54  ;;  %v5823_v3 = vpack.c.b16 %v5815_v49, %v5814_v1  ;;  %v5705_v4 = vor.u32 %v5704_v8, %v5700_v55  ;;  %v4770_v26 = vadd.f32 %v10676_v20, %v10667_v9  ;;  %6277 = vmatmul.bf16.gmra.mxu1 %v5855_v41 }
 0x2ae   : > { %7589 = vst [vmem:[%s9308_s11 + $0x1be] sm:$0x1] %v4936_v59  ;;  %v5696_v11 = vrot.slane %v5695_v29, 4  ;;  %v5796_v40 = vsel %vm9183_vm14, %v7621_v56, %v5795_v0  ;;  %v5797_v33 = vrot.slane %v5795_v0, 4  ;;  %v4674_v37 = vadd.f32 %v10459_v48, %v10649_v50 }
 0x2af   : > { %6228 = vmatmul.bf16.gmra.mxu0 %v5823_v3  ;;  %v5706_v45 = vrot.slane %v5705_v4, 4  ;;  %v5910_v24 = vunpack.c.l.b16 %v5796_v40  ;;  %v6195_v5 = vadd.f32 %v10459_v48, %v10685_v53  ;;  %v6245_v53 = vpop.f32.mrf.mxu1  ;;  %v6197_v58 = vadd.f32 %v10459_v48, %v6196_v62 }
 0x2b0   : > { %v4818_v28 = vpop.f32.mrf.mxu3  ;;  %v5701_v9 = vsel %vm8912_vm11, %v5696_v11, %v5700_v55  ;;  %v5799_v20 = vsel %vm9183_vm14, %v5797_v33, %v5798_v19  ;;  %v4723_v39 = vadd.f32 %v10672_v17, %v4674_v37  ;;  %v10754_v55 = vld [vmem:[%s11044_s15] ss:$0 sm:$0xff] }
 0x2b1   : > { %v4819_v38 = vadd.f32 %v4818_v28, %v4770_v26  ;;  %v5711_v51 = vsel %vm8912_vm11, %v5706_v45, %v5710_v21  ;;  %v5878_v50 = vunpack.c.l.b16 %v5701_v9  ;;  %v5911_v31 = vunpack.c.l.b16 %v5799_v20 }
 0x2b2   : > { %v6292_v43 = vpop.f32.mrf.mxu2  ;;  %v5879_v61 = vunpack.c.l.b16 %v5711_v51  ;;  %v4772_v57 = vadd.f32 %v4771_v52, %v4723_v39  ;;  %v6244_v18 = vadd.f32 %v6243_v12, %v6195_v5  ;;  %v6246_v1 = vadd.f32 %v6245_v53, %v6197_v58 }
 0x2b3   : > { %v4937_v42 = vrot.slane %v4819_v38, 1  ;;  %7590 = vst [vmem:[%s9308_s11 + $0x1e0] sm:$0x1] %v4819_v38  ;;  %v4938_v35 = vrot.slane %v4819_v38, 2  ;;  %v4939_v63 = vrot.slane %v4819_v38, 3  ;;  %v4940_v54 = vrot.slane %v4819_v38, 4 }
 0x2b4   : > { %v5919_v59 = vpack.c.b16 %v5911_v31, %v5910_v24  ;;  %v4941_v17 = vrot.slane %v4819_v38, 5  ;;  %v5887_v22 = vpack.c.b16 %v5879_v61, %v5878_v50  ;;  %v4942_v23 = vrot.slane %v4819_v38, 6 }
 0x2b5   : > { %7591 = vst [vmem:[%s9308_s11 + $0x1e2] sm:$0x1] %v4937_v42  ;;  %v4943_v60 = vrot.slane %v4819_v38, 7  ;;  %v6293_v7 = vadd.f32 %v6292_v43, %v6244_v18 }
 0x2b6   : > { %7592 = vst [vmem:[%s9308_s11 + $0x1e4] sm:$0x1] %v4938_v35  ;;  %6375 = vmatmul.bf16.gmra.mxu3 %v5919_v59  ;;  %6326 = vmatmul.bf16.gmra.mxu2 %v5887_v22  ;;  %v6199_v6 = vpop.f32.mrf.mxu0 }
 0x2b7   : > { %7593 = vst [vmem:[%s9308_s11 + $0x1e6] sm:$0x1] %v4939_v63  ;;  %v6248_v14 = vpop.f32.mrf.mxu1  ;;  %v6200_v8 = vadd.f32 %v10754_v55, %v6199_v6 }
 0x2b8   : > { %v4820_v13 = vpop.f32.mrf.mxu3  ;;  %7594 = vst [vmem:[%s9308_s11 + $0x1e8] sm:$0x1] %v4940_v54 }
 0x2b9   : > { %v4821_v16 = vadd.f32 %v4820_v13, %v4772_v57  ;;  %7595 = vst [vmem:[%s9308_s11 + $0x1ea] sm:$0x1] %v4941_v17  ;;  %v6249_v4 = vadd.f32 %v6248_v14, %v6200_v8 }
 0x2ba   : > { %7596 = vst [vmem:[%s9308_s11 + $0x1ec] sm:$0x1] %v4942_v23  ;;  %v6294_v36 = vpop.f32.mrf.mxu2 }
 0x2bb   : > { %v4944_v2 = vrot.slane %v4821_v16, 1  ;;  %v4945_v47 = vrot.slane %v4821_v16, 2  ;;  %7597 = vst [vmem:[%s9308_s11 + $0x1ee] sm:$0x1] %v4943_v60  ;;  %v4946_v44 = vrot.slane %v4821_v16, 3  ;;  %v4947_v34 = vrot.slane %v4821_v16, 4 }
 0x2bc   : > { %7598 = vst [vmem:[%s9308_s11 + $0x1f0] sm:$0x1] %v4821_v16  ;;  %v4948_v15 = vrot.slane %v4821_v16, 5  ;;  %v4949_v27 = vrot.slane %v4821_v16, 6  ;;  %v4950_v46 = vrot.slane %v4821_v16, 7  ;;  %v6295_v49 = vadd.f32 %v6294_v36, %v6246_v1 }
 0x2bd   : > { %7599 = vst [vmem:[%s9308_s11 + $0x1f2] sm:$0x1] %v4944_v2 }
 0x2be   : > { %7600 = vst [vmem:[%s9308_s11 + $0x1f4] sm:$0x1] %v4945_v47  ;;  %v6201_v30 = vpop.f32.mrf.mxu0 }
 0x2bf   : > { %7601 = vst [vmem:[%s9308_s11 + $0x1f6] sm:$0x1] %v4946_v44  ;;  %v6250_v19 = vpop.f32.mrf.mxu1  ;;  %v6202_v24 = vadd.f32 %v10754_v55, %v6201_v30 }
 0x2c0   : > { %v6341_v25 = vpop.f32.mrf.mxu3  ;;  %7602 = vst [vmem:[%s9308_s11 + $0x1f8] sm:$0x1] %v4947_v34 }
 0x2c1   : > { %v6342_v52 = vadd.f32 %v6341_v25, %v6293_v7  ;;  %7603 = vst [vmem:[%s9308_s11 + $0x1fa] sm:$0x1] %v4948_v15  ;;  %v6251_v50 = vadd.f32 %v6250_v19, %v6202_v24 }
 0x2c2   : > { %7604 = vst [vmem:[%s9308_s11 + $0x1fc] sm:$0x1] %v4949_v27 }
 0x2c3   : > { %v6397_v12 = vrot.slane %v6342_v52, 1  ;;  %v6398_v10 = vrot.slane %v6342_v52, 2  ;;  %7605 = vst [vmem:[%s9308_s11 + $0x1fe] sm:$0x1] %v4950_v46  ;;  %v6399_v32 = vrot.slane %v6342_v52, 3  ;;  %v6400_v48 = vrot.slane %v6342_v52, 4 }
 0x2c4   : > { %7750 = vst [vmem:[%s9308_s11 + $0x21] sm:$0x1] %v6342_v52  ;;  %v6401_v21 = vrot.slane %v6342_v52, 5  ;;  %v6402_v41 = vrot.slane %v6342_v52, 6  ;;  %v6403_v29 = vrot.slane %v6342_v52, 7 }
 0x2c5   : > { %7751 = vst [vmem:[%s9308_s11 + $0x23] sm:$0x1] %v6397_v12  ;;  %v6297_v0 = vpop.f32.mrf.mxu2 }
 0x2c6   : > { %7752 = vst [vmem:[%s9308_s11 + $0x25] sm:$0x1] %v6398_v10  ;;  %v6298_v40 = vadd.f32 %v6297_v0, %v6249_v4 }
 0x2c7   : > { %7753 = vst [vmem:[%s9308_s11 + $0x27] sm:$0x1] %v6399_v32 }
 0x2c8   : > { %v6343_v56 = vpop.f32.mrf.mxu3  ;;  %7754 = vst [vmem:[%s9308_s11 + $0x29] sm:$0x1] %v6400_v48  ;;  %v6253_v42 = vpop.f32.mrf.mxu1 }
 0x2c9   : > { %v6344_v3 = vadd.f32 %v6343_v56, %v6295_v49  ;;  %7755 = vst [vmem:[%s9308_s11 + $0x2b] sm:$0x1] %v6401_v21 }
 0x2ca   : > { %7756 = vst [vmem:[%s9308_s11 + $0x2d] sm:$0x1] %v6402_v41 }
 0x2cb   : > { %v6404_v26 = vrot.slane %v6344_v3, 1  ;;  %v6405_v28 = vrot.slane %v6344_v3, 2  ;;  %7757 = vst [vmem:[%s9308_s11 + $0x2f] sm:$0x1] %v6403_v29  ;;  %v6406_v62 = vrot.slane %v6344_v3, 3  ;;  %v6407_v11 = vrot.slane %v6344_v3, 4  ;;  %v6204_v37 = vpop.f32.mrf.mxu0 }
 0x2cc   : > { %7758 = vst [vmem:[%s9308_s11 + $0x31] sm:$0x1] %v6344_v3  ;;  %v6408_v33 = vrot.slane %v6344_v3, 5  ;;  %v6409_v45 = vrot.slane %v6344_v3, 6  ;;  %v6410_v38 = vrot.slane %v6344_v3, 7  ;;  %v6205_v35 = vadd.f32 %v10754_v55, %v6204_v37 }
 0x2cd   : > { %7759 = vst [vmem:[%s9308_s11 + $0x33] sm:$0x1] %v6404_v26  ;;  %v6299_v39 = vpop.f32.mrf.mxu2 }
 0x2ce   : > { %7760 = vst [vmem:[%s9308_s11 + $0x35] sm:$0x1] %v6405_v28  ;;  %v6300_v61 = vadd.f32 %v6299_v39, %v6251_v50  ;;  %v6254_v23 = vadd.f32 %v6253_v42, %v6205_v35 }
 0x2cf   : > { %7761 = vst [vmem:[%s9308_s11 + $0x37] sm:$0x1] %v6406_v62 }
 0x2d0   : > { %v6346_v9 = vpop.f32.mrf.mxu3  ;;  %7762 = vst [vmem:[%s9308_s11 + $0x39] sm:$0x1] %v6407_v11  ;;  %v6255_v47 = vpop.f32.mrf.mxu1 }
 0x2d1   : > { %v6347_v20 = vadd.f32 %v6346_v9, %v6298_v40  ;;  %7763 = vst [vmem:[%s9308_s11 + $0x3b] sm:$0x1] %v6408_v33 }
 0x2d2   : > { %7764 = vst [vmem:[%s9308_s11 + $0x3d] sm:$0x1] %v6409_v45 }
 0x2d3   : > { %v6411_v5 = vrot.slane %v6347_v20, 1  ;;  %v6412_v51 = vrot.slane %v6347_v20, 2  ;;  %7765 = vst [vmem:[%s9308_s11 + $0x3f] sm:$0x1] %v6410_v38  ;;  %v6413_v31 = vrot.slane %v6347_v20, 3  ;;  %v6414_v43 = vrot.slane %v6347_v20, 4  ;;  %v6206_v59 = vpop.f32.mrf.mxu0 }
 0x2d4   : > { %7766 = vst [vmem:[%s9308_s11 + $0x61] sm:$0x1] %v6347_v20  ;;  %v6415_v63 = vrot.slane %v6347_v20, 5  ;;  %v6416_v54 = vrot.slane %v6347_v20, 6  ;;  %v6417_v17 = vrot.slane %v6347_v20, 7  ;;  %v6207_v34 = vadd.f32 %v10754_v55, %v6206_v59 }
 0x2d5   : > { %7767 = vst [vmem:[%s9308_s11 + $0x63] sm:$0x1] %v6411_v5 }
 0x2d6   : > { %7768 = vst [vmem:[%s9308_s11 + $0x65] sm:$0x1] %v6412_v51  ;;  %v6256_v25 = vadd.f32 %v6255_v47, %v6207_v34 }
 0x2d7   : > { %7769 = vst [vmem:[%s9308_s11 + $0x67] sm:$0x1] %v6413_v31 }
 0x2d8   : > { %v6348_v53 = vpop.f32.mrf.mxu3  ;;  %7770 = vst [vmem:[%s9308_s11 + $0x69] sm:$0x1] %v6414_v43  ;;  %v6302_v13 = vpop.f32.mrf.mxu2 }
 0x2d9   : > { %v6349_v22 = vadd.f32 %v6348_v53, %v6300_v61  ;;  %7771 = vst [vmem:[%s9308_s11 + $0x6b] sm:$0x1] %v6415_v63  ;;  %v6303_v6 = vadd.f32 %v6302_v13, %v6254_v23 }
 0x2da   : > { %7772 = vst [vmem:[%s9308_s11 + $0x6d] sm:$0x1] %v6416_v54 }
 0x2db   : > { %v6418_v57 = vrot.slane %v6349_v22, 1  ;;  %v6419_v60 = vrot.slane %v6349_v22, 2  ;;  %7773 = vst [vmem:[%s9308_s11 + $0x6f] sm:$0x1] %v6417_v17  ;;  %v6420_v16 = vrot.slane %v6349_v22, 3  ;;  %v6421_v18 = vrot.slane %v6349_v22, 4 }
 0x2dc   : > { %7774 = vst [vmem:[%s9308_s11 + $0x71] sm:$0x1] %v6349_v22  ;;  %v6422_v2 = vrot.slane %v6349_v22, 5  ;;  %v6423_v44 = vrot.slane %v6349_v22, 6  ;;  %v6424_v7 = vrot.slane %v6349_v22, 7  ;;  %v6258_v8 = vpop.f32.mrf.mxu1 }
 0x2dd   : > { %7775 = vst [vmem:[%s9308_s11 + $0x73] sm:$0x1] %v6418_v57 }
 0x2de   : > { %7776 = vst [vmem:[%s9308_s11 + $0x75] sm:$0x1] %v6419_v60  ;;  %v6209_v27 = vpop.f32.mrf.mxu0 }
 0x2df   : > { %7777 = vst [vmem:[%s9308_s11 + $0x77] sm:$0x1] %v6420_v16  ;;  %v6210_v30 = vadd.f32 %v10754_v55, %v6209_v27 }
 0x2e0   : > { %v6351_v15 = vpop.f32.mrf.mxu3  ;;  %7778 = vst [vmem:[%s9308_s11 + $0x79] sm:$0x1] %v6421_v18  ;;  %v6304_v14 = vpop.f32.mrf.mxu2 }
 0x2e1   : > { %v6352_v36 = vadd.f32 %v6351_v15, %v6303_v6  ;;  %7779 = vst [vmem:[%s9308_s11 + $0x7b] sm:$0x1] %v6422_v2  ;;  %v6305_v10 = vadd.f32 %v6304_v14, %v6256_v25  ;;  %v6259_v56 = vadd.f32 %v6258_v8, %v6210_v30 }
 0x2e2   : > { %7780 = vst [vmem:[%s9308_s11 + $0x7d] sm:$0x1] %v6423_v44 }
 0x2e3   : > { %v6425_v58 = vrot.slane %v6352_v36, 1  ;;  %v6426_v46 = vrot.slane %v6352_v36, 2  ;;  %7781 = vst [vmem:[%s9308_s11 + $0x7f] sm:$0x1] %v6424_v7  ;;  %v6427_v52 = vrot.slane %v6352_v36, 3  ;;  %v6428_v12 = vrot.slane %v6352_v36, 4 }
 0x2e4   : > { %7782 = vst [vmem:[%s9308_s11 + $0xa1] sm:$0x1] %v6352_v36  ;;  %v6429_v1 = vrot.slane %v6352_v36, 5  ;;  %v6430_v32 = vrot.slane %v6352_v36, 6  ;;  %v6431_v48 = vrot.slane %v6352_v36, 7  ;;  %v6260_v45 = vpop.f32.mrf.mxu1 }
 0x2e5   : > { %7783 = vst [vmem:[%s9308_s11 + $0xa3] sm:$0x1] %v6425_v58 }
 0x2e6   : > { %7784 = vst [vmem:[%s9308_s11 + $0xa5] sm:$0x1] %v6426_v46  ;;  %v6211_v0 = vpop.f32.mrf.mxu0 }
 0x2e7   : > { %7785 = vst [vmem:[%s9308_s11 + $0xa7] sm:$0x1] %v6427_v52  ;;  %v6212_v37 = vadd.f32 %v10754_v55, %v6211_v0 }
 0x2e8   : > { %v6353_v49 = vpop.f32.mrf.mxu3  ;;  %7786 = vst [vmem:[%s9308_s11 + $0xa9] sm:$0x1] %v6428_v12 }
 0x2e9   : > { %v6354_v21 = vadd.f32 %v6353_v49, %v6305_v10  ;;  %7787 = vst [vmem:[%s9308_s11 + $0xab] sm:$0x1] %v6429_v1  ;;  %v6261_v39 = vadd.f32 %v6260_v45, %v6212_v37 }
 0x2ea   : > { %7788 = vst [vmem:[%s9308_s11 + $0xad] sm:$0x1] %v6430_v32 }
 0x2eb   : > { %v6432_v41 = vrot.slane %v6354_v21, 1  ;;  %v6433_v29 = vrot.slane %v6354_v21, 2  ;;  %7789 = vst [vmem:[%s9308_s11 + $0xaf] sm:$0x1] %v6431_v48  ;;  %v6434_v3 = vrot.slane %v6354_v21, 3  ;;  %v6435_v4 = vrot.slane %v6354_v21, 4  ;;  %v6307_v26 = vpop.f32.mrf.mxu2 }
 0x2ec   : > { %7790 = vst [vmem:[%s9308_s11 + $0xb1] sm:$0x1] %v6354_v21  ;;  %v6436_v19 = vrot.slane %v6354_v21, 5  ;;  %v6437_v28 = vrot.slane %v6354_v21, 6  ;;  %v6308_v62 = vadd.f32 %v6307_v26, %v6259_v56  ;;  %v6438_v11 = vrot.slane %v6354_v21, 7 }
 0x2ed   : > { %7791 = vst [vmem:[%s9308_s11 + $0xb3] sm:$0x1] %v6432_v41 }
 0x2ee   : > { %7792 = vst [vmem:[%s9308_s11 + $0xb5] sm:$0x1] %v6433_v29 }
 0x2ef   : > { %7793 = vst [vmem:[%s9308_s11 + $0xb7] sm:$0x1] %v6434_v3 }
 0x2f0   : > { %v6356_v40 = vpop.f32.mrf.mxu3  ;;  %7794 = vst [vmem:[%s9308_s11 + $0xb9] sm:$0x1] %v6435_v4  ;;  %v6263_v53 = vpop.f32.mrf.mxu1 }
 0x2f1   : > { %v6357_v33 = vadd.f32 %v6356_v40, %v6308_v62  ;;  %7795 = vst [vmem:[%s9308_s11 + $0xbb] sm:$0x1] %v6436_v19 }
 0x2f2   : > { %7796 = vst [vmem:[%s9308_s11 + $0xbd] sm:$0x1] %v6437_v28  ;;  %v6214_v5 = vpop.f32.mrf.mxu0 }
 0x2f3   : > { %v6439_v24 = vrot.slane %v6357_v33, 1  ;;  %v6440_v38 = vrot.slane %v6357_v33, 2  ;;  %7797 = vst [vmem:[%s9308_s11 + $0xbf] sm:$0x1] %v6438_v11  ;;  %v6441_v9 = vrot.slane %v6357_v33, 3  ;;  %v6442_v20 = vrot.slane %v6357_v33, 4  ;;  %v6309_v50 = vpop.f32.mrf.mxu2 }
 0x2f4   : > { %7798 = vst [vmem:[%s9308_s11 + $0xe1] sm:$0x1] %v6357_v33  ;;  %v6443_v51 = vrot.slane %v6357_v33, 5  ;;  %v6444_v31 = vrot.slane %v6357_v33, 6  ;;  %v6310_v42 = vadd.f32 %v6309_v50, %v6261_v39  ;;  %v6445_v43 = vrot.slane %v6357_v33, 7 }
 0x2f5   : > { %7799 = vst [vmem:[%s9308_s11 + $0xe3] sm:$0x1] %v6439_v24  ;;  %v6215_v63 = vadd.f32 %v10754_v55, %v6214_v5 }
 0x2f6   : > { %7800 = vst [vmem:[%s9308_s11 + $0xe5] sm:$0x1] %v6440_v38 }
 0x2f7   : > { %7801 = vst [vmem:[%s9308_s11 + $0xe7] sm:$0x1] %v6441_v9  ;;  %v6264_v57 = vadd.f32 %v6263_v53, %v6215_v63 }
 0x2f8   : > { %v6358_v61 = vpop.f32.mrf.mxu3  ;;  %7802 = vst [vmem:[%s9308_s11 + $0xe9] sm:$0x1] %v6442_v20  ;;  %v6265_v36 = vpop.f32.mrf.mxu1 }
 0x2f9   : > { %v6359_v35 = vadd.f32 %v6358_v61, %v6310_v42  ;;  %7803 = vst [vmem:[%s9308_s11 + $0xeb] sm:$0x1] %v6443_v51 }
 0x2fa   : > { %7804 = vst [vmem:[%s9308_s11 + $0xed] sm:$0x1] %v6444_v31  ;;  %v6216_v13 = vpop.f32.mrf.mxu0 }
 0x2fb   : > { %v6446_v54 = vrot.slane %v6359_v35, 1  ;;  %v6447_v59 = vrot.slane %v6359_v35, 2  ;;  %7805 = vst [vmem:[%s9308_s11 + $0xef] sm:$0x1] %v6445_v43  ;;  %v6448_v17 = vrot.slane %v6359_v35, 3  ;;  %v6449_v22 = vrot.slane %v6359_v35, 4 }
 0x2fc   : > { %7806 = vst [vmem:[%s9308_s11 + $0xf1] sm:$0x1] %v6359_v35  ;;  %v6450_v23 = vrot.slane %v6359_v35, 5  ;;  %v6451_v60 = vrot.slane %v6359_v35, 6  ;;  %v6452_v16 = vrot.slane %v6359_v35, 7  ;;  %v6217_v44 = vadd.f32 %v10754_v55, %v6216_v13 }
 0x2fd   : > { %7807 = vst [vmem:[%s9308_s11 + $0xf3] sm:$0x1] %v6446_v54 }
 0x2fe   : > { %7808 = vst [vmem:[%s9308_s11 + $0xf5] sm:$0x1] %v6447_v59  ;;  %v6312_v18 = vpop.f32.mrf.mxu2  ;;  %v6266_v46 = vadd.f32 %v6265_v36, %v6217_v44 }
 0x2ff   : > { %7809 = vst [vmem:[%s9308_s11 + $0xf7] sm:$0x1] %v6448_v17  ;;  %v6313_v2 = vadd.f32 %v6312_v18, %v6264_v57 }
 0x300   : > { %7810 = vst [vmem:[%s9308_s11 + $0xf9] sm:$0x1] %v6449_v22  ;;  %v6361_v6 = vpop.f32.mrf.mxu3 }
 0x301   : > { %7811 = vst [vmem:[%s9308_s11 + $0xfb] sm:$0x1] %v6450_v23  ;;  %v6362_v47 = vadd.f32 %v6361_v6, %v6313_v2 }
 0x302   : > { %7812 = vst [vmem:[%s9308_s11 + $0xfd] sm:$0x1] %v6451_v60 }
 0x303   : > { %7813 = vst [vmem:[%s9308_s11 + $0xff] sm:$0x1] %v6452_v16  ;;  %v6453_v34 = vrot.slane %v6362_v47, 1  ;;  %v6454_v7 = vrot.slane %v6362_v47, 2  ;;  %v6455_v15 = vrot.slane %v6362_v47, 3  ;;  %v6456_v27 = vrot.slane %v6362_v47, 4  ;;  %v6268_v29 = vpop.f32.mrf.mxu1 }
 0x304   : > { %7814 = vst [vmem:[%s9308_s11 + $0x121] sm:$0x1] %v6362_v47  ;;  %v6457_v58 = vrot.slane %v6362_v47, 5  ;;  %v6458_v25 = vrot.slane %v6362_v47, 6  ;;  %v6459_v12 = vrot.slane %v6362_v47, 7 }
 0x305   : > { %7815 = vst [vmem:[%s9308_s11 + $0x123] sm:$0x1] %v6453_v34  ;;  %v6219_v52 = vpop.f32.mrf.mxu0 }
 0x306   : > { %7816 = vst [vmem:[%s9308_s11 + $0x125] sm:$0x1] %v6454_v7  ;;  %v6314_v14 = vpop.f32.mrf.mxu2  ;;  %v6220_v8 = vadd.f32 %v10754_v55, %v6219_v52 }
 0x307   : > { %7817 = vst [vmem:[%s9308_s11 + $0x127] sm:$0x1] %v6455_v15  ;;  %v6315_v10 = vadd.f32 %v6314_v14, %v6266_v46 }
 0x308   : > { %v6363_v1 = vpop.f32.mrf.mxu3  ;;  %7818 = vst [vmem:[%s9308_s11 + $0x129] sm:$0x1] %v6456_v27  ;;  %v6269_v3 = vadd.f32 %v6268_v29, %v6220_v8 }
 0x309   : > { %7819 = vst [vmem:[%s9308_s11 + $0x12b] sm:$0x1] %v6457_v58  ;;  %v6364_v32 = vadd.f32 %v6363_v1, %v6315_v10 }
 0x30a   : > { %7820 = vst [vmem:[%s9308_s11 + $0x12d] sm:$0x1] %v6458_v25 }
 0x30b   : > { %7821 = vst [vmem:[%s9308_s11 + $0x12f] sm:$0x1] %v6459_v12  ;;  %v6460_v30 = vrot.slane %v6364_v32, 1  ;;  %v6461_v48 = vrot.slane %v6364_v32, 2  ;;  %v6462_v49 = vrot.slane %v6364_v32, 3  ;;  %v6463_v21 = vrot.slane %v6364_v32, 4  ;;  %v6270_v45 = vpop.f32.mrf.mxu1 }
 0x30c   : > { %7822 = vst [vmem:[%s9308_s11 + $0x131] sm:$0x1] %v6364_v32  ;;  %v6464_v41 = vrot.slane %v6364_v32, 5  ;;  %v6465_v56 = vrot.slane %v6364_v32, 6  ;;  %v6466_v0 = vrot.slane %v6364_v32, 7 }
 0x30d   : > { %7823 = vst [vmem:[%s9308_s11 + $0x133] sm:$0x1] %v6460_v30  ;;  %v6221_v4 = vpop.f32.mrf.mxu0 }
 0x30e   : > { %7824 = vst [vmem:[%s9308_s11 + $0x135] sm:$0x1] %v6461_v48  ;;  %v6222_v11 = vadd.f32 %v10754_v55, %v6221_v4 }
 0x30f   : > { %7825 = vst [vmem:[%s9308_s11 + $0x137] sm:$0x1] %v6462_v49 }
 0x310   : > { %7826 = vst [vmem:[%s9308_s11 + $0x139] sm:$0x1] %v6463_v21  ;;  %v6271_v9 = vadd.f32 %v6270_v45, %v6222_v11 }
 0x311   : > { %7827 = vst [vmem:[%s9308_s11 + $0x13b] sm:$0x1] %v6464_v41  ;;  %v6366_v19 = vpop.f32.mrf.mxu3 }
 0x312   : > { %7828 = vst [vmem:[%s9308_s11 + $0x13d] sm:$0x1] %v6465_v56  ;;  %v6317_v26 = vpop.f32.mrf.mxu2 }
 0x313   : > { %7829 = vst [vmem:[%s9308_s11 + $0x13f] sm:$0x1] %v6466_v0  ;;  %v6318_v28 = vadd.f32 %v6317_v26, %v6269_v3 }
 0x315   : > { %v6367_v62 = vadd.f32 %v6366_v19, %v6318_v28 }
 0x317   : > { %v6467_v40 = vrot.slane %v6367_v62, 1  ;;  %v6468_v33 = vrot.slane %v6367_v62, 2  ;;  %v6469_v37 = vrot.slane %v6367_v62, 3  ;;  %7830 = vst [vmem:[%s9308_s11 + $0x161] sm:$0x1] %v6367_v62  ;;  %v6470_v24 = vrot.slane %v6367_v62, 4  ;;  %v6273_v17 = vpop.f32.mrf.mxu1 }
 0x318   : > { %v6471_v38 = vrot.slane %v6367_v62, 5  ;;  %v6472_v20 = vrot.slane %v6367_v62, 6  ;;  %v6473_v51 = vrot.slane %v6367_v62, 7 }
 0x319   : > { %7831 = vst [vmem:[%s9308_s11 + $0x163] sm:$0x1] %v6467_v40  ;;  %v6224_v5 = vpop.f32.mrf.mxu0  ;;  %v6368_v31 = vpop.f32.mrf.mxu3 }
 0x31a   : > { %7832 = vst [vmem:[%s9308_s11 + $0x165] sm:$0x1] %v6468_v33  ;;  %v6319_v39 = vpop.f32.mrf.mxu2  ;;  %v6225_v43 = vadd.f32 %v10754_v55, %v6224_v5 }
 0x31b   : > { %7833 = vst [vmem:[%s9308_s11 + $0x167] sm:$0x1] %v6469_v37  ;;  %v6320_v50 = vadd.f32 %v6319_v39, %v6271_v9 }
 0x31c   : > { %7834 = vst [vmem:[%s9308_s11 + $0x169] sm:$0x1] %v6470_v24  ;;  %v6274_v22 = vadd.f32 %v6273_v17, %v6225_v43 }
 0x31d   : > { %7835 = vst [vmem:[%s9308_s11 + $0x16b] sm:$0x1] %v6471_v38  ;;  %v6369_v42 = vadd.f32 %v6368_v31, %v6320_v50 }
 0x31e   : > { %7836 = vst [vmem:[%s9308_s11 + $0x16d] sm:$0x1] %v6472_v20 }
 0x31f   : > { %7837 = vst [vmem:[%s9308_s11 + $0x16f] sm:$0x1] %v6473_v51  ;;  %v6474_v61 = vrot.slane %v6369_v42, 1  ;;  %v6475_v35 = vrot.slane %v6369_v42, 2  ;;  %v6476_v63 = vrot.slane %v6369_v42, 3  ;;  %v6477_v54 = vrot.slane %v6369_v42, 4  ;;  %v6275_v7 = vpop.f32.mrf.mxu1 }
 0x320   : > { %7838 = vst [vmem:[%s9308_s11 + $0x171] sm:$0x1] %v6369_v42  ;;  %v6478_v59 = vrot.slane %v6369_v42, 5  ;;  %v6479_v53 = vrot.slane %v6369_v42, 6  ;;  %v6480_v23 = vrot.slane %v6369_v42, 7 }
 0x321   : > { %7839 = vst [vmem:[%s9308_s11 + $0x173] sm:$0x1] %v6474_v61  ;;  %v6226_v57 = vpop.f32.mrf.mxu0 }
 0x322   : > { %7840 = vst [vmem:[%s9308_s11 + $0x175] sm:$0x1] %v6475_v35  ;;  %v6227_v6 = vadd.f32 %v10754_v55, %v6226_v57 }
 0x323   : > { %7841 = vst [vmem:[%s9308_s11 + $0x177] sm:$0x1] %v6476_v63 }
 0x324   : > { %7842 = vst [vmem:[%s9308_s11 + $0x179] sm:$0x1] %v6477_v54  ;;  %v6276_v36 = vadd.f32 %v6275_v7, %v6227_v6 }
 0x325   : > { %7843 = vst [vmem:[%s9308_s11 + $0x17b] sm:$0x1] %v6478_v59  ;;  %v6322_v60 = vpop.f32.mrf.mxu2  ;;  %v6371_v13 = vpop.f32.mrf.mxu3 }
 0x326   : > { %7844 = vst [vmem:[%s9308_s11 + $0x17d] sm:$0x1] %v6479_v53  ;;  %v6323_v16 = vadd.f32 %v6322_v60, %v6274_v22 }
 0x327   : > { %7845 = vst [vmem:[%s9308_s11 + $0x17f] sm:$0x1] %v6480_v23 }
 0x328   : > { %v6372_v18 = vadd.f32 %v6371_v13, %v6323_v16 }
 0x32a   : > { %v6481_v2 = vrot.slane %v6372_v18, 1  ;;  %v6482_v47 = vrot.slane %v6372_v18, 2  ;;  %v6483_v44 = vrot.slane %v6372_v18, 3  ;;  %7846 = vst [vmem:[%s9308_s11 + $0x1a1] sm:$0x1] %v6372_v18  ;;  %v6484_v34 = vrot.slane %v6372_v18, 4  ;;  %v6278_v21 = vpop.f32.mrf.mxu1 }
 0x32b   : > { %v6485_v15 = vrot.slane %v6372_v18, 5  ;;  %v6486_v27 = vrot.slane %v6372_v18, 6  ;;  %v6487_v46 = vrot.slane %v6372_v18, 7 }
 0x32c   : > { %7847 = vst [vmem:[%s9308_s11 + $0x1a3] sm:$0x1] %v6481_v2  ;;  %v6229_v14 = vpop.f32.mrf.mxu0 }
 0x32d   : > { %7848 = vst [vmem:[%s9308_s11 + $0x1a5] sm:$0x1] %v6482_v47  ;;  %v6324_v58 = vpop.f32.mrf.mxu2  ;;  %v6373_v52 = vpop.f32.mrf.mxu3  ;;  %v6230_v30 = vadd.f32 %v10754_v55, %v6229_v14 }
 0x32e   : > { %7849 = vst [vmem:[%s9308_s11 + $0x1a7] sm:$0x1] %v6483_v44  ;;  %v6325_v25 = vadd.f32 %v6324_v58, %v6276_v36 }
 0x32f   : > { %7850 = vst [vmem:[%s9308_s11 + $0x1a9] sm:$0x1] %v6484_v34  ;;  %v6279_v29 = vadd.f32 %v6278_v21, %v6230_v30 }
 0x330   : > { %7851 = vst [vmem:[%s9308_s11 + $0x1ab] sm:$0x1] %v6485_v15  ;;  %v6374_v12 = vadd.f32 %v6373_v52, %v6325_v25 }
 0x331   : > { %7852 = vst [vmem:[%s9308_s11 + $0x1ad] sm:$0x1] %v6486_v27 }
 0x332   : > { %7853 = vst [vmem:[%s9308_s11 + $0x1af] sm:$0x1] %v6487_v46  ;;  %v6488_v10 = vrot.slane %v6374_v12, 1  ;;  %v6489_v1 = vrot.slane %v6374_v12, 2  ;;  %v6490_v32 = vrot.slane %v6374_v12, 3  ;;  %v6491_v48 = vrot.slane %v6374_v12, 4  ;;  %v6280_v33 = vpop.f32.mrf.mxu1 }
 0x333   : > { %7854 = vst [vmem:[%s9308_s11 + $0x1b1] sm:$0x1] %v6374_v12  ;;  %v6492_v49 = vrot.slane %v6374_v12, 5  ;;  %v6493_v8 = vrot.slane %v6374_v12, 6  ;;  %v6494_v41 = vrot.slane %v6374_v12, 7 }
 0x334   : > { %7855 = vst [vmem:[%s9308_s11 + $0x1b3] sm:$0x1] %v6488_v10  ;;  %v6231_v56 = vpop.f32.mrf.mxu0 }
 0x335   : > { %7856 = vst [vmem:[%s9308_s11 + $0x1b5] sm:$0x1] %v6489_v1  ;;  %v6232_v26 = vadd.f32 %v10754_v55, %v6231_v56 }
 0x336   : > { %7857 = vst [vmem:[%s9308_s11 + $0x1b7] sm:$0x1] %v6490_v32 }
 0x337   : > { %7858 = vst [vmem:[%s9308_s11 + $0x1b9] sm:$0x1] %v6491_v48  ;;  %v6281_v45 = vadd.f32 %v6280_v33, %v6232_v26 }
 0x338   : > { %7859 = vst [vmem:[%s9308_s11 + $0x1bb] sm:$0x1] %v6492_v49 }
 0x339   : > { %7860 = vst [vmem:[%s9308_s11 + $0x1bd] sm:$0x1] %v6493_v8  ;;  %v6327_v0 = vpop.f32.mrf.mxu2  ;;  %v6376_v3 = vpop.f32.mrf.mxu3 }
 0x33a   : > { %7861 = vst [vmem:[%s9308_s11 + $0x1bf] sm:$0x1] %v6494_v41  ;;  %v6328_v4 = vadd.f32 %v6327_v0, %v6279_v29 }
 0x33c   : > { %v6377_v19 = vadd.f32 %v6376_v3, %v6328_v4 }
 0x33e   : > { %v6495_v28 = vrot.slane %v6377_v19, 1  ;;  %v6496_v62 = vrot.slane %v6377_v19, 2  ;;  %v6497_v11 = vrot.slane %v6377_v19, 3  ;;  %7862 = vst [vmem:[%s9308_s11 + $0x1e1] sm:$0x1] %v6377_v19  ;;  %v6498_v40 = vrot.slane %v6377_v19, 4 }
 0x33f   : > { %v6499_v37 = vrot.slane %v6377_v19, 5  ;;  %v6500_v24 = vrot.slane %v6377_v19, 6  ;;  %v6501_v38 = vrot.slane %v6377_v19, 7 }
 0x340   : > { %7863 = vst [vmem:[%s9308_s11 + $0x1e3] sm:$0x1] %v6495_v28 }
 0x341   : > { %7864 = vst [vmem:[%s9308_s11 + $0x1e5] sm:$0x1] %v6496_v62  ;;  %v6329_v55 = vpop.f32.mrf.mxu2  ;;  %v6378_v20 = vpop.f32.mrf.mxu3 }
 0x342   : > { %7865 = vst [vmem:[%s9308_s11 + $0x1e7] sm:$0x1] %v6497_v11  ;;  %v6330_v9 = vadd.f32 %v6329_v55, %v6281_v45 }
 0x343   : > { %7866 = vst [vmem:[%s9308_s11 + $0x1e9] sm:$0x1] %v6498_v40 }
 0x344   : > { %7867 = vst [vmem:[%s9308_s11 + $0x1eb] sm:$0x1] %v6499_v37  ;;  %v6379_v39 = vadd.f32 %v6378_v20, %v6330_v9 }
 0x345   : > { %7868 = vst [vmem:[%s9308_s11 + $0x1ed] sm:$0x1] %v6500_v24 }
 0x346   : > { %7869 = vst [vmem:[%s9308_s11 + $0x1ef] sm:$0x1] %v6501_v38  ;;  %v6502_v5 = vrot.slane %v6379_v39, 1  ;;  %v6503_v51 = vrot.slane %v6379_v39, 2  ;;  %v6504_v50 = vrot.slane %v6379_v39, 3  ;;  %v6505_v31 = vrot.slane %v6379_v39, 4 }
 0x347   : > { %7870 = vst [vmem:[%s9308_s11 + $0x1f1] sm:$0x1] %v6379_v39  ;;  %v6506_v42 = vrot.slane %v6379_v39, 5  ;;  %v6507_v43 = vrot.slane %v6379_v39, 6  ;;  %v6508_v61 = vrot.slane %v6379_v39, 7 }
 0x348   : > { %7871 = vst [vmem:[%s9308_s11 + $0x1f3] sm:$0x1] %v6502_v5 }
 0x349   : > { %7872 = vst [vmem:[%s9308_s11 + $0x1f5] sm:$0x1] %v6503_v51 }
 0x34a   : > { %7873 = vst [vmem:[%s9308_s11 + $0x1f7] sm:$0x1] %v6504_v50 }
 0x34b   : > { %7874 = vst [vmem:[%s9308_s11 + $0x1f9] sm:$0x1] %v6505_v31 }
 0x34c   : > { %7875 = vst [vmem:[%s9308_s11 + $0x1fb] sm:$0x1] %v6506_v42 }
 0x34d   : > { %7876 = vst [vmem:[%s9308_s11 + $0x1fd] sm:$0x1] %v6507_v43 }
 0x34e   : > { %7877 = vst [vmem:[%s9308_s11 + $0x1ff] sm:$0x1] %v6508_v61 }
 0x34f   : > { %8371 = shalt.err (!%p8368_p13)
}
 0x350   : > { %s8509_s4 = smov 32   ;;  %s8510_s11 = smov 2  }
 0x351   : > { %8063 = dma.vmem_to_hbm [thread:$0]  (%p8723_p8), %s6766_s29, 8192, %s6768_s27, %s6750_s1, %s8509_s4, %s8509_s4, %s8510_s11  }
 0x352 PF: > { %s11048_s9 = sld [smem:[#allocation19_spill]]  ;;  %p8086_p10 = scmp.ge.s32.totalorder %s8502_s6, 2 }
 0x354   : > { %p8080_p1 = pnand %p8086_p10, %p8727_p6 }
 0x356   : > { %p8081_p9 = pneg %p8080_p1 }
 0x358   : > { %s6782_s16 = sand.u32 1, %s11048_s9  }
 0x359   : > { %s6783_s13 = scalar_lea.sflag [#allocation5], %s6782_s16 }
 0x35a   : > { %8445 = dma.done.wait (%p8081_p9), %s6783_s13, 8192  }
 0x35b   : > { %8447 = vsyncadd (%p8081_p9), %s6783_s13, 4294959104  ;;  %s25_s6 = sadd.s32 1, %s8502_s6   ;;  %s11051_s26 = smov %s8769_s18 }
 0x35c   : > { %p10919_p11 = scmp.ge.s32.totalorder %s25_s6, 6   ;;  %s11052_s17 = sld [smem:[#allocation18_spill]] }
 0x35d   : > { %s11053_s23 = sld [smem:[#allocation28_spill]]  ;;  %s11060_s18 = smov %s8454_s19 }
 0x35e   : > { %s11054_s28 = sld [smem:[#allocation20_spill]]  ;;  %s11061_s19 = smov %s8458_s20 }
 0x35f   : > { %s11055_s30 = sld [smem:[#allocation29_spill]]  ;;  %s11062_s20 = smov %s11051_s26 }
 0x360   : > { %s11056_s27 = sld [smem:[#allocation23_spill]]  ;;  %s11063_s21 = smov %s8466_s22 }
 0x361   : > { %s11057_s29 = sld [smem:[#allocation24_spill]]  ;;  %s11065_s24 = smov %s8478_s25 }
 0x362   : > { %s11058_s2 = sld [smem:[#allocation25_spill]]  ;;  %s11064_s22 = smov %s11052_s17 }
 0x363   : > { %s11059_s1 = sld [smem:[#allocation26_spill]] }
 0x364   : > { %s11066_s25 = smov %s11054_s28 }
 0x365   : > { %s11067_s26 = smov %s11055_s30  ;;  %24 = sbr.rel (!%p10919_p11) target bundleno = 20 (0x14), region = 120 }
 0x367   : > { %s11068_s28 = smov %s11057_s29 }
 0x368   : > { %s11069_s29 = smov %s11058_s2 }
 0x369   : > { %s11070_s30 = smov %s11059_s1 }
 0x36a   :  { %6789 = vsyncpa [#allocation4], 1 }
 0x36b   :  { %6791 = vsyncpa [#allocation4 + $0x1], 1 }
 0x36c   :  { %6792 = vsyncpa [#allocation7], 1 }
 0x36d   :  { %6794 = vsyncpa [#allocation7 + $0x1], 1 }
 0x36e   :  { %6795 = vsyncpa [#allocation10], 1 }
 0x36f   :  { %6796 = vsyncpa [#allocation5], 1 }
 0x370   :  { %6798 = vsyncpa [#allocation5 + $0x1], 1 }

</bundles_post_ra>
